<compile_context>
chip_gen: v6e
topology: v6e:2x2x1
jax: 0.10.0
libtpu: 0.0.40
codegen_flags: <defaults>
</compile_context>

<pallas_src>
import functools
import math

import jax
import jax.numpy as jnp
from jax.experimental import pallas as pl
from jax.experimental.pallas import tpu as pltpu

LANE = 128          # every feature axis is zero-padded to this many lanes
NEG_BIG = -1e30     # padded vocab lanes of the output bias (keeps log-softmax exact)


def decoder_kernel(emb_ref, hid_ref, eo_b_ref, eo_t_ref,
                   w12_ref, misc_ref, wih_ref, whh_ref, bg_ref, outw_ref,
                   out_ref):
    f32 = jnp.float32
    hp = jax.lax.Precision.HIGHEST   # per-dot; tiny shapes -> HIGHEST is essentially free

    P = hid_ref.shape[1]             # padded feature width (= LANE)
    N = hid_ref.shape[0]             # batch == encoder timesteps (module requires T == B)

    embedded = emb_ref[...]          # (N, P)  pre-gathered, zero-padded embedding rows
    hidden = hid_ref[...]            # (N, P)  last-layer GRU hidden state, zero-padded
    attn_b = misc_ref[0:1, :]        # (1, P)
    v_row = misc_ref[1:2, :]         # (1, P)
    out_b = misc_ref[2:3, :]         # (1, P)  padded vocab lanes preset to NEG_BIG

    # ---- attention: relu(W1 h + W2 enc + b) . v, softmax over timesteps ----------------
    wh = jnp.dot(hidden, w12_ref[0], preferred_element_type=f32, precision=hp) + attn_b  # (N, P)
    we = jnp.dot(eo_b_ref[...], w12_ref[1], preferred_element_type=f32, precision=hp)    # (N*N, P)
    # hidden replication over timesteps = sublane broadcast (no mask matmul)
    energy = jnp.maximum(we.reshape(N, N, P) + wh[:, None, :], 0.0)                      # (B, T, P)
    # score reduction = VPU multiply + lane reduce (no permute matmul, no reshape of d)
    scores = jnp.sum(energy * v_row[None], axis=2)                                       # (B, T)

    m = jnp.max(scores, axis=1, keepdims=True)
    ex = jnp.exp(scores - m)
    attn = ex / jnp.sum(ex, axis=1, keepdims=True)                                       # (B, T)

    # ---- context[b] = sum_t attn[b, t] * enc[t, b]  (axis0 of enc read as time) --------
    context = jnp.einsum('bqt,bth->bqh', attn[:, None, :], eo_t_ref[...],
                         preferred_element_type=f32, precision=hp)[:, 0, :]              # (N, P)

    # ---- single-layer GRU cell, input = [embedded | context] ---------------------------
    x_cat = jnp.concatenate([embedded, context], axis=1)                                 # (N, 2P)
    gi = jnp.dot(x_cat, wih_ref[...], preferred_element_type=f32, precision=hp) + bg_ref[0:1, :]
    gh = jnp.dot(hidden, whh_ref[...], preferred_element_type=f32, precision=hp) + bg_ref[1:2, :]
    r = jax.nn.sigmoid(gi[:, 0:P] + gh[:, 0:P])                      # 128-aligned gate slices
    z = jax.nn.sigmoid(gi[:, P:2 * P] + gh[:, P:2 * P])
    n = jnp.tanh(gi[:, 2 * P:3 * P] + r * gh[:, 2 * P:3 * P])
    h_new = (1.0 - z) * n + z * hidden                                                   # (N, P)

    # ---- output projection on [gru_output | context] + log_softmax ---------------------
    hc = jnp.concatenate([h_new, context], axis=1)                                       # (N, 2P)
    logits = jnp.dot(hc, outw_ref[...], preferred_element_type=f32, precision=hp) + out_b
    lm = jnp.max(logits, axis=1, keepdims=True)
    lse = lm + jnp.log(jnp.sum(jnp.exp(logits - lm), axis=1, keepdims=True))

    # ---- one packed, lane-dense output slab: 3 aligned unmasked stores, single DMA -----
    if P > N:
        attn_wide = jnp.concatenate([attn, jnp.zeros((N, P - N), f32)], axis=1)
    else:
        attn_wide = attn
    out_ref[:, 0:P] = logits - lse
    out_ref[:, P:2 * P] = h_new
    out_ref[:, 2 * P:3 * P] = attn_wide


# ----------------------------------------------------------------------------------------
# Host-side preparation (hoisted out of the per-token decode step)
# ----------------------------------------------------------------------------------------
def _place(shape, blocks):
    """Zero array of `shape` with (row, col, block) sub-blocks written in."""
    out = jnp.zeros(shape, jnp.float32)
    for r, c, blk in blocks:
        blk = jnp.asarray(blk, jnp.float32)
        out = out.at[r:r + blk.shape[0], c:c + blk.shape[1]].set(blk)
    return out


def prepare_params(params, pad=LANE):
    """One-time weight prep: transpose / split / zero-pad to 128 lanes, consolidate inputs."""
    O, E = params["embed_w"].shape
    H = params["w_hh"].shape[1]
    assert max(E, H, O) <= pad, "feature dims must fit in one 128-lane pad block"

    aw = params["attn_w"]                                 # (H, 2H): [:, :H] hidden, [:, H:] enc
    w12 = jnp.stack([_place((pad, pad), [(0, 0, aw[:, :H].T)]),
                     _place((pad, pad), [(0, 0, aw[:, H:].T)])])                      # (2, P, P)

    misc = jnp.concatenate([
        _place((1, pad), [(0, 0, params["attn_b"][None, :])]),
        _place((1, pad), [(0, 0, params["v"][None, :])]),
        jnp.full((1, pad), NEG_BIG, jnp.float32).at[0, :O].set(params["out_b"]),
    ], axis=0)                                                                         # (3, P)

    w_ih, w_hh = params["w_ih"], params["w_hh"]           # (3H, E+H), (3H, H); gates [r|z|n]
    wih_blocks, whh_blocks, bg_blocks = [], [], []
    for g in range(3):
        rows = slice(g * H, (g + 1) * H)
        wih_blocks += [(0, g * pad, w_ih[rows, :E].T),     # embedded columns
                       (pad, g * pad, w_ih[rows, E:].T)]   # context columns
        whh_blocks += [(0, g * pad, w_hh[rows, :].T)]
        bg_blocks += [(0, g * pad, params["b_ih"][None, rows]),
                      (1, g * pad, params["b_hh"][None, rows])]
    wih = _place((2 * pad, 3 * pad), wih_blocks)           # (2P, 3P)
    whh = _place((pad, 3 * pad), whh_blocks)               # (P, 3P)
    bg = _place((2, 3 * pad), bg_blocks)                   # (2, 3P)

    ow = params["out_w"]                                   # (O, 2H): [:, :H] gru out, [:, H:] ctx
    outw = _place((2 * pad, pad), [(0, 0, ow[:, :H].T), (pad, 0, ow[:, H:].T)])       # (2P, P)

    embed_p = _place((O, pad), [(0, 0, params["embed_w"])])                            # (O, P)

    return dict(embed_p=embed_p, w12=w12, misc=misc, wih=wih, whh=whh, bg=bg, outw=outw)


def prepare_encoder_outputs(encoder_outputs, pad=LANE):
    """Per-sequence prep: pad H to 128 lanes; batch-first-flat and time-first views."""
    A0, A1, H = encoder_outputs.shape
    eo_p = jnp.pad(encoder_outputs.astype(jnp.float32), ((0, 0), (0, 0), (0, pad - H)))
    eo_b = eo_p.reshape(A0 * A1, pad)          # row a0*A1 + a1 (batch-first read, energies)
    eo_t = eo_p.transpose(1, 0, 2)             # [b, t] = enc[t, b] (time-first read, context)
    return eo_b, eo_t


@functools.partial(jax.jit, static_argnames=("H", "O"))
def decoder_step(weights, input_ids, last_hidden, eo_b, eo_t, *, H, O):
    P = LANE
    N = input_ids.shape[0]
    # Module semantics (mixed batch/time indexing of encoder_outputs) require T == B.
    assert eo_t.shape[0] == N and eo_t.shape[1] == N and eo_b.shape[0] == N * N
    assert last_hidden.shape[1] == N and N <= P

    embedded = jnp.take(weights["embed_p"], input_ids, axis=0)                  # (N, P) gather
    hidden_p = jnp.pad(last_hidden[-1].astype(jnp.float32), ((0, 0), (0, P - H)))

    vmem = pl.BlockSpec(memory_space=pltpu.MemorySpace.VMEM)
    slab = pl.pallas_call(
        decoder_kernel,
        out_shape=jax.ShapeDtypeStruct((N, 3 * P), jnp.float32),
        in_specs=[vmem] * 10,
        out_specs=vmem,
    )(embedded, hidden_p, eo_b, eo_t,
      weights["w12"], weights["misc"], weights["wih"], weights["whh"],
      weights["bg"], weights["outw"])

    logp = slab[:, :O]
    h_new = slab[:, P:P + H]
    attn = slab[:, 2 * P:2 * P + N]
    return logp, h_new[None], attn[:, None, :]


def decoder_forward(params, input_ids, last_hidden, encoder_outputs):
    """Convenience wrapper matching Decoder.forward(input, last_hidden, encoder_outputs).

    In an autoregressive loop call prepare_params / prepare_encoder_outputs once and
    decoder_step per token (the weight prep is hoisted for exactly that reason).
    """
    weights = prepare_params(params)
    eo_b, eo_t = prepare_encoder_outputs(encoder_outputs)
    H = last_hidden.shape[-1]
    O = params["out_b"].shape[0]
    return decoder_step(weights, input_ids, last_hidden, eo_b, eo_t, H=H, O=O)


# ----------------------------------------------------------------------------------------
# Pure-JAX transcription of the PyTorch forward, for verification
# ----------------------------------------------------------------------------------------
def decoder_ref(params, ids, last_hidden, eo):
    with jax.default_matmul_precision("highest"):
        H = last_hidden.shape[-1]
        B = ids.shape[0]
        embedded = params["embed_w"][ids]                                   # (B, E)
        hidden = last_hidden[-1]                                            # (B, H)
        T = eo.shape[1]
        h_rep = jnp.broadcast_to(hidden[:, None, :], (B, T, H))
        cat = jnp.concatenate([h_rep, eo], axis=-1)                         # (B, T, 2H)
        energy = jax.nn.relu(cat @ params["attn_w"].T + params["attn_b"])
        scores = jnp.einsum("bth,h->bt", energy, params["v"])
        attn = jax.nn.softmax(scores, axis=1)
        context = jnp.einsum("bt,tbh->bh", attn, eo)
        x = jnp.concatenate([embedded, context], axis=-1)
        gi = x @ params["w_ih"].T + params["b_ih"]
        gh = hidden @ params["w_hh"].T + params["b_hh"]
        r = jax.nn.sigmoid(gi[:, :H] + gh[:, :H])
        z = jax.nn.sigmoid(gi[:, H:2 * H] + gh[:, H:2 * H])
        n = jnp.tanh(gi[:, 2 * H:] + r * gh[:, 2 * H:])
        h_new = (1.0 - z) * n + z * hidden
        logits = jnp.concatenate([h_new, context], axis=-1) @ params["out_w"].T + params["out_b"]
        logp = jax.nn.log_softmax(logits, axis=1)
    return logp, h_new[None], attn[:, None, :]


def init_params(key, embed_size, hidden_size, output_size):
    E, H, O = embed_size, hidden_size, output_size
    ks = jax.random.split(key, 10)
    u = lambda k, shape, bound: jax.random.uniform(k, shape, jnp.float32, -bound, bound)
    sH = 1.0 / math.sqrt(H)
    s2H = 1.0 / math.sqrt(2 * H)
    return dict(
        embed_w=jax.random.normal(ks[0], (O, E), jnp.float32),
        attn_w=u(ks[1], (H, 2 * H), s2H),
        attn_b=u(ks[2], (H,), s2H),
        v=u(ks[3], (H,), sH),
        w_ih=u(ks[4], (3 * H, H + E), sH),
        w_hh=u(ks[5], (3 * H, H), sH),
        b_ih=u(ks[6], (3 * H,), sH),
        b_hh=u(ks[7], (3 * H,), sH),
        out_w=u(ks[8], (O, 2 * H), s2H),
        out_b=u(ks[9], (O,), s2H),
    )


if __name__ == "__main__":
    E, H, O = 16, 32, 40          # embed_size, hidden_size, output_size (vocab)
    N = 8                         # batch == encoder timesteps (required, see layout note)
    L = 1                         # n_layers

    key = jax.random.PRNGKey(0)
    kp, ki, kh, ke = jax.random.split(key, 4)
    params = init_params(kp, E, H, O)
    input_ids = jax.random.randint(ki, (N,), 0, O, dtype=jnp.int32)
    last_hidden = jax.random.normal(kh, (L, N, H), jnp.float32)
    encoder_outputs = jax.random.normal(ke, (N, N, H), jnp.float32)

    # Hoisted prep (runs once per model / per sequence), then the fused per-token step.
    weights = prepare_params(params)
    eo_b, eo_t = prepare_encoder_outputs(encoder_outputs)
    logp, hidden_out, attn_w = decoder_step(weights, input_ids, last_hidden, eo_b, eo_t, H=H, O=O)
    jax.block_until_ready((logp, hidden_out, attn_w))

    # verify against the pure-JAX transcription of the PyTorch forward
    rl, rh, ra = decoder_ref(params, input_ids, last_hidden, encoder_outputs)
    assert logp.shape == (N, O)
    assert hidden_out.shape == (L, N, H)
    assert attn_w.shape == (N, 1, N)
    assert bool(jnp.allclose(logp, rl, atol=2e-3, rtol=2e-3))
    assert bool(jnp.allclose(hidden_out, rh, atol=2e-3, rtol=2e-3))
    assert bool(jnp.allclose(attn_w, ra, atol=2e-3, rtol=2e-3))

    print("KERNEL_OK")
</pallas_src>

<mosaic_0001>
module attributes {stable_mosaic.version = 11 : i64} {
  func.func @decoder_kernel(%arg0: memref<8x128xf32, #tpu.memory_space<vmem>>, %arg1: memref<8x128xf32, #tpu.memory_space<vmem>>, %arg2: memref<64x128xf32, #tpu.memory_space<vmem>>, %arg3: memref<8x8x128xf32, #tpu.memory_space<vmem>>, %arg4: memref<2x128x128xf32, #tpu.memory_space<vmem>>, %arg5: memref<3x128xf32, #tpu.memory_space<vmem>>, %arg6: memref<256x384xf32, #tpu.memory_space<vmem>>, %arg7: memref<128x384xf32, #tpu.memory_space<vmem>>, %arg8: memref<2x384xf32, #tpu.memory_space<vmem>>, %arg9: memref<256x128xf32, #tpu.memory_space<vmem>>, %arg10: memref<8x384xf32, #tpu.memory_space<vmem>>) attributes {dimension_semantics = [], scalar_prefetch = 0 : i64, scratch_operands = 0 : i64, tpu.core_type = #tpu.core_type<tc>} {
    %c0 = arith.constant 0 : index
    %c0_0 = arith.constant 0 : index
    %0 = vector.load %arg0[%c0, %c0_0] : memref<8x128xf32, #tpu.memory_space<vmem>>, vector<8x128xf32>
    %c0_1 = arith.constant 0 : index
    %c0_2 = arith.constant 0 : index
    %1 = vector.load %arg1[%c0_1, %c0_2] : memref<8x128xf32, #tpu.memory_space<vmem>>, vector<8x128xf32>
    %c0_3 = arith.constant 0 : index
    %c0_4 = arith.constant 0 : index
    %2 = vector.load %arg5[%c0_3, %c0_4] : memref<3x128xf32, #tpu.memory_space<vmem>>, vector<1x128xf32>
    %c1 = arith.constant 1 : index
    %c0_5 = arith.constant 0 : index
    %3 = vector.load %arg5[%c1, %c0_5] : memref<3x128xf32, #tpu.memory_space<vmem>>, vector<1x128xf32>
    %c2 = arith.constant 2 : index
    %c0_6 = arith.constant 0 : index
    %4 = vector.load %arg5[%c2, %c0_6] : memref<3x128xf32, #tpu.memory_space<vmem>>, vector<1x128xf32>
    %c0_7 = arith.constant 0 : index
    %c0_8 = arith.constant 0 : index
    %c0_9 = arith.constant 0 : index
    %5 = vector.load %arg4[%c0_7, %c0_8, %c0_9] : memref<2x128x128xf32, #tpu.memory_space<vmem>>, vector<1x128x128xf32>
    %6 = vector.shape_cast %5 : vector<1x128x128xf32> to vector<128x128xf32>
    %cst = arith.constant dense<0.000000e+00> : vector<8x128xf32>
    %7 = tpu.matmul %1, %6, %cst {dimension_numbers = #tpu.dot_dimension_numbers<[1], [0], [0], [1], [0, 0, 1, 1], [], []>, precision = #tpu.contract_precision<fp32>} : vector<8x128xf32>, vector<128x128xf32>, vector<8x128xf32> -> vector<8x128xf32>
    %8 = vector.broadcast %2 : vector<1x128xf32> to vector<8x128xf32>
    %9 = arith.addf %7, %8 : vector<8x128xf32>
    %c0_10 = arith.constant 0 : index
    %c0_11 = arith.constant 0 : index
    %10 = vector.load %arg2[%c0_10, %c0_11] : memref<64x128xf32, #tpu.memory_space<vmem>>, vector<64x128xf32>
    %c1_12 = arith.constant 1 : index
    %c0_13 = arith.constant 0 : index
    %c0_14 = arith.constant 0 : index
    %11 = vector.load %arg4[%c1_12, %c0_13, %c0_14] : memref<2x128x128xf32, #tpu.memory_space<vmem>>, vector<1x128x128xf32>
    %12 = vector.shape_cast %11 : vector<1x128x128xf32> to vector<128x128xf32>
    %cst_15 = arith.constant dense<0.000000e+00> : vector<64x128xf32>
    %13 = tpu.matmul %10, %12, %cst_15 {dimension_numbers = #tpu.dot_dimension_numbers<[1], [0], [0], [1], [0, 0, 1, 1], [], []>, precision = #tpu.contract_precision<fp32>} : vector<64x128xf32>, vector<128x128xf32>, vector<64x128xf32> -> vector<64x128xf32>
    %14 = vector.shape_cast %13 : vector<64x128xf32> to vector<8x8x128xf32>
    %15 = vector.shape_cast %9 : vector<8x128xf32> to vector<8x1x128xf32>
    %16 = vector.broadcast %15 : vector<8x1x128xf32> to vector<8x8x128xf32>
    %17 = arith.addf %14, %16 : vector<8x8x128xf32>
    %cst_16 = arith.constant 0.000000e+00 : f32
    %18 = vector.broadcast %cst_16 : f32 to vector<8x8x128xf32>
    %19 = arith.maximumf %17, %18 : vector<8x8x128xf32>
    %20 = vector.shape_cast %3 : vector<1x128xf32> to vector<1x1x128xf32>
    %21 = vector.broadcast %20 : vector<1x1x128xf32> to vector<8x8x128xf32>
    %22 = arith.mulf %19, %21 : vector<8x8x128xf32>
    %cst_17 = arith.constant dense<0.000000e+00> : vector<8x8xf32>
    %23 = vector.multi_reduction <add>, %22, %cst_17 [2] : vector<8x8x128xf32> to vector<8x8xf32>
    %cst_18 = arith.constant dense<0xFF800000> : vector<8xf32>
    %24 = vector.multi_reduction <maximumf>, %23, %cst_18 [1] : vector<8x8xf32> to vector<8xf32>
    %25 = vector.shape_cast %24 : vector<8xf32> to vector<8x1xf32>
    %26 = vector.broadcast %25 : vector<8x1xf32> to vector<8x8xf32>
    %27 = arith.subf %23, %26 : vector<8x8xf32>
    %28 = math.exp %27 : vector<8x8xf32>
    %cst_19 = arith.constant dense<0.000000e+00> : vector<8xf32>
    %29 = vector.multi_reduction <add>, %28, %cst_19 [1] : vector<8x8xf32> to vector<8xf32>
    %30 = vector.shape_cast %29 : vector<8xf32> to vector<8x1xf32>
    %31 = vector.broadcast %30 : vector<8x1xf32> to vector<8x8xf32>
    %32 = arith.divf %28, %31 : vector<8x8xf32>
    %33 = vector.shape_cast %32 : vector<8x8xf32> to vector<8x1x8xf32>
    %c0_20 = arith.constant 0 : index
    %c0_21 = arith.constant 0 : index
    %c0_22 = arith.constant 0 : index
    %34 = vector.load %arg3[%c0_20, %c0_21, %c0_22] : memref<8x8x128xf32, #tpu.memory_space<vmem>>, vector<8x8x128xf32>
    "tpu.trace_start"() <{level = 10 : i32, message = "bqt,bth->bqh"}> : () -> ()
    %cst_23 = arith.constant dense<0.000000e+00> : vector<8x1x128xf32>
    %35 = tpu.matmul %33, %34, %cst_23 {dimension_numbers = #tpu.dot_dimension_numbers<[2], [1], [1], [2], [0, 0, 0, 1, 1, 2], [0], [0]>, precision = #tpu.contract_precision<fp32>} : vector<8x1x8xf32>, vector<8x8x128xf32>, vector<8x1x128xf32> -> vector<8x1x128xf32>
    "tpu.trace_stop"() : () -> ()
    %36 = vector.shape_cast %35 : vector<8x1x128xf32> to vector<8x128xf32>
    %37 = tpu.concatenate %0, %36 in 1 : vector<8x128xf32>, vector<8x128xf32> -> vector<8x256xf32>
    %c0_24 = arith.constant 0 : index
    %c0_25 = arith.constant 0 : index
    %38 = vector.load %arg6[%c0_24, %c0_25] : memref<256x384xf32, #tpu.memory_space<vmem>>, vector<256x384xf32>
    %cst_26 = arith.constant dense<0.000000e+00> : vector<8x384xf32>
    %39 = tpu.matmul %37, %38, %cst_26 {dimension_numbers = #tpu.dot_dimension_numbers<[1], [0], [0], [1], [0, 0, 1, 1], [], []>, precision = #tpu.contract_precision<fp32>} : vector<8x256xf32>, vector<256x384xf32>, vector<8x384xf32> -> vector<8x384xf32>
    %c0_27 = arith.constant 0 : index
    %c0_28 = arith.constant 0 : index
    %40 = vector.load %arg8[%c0_27, %c0_28] : memref<2x384xf32, #tpu.memory_space<vmem>>, vector<1x384xf32>
    %41 = vector.broadcast %40 : vector<1x384xf32> to vector<8x384xf32>
    %42 = arith.addf %39, %41 : vector<8x384xf32>
    %c0_29 = arith.constant 0 : index
    %c0_30 = arith.constant 0 : index
    %43 = vector.load %arg7[%c0_29, %c0_30] : memref<128x384xf32, #tpu.memory_space<vmem>>, vector<128x384xf32>
    %cst_31 = arith.constant dense<0.000000e+00> : vector<8x384xf32>
    %44 = tpu.matmul %1, %43, %cst_31 {dimension_numbers = #tpu.dot_dimension_numbers<[1], [0], [0], [1], [0, 0, 1, 1], [], []>, precision = #tpu.contract_precision<fp32>} : vector<8x128xf32>, vector<128x384xf32>, vector<8x384xf32> -> vector<8x384xf32>
    %c1_32 = arith.constant 1 : index
    %c0_33 = arith.constant 0 : index
    %45 = vector.load %arg8[%c1_32, %c0_33] : memref<2x384xf32, #tpu.memory_space<vmem>>, vector<1x384xf32>
    %46 = vector.broadcast %45 : vector<1x384xf32> to vector<8x384xf32>
    %47 = arith.addf %44, %46 : vector<8x384xf32>
    %48 = vector.extract_strided_slice %42 {offsets = [0, 0], sizes = [8, 128], strides = [1, 1]} : vector<8x384xf32> to vector<8x128xf32>
    %49 = vector.extract_strided_slice %47 {offsets = [0, 0], sizes = [8, 128], strides = [1, 1]} : vector<8x384xf32> to vector<8x128xf32>
    %50 = arith.addf %48, %49 : vector<8x128xf32>
    %51 = arith.negf %50 : vector<8x128xf32>
    %52 = math.exp %51 : vector<8x128xf32>
    %cst_34 = arith.constant 1.000000e+00 : f32
    %53 = vector.broadcast %cst_34 : f32 to vector<8x128xf32>
    %54 = arith.addf %53, %52 : vector<8x128xf32>
    %55 = arith.divf %53, %54 : vector<8x128xf32>
    %56 = vector.extract_strided_slice %42 {offsets = [0, 128], sizes = [8, 128], strides = [1, 1]} : vector<8x384xf32> to vector<8x128xf32>
    %57 = vector.extract_strided_slice %47 {offsets = [0, 128], sizes = [8, 128], strides = [1, 1]} : vector<8x384xf32> to vector<8x128xf32>
    %58 = arith.addf %56, %57 : vector<8x128xf32>
    %59 = arith.negf %58 : vector<8x128xf32>
    %60 = math.exp %59 : vector<8x128xf32>
    %cst_35 = arith.constant 1.000000e+00 : f32
    %61 = vector.broadcast %cst_35 : f32 to vector<8x128xf32>
    %62 = arith.addf %61, %60 : vector<8x128xf32>
    %63 = arith.divf %61, %62 : vector<8x128xf32>
    %64 = vector.extract_strided_slice %42 {offsets = [0, 256], sizes = [8, 128], strides = [1, 1]} : vector<8x384xf32> to vector<8x128xf32>
    %65 = vector.extract_strided_slice %47 {offsets = [0, 256], sizes = [8, 128], strides = [1, 1]} : vector<8x384xf32> to vector<8x128xf32>
    %66 = arith.mulf %55, %65 : vector<8x128xf32>
    %67 = arith.addf %64, %66 : vector<8x128xf32>
    %68 = math.tanh %67 : vector<8x128xf32>
    %cst_36 = arith.constant 1.000000e+00 : f32
    %69 = vector.broadcast %cst_36 : f32 to vector<8x128xf32>
    %70 = arith.subf %69, %63 : vector<8x128xf32>
    %71 = arith.mulf %70, %68 : vector<8x128xf32>
    %72 = arith.mulf %63, %1 : vector<8x128xf32>
    %73 = arith.addf %71, %72 : vector<8x128xf32>
    %74 = tpu.concatenate %73, %36 in 1 : vector<8x128xf32>, vector<8x128xf32> -> vector<8x256xf32>
    %c0_37 = arith.constant 0 : index
    %c0_38 = arith.constant 0 : index
    %75 = vector.load %arg9[%c0_37, %c0_38] : memref<256x128xf32, #tpu.memory_space<vmem>>, vector<256x128xf32>
    %cst_39 = arith.constant dense<0.000000e+00> : vector<8x128xf32>
    %76 = tpu.matmul %74, %75, %cst_39 {dimension_numbers = #tpu.dot_dimension_numbers<[1], [0], [0], [1], [0, 0, 1, 1], [], []>, precision = #tpu.contract_precision<fp32>} : vector<8x256xf32>, vector<256x128xf32>, vector<8x128xf32> -> vector<8x128xf32>
    %77 = vector.broadcast %4 : vector<1x128xf32> to vector<8x128xf32>
    %78 = arith.addf %76, %77 : vector<8x128xf32>
    %cst_40 = arith.constant dense<0xFF800000> : vector<8xf32>
    %79 = vector.multi_reduction <maximumf>, %78, %cst_40 [1] : vector<8x128xf32> to vector<8xf32>
    %80 = vector.shape_cast %79 : vector<8xf32> to vector<8x1xf32>
    %81 = vector.broadcast %80 : vector<8x1xf32> to vector<8x128xf32>
    %82 = arith.subf %78, %81 : vector<8x128xf32>
    %83 = math.exp %82 : vector<8x128xf32>
    %cst_41 = arith.constant dense<0.000000e+00> : vector<8xf32>
    %84 = vector.multi_reduction <add>, %83, %cst_41 [1] : vector<8x128xf32> to vector<8xf32>
    %85 = vector.shape_cast %84 : vector<8xf32> to vector<8x1xf32>
    %86 = math.log %85 : vector<8x1xf32>
    %87 = arith.addf %80, %86 : vector<8x1xf32>
    %cst_42 = arith.constant 0.000000e+00 : f32
    %88 = vector.broadcast %cst_42 : f32 to vector<8x120xf32>
    %89 = tpu.concatenate %32, %88 in 1 : vector<8x8xf32>, vector<8x120xf32> -> vector<8x128xf32>
    %90 = vector.broadcast %87 : vector<8x1xf32> to vector<8x128xf32>
    %91 = arith.subf %78, %90 : vector<8x128xf32>
    %c0_43 = arith.constant 0 : index
    %c0_44 = arith.constant 0 : index
    %92 = vector.load %arg10[%c0_43, %c0_44] : memref<8x384xf32, #tpu.memory_space<vmem>>, vector<8x128xf32>
    tpu.vector_store %arg10[%c0_43, %c0_44], %91 {strides = array<i32>} : memref<8x384xf32, #tpu.memory_space<vmem>>, vector<8x128xf32>,
    %c0_45 = arith.constant 0 : index
    %c128 = arith.constant 128 : index
    %93 = vector.load %arg10[%c0_45, %c128] : memref<8x384xf32, #tpu.memory_space<vmem>>, vector<8x128xf32>
    tpu.vector_store %arg10[%c0_45, %c128], %73 {strides = array<i32>} : memref<8x384xf32, #tpu.memory_space<vmem>>, vector<8x128xf32>,
    %c0_46 = arith.constant 0 : index
    %c256 = arith.constant 256 : index
    %94 = vector.load %arg10[%c0_46, %c256] : memref<8x384xf32, #tpu.memory_space<vmem>>, vector<8x128xf32>
    tpu.vector_store %arg10[%c0_46, %c256], %89 {strides = array<i32>} : memref<8x384xf32, #tpu.memory_space<vmem>>, vector<8x128xf32>,
    return
  }
}

</mosaic_0001>

<bundles_post_ra>
// kernel: decoder_step.1
= control target key start
LH: loop header
LB: loop body
LE: loop exit
PB: predicated region body
PF: predicated region fallthrough
CT: control target
= control target key end

     0   :  { %15 = vsyncpa [#allocation3], 0  ;;  %s17012_s0 = inlined_call_operand.vmem [shape: f32[8,128], index: 0, kind: input, shape index: {}]   ;;  %s17013_s1 = inlined_call_operand.vmem [shape: f32[8,128], index: 1, kind: input, shape index: {}]   ;;  %s17014_s2 = inlined_call_operand.vmem [shape: f32[64,128], index: 2, kind: input, shape index: {}]   ;;  %s17015_s3 = inlined_call_operand.vmem [shape: f32[8,8,128], index: 3, kind: input, shape index: {}]   ;;  %s17016_s4 = inlined_call_operand.hbm [shape: f32[2,128,128], index: 4, kind: input, shape index: {}]   ;;  %s17017_s5 = inlined_call_operand.hbm [shape: f32[3,128], index: 5, kind: input, shape index: {}]   ;;  %s17018_s6 = inlined_call_operand.hbm [shape: f32[256,384], index: 6, kind: input, shape index: {}]   ;;  %s17019_s7 = inlined_call_operand.hbm [shape: f32[128,384], index: 7, kind: input, shape index: {}]   ;;  %s17020_s8 = inlined_call_operand.hbm [shape: f32[2,384], index: 8, kind: input, shape index: {}]   ;;  %s17021_s9 = inlined_call_operand.hbm [shape: f32[256,128], index: 9, kind: input, shape index: {}]   ;;  %s17022_s10 = inlined_call_operand.vmem [shape: f32[8,384], index: 10, kind: output, shape index: {}]  }
   0x1   :  { %16 = vsyncpa [#allocation5], 0 }
   0x2   :  { %17 = vsyncpa [#allocation8], 0 }
   0x3   :  { %18 = vsyncpa [#allocation11], 0  ;;  %s12573_s13 = smov [#allocation4]  }
   0x4   :  { %s45_s14 = sshll.u32 %s12573_s13, 4  ;;  %s46_s14 = int_to_ptr.vmem [resolvable:$true] %s45_s14 }
   0x5   :  { %s12453_s15 = scalar_lea.vmem %s46_s14, 64  ;;  %p12458_p1 = scmp.lt.s32.totalorder %s46_s14, %s46_s14 }
   0x6   :  { %p12454_p0 = scmp.ne.s32.totalorder %s46_s14, %s12453_s15  ;;  %p12459_p2 = scmp.lt.s32.totalorder %s12453_s15, %s12453_s15 }
   0x8   :  { %p12460_p3 = por %p12459_p2, %p12458_p1 }
   0xa   :  { %p12461_p4 = pnand %p12460_p3, %p12454_p0 }
   0xc   :  { %12464 = shalt.err (!%p12461_p4)
}
   0xd   :  { %48 = dma.hbm_to_vmem [thread:$0]  %s17017_s5, 64, %s46_s14, [#allocation5]  }
   0xe   :  { %s12574_s18 = smov [#allocation7]   ;;  %s12575_s20 = smov [#allocation2]  }
   0xf   :  { %s66_s19 = sshll.u32 %s12574_s18, 4  ;;  %s32_s21 = sshll.u32 %s12575_s20, 4  ;;  %s67_s19 = int_to_ptr.vmem [resolvable:$true] %s66_s19  ;;  %s33_s21 = int_to_ptr.vmem [resolvable:$true] %s32_s21 }
  0x10   :  { %s12473_s22 = scalar_lea.vmem %s67_s19, 6144  ;;  %p12478_p6 = scmp.lt.s32.totalorder %s67_s19, %s67_s19 }
  0x11   :  { %p12474_p5 = scmp.ne.s32.totalorder %s67_s19, %s12473_s22  ;;  %p12479_p7 = scmp.lt.s32.totalorder %s12473_s22, %s12473_s22 }
  0x13   :  { %p12480_p8 = por %p12479_p7, %p12478_p6 }
  0x15   :  { %p12481_p9 = pnand %p12480_p8, %p12474_p5 }
  0x17   :  { %12484 = shalt.err (!%p12481_p9)
}
  0x18   :  { %s12576_s23 = smov 384   ;;  %s12577_s24 = smov 24  }
  0x19   :  { %72 = dma.hbm_to_vmem [thread:$0]  %s17019_s7, 6144, %s67_s19, [#allocation8], %s12576_s23, %s12576_s23, %s12577_s24  }
  0x1a   :  { %s12493_s5 = scalar_lea.vmem %s33_s21, 4096  ;;  %p12498_p11 = scmp.lt.s32.totalorder %s33_s21, %s33_s21 }
  0x1b   :  { %p12494_p10 = scmp.ne.s32.totalorder %s33_s21, %s12493_s5  ;;  %p12499_p12 = scmp.lt.s32.totalorder %s12493_s5, %s12493_s5 }
  0x1d   :  { %p12500_p13 = por %p12499_p12, %p12498_p11 }
  0x1f   :  { %p12501_p0 = pnand %p12500_p13, %p12494_p10 }
  0x21   :  { %12504 = shalt.err (!%p12501_p0)
}
  0x22   :  { %s12578_s27 = smov 128   ;;  %s12579_s28 = smov 8  }
  0x23   :  { %38 = dma.hbm_to_vmem [thread:$0]  %s17016_s4, 4096, %s33_s21, [#allocation3], %s12578_s27, %s12578_s27, %s12579_s28  }
  0x24   :  { %s12580_s11 = smov [#allocation6]   ;;  %s12581_s7 = smov [#allocation9]  }
  0x25   :  { %s54_s12 = sshll.u32 %s12580_s11, 4  ;;  %s79_s13 = sshll.u32 %s12581_s7, 4  ;;  %s55_s12 = int_to_ptr.vmem [resolvable:$true] %s54_s12  ;;  %s80_s13 = int_to_ptr.vmem [resolvable:$true] %s79_s13 }
  0x26   :  { %s12513_s14 = scalar_lea.vmem %s55_s12, 12288  ;;  %p12518_p2 = scmp.lt.s32.totalorder %s55_s12, %s55_s12 }
  0x27   :  { %p12514_p1 = scmp.ne.s32.totalorder %s55_s12, %s12513_s14  ;;  %p12519_p3 = scmp.lt.s32.totalorder %s12513_s14, %s12513_s14 }
  0x29   :  { %p12520_p4 = por %p12519_p3, %p12518_p2 }
  0x2b   :  { %p12521_p5 = pnand %p12520_p4, %p12514_p1 }
  0x2d   :  { %12524 = shalt.err (!%p12521_p5)
}
  0x2e   :  { %60 = dma.hbm_to_vmem [thread:$0]  %s17018_s6, 12288, %s55_s12, [#allocation5], %s12576_s23, %s12576_s23, %s12577_s24  }
  0x2f   :  { %s12533_s17 = scalar_lea.vmem %s80_s13, 96  ;;  %p12538_p7 = scmp.lt.s32.totalorder %s80_s13, %s80_s13 }
  0x30   :  { %p12534_p6 = scmp.ne.s32.totalorder %s80_s13, %s12533_s17  ;;  %p12539_p8 = scmp.lt.s32.totalorder %s12533_s17, %s12533_s17 }
  0x32   :  { %p12540_p9 = por %p12539_p8, %p12538_p7 }
  0x34   :  { %p12541_p10 = pnand %p12540_p9, %p12534_p6 }
  0x36   :  { %12544 = shalt.err (!%p12541_p10)
}
  0x37   :  { %82 = dma.hbm_to_vmem [thread:$0]  %s17020_s8, 96, %s80_s13, [#allocation8]  }
  0x38   :  { %s12582_s19 = smov [#allocation10]  }
  0x39   :  { %s88_s20 = sshll.u32 %s12582_s19, 4  ;;  %s89_s20 = int_to_ptr.vmem [resolvable:$true] %s88_s20 }
  0x3a   :  { %s12553_s21 = scalar_lea.vmem %s89_s20, 4096  ;;  %p12558_p12 = scmp.lt.s32.totalorder %s89_s20, %s89_s20 }
  0x3b   :  { %p12554_p11 = scmp.ne.s32.totalorder %s89_s20, %s12553_s21  ;;  %p12559_p13 = scmp.lt.s32.totalorder %s12553_s21, %s12553_s21 }
  0x3d   :  { %p12560_p0 = por %p12559_p13, %p12558_p12 }
  0x3f   :  { %p12561_p1 = pnand %p12560_p0, %p12554_p11 }
  0x41   :  { %12564 = shalt.err (!%p12561_p1)
}
  0x42   :  { %94 = dma.hbm_to_vmem [thread:$0]  %s17021_s9, 4096, %s89_s20, [#allocation11], %s12578_s27, %s12578_s27, %s12579_s28  }
  0x43   :  { %12565 = dma.done.wait [#allocation3], 4096  }
  0x44   :  { %12566 = vsyncadd [#allocation3], 4294963200 }
  0x45   :  { %12567 = dma.done.wait [#allocation5], 12352  }
  0x46   :  { %12568 = vsyncadd [#allocation5], 4294954944 }
  0x47   :  { %12569 = dma.done.wait [#allocation8], 6240  }
  0x48   :  { %12570 = vsyncadd [#allocation8], 4294961056 }
  0x49   :  { %12571 = dma.done.wait [#allocation11], 4096  }
  0x4a   :  { %12572 = vsyncadd [#allocation11], 4294963200  ;;  %v17023_v0 = vmov 0.0   ;;  %vm12584_vm0 = vmmov 0   ;;  %v133_v1 = vld [vmem:[#allocation2 + $0x78] sm:$0xff]  ;;  %v132_v2 = vld [vmem:[#allocation2 + $0x70] sm:$0xff] }
  0x4b   :  { %11457 = vmatprep.subr.mxu0 %v17023_v0  ;;  %11492 = vmatprep.subr.mxu1 %v17023_v0  ;;  %v131_v3 = vld [vmem:[#allocation2 + $0x68] sm:$0xff]  ;;  %v12672_v4 = vand.u32 4294901760, %v133_v1  ;;  %v12674_v5 = vand.u32 4294901760, %v132_v2  ;;  %v130_v7 = vld [vmem:[#allocation2 + $0x60] sm:$0xff]  ;;  %v129_v8 = vld [vmem:[#allocation2 + $0x58] sm:$0xff]  ;;  %vm1922_vm1 = vcmask 1041409  }
  0x4c   :  { %11489 = vmatprep.mubr.msk.f32.mxu0 %vm12584_vm0, %v17023_v0  ;;  %11524 = vmatprep.mubr.msk.f32.mxu1 %vm12584_vm0, %v17023_v0  ;;  %v12676_v6 = vand.u32 4294901760, %v131_v3  ;;  %v128_v9 = vld [vmem:[#allocation2 + $0x50] sm:$0xff]  ;;  %v12678_v10 = vand.u32 4294901760, %v130_v7  ;;  %v12680_v11 = vand.u32 4294901760, %v129_v8  ;;  %v127_v13 = vld [vmem:[#allocation2 + $0x48] sm:$0xff]  ;;  %v126_v14 = vld [vmem:[#allocation2 + $0x40] sm:$0xff] }
  0x4d   :  { %v12682_v12 = vand.u32 4294901760, %v128_v9  ;;  %11458 = vmatpush3.msra.mxu0 %v12672_v4  ;;  %v12686_v15 = vsub.f32 %v133_v1, %v12672_v4  ;;  %v12689_v16 = vsub.f32 %v132_v2, %v12674_v5  ;;  %v12691_v17 = vand.u32 4294901760, %v127_v13  ;;  %v125_v19 = vld [vmem:[#allocation2 + $0x38] sm:$0xff]  ;;  %v124_v26 = vld [vmem:[#allocation2 + $0x30] sm:$0xff]  ;;  %v123_v36 = vld [vmem:[#allocation2 + $0x28] sm:$0xff] }
  0x4e   :  { %v12694_v18 = vsub.f32 %v131_v3, %v12676_v6  ;;  %11459 = vmatprep.subr.mxu0 %v17023_v0  ;;  %v12698_v20 = vsub.f32 %v130_v7, %v12678_v10  ;;  %v12701_v21 = vsub.f32 %v129_v8, %v12680_v11  ;;  %v12707_v25 = vand.u32 4294901760, %v126_v14  ;;  %v122_v41 = vld [vmem:[#allocation2 + $0x20] sm:$0xff]  ;;  %v121_v49 = vld [vmem:[#allocation2 + $0x18] sm:$0xff]  ;;  %v120_v54 = vld [vmem:[#allocation2 + $0x10] sm:$0xff] }
  0x4f   :  { %11460 = vmatpush3.msra.mxu0 %v12674_v5  ;;  %v232_v22 = vand.u32 4294901760, %v12686_v15  ;;  %v239_v23 = vand.u32 4294901760, %v12689_v16  ;;  %v12711_v28 = vand.u32 4294901760, %v125_v19  ;;  %v12715_v30 = vsub.f32 %v128_v9, %v12682_v12  ;;  %v114_v50 = vld [vmem:[%s17013_s1] sm:$0xff]  ;;  %v119_v60 = vld [vmem:[#allocation2 + $0x8] sm:$0xff] }
  0x50   :  { %v246_v24 = vand.u32 4294901760, %v12694_v18  ;;  %11461 = vmatprep.subr.mxu0 %v17023_v0  ;;  %v253_v27 = vand.u32 4294901760, %v12698_v20  ;;  %v260_v29 = vand.u32 4294901760, %v12701_v21  ;;  %v12728_v34 = vsub.f32 %v127_v13, %v12691_v17  ;;  %v118_v7 = vld [vmem:[#allocation2] sm:$0xff] }
  0x51   :  { %11462 = vmatpush3.msra.mxu0 %v12676_v6  ;;  %v233_v31 = vsub.f32 %v12686_v15, %v232_v22  ;;  %v240_v32 = vsub.f32 %v12689_v16, %v239_v23  ;;  %v12731_v35 = vand.u32 4294901760, %v124_v26  ;;  %v267_v40 = vand.u32 4294901760, %v12715_v30 }
  0x52   :  { %v247_v33 = vsub.f32 %v12694_v18, %v246_v24  ;;  %11463 = vmatprep.subr.mxu0 %v17023_v0  ;;  %v254_v39 = vsub.f32 %v12698_v20, %v253_v27  ;;  %v261_v42 = vsub.f32 %v12701_v21, %v260_v29  ;;  %v12743_v43 = vsub.f32 %v126_v14, %v12707_v25 }
  0x53   :  { %11464 = vmatpush3.msra.mxu0 %v12678_v10  ;;  %v234_v37 = vand.u32 4294901760, %v233_v31  ;;  %v241_v38 = vand.u32 4294901760, %v240_v32  ;;  %v12746_v45 = vand.u32 4294901760, %v123_v36  ;;  %v274_v46 = vand.u32 4294901760, %v12728_v34 }
  0x54   :  { %11465 = vmatprep.subr.mxu0 %v17023_v0  ;;  %v248_v44 = vand.u32 4294901760, %v247_v33  ;;  %v12750_v47 = vsub.f32 %v125_v19, %v12711_v28  ;;  %v12754_v48 = vand.u32 4294901760, %v122_v41  ;;  %v255_v51 = vand.u32 4294901760, %v254_v39 }
  0x55   :  { %11466 = vmatpush3.msra.mxu0 %v12680_v11  ;;  %11493 = vmatpush3.msra.mxu1 %v234_v37  ;;  %v268_v52 = vsub.f32 %v12715_v30, %v267_v40  ;;  %v281_v53 = vand.u32 4294901760, %v12743_v43  ;;  %v12765_v55 = vsub.f32 %v124_v26, %v12731_v35  ;;  %v262_v56 = vand.u32 4294901760, %v261_v42 }
  0x56   :  { %11467 = vmatprep.subr.mxu0 %v17023_v0  ;;  %11494 = vmatprep.subr.mxu1 %v17023_v0  ;;  %v288_v57 = vand.u32 4294901760, %v12750_v47  ;;  %v275_v58 = vsub.f32 %v12728_v34, %v274_v46  ;;  %v12774_v59 = vand.u32 4294901760, %v121_v49  ;;  %v12777_v61 = vsub.f32 %v123_v36, %v12746_v45 }
  0x57   :  { %11468 = vmatpush3.msra.mxu0 %v12682_v12  ;;  %11495 = vmatpush3.msra.mxu1 %v241_v38  ;;  %v12779_v62 = vand.u32 4294901760, %v114_v50  ;;  %v12783_v63 = vand.u32 4294901760, %v120_v54  ;;  %v269_v1 = vand.u32 4294901760, %v268_v52  ;;  %v282_v2 = vsub.f32 %v12743_v43, %v281_v53 }
  0x58   :  { %11469 = vmatprep.subr.mxu0 %v17023_v0  ;;  %11496 = vmatprep.subr.mxu1 %v17023_v0  ;;  %v295_v3 = vand.u32 4294901760, %v12765_v55  ;;  %v12791_v8 = vsub.f32 %v122_v41, %v12754_v48  ;;  %v289_v9 = vsub.f32 %v12750_v47, %v288_v57  ;;  %v12798_v13 = vand.u32 4294901760, %v119_v60 }
  0x59   :  { %11470 = vmatpush3.msra.mxu0 %v12691_v17  ;;  %11497 = vmatpush3.msra.mxu1 %v248_v44  ;;  %17537 = vst [vmem:[#allocation16_spill] sm:$0xff] %v12779_v62  ;;  %v276_v14 = vand.u32 4294901760, %v275_v58  ;;  %v302_v19 = vand.u32 4294901760, %v12777_v61  ;;  %v12803_v26 = vsub.f32 %v114_v50, %v12779_v62  ;;  %v12806_v31 = vsub.f32 %v121_v49, %v12774_v59 }
  0x5a   :  { %11471 = vmatprep.subr.mxu0 %v17023_v0  ;;  %11498 = vmatprep.subr.mxu1 %v17023_v0  ;;  %v12810_v32 = vand.u32 4294901760, %v118_v7  ;;  %v283_v33 = vand.u32 4294901760, %v282_v2  ;;  %v296_v36 = vsub.f32 %v12765_v55, %v295_v3  ;;  %v309_v37 = vand.u32 4294901760, %v12791_v8 }
  0x5b   :  { %11472 = vmatpush3.msra.mxu0 %v12707_v25  ;;  %11499 = vmatpush3.msra.mxu1 %v255_v51  ;;  %17538 = vst [vmem:[#allocation17_spill] sm:$0xff] %v12803_v26  ;;  %v12818_v38 = vsub.f32 %v120_v54, %v12783_v63  ;;  %v290_v39 = vand.u32 4294901760, %v289_v9  ;;  %v303_v41 = vsub.f32 %v12777_v61, %v302_v19  ;;  %v12827_v42 = vand.u32 4294901760, %v12803_v26 }
  0x5c   :  { %11473 = vmatprep.subr.mxu0 %v17023_v0  ;;  %11500 = vmatprep.subr.mxu1 %v17023_v0  ;;  %v316_v44 = vand.u32 4294901760, %v12806_v31  ;;  %v12831_v49 = vsub.f32 %v119_v60, %v12798_v13  ;;  %v297_v50 = vand.u32 4294901760, %v296_v36  ;;  %v310_v51 = vsub.f32 %v12791_v8, %v309_v37 }
  0x5d   :  { %11474 = vmatpush3.msra.mxu0 %v12711_v28  ;;  %11501 = vmatpush3.msra.mxu1 %v262_v56  ;;  %17539 = vst [vmem:[#allocation18_spill] sm:$0xff] %v12827_v42  ;;  %v323_v52 = vand.u32 4294901760, %v12818_v38  ;;  %v12841_v54 = vsub.f32 %v118_v7, %v12810_v32  ;;  %v304_v56 = vand.u32 4294901760, %v303_v41  ;;  %v222_v58 = vsub.f32 %v12803_v26, %v12827_v42 }
  0x5e   :  { %11475 = vmatprep.subr.mxu0 %v17023_v0  ;;  %11502 = vmatprep.subr.mxu1 %v17023_v0  ;;  %v317_v60 = vsub.f32 %v12806_v31, %v316_v44  ;;  %v311_v2 = vand.u32 4294901760, %v310_v51  ;;  %vm1924_vm2 = vcmask 1042434   ;;  %vm1926_vm3 = vcmask 1043459  }
  0x5f   :  { %11476 = vmatpush3.msra.mxu0 %v12731_v35  ;;  %11503 = vmatpush3.msra.mxu1 %v269_v1  ;;  %v330_v1 = vand.u32 4294901760, %v12831_v49  ;;  %v324_v7 = vsub.f32 %v12818_v38, %v323_v52  ;;  %v337_v9 = vand.u32 4294901760, %v12841_v54  ;;  %vm1928_vm4 = vcmask 1044484  }
  0x60   :  { %11477 = vmatprep.subr.mxu0 %v17023_v0  ;;  %11504 = vmatprep.subr.mxu1 %v17023_v0  ;;  %vm1930_vm5 = vcmask 1045509   ;;  %vm1932_vm6 = vcmask 1046534   ;;  %vm1934_vm7 = vcmask 1047559   ;;  %vm1937_vm8 = vcmask 64512  }
  0x61   :  { %11478 = vmatpush3.msra.mxu0 %v12746_v45  ;;  %11505 = vmatpush3.msra.mxu1 %v276_v14  ;;  %v12862_v14 = vand.u32 4294901760, %v222_v58  ;;  %v331_v36 = vsub.f32 %v12831_v49, %v330_v1  ;;  %v338_v41 = vsub.f32 %v12841_v54, %v337_v9 }
  0x62   :  { %11479 = vmatprep.subr.mxu0 %v17023_v0  ;;  %11506 = vmatprep.subr.mxu1 %v17023_v0 }
  0x63   :  { %11480 = vmatpush3.msra.mxu0 %v12754_v48  ;;  %11507 = vmatpush3.msra.mxu1 %v283_v33  ;;  %17540 = vst [vmem:[#allocation19_spill] sm:$0xff] %v12862_v14  ;;  %v318_v33 = vand.u32 4294901760, %v317_v60  ;;  %v339_v51 = vand.u32 4294901760, %v338_v41  ;;  %v791_v60 = vld [vmem:[#allocation2 + $0x98] sm:$0xff] }
  0x64   :  { %11481 = vmatprep.subr.mxu0 %v17023_v0  ;;  %11508 = vmatprep.subr.mxu1 %v17023_v0 }
  0x65   :  { %11482 = vmatpush3.msra.mxu0 %v12774_v59  ;;  %11509 = vmatpush3.msra.mxu1 %v290_v39  ;;  %v325_v39 = vand.u32 4294901760, %v324_v7 }
  0x66   :  { %11483 = vmatprep.subr.mxu0 %v17023_v0  ;;  %11510 = vmatprep.subr.mxu1 %v17023_v0 }
  0x67   :  { %11484 = vmatpush3.msra.mxu0 %v12783_v63  ;;  %11511 = vmatpush3.msra.mxu1 %v297_v50  ;;  %v332_v50 = vand.u32 4294901760, %v331_v36  ;;  %v780_v36 = vld [vmem:[%s17014_s2 + $0x8] sm:$0xff] }
  0x68   :  { %11485 = vmatprep.subr.mxu0 %v17023_v0  ;;  %11512 = vmatprep.subr.mxu1 %v17023_v0 }
  0x69   :  { %11486 = vmatpush3.msra.mxu0 %v12798_v13  ;;  %11513 = vmatpush3.msra.mxu1 %v304_v56 }
  0x6a   :  { %11487 = vmatprep.subr.mxu0 %v17023_v0  ;;  %11514 = vmatprep.subr.mxu1 %v17023_v0 }
  0x6b   :  { %11488 = vmatpush3.msra.mxu0 %v12810_v32  ;;  %11515 = vmatpush3.msra.mxu1 %v311_v2 }
  0x6c   :  { %11516 = vmatprep.subr.mxu1 %v17023_v0  ;;  %11527 = vmatprep.subr.mxu0 %v17023_v0 }
  0x6d   :  { %11490 = vmatmul.mubr.f32.vlgmr.msra.gmra.mxu0 %v12862_v14  ;;  %11517 = vmatpush3.msra.mxu1 %v318_v33 }
  0x6e   :  { %11528 = vmatpush3.msra.mxu0 %v12686_v15  ;;  %11518 = vmatprep.subr.mxu1 %v17023_v0 }
  0x6f   :  { %11529 = vmatprep.subr.mxu0 %v17023_v0  ;;  %11519 = vmatpush3.msra.mxu1 %v325_v39 }
  0x70   :  { %11530 = vmatpush3.msra.mxu0 %v12689_v16  ;;  %11520 = vmatprep.subr.mxu1 %v17023_v0  ;;  %v799_v16 = vld [vmem:[#allocation2 + $0xd8] sm:$0xff] }
  0x71   :  { %11531 = vmatprep.subr.mxu0 %v17023_v0  ;;  %11521 = vmatpush3.msra.mxu1 %v332_v50  ;;  %v13146_v50 = vand.u32 4294901760, %v791_v60 }
  0x72   :  { %11532 = vmatpush3.msra.mxu0 %v12694_v18  ;;  %11522 = vmatprep.subr.mxu1 %v17023_v0 }
  0x73   :  { %11533 = vmatprep.subr.mxu0 %v17023_v0  ;;  %11523 = vmatpush3.msra.mxu1 %v339_v51 }
  0x74   :  { %11534 = vmatpush3.msra.mxu0 %v12698_v20  ;;  %11525 = vmatmul.mubr.f32.vlgmr.msra.gmra.mxu1 %v12779_v62 }
  0x75   :  { %11535 = vmatprep.subr.mxu0 %v17023_v0  ;;  %11562 = vmatprep.subr.mxu1 %v17023_v0 }
  0x76   :  { %11536 = vmatpush3.msra.mxu0 %v12701_v21  ;;  %11563 = vmatpush3.msra.mxu1 %v12672_v4  ;;  %v13030_v21 = vand.u32 4294901760, %v799_v16 }
  0x77   :  { %11537 = vmatprep.subr.mxu0 %v17023_v0  ;;  %11564 = vmatprep.subr.mxu1 %v17023_v0 }
  0x78   :  { %11538 = vmatpush3.msra.mxu0 %v12715_v30  ;;  %11565 = vmatpush3.msra.mxu1 %v12674_v5 }
  0x79   :  { %11539 = vmatprep.subr.mxu0 %v17023_v0  ;;  %11566 = vmatprep.subr.mxu1 %v17023_v0 }
  0x7a   :  { %11540 = vmatpush3.msra.mxu0 %v12728_v34  ;;  %11567 = vmatpush3.msra.mxu1 %v12676_v6  ;;  %v796_v34 = vld [vmem:[#allocation2 + $0xc0] sm:$0xff] }
  0x7b   :  { %11541 = vmatprep.subr.mxu0 %v17023_v0  ;;  %11568 = vmatprep.subr.mxu1 %v17023_v0 }
  0x7c   :  { %11542 = vmatpush3.msra.mxu0 %v12743_v43  ;;  %11569 = vmatpush3.msra.mxu1 %v12678_v10 }
  0x7d   :  { %11543 = vmatprep.subr.mxu0 %v17023_v0  ;;  %11570 = vmatprep.subr.mxu1 %v17023_v0 }
  0x7e   :  { %11544 = vmatpush3.msra.mxu0 %v12750_v47  ;;  %11571 = vmatpush3.msra.mxu1 %v12680_v11  ;;  %v13074_v47 = vand.u32 4294901760, %v796_v34 }
  0x7f   :  { %11545 = vmatprep.subr.mxu0 %v17023_v0  ;;  %11572 = vmatprep.subr.mxu1 %v17023_v0 }
  0x80   :  { %11546 = vmatpush3.msra.mxu0 %v12765_v55  ;;  %11573 = vmatpush3.msra.mxu1 %v12682_v12 }
  0x81   :  { %11547 = vmatprep.subr.mxu0 %v17023_v0  ;;  %11574 = vmatprep.subr.mxu1 %v17023_v0 }
  0x82   :  { %11548 = vmatpush3.msra.mxu0 %v12777_v61  ;;  %11575 = vmatpush3.msra.mxu1 %v12691_v17 }
  0x83   :  { %11549 = vmatprep.subr.mxu0 %v17023_v0  ;;  %11576 = vmatprep.subr.mxu1 %v17023_v0 }
  0x84   :  { %11550 = vmatpush3.msra.mxu0 %v12791_v8  ;;  %11577 = vmatpush3.msra.mxu1 %v12707_v25 }
  0x85   :  { %11551 = vmatprep.subr.mxu0 %v17023_v0  ;;  %11578 = vmatprep.subr.mxu1 %v17023_v0 }
  0x86   :  { %11552 = vmatpush3.msra.mxu0 %v12806_v31  ;;  %11579 = vmatpush3.msra.mxu1 %v12711_v28 }
  0x87   :  { %11553 = vmatprep.subr.mxu0 %v17023_v0  ;;  %11580 = vmatprep.subr.mxu1 %v17023_v0 }
  0x88   :  { %11554 = vmatpush3.msra.mxu0 %v12818_v38  ;;  %11581 = vmatpush3.msra.mxu1 %v12731_v35  ;;  %v792_v38 = vld [vmem:[#allocation2 + $0xa0] sm:$0xff] }
  0x89   :  { %11555 = vmatprep.subr.mxu0 %v17023_v0  ;;  %11582 = vmatprep.subr.mxu1 %v17023_v0  ;;  %v13125_v58 = vand.u32 4294901760, %v792_v38 }
  0x8a   :  { %11556 = vmatpush3.msra.mxu0 %v12831_v49  ;;  %11583 = vmatpush3.msra.mxu1 %v12746_v45 }
  0x8b   :  { %11557 = vmatprep.subr.mxu0 %v17023_v0  ;;  %11584 = vmatprep.subr.mxu1 %v17023_v0 }
  0x8c   :  { %11558 = vmatpush3.msra.mxu0 %v12841_v54  ;;  %11559 = vmatprep.mubr.msk.f32.mxu0 %vm12584_vm0, %v17023_v0 }
  0x8d   :  { %11585 = vmatpush3.msra.mxu1 %v12754_v48  ;;  %11560 = vmatmul.mubr.f32.vlgmr.msra.gmra.mxu0 %v12803_v26 }
  0x8e   :  { %11586 = vmatprep.subr.mxu1 %v17023_v0  ;;  %11597 = vmatprep.subr.mxu0 %v17023_v0 }
  0x8f   :  { %11587 = vmatpush3.msra.mxu1 %v12774_v59  ;;  %11598 = vmatpush3.msra.mxu0 %v232_v22  ;;  %v798_v22 = vld [vmem:[#allocation2 + $0xd0] sm:$0xff] }
  0x90   :  { %11588 = vmatprep.subr.mxu1 %v17023_v0  ;;  %11599 = vmatprep.subr.mxu0 %v17023_v0 }
  0x91   :  { %11589 = vmatpush3.msra.mxu1 %v12783_v63  ;;  %11600 = vmatpush3.msra.mxu0 %v239_v23 }
  0x92   :  { %11590 = vmatprep.subr.mxu1 %v17023_v0  ;;  %11601 = vmatprep.subr.mxu0 %v17023_v0 }
  0x93   :  { %11591 = vmatpush3.msra.mxu1 %v12798_v13  ;;  %11602 = vmatpush3.msra.mxu0 %v246_v24  ;;  %v797_v24 = vld [vmem:[#allocation2 + $0xc8] sm:$0xff] }
  0x94   :  { %11592 = vmatprep.subr.mxu1 %v17023_v0  ;;  %11603 = vmatprep.subr.mxu0 %v17023_v0  ;;  %v13056_v30 = vand.u32 4294901760, %v797_v24 }
  0x95   :  { %11593 = vmatpush3.msra.mxu1 %v12810_v32  ;;  %11594 = vmatprep.mubr.msk.f32.mxu1 %vm12584_vm0, %v17023_v0 }
  0x96   :  { %11604 = vmatpush3.msra.mxu0 %v253_v27  ;;  %11595 = vmatmul.mubr.f32.vlgmr.msra.gmra.mxu1 %v12827_v42  ;;  %v13046_v27 = vand.u32 4294901760, %v798_v22 }
  0x97   :  { %11605 = vmatprep.subr.mxu0 %v17023_v0  ;;  %11632 = vmatprep.subr.mxu1 %v17023_v0 }
  0x98   :  { %11606 = vmatpush3.msra.mxu0 %v260_v29  ;;  %11633 = vmatpush3.msra.mxu1 %v12672_v4  ;;  %v803_v4 = vld [vmem:[#allocation2 + $0xf8] sm:$0xff]  ;;  %v13080_v55 = vsub.f32 %v798_v22, %v13046_v27 }
  0x99   :  { %11607 = vmatprep.subr.mxu0 %v17023_v0  ;;  %11634 = vmatprep.subr.mxu1 %v17023_v0 }
  0x9a   :  { %11608 = vmatpush3.msra.mxu0 %v267_v40  ;;  %11635 = vmatpush3.msra.mxu1 %v12674_v5  ;;  %v802_v5 = vld [vmem:[#allocation2 + $0xf0] sm:$0xff] }
  0x9b   :  { %11609 = vmatprep.subr.mxu0 %v17023_v0  ;;  %11636 = vmatprep.subr.mxu1 %v17023_v0 }
  0x9c   :  { %11610 = vmatpush3.msra.mxu0 %v274_v46  ;;  %11637 = vmatpush3.msra.mxu1 %v12676_v6  ;;  %v12998_v6 = vand.u32 4294901760, %v803_v4 }
  0x9d   :  { %11611 = vmatprep.subr.mxu0 %v17023_v0  ;;  %11638 = vmatprep.subr.mxu1 %v17023_v0 }
  0x9e   :  { %11612 = vmatpush3.msra.mxu0 %v281_v53  ;;  %11639 = vmatpush3.msra.mxu1 %v12678_v10  ;;  %v801_v10 = vld [vmem:[#allocation2 + $0xe8] sm:$0xff]  ;;  %v794_v53 = vld [vmem:[#allocation2 + $0xb0] sm:$0xff] }
  0x9f   :  { %11613 = vmatprep.subr.mxu0 %v17023_v0  ;;  %11640 = vmatprep.subr.mxu1 %v17023_v0  ;;  %v13012_v15 = vand.u32 4294901760, %v801_v10  ;;  %v13098_v8 = vand.u32 4294901760, %v794_v53 }
  0xa0   :  { %11614 = vmatpush3.msra.mxu0 %v288_v57  ;;  %11641 = vmatpush3.msra.mxu1 %v12680_v11  ;;  %v13005_v11 = vand.u32 4294901760, %v802_v5 }
  0xa1   :  { %11615 = vmatprep.subr.mxu0 %v17023_v0  ;;  %11642 = vmatprep.subr.mxu1 %v17023_v0  ;;  %v13137_v33 = vsub.f32 %v794_v53, %v13098_v8 }
  0xa2   :  { %11616 = vmatpush3.msra.mxu0 %v295_v3  ;;  %11643 = vmatpush3.msra.mxu1 %v12682_v12  ;;  %v800_v12 = vld [vmem:[#allocation2 + $0xe0] sm:$0xff]  ;;  %v13025_v20 = vsub.f32 %v802_v5, %v13005_v11 }
  0xa3   :  { %11617 = vmatprep.subr.mxu0 %v17023_v0  ;;  %11644 = vmatprep.subr.mxu1 %v17023_v0  ;;  %v13022_v18 = vand.u32 4294901760, %v800_v12 }
  0xa4   :  { %11618 = vmatpush3.msra.mxu0 %v302_v19  ;;  %11645 = vmatpush3.msra.mxu1 %v12691_v17  ;;  %v13015_v17 = vsub.f32 %v803_v4, %v12998_v6  ;;  %v793_v19 = vld [vmem:[#allocation2 + $0xa8] sm:$0xff]  ;;  %v790_v4 = vld [vmem:[#allocation2 + $0x90] sm:$0xff] }
  0xa5   :  { %11619 = vmatprep.subr.mxu0 %v17023_v0  ;;  %11646 = vmatprep.subr.mxu1 %v17023_v0  ;;  %v13052_v29 = vsub.f32 %v800_v12, %v13022_v18  ;;  %v13119_v54 = vand.u32 4294901760, %v793_v19  ;;  %v13157_v12 = vand.u32 4294901760, %v780_v36 }
  0xa6   :  { %11620 = vmatpush3.msra.mxu0 %v309_v37  ;;  %11647 = vmatpush3.msra.mxu1 %v12707_v25  ;;  %v13035_v23 = vand.u32 4294901760, %v13015_v17  ;;  %v13038_v25 = vsub.f32 %v801_v10, %v13012_v15  ;;  %v13106_v37 = vand.u32 4294901760, %v13080_v55 }
  0xa7   :  { %11621 = vmatprep.subr.mxu0 %v17023_v0  ;;  %11648 = vmatprep.subr.mxu1 %v17023_v0  ;;  %v13152_v5 = vsub.f32 %v793_v19, %v13119_v54  ;;  %17541 = vst [vmem:[#allocation20_spill] sm:$0xff] %v13157_v12 }
  0xa8   :  { %11622 = vmatpush3.msra.mxu0 %v316_v44  ;;  %11649 = vmatpush3.msra.mxu1 %v12711_v28  ;;  %v13049_v28 = vand.u32 4294901760, %v13025_v20  ;;  %v969_v40 = vsub.f32 %v13015_v17, %v13035_v23  ;;  %v13066_v43 = vand.u32 4294901760, %v13038_v25  ;;  %v13109_v44 = vsub.f32 %v796_v34, %v13074_v47  ;;  %v789_v34 = vld [vmem:[#allocation2 + $0x88] sm:$0xff] }
  0xa9   :  { %11623 = vmatprep.subr.mxu0 %v17023_v0  ;;  %11650 = vmatprep.subr.mxu1 %v17023_v0  ;;  %v1004_v7 = vsub.f32 %v13080_v55, %v13106_v37 }
  0xaa   :  { %11624 = vmatpush3.msra.mxu0 %v323_v52  ;;  %11651 = vmatpush3.msra.mxu1 %v12731_v35  ;;  %v13059_v35 = vsub.f32 %v799_v16, %v13030_v21  ;;  %v976_v46 = vsub.f32 %v13025_v20, %v13049_v28  ;;  %v970_v61 = vand.u32 4294901760, %v969_v40  ;;  %v13166_v40 = vsub.f32 %v792_v38, %v13125_v58 }
  0xab   :  { %11625 = vmatprep.subr.mxu0 %v17023_v0  ;;  %11652 = vmatprep.subr.mxu1 %v17023_v0  ;;  %v1005_v16 = vand.u32 4294901760, %v1004_v7  ;;  %v13187_v38 = vsub.f32 %v780_v36, %v13157_v12 }
  0xac   :  { %11626 = vmatpush3.msra.mxu0 %v330_v1  ;;  %11653 = vmatpush3.msra.mxu1 %v12746_v45  ;;  %v795_v45 = vld [vmem:[#allocation2 + $0xb8] sm:$0xff]  ;;  %v13085_v57 = vand.u32 4294901760, %v13059_v35  ;;  %v779_v1 = vld [vmem:[%s17014_s2] sm:$0xff] }
  0xad   :  { %11627 = vmatprep.subr.mxu0 %v17023_v0  ;;  %11654 = vmatprep.subr.mxu1 %v17023_v0  ;;  %v13094_v3 = vand.u32 4294901760, %v795_v45  ;;  %v13154_v10 = vand.u32 4294901760, %v779_v1 }
  0xae   :  { %11628 = vmatpush3.msra.mxu0 %v337_v9  ;;  %11629 = vmatprep.mubr.msk.f32.mxu0 %vm12584_vm0, %v17023_v0  ;;  %v13134_v9 = vand.u32 4294901760, %v13109_v44 }
  0xaf   :  { %11655 = vmatpush3.msra.mxu1 %v12754_v48  ;;  %11630 = vmatmul.mubr.f32.vlgmr.msra.gmra.mxu0 %v12779_v62  ;;  %v13077_v48 = vand.u32 4294901760, %v13052_v29  ;;  %v13122_v56 = vsub.f32 %v795_v45, %v13094_v3  ;;  %v13178_v19 = vsub.f32 %v779_v1, %v13154_v10  ;;  %v13193_v1 = vand.u32 4294901760, %v13166_v40 }
  0xb0   :  { %11656 = vmatprep.subr.mxu1 %v17023_v0  ;;  %11667 = vmatprep.subr.mxu0 %v12998_v6  ;;  %v1018_v22 = vsub.f32 %v13109_v44, %v13134_v9 }
  0xb1   :  { %11657 = vmatpush3.msra.mxu1 %v12774_v59  ;;  %11668 = vmatpush3.msra.mxu0 %v12998_v6  ;;  %v13088_v59 = vsub.f32 %v797_v24, %v13056_v30  ;;  %v990_v31 = vsub.f32 %v13052_v29, %v13077_v48  ;;  %v13149_v51 = vand.u32 4294901760, %v13122_v56  ;;  %v13163_v24 = vand.u32 4294901760, %v13137_v33 }
  0xb2   :  { %11658 = vmatprep.subr.mxu1 %v17023_v0  ;;  %11669 = vmatprep.subr.mxu0 %v13005_v11 }
  0xb3   :  { %11659 = vmatpush3.msra.mxu1 %v12783_v63  ;;  %11670 = vmatpush3.msra.mxu0 %v13005_v11  ;;  %v983_v63 = vsub.f32 %v13038_v25, %v13066_v43  ;;  %v13116_v49 = vand.u32 4294901760, %v13088_v59  ;;  %v991_v2 = vand.u32 4294901760, %v990_v31  ;;  %v1025_v53 = vsub.f32 %v13122_v56, %v13149_v51 }
  0xb4   :  { %11660 = vmatprep.subr.mxu1 %v17023_v0  ;;  %11671 = vmatprep.subr.mxu0 %v13012_v15  ;;  %v13184_v31 = vand.u32 4294901760, %v789_v34 }
  0xb5   :  { %11661 = vmatpush3.msra.mxu1 %v12798_v13  ;;  %11672 = vmatpush3.msra.mxu0 %v13012_v15  ;;  %v977_v13 = vand.u32 4294901760, %v976_v46  ;;  %v984_v52 = vand.u32 4294901760, %v983_v63  ;;  %v1011_v41 = vsub.f32 %v13088_v59, %v13116_v49  ;;  %v13169_v46 = vand.u32 4294901760, %v790_v4  ;;  %v788_v63 = vld [vmem:[#allocation2 + $0x80] sm:$0xff] }
  0xb6   :  { %11662 = vmatprep.subr.mxu1 %v17023_v0  ;;  %11673 = vmatprep.subr.mxu0 %v13022_v18  ;;  %v1026_v7 = vand.u32 4294901760, %v1025_v53  ;;  %v1046_v53 = vsub.f32 %v13166_v40, %v13193_v1 }
  0xb7   :  { %11663 = vmatpush3.msra.mxu1 %v12810_v32  ;;  %11664 = vmatprep.mubr.msk.f32.mxu1 %vm12584_vm0, %v17023_v0  ;;  %v997_v32 = vsub.f32 %v13059_v35, %v13085_v57  ;;  %v1012_v45 = vand.u32 4294901760, %v1011_v41 }
  0xb8   :  { %11674 = vmatpush3.msra.mxu0 %v13022_v18  ;;  %11665 = vmatmul.mubr.f32.vlgmr.msra.gmra.mxu1 %v12779_v62 }
  0xb9   :  { %11675 = vmatprep.subr.mxu0 %v13030_v21  ;;  %11711 = vmatprep.subr.mxu1 %v970_v61  ;;  %v998_v39 = vand.u32 4294901760, %v997_v32  ;;  %v1019_v32 = vand.u32 4294901760, %v1018_v22 }
  0xba   :  { %11676 = vmatpush3.msra.mxu0 %v13030_v21  ;;  %11712 = vmatpush3.msra.mxu1 %v970_v61  ;;  %v13175_v61 = vand.u32 4294901760, %v13152_v5 }
  0xbb   :  { %11677 = vmatprep.subr.mxu0 %v13046_v27  ;;  %11713 = vmatprep.subr.mxu1 %v977_v13 }
  0xbc   :  { %11678 = vmatpush3.msra.mxu0 %v13046_v27  ;;  %11714 = vmatpush3.msra.mxu1 %v977_v13  ;;  %v13181_v13 = vsub.f32 %v791_v60, %v13146_v50  ;;  %v13196_v60 = vand.u32 4294901760, %v788_v63  ;;  %v1039_v36 = vsub.f32 %v13152_v5, %v13175_v61 }
  0xbd   :  { %11679 = vmatprep.subr.mxu0 %v13056_v30  ;;  %11715 = vmatprep.subr.mxu1 %v984_v52 }
  0xbe   :  { %11680 = vmatpush3.msra.mxu0 %v13056_v30  ;;  %11716 = vmatpush3.msra.mxu1 %v984_v52  ;;  %v1032_v52 = vsub.f32 %v13137_v33, %v13163_v24  ;;  %v13206_v41 = vand.u32 4294901760, %v13181_v13 }
  0xbf   :  { %11681 = vmatprep.subr.mxu0 %v13074_v47  ;;  %11717 = vmatprep.subr.mxu1 %v991_v2 }
  0xc0   :  { %11682 = vmatpush3.msra.mxu0 %v13074_v47  ;;  %11718 = vmatpush3.msra.mxu1 %v991_v2  ;;  %v13199_v2 = vsub.f32 %v790_v4, %v13169_v46  ;;  %v13211_v4 = vsub.f32 %v789_v34, %v13184_v31  ;;  %v1033_v22 = vand.u32 4294901760, %v1032_v52  ;;  %v1040_v34 = vand.u32 4294901760, %v1039_v36 }
  0xc1   :  { %11683 = vmatprep.subr.mxu0 %v13094_v3  ;;  %11719 = vmatprep.subr.mxu1 %v998_v39  ;;  %v1047_v36 = vand.u32 4294901760, %v1046_v53 }
  0xc2   :  { %11684 = vmatpush3.msra.mxu0 %v13094_v3  ;;  %11720 = vmatpush3.msra.mxu1 %v998_v39  ;;  %v17027_v39 = vand.u32 4294901760, %v13178_v19  ;;  %v13218_v0 = vand.u32 4294901760, %v13199_v2 }
  0xc3   :  { %11685 = vmatprep.subr.mxu0 %v13098_v8  ;;  %11721 = vmatprep.subr.mxu1 %v1005_v16 }
  0xc4   :  { %11686 = vmatpush3.msra.mxu0 %v13098_v8  ;;  %11722 = vmatpush3.msra.mxu1 %v1005_v16  ;;  %v888_v52 = vsub.f32 %v13178_v19, %v17027_v39  ;;  %v1053_v16 = vsub.f32 %v13181_v13, %v13206_v41  ;;  %v1060_v39 = vsub.f32 %v13199_v2, %v13218_v0 }
  0xc5   :  { %11687 = vmatprep.subr.mxu0 %v13119_v54  ;;  %11723 = vmatprep.subr.mxu1 %v1012_v45 }
  0xc6   :  { %11688 = vmatpush3.msra.mxu0 %v13119_v54  ;;  %11724 = vmatpush3.msra.mxu1 %v1012_v45  ;;  %v13221_v45 = vsub.f32 %v788_v63, %v13196_v60  ;;  %v13234_v63 = vand.u32 4294901760, %v13211_v4  ;;  %v1061_v62 = vand.u32 4294901760, %v1060_v39 }
  0xc7   :  { %11689 = vmatprep.subr.mxu0 %v13125_v58  ;;  %11725 = vmatprep.subr.mxu1 %v1019_v32 }
  0xc8   :  { %11690 = vmatpush3.msra.mxu0 %v13125_v58  ;;  %11726 = vmatpush3.msra.mxu1 %v1019_v32  ;;  %v17542_v32 = vand.u32 4294901760, %v13187_v38  ;;  %v13241_v42 = vand.u32 4294901760, %v13221_v45  ;;  %v1067_v53 = vsub.f32 %v13211_v4, %v13234_v63 }
  0xc9   :  { %11691 = vmatprep.subr.mxu0 %v13146_v50  ;;  %11727 = vmatprep.subr.mxu1 %v1026_v7 }
  0xca   :  { %11692 = vmatpush3.msra.mxu0 %v13146_v50  ;;  %11728 = vmatpush3.msra.mxu1 %v1026_v7  ;;  %v898_v26 = vsub.f32 %v13187_v38, %v17542_v32  ;;  %v889_v7 = vand.u32 4294901760, %v888_v52  ;;  %v1054_v32 = vand.u32 4294901760, %v1053_v16  ;;  %v1074_v16 = vsub.f32 %v13221_v45, %v13241_v42 }
  0xcb   :  { %11693 = vmatprep.subr.mxu0 %v13169_v46  ;;  %11729 = vmatprep.subr.mxu1 %v1033_v22 }
  0xcc   :  { %11694 = vmatpush3.msra.mxu0 %v13169_v46  ;;  %11730 = vmatpush3.msra.mxu1 %v1033_v22  ;;  %v899_v14 = vand.u32 4294901760, %v898_v26  ;;  %v781_v22 = vld [vmem:[%s17014_s2 + $0x10] sm:$0xff]  ;;  %v782_v26 = vld [vmem:[%s17014_s2 + $0x18] sm:$0xff]  ;;  %v1075_v39 = vand.u32 4294901760, %v1074_v16 }
  0xcd   :  { %11695 = vmatprep.subr.mxu0 %v13184_v31  ;;  %11731 = vmatprep.subr.mxu1 %v1040_v34  ;;  %v13258_v52 = vand.u32 4294901760, %v781_v22 }
  0xce   :  { %11696 = vmatpush3.msra.mxu0 %v13184_v31  ;;  %11732 = vmatpush3.msra.mxu1 %v1040_v34  ;;  %v1068_v34 = vand.u32 4294901760, %v1067_v53 }
  0xcf   :  { %11697 = vmatprep.subr.mxu0 %v13196_v60  ;;  %11733 = vmatprep.subr.mxu1 %v1047_v36 }
  0xd0   :  { %11698 = vmatpush3.msra.mxu0 %v13196_v60  ;;  %11734 = vmatpush3.msra.mxu1 %v1047_v36  ;;  %v13261_v36 = vand.u32 4294901760, %v782_v26 }
  0xd1   :  { %11699 = vmatprep.mubr.f32.mxu0 %v889_v7  ;;  %11735 = vmatprep.subr.mxu1 %v1054_v32  ;;  %v783_v7 = vld [vmem:[%s17014_s2 + $0x20] sm:$0xff] }
  0xd2   :  { %11755 = vmatprep.subr.mxu0 %v13015_v17  ;;  %11700 = vmatmul.mubr.f32.vlgmr.msra.gmra.mxu0 %v899_v14  ;;  %v784_v14 = vld [vmem:[%s17014_s2 + $0x28] sm:$0xff]  ;;  %v13279_v53 = vand.u32 4294901760, %v783_v7 }
  0xd3   :  { %11736 = vmatpush3.msra.mxu1 %v1054_v32  ;;  %11756 = vmatpush3.msra.mxu0 %v13015_v17  ;;  %v13273_v17 = vsub.f32 %v781_v22, %v13258_v52  ;;  %v13277_v32 = vsub.f32 %v782_v26, %v13261_v36 }
  0xd4   :  { %11737 = vmatprep.subr.mxu1 %v1061_v62  ;;  %11757 = vmatprep.subr.mxu0 %v13025_v20  ;;  %v13295_v16 = vsub.f32 %v783_v7, %v13279_v53 }
  0xd5   :  { %11738 = vmatpush3.msra.mxu1 %v1061_v62  ;;  %11758 = vmatpush3.msra.mxu0 %v13025_v20  ;;  %v13282_v62 = vand.u32 4294901760, %v784_v14  ;;  %v17034_v20 = vand.u32 4294901760, %v13273_v17  ;;  %v17035_v22 = vand.u32 4294901760, %v13277_v32 }
  0xd6   :  { %11739 = vmatprep.subr.mxu1 %v1068_v34  ;;  %11759 = vmatprep.subr.mxu0 %v13038_v25 }
  0xd7   :  { %11740 = vmatpush3.msra.mxu1 %v1068_v34  ;;  %11760 = vmatpush3.msra.mxu0 %v13038_v25  ;;  %v785_v25 = vld [vmem:[%s17014_s2 + $0x30] sm:$0xff]  ;;  %v13303_v26 = vsub.f32 %v784_v14, %v13282_v62  ;;  %v918_v7 = vsub.f32 %v13277_v32, %v17035_v22 }
  0xd8   :  { %11741 = vmatprep.subr.mxu1 %v1075_v39  ;;  %11761 = vmatprep.subr.mxu0 %v13052_v29  ;;  %v13307_v34 = vand.u32 4294901760, %v785_v25 }
  0xd9   :  { %11742 = vmatpush3.msra.mxu1 %v1075_v39  ;;  %11743 = vmatprep.mubr.f32.mxu1 %v13154_v10  ;;  %v908_v39 = vsub.f32 %v13273_v17, %v17034_v20 }
  0xda   :  { %11762 = vmatpush3.msra.mxu0 %v13052_v29  ;;  %11744 = vmatmul.mubr.f32.vlgmr.msra.gmra.mxu1 %v13157_v12  ;;  %v786_v29 = vld [vmem:[%s17014_s2 + $0x38] sm:$0xff]  ;;  %v13328_v20 = vsub.f32 %v785_v25, %v13307_v34 }
  0xdb   :  { %11763 = vmatprep.subr.mxu0 %v13059_v35  ;;  %11799 = vmatprep.subr.mxu1 %v12998_v6  ;;  %v909_v22 = vand.u32 4294901760, %v908_v39 }
  0xdc   :  { %11764 = vmatpush3.msra.mxu0 %v13059_v35  ;;  %11800 = vmatpush3.msra.mxu1 %v12998_v6  ;;  %v13314_v35 = vand.u32 4294901760, %v786_v29 }
  0xdd   :  { %11765 = vmatprep.subr.mxu0 %v13080_v55  ;;  %11801 = vmatprep.subr.mxu1 %v13005_v11 }
  0xde   :  { %11766 = vmatpush3.msra.mxu0 %v13080_v55  ;;  %11802 = vmatpush3.msra.mxu1 %v13005_v11  ;;  %v13333_v14 = vsub.f32 %v786_v29, %v13314_v35  ;;  %v17543_v55 = vand.u32 4294901760, %v13295_v16  ;;  %v947_v29 = vand.u32 4294901760, %v13328_v20 }
  0xdf   :  { %11767 = vmatprep.subr.mxu0 %v13088_v59  ;;  %11803 = vmatprep.subr.mxu1 %v13012_v15 }
  0xe0   :  { %11768 = vmatpush3.msra.mxu0 %v13088_v59  ;;  %11804 = vmatpush3.msra.mxu1 %v13012_v15  ;;  %v919_v59 = vand.u32 4294901760, %v918_v7  ;;  %v928_v12 = vsub.f32 %v13295_v16, %v17543_v55  ;;  %v957_v39 = vand.u32 4294901760, %v13333_v14 }
  0xe1   :  { %11769 = vmatprep.subr.mxu0 %v13109_v44  ;;  %11805 = vmatprep.subr.mxu1 %v13022_v18 }
  0xe2   :  { %11770 = vmatpush3.msra.mxu0 %v13109_v44  ;;  %11806 = vmatpush3.msra.mxu1 %v13022_v18  ;;  %v17544_v44 = vand.u32 4294901760, %v13303_v26 }
  0xe3   :  { %11771 = vmatprep.subr.mxu0 %v13122_v56  ;;  %11807 = vmatprep.subr.mxu1 %v13030_v21 }
  0xe4   :  { %11772 = vmatpush3.msra.mxu0 %v13122_v56  ;;  %11808 = vmatpush3.msra.mxu1 %v13030_v21  ;;  %v938_v25 = vsub.f32 %v13303_v26, %v17544_v44  ;;  %v929_v56 = vand.u32 4294901760, %v928_v12 }
  0xe5   :  { %11773 = vmatprep.subr.mxu0 %v13137_v33  ;;  %11809 = vmatprep.subr.mxu1 %v13046_v27 }
  0xe6   :  { %11702 = vmatprep.mubr.f32.mxu0 %v909_v22  ;;  %11774 = vmatpush3.msra.mxu0 %v13137_v33  ;;  %v939_v7 = vand.u32 4294901760, %v938_v25  ;;  %v948_v22 = vsub.f32 %v13328_v20, %v947_v29  ;;  %v958_v33 = vsub.f32 %v13333_v14, %v957_v39 }
  0xe7   :  { %11810 = vmatpush3.msra.mxu1 %v13046_v27  ;;  %11703 = vmatmul.mubr.f32.gmra.mxu0 %v919_v59 }
  0xe8   :  { %11775 = vmatprep.subr.mxu0 %v13152_v5  ;;  %11811 = vmatprep.subr.mxu1 %v13056_v30  ;;  %v959_v12 = vand.u32 4294901760, %v958_v33 }
  0xe9   :  { %11776 = vmatpush3.msra.mxu0 %v13152_v5  ;;  %11812 = vmatpush3.msra.mxu1 %v13056_v30  ;;  %v949_v5 = vand.u32 4294901760, %v948_v22 }
  0xea   :  { %11777 = vmatprep.subr.mxu0 %v13166_v40  ;;  %11813 = vmatprep.subr.mxu1 %v13074_v47 }
  0xeb   :  { %11705 = vmatprep.mubr.f32.mxu0 %v929_v56  ;;  %11778 = vmatpush3.msra.mxu0 %v13166_v40 }
  0xec   :  { %11814 = vmatpush3.msra.mxu1 %v13074_v47  ;;  %11706 = vmatmul.mubr.f32.gmra.mxu0 %v939_v7 }
  0xed   :  { %11746 = vmatprep.mubr.f32.mxu1 %v13258_v52  ;;  %11779 = vmatprep.subr.mxu0 %v13181_v13 }
  0xee   :  { %11815 = vmatprep.subr.mxu1 %v13094_v3  ;;  %11747 = vmatmul.mubr.f32.gmra.mxu1 %v13261_v36 }
  0xef   :  { %11780 = vmatpush3.msra.mxu0 %v13181_v13  ;;  %11816 = vmatpush3.msra.mxu1 %v13094_v3 }
  0xf0   :  { %11781 = vmatprep.subr.mxu0 %v13199_v2  ;;  %11817 = vmatprep.subr.mxu1 %v13098_v8 }
  0xf1   :  { %11708 = vmatprep.mubr.f32.mxu0 %v949_v5  ;;  %11782 = vmatpush3.msra.mxu0 %v13199_v2 }
  0xf2   :  { %11818 = vmatpush3.msra.mxu1 %v13098_v8  ;;  %11709 = vmatmul.mubr.f32.gmra.mxu0 %v959_v12 }
  0xf3   :  { %11749 = vmatprep.mubr.f32.mxu1 %v13279_v53  ;;  %11783 = vmatprep.subr.mxu0 %v13211_v4 }
  0xf4   :  { %11819 = vmatprep.subr.mxu1 %v13119_v54  ;;  %11750 = vmatmul.mubr.f32.gmra.mxu1 %v13282_v62 }
  0xf5   :  { %11784 = vmatpush3.msra.mxu0 %v13211_v4  ;;  %11820 = vmatpush3.msra.mxu1 %v13119_v54 }
  0xf6   :  { %11785 = vmatprep.subr.mxu0 %v13221_v45  ;;  %11821 = vmatprep.subr.mxu1 %v13125_v58 }
  0xf7   :  { %11786 = vmatpush3.msra.mxu0 %v13221_v45  ;;  %11787 = vmatprep.mubr.f32.mxu0 %v13178_v19 }
  0xf8   :  { %11822 = vmatpush3.msra.mxu1 %v13125_v58  ;;  %11752 = vmatprep.mubr.f32.mxu1 %v13307_v34 }
  0xf9   :  { %11788 = vmatmul.mubr.f32.vlgmr.msra.gmra.mxu0 %v13187_v38  ;;  %11823 = vmatprep.subr.mxu1 %v13146_v50 }
  0xfa   :  { %11843 = vmatprep.subr.mxu0 %v13035_v23  ;;  %11753 = vmatmul.mubr.f32.gmra.mxu1 %v13314_v35 }
  0xfb   :  { %11824 = vmatpush3.msra.mxu1 %v13146_v50  ;;  %11844 = vmatpush3.msra.mxu0 %v13035_v23  ;;  %v17545_v23 = vand.u32 4294901760, %v13178_v19 }
  0xfc   :  { %11825 = vmatprep.subr.mxu1 %v13169_v46  ;;  %11845 = vmatprep.subr.mxu0 %v13049_v28 }
  0xfd   :  { %11790 = vmatprep.mubr.f32.mxu0 %v13273_v17  ;;  %11826 = vmatpush3.msra.mxu1 %v13169_v46 }
  0xfe   :  { %11846 = vmatpush3.msra.mxu0 %v13049_v28  ;;  %11827 = vmatprep.subr.mxu1 %v13184_v31  ;;  %v17546_v28 = vand.u32 4294901760, %v13187_v38 }
  0xff   :  { %11791 = vmatmul.mubr.f32.gmra.mxu0 %v13277_v32  ;;  %11847 = vmatprep.subr.mxu0 %v13066_v43 }
 0x100   :  { %11828 = vmatpush3.msra.mxu1 %v13184_v31  ;;  %11848 = vmatpush3.msra.mxu0 %v13066_v43  ;;  %v17547_v43 = vand.u32 4294901760, %v13273_v17 }
 0x101   :  { %11829 = vmatprep.subr.mxu1 %v13196_v60  ;;  %11849 = vmatprep.subr.mxu0 %v13077_v48 }
 0x102   :  { %11793 = vmatprep.mubr.f32.mxu0 %v13295_v16  ;;  %11830 = vmatpush3.msra.mxu1 %v13196_v60 }
 0x103   :  { %11831 = vmatprep.mubr.f32.mxu1 %v17545_v23  ;;  %11850 = vmatpush3.msra.mxu0 %v13077_v48  ;;  %v17548_v48 = vand.u32 4294901760, %v13277_v32 }
 0x104   :  { %11794 = vmatmul.mubr.f32.gmra.mxu0 %v13303_v26  ;;  %11832 = vmatmul.mubr.f32.vlgmr.msra.gmra.mxu1 %v17546_v28 }
 0x105   :  { %11851 = vmatprep.subr.mxu0 %v13085_v57  ;;  %11887 = vmatprep.subr.mxu1 %v12998_v6 }
 0x106   :  { %11852 = vmatpush3.msra.mxu0 %v13085_v57  ;;  %11888 = vmatpush3.msra.mxu1 %v12998_v6  ;;  %v17549_v6 = vmov %v17543_v55 }
 0x107   :  { %11853 = vmatprep.subr.mxu0 %v13106_v37  ;;  %11889 = vmatprep.subr.mxu1 %v13005_v11 }
 0x108   :  { %11796 = vmatprep.mubr.f32.mxu0 %v13328_v20  ;;  %11834 = vmatprep.mubr.f32.mxu1 %v17547_v43 }
 0x109   :  { %11854 = vmatpush3.msra.mxu0 %v13106_v37  ;;  %11890 = vmatpush3.msra.mxu1 %v13005_v11  ;;  %v17550_v11 = vmov %v17544_v44 }
 0x10a   :  { %11797 = vmatmul.mubr.f32.gmra.mxu0 %v13333_v14  ;;  %11835 = vmatmul.mubr.f32.gmra.mxu1 %v17548_v48  ;;  %v1751_v14 = vlaneseq }
 0x10b   :  { %11855 = vmatprep.subr.mxu0 %v13116_v49  ;;  %11891 = vmatprep.subr.mxu1 %v13012_v15 }
 0x10c   :  { %11856 = vmatpush3.msra.mxu0 %v13116_v49  ;;  %11892 = vmatpush3.msra.mxu1 %v13012_v15  ;;  %v17552_v15 = vmov 0.0   ;;  %v13516_v25 = vshrl.u32 %v1751_v14, 7 }
 0x10d   :  { %11857 = vmatprep.subr.mxu0 %v13134_v9  ;;  %11893 = vmatprep.subr.mxu1 %v13022_v18 }
 0x10e   :  { %11837 = vmatprep.mubr.f32.mxu1 %v17549_v6  ;;  %11858 = vmatpush3.msra.mxu0 %v13134_v9 }
 0x10f   :  { %11894 = vmatpush3.msra.mxu1 %v13022_v18  ;;  %11859 = vmatprep.subr.mxu0 %v13149_v51  ;;  %v10588_v18 = vld [vmem:[#allocation4] ss:$0 sm:$0xff] }
 0x110   :  { %11838 = vmatmul.mubr.f32.gmra.mxu1 %v17550_v11  ;;  %11895 = vmatprep.subr.mxu1 %v13030_v21 }
 0x111   :  { %11860 = vmatpush3.msra.mxu0 %v13149_v51  ;;  %11896 = vmatpush3.msra.mxu1 %v13030_v21 }
 0x112   :  { %11861 = vmatprep.subr.mxu0 %v13163_v24  ;;  %11897 = vmatprep.subr.mxu1 %v13046_v27 }
 0x113   :  { %11840 = vmatprep.mubr.f32.mxu1 %v947_v29  ;;  %11862 = vmatpush3.msra.mxu0 %v13163_v24 }
 0x114   :  { %11898 = vmatpush3.msra.mxu1 %v13046_v27  ;;  %11863 = vmatprep.subr.mxu0 %v13175_v61 }
 0x115   :  { %11841 = vmatmul.mubr.f32.gmra.mxu1 %v957_v39  ;;  %11899 = vmatprep.subr.mxu1 %v13056_v30 }
 0x116   :  { %11864 = vmatpush3.msra.mxu0 %v13175_v61  ;;  %11900 = vmatpush3.msra.mxu1 %v13056_v30 }
 0x117   :  { %11865 = vmatprep.subr.mxu0 %v13193_v1  ;;  %11901 = vmatprep.subr.mxu1 %v13074_v47 }
 0x118   :  { %11866 = vmatpush3.msra.mxu0 %v13193_v1  ;;  %11902 = vmatpush3.msra.mxu1 %v13074_v47 }
 0x119   :  { %11867 = vmatprep.subr.mxu0 %v13206_v41  ;;  %11903 = vmatprep.subr.mxu1 %v13094_v3 }
 0x11a   :  { %11868 = vmatpush3.msra.mxu0 %v13206_v41  ;;  %11904 = vmatpush3.msra.mxu1 %v13094_v3 }
 0x11b   :  { %11869 = vmatprep.subr.mxu0 %v13218_v0  ;;  %11905 = vmatprep.subr.mxu1 %v13098_v8 }
 0x11c   :  { %11870 = vmatpush3.msra.mxu0 %v13218_v0  ;;  %11906 = vmatpush3.msra.mxu1 %v13098_v8  ;;  %v17551_v0 = vld [vmem:[#allocation20_spill] sm:$0xff] }
 0x11d   :  { %11871 = vmatprep.subr.mxu0 %v13234_v63  ;;  %11907 = vmatprep.subr.mxu1 %v13119_v54 }
 0x11e   :  { %11872 = vmatpush3.msra.mxu0 %v13234_v63  ;;  %11908 = vmatpush3.msra.mxu1 %v13119_v54 }
 0x11f   :  { %11873 = vmatprep.subr.mxu0 %v13241_v42  ;;  %11909 = vmatprep.subr.mxu1 %v13125_v58 }
 0x120   :  { %11874 = vmatpush3.msra.mxu0 %v13241_v42  ;;  %11875 = vmatprep.mubr.f32.mxu0 %v13154_v10 }
 0x121   :  { %11910 = vmatpush3.msra.mxu1 %v13125_v58  ;;  %11876 = vmatmul.mubr.f32.vlgmr.msra.gmra.mxu0 %v17551_v0 }
 0x122   :  { %11911 = vmatprep.subr.mxu1 %v13146_v50  ;;  %11878 = vmatprep.mubr.f32.mxu0 %v13258_v52 }
 0x123   :  { %11912 = vmatpush3.msra.mxu1 %v13146_v50  ;;  %11919 = vmatprep.mubr.f32.mxu1 %v13154_v10 }
 0x124   :  { %11913 = vmatprep.subr.mxu1 %v13169_v46  ;;  %11931 = vmatprep.subr.mxu0 %v17552_v15 }
 0x125   :  { %11914 = vmatpush3.msra.mxu1 %v13169_v46  ;;  %11879 = vmatmul.mubr.f32.gmra.mxu0 %v13261_v36 }
 0x126   :  { %11915 = vmatprep.subr.mxu1 %v13184_v31  ;;  %11881 = vmatprep.mubr.f32.mxu0 %v13279_v53 }
 0x127   :  { %11916 = vmatpush3.msra.mxu1 %v13184_v31 }
 0x128   :  { %11917 = vmatprep.subr.mxu1 %v13196_v60 }
 0x129   :  { %11918 = vmatpush3.msra.mxu1 %v13196_v60  ;;  %11882 = vmatmul.mubr.f32.gmra.mxu0 %v13282_v62 }
 0x12a   :  { %11920 = vmatmul.mubr.f32.vlgmr.msra.gmra.mxu1 %v17551_v0  ;;  %11884 = vmatprep.mubr.f32.mxu0 %v13307_v34 }
 0x12b   :  { %11922 = vmatprep.mubr.f32.mxu1 %v13258_v52  ;;  %11936 = vmatprep.subr.mxu1 %v17552_v15 }
 0x12d   :  { %11885 = vmatmul.mubr.f32.gmra.mxu0 %v13314_v35  ;;  %v225_v42 = vpop.f32.mrf.mxu0 }
 0x12e   :  { %11923 = vmatmul.mubr.f32.gmra.mxu1 %v13261_v36  ;;  %11933 = vmatprep.mubr.msk.f32.mxu0 %vm12584_vm0, %v17552_v15  ;;  %v226_v27 = vadd.f32 %v10588_v18, %v225_v42  ;;  %v13522_v18 = vsub.s32 0, %v13516_v25 }
 0x12f   :  { %11925 = vmatprep.mubr.f32.mxu1 %v13279_v53  ;;  %v11491_v21 = vpop.f32.mrf.mxu0 }
 0x130   :  { %17553 = vst [vmem:[#allocation20_spill] sm:$0xff] %v13522_v18 }
 0x132   :  { %11926 = vmatmul.mubr.f32.gmra.mxu1 %v13282_v62 }
 0x133   :  { %11928 = vmatprep.mubr.f32.mxu1 %v13307_v34  ;;  %v12585_v34 = vmov 1966171168  }
 0x134   :  { %v376_v30 = vpop.f32.mrf.mxu1 }
 0x135   :  { %v377_v47 = vadd.f32 %v376_v30, %v226_v27 }
 0x136   :  { %11929 = vmatmul.mubr.f32.gmra.mxu1 %v13314_v35  ;;  %v11526_v57 = vpop.f32.mrf.mxu1  ;;  %v1749_v35 = vunpack.c.l.s4 %v12585_v34 }
 0x137   :  { %11938 = vmatprep.mubr.msk.f32.mxu1 %vm12584_vm0, %v17552_v15 }
 0x138   :  { %v1750_v44 = vunpack.c.0.s8 %v1749_v35 }
 0x13a   :  { %v1753_v56 = vsub.s32 %v1750_v44, %v13516_v25 }
 0x14d   :  { %v480_v3 = vpop.f32.mrf.mxu0 }
 0x14e   :  { %v481_v8 = vadd.f32 %v480_v3, %v377_v47 }
 0x14f   :  { %v11561_v37 = vpop.f32.mrf.mxu0 }
 0x156   :  { %v569_v49 = vpop.f32.mrf.mxu1 }
 0x157   :  { %v570_v54 = vadd.f32 %v569_v49, %v481_v8 }
 0x158   :  { %v11596_v58 = vpop.f32.mrf.mxu1 }
 0x16f   :  { %v688_v9 = vpop.f32.mrf.mxu0 }
 0x170   :  { %v689_v50 = vadd.f32 %v688_v9, %v570_v54 }
 0x171   :  { %v11631_v51 = vpop.f32.mrf.mxu0 }
 0x178   :  { %v775_v10 = vpop.f32.mrf.mxu1 }
 0x179   :  { %v776_v24 = vadd.f32 %v775_v10, %v689_v50 }
 0x17a   :  { %v11666_v40 = vpop.f32.mrf.mxu1 }
 0x17b   :  { %v1754_v33 = vrot.slane %v776_v24, %v1753_v56  ;;  %v1747_v12 = vcombine.high %v776_v24, %v776_v24 }
 0x17d   :  { %v1762_v43 = vcombine.high %v1754_v33, %v1754_v33  ;;  %v1770_v48 = vrot.slane %v1754_v33, %v1753_v56  ;;  %v1761_v0 = vrot.slane %v1747_v12, %v1753_v56 }
 0x17f   :  { %v1792_v47 = vcombine.high %v1770_v48, %v1770_v48  ;;  %v1784_v57 = vrot.slane %v1762_v43, %v1753_v56  ;;  %v1763_v54 = vcombine.high %v1761_v0, %v1761_v0  ;;  %v1799_v9 = vrot.slane %v1770_v48, %v13522_v18  ;;  %v10589_v48 = vld [vmem:[#allocation4 + $0x1] ss:$0 sm:$0xff] }
 0x180   :  { %v13525_v50 = vrot.slane %v1761_v0, %v1753_v56 }
 0x192   :  { %v11701_v46 = vpop.f32.mrf.mxu0 }
 0x194   :  { %v891_v61 = vpop.f32.mrf.mxu0 }
 0x19a   :  { %v11745_v31 = vpop.f32.mrf.mxu1 }
 0x19b   :  { %v1119_v6 = vadd.f32 %v11745_v31, %v11701_v46 }
 0x19c   :  { %v1112_v1 = vpop.f32.mrf.mxu1 }
 0x19d   :  { %v1113_v21 = vadd.f32 %v1112_v1, %v891_v61  ;;  %v1807_v1 = vrot.slane %v1792_v47, %v13522_v18 }
 0x1a7   :  { %v11704_v19 = vpop.f32.mrf.mxu0 }
 0x1a9   :  { %v911_v13 = vpop.f32.mrf.mxu0 }
 0x1ac   :  { %v11707_v38 = vpop.f32.mrf.mxu0 }
 0x1ae   :  { %v11748_v60 = vpop.f32.mrf.mxu1  ;;  %v13505_v2 = vpop.f32.mrf.mxu0 }
 0x1af   :  { %v1131_v3 = vadd.f32 %v11748_v60, %v11704_v19  ;;  %v1803_v19 = vrot.slane %v1784_v57, %v13522_v18  ;;  %v1794_v60 = vcombine.high %v1784_v57, %v1784_v57 }
 0x1b0   :  { %v1124_v41 = vpop.f32.mrf.mxu1 }
 0x1b1   :  { %v1125_v51 = vadd.f32 %v1124_v41, %v911_v13  ;;  %v1791_v41 = vrot.slane %v1763_v54, %v1753_v56 }
 0x1b2   :  { %v13507_v4 = vpop.f32.mrf.mxu0 }
 0x1b4   :  { %v11751_v45 = vpop.f32.mrf.mxu1  ;;  %v13509_v63 = vpop.f32.mrf.mxu0 }
 0x1b5   :  { %v1143_v61 = vadd.f32 %v11751_v45, %v11707_v38 }
 0x1b6   :  { %v1136_v52 = vpop.f32.mrf.mxu1 }
 0x1b7   :  { %v1137_v35 = vadd.f32 %v1136_v52, %v13505_v2  ;;  %v1811_v2 = vrot.slane %v1794_v60, %v13522_v18 }
 0x1b9   :  { %v11789_v36 = vpop.f32.mrf.mxu0 }
 0x1ba   :  { %v13511_v17 = vpop.f32.mrf.mxu1  ;;  %v1266_v27 = vadd.f32 %v11789_v36, %v1119_v6 }
 0x1bb   :  { %v1258_v32 = vpop.f32.mrf.mxu0 }
 0x1bc   :  { %v13513_v53 = vpop.f32.mrf.mxu1  ;;  %v1259_v8 = vadd.f32 %v1258_v32, %v1113_v21 }
 0x1bf   :  { %v11792_v62 = vpop.f32.mrf.mxu0 }
 0x1c0   :  { %v1280_v10 = vadd.f32 %v11792_v62, %v1131_v3  ;;  %v1815_v62 = vrot.slane %v13525_v50, %v13522_v18 }
 0x1c1   :  { %v1272_v16 = vpop.f32.mrf.mxu0 }
 0x1c2   :  { %v1273_v36 = vadd.f32 %v1272_v16, %v1125_v51 }
 0x1c4   :  { %v11833_v20 = vpop.f32.mrf.mxu1  ;;  %v11795_v55 = vpop.f32.mrf.mxu0 }
 0x1c5   :  { %v1405_v37 = vadd.f32 %v11833_v20, %v1266_v27  ;;  %v1294_v44 = vadd.f32 %v11795_v55, %v1143_v61 }
 0x1c6   :  { %v1396_v26 = vpop.f32.mrf.mxu1  ;;  %v1286_v29 = vpop.f32.mrf.mxu0 }
 0x1c7   :  { %v1397_v24 = vadd.f32 %v1396_v26, %v1259_v8  ;;  %v1287_v16 = vadd.f32 %v1286_v29, %v1137_v35  ;;  %v1819_v8 = vrot.slane %v1791_v41, %v13522_v18 }
 0x1ca   :  { %v11836_v59 = vpop.f32.mrf.mxu1  ;;  %v11798_v7 = vpop.f32.mrf.mxu0 }
 0x1cb   :  { %v1421_v32 = vadd.f32 %v11836_v59, %v1280_v10 }
 0x1cc   :  { %v1412_v39 = vpop.f32.mrf.mxu1  ;;  %v13519_v5 = vpop.f32.mrf.mxu0 }
 0x1cd   :  { %v1413_v38 = vadd.f32 %v1412_v39, %v1273_v36 }
 0x1d0   :  { %v11839_v22 = vpop.f32.mrf.mxu1 }
 0x1d1   :  { %v1437_v59 = vadd.f32 %v11839_v22, %v1294_v44 }
 0x1d2   :  { %v1428_v23 = vpop.f32.mrf.mxu1 }
 0x1d3   :  { %v1429_v0 = vadd.f32 %v1428_v23, %v1287_v16 }
 0x1d5   :  { %v11842_v42 = vpop.f32.mrf.mxu1 }
 0x1d7   :  { %v1444_v58 = vpop.f32.mrf.mxu1 }
 0x1e1   :  { %v11877_v28 = vpop.f32.mrf.mxu0 }
 0x1e2   :  { %v1578_v40 = vadd.f32 %v11877_v28, %v1405_v37  ;;  %v1155_v28 = vadd.f32 %v13511_v17, %v13507_v4  ;;  %v1795_v37 = vcombine.high %v1791_v41, %v1791_v41 }
 0x1e3   :  { %v1571_v11 = vpop.f32.mrf.mxu0 }
 0x1e4   :  { %v1572_v20 = vadd.f32 %v1571_v11, %v1397_v24  ;;  %v1149_v11 = vadd.f32 %v13513_v53, %v13509_v63  ;;  %v1308_v39 = vadd.f32 %v11798_v7, %v1155_v28  ;;  %v1793_v24 = vcombine.high %v13525_v50, %v13525_v50 }
 0x1e5   :  { %v11880_v30 = vpop.f32.mrf.mxu0 }
 0x1e6   :  { %v1590_v45 = vadd.f32 %v11880_v30, %v1421_v32  ;;  %v1301_v22 = vadd.f32 %v13519_v5, %v1149_v11  ;;  %v1453_v57 = vadd.f32 %v11842_v42, %v1308_v39  ;;  %v1823_v32 = vrot.slane %v1793_v24, %v13522_v18 }
 0x1e7   :  { %v1583_v49 = vpop.f32.mrf.mxu0 }
 0x1e8   :  { %v1584_v52 = vadd.f32 %v1583_v49, %v1413_v38  ;;  %v1445_v53 = vadd.f32 %v1444_v58, %v1301_v22 }
 0x1e9   :  { %v11883_v46 = vpop.f32.mrf.mxu0 }
 0x1ea   :  { %v11921_v31 = vpop.f32.mrf.mxu1  ;;  %v1602_v21 = vadd.f32 %v11883_v46, %v1437_v59 }
 0x1eb   :  { %v1707_v34 = vadd.f32 %v11921_v31, %v1578_v40  ;;  %v1595_v33 = vpop.f32.mrf.mxu0  ;;  %v1827_v31 = vrot.slane %v1795_v37, %v13522_v18  ;;  %v13564_v37 = vsub.s32 1, %v13516_v25 }
 0x1ec   :  { %v1700_v13 = vpop.f32.mrf.mxu1  ;;  %v1596_v49 = vadd.f32 %v1595_v33, %v1429_v0 }
 0x1ed   :  { %v1701_v26 = vadd.f32 %v1700_v13, %v1572_v20  ;;  %v1837_v12 = vadd.f32 %v1803_v19, %v1707_v34  ;;  %v11886_v27 = vpop.f32.mrf.mxu0  ;;  %17554 = vst [vmem:[#allocation21_spill] sm:$0xff] %v13564_v37 }
 0x1ee   :  { %v11924_v43 = vpop.f32.mrf.mxu1  ;;  %v1614_v7 = vadd.f32 %v11886_v27, %v1453_v57 }
 0x1ef   :  { %v1836_v55 = vadd.f32 %v1799_v9, %v1701_v26  ;;  %v1719_v6 = vadd.f32 %v11924_v43, %v1590_v45  ;;  %v1845_v56 = vmax.f32 %v1837_v12, 0.0  ;;  %v1607_v23 = vpop.f32.mrf.mxu0  ;;  %v1889_v26 = vand.u32 127, %v1751_v14 }
 0x1f0   :  { %v1712_v30 = vpop.f32.mrf.mxu1  ;;  %v1608_v19 = vadd.f32 %v1607_v23, %v1445_v53  ;;  %v1960_v23 = vsub.s32 4, %v13516_v25 }
 0x1f1   :  { %v1844_v47 = vmax.f32 %v1836_v55, 0.0  ;;  %v1713_v4 = vadd.f32 %v1712_v30, %v1584_v52  ;;  %v1857_v17 = vmul.f32 %v10589_v48, %v1845_v56  ;;  %v1839_v29 = vadd.f32 %v1811_v2, %v1719_v6 }
 0x1f2   :  { %v11927_v3 = vpop.f32.mrf.mxu1  ;;  %v13545_v28 = vsub.s32 %v1889_v26, %v13516_v25 }
 0x1f3   :  { %v1838_v54 = vadd.f32 %v1807_v1, %v1713_v4  ;;  %v1731_v9 = vadd.f32 %v11927_v3, %v1602_v21  ;;  %1866 = vadd.xlane.f32.xlu0 %v1857_v17  ;;  %v1847_v63 = vmax.f32 %v1839_v29, 0.0  ;;  %v1856_v10 = vmul.f32 %v10589_v48, %v1844_v47 }
 0x1f4   :  { %v1724_v51 = vpop.f32.mrf.mxu1 }
 0x1f5   :  { %v1846_v40 = vmax.f32 %v1838_v54, 0.0  ;;  %v1841_v5 = vadd.f32 %v1819_v8, %v1731_v9  ;;  %v1725_v42 = vadd.f32 %v1724_v51, %v1596_v49  ;;  %v1859_v46 = vmul.f32 %v10589_v48, %v1847_v63 }
 0x1f6   :  { %v11930_v61 = vpop.f32.mrf.mxu1  ;;  %v12586_v8 = vmov 0   ;;  %v13567_v49 = vsub.s32 2, %v13516_v25  ;;  %v1956_v54 = vsub.s32 3, %v13516_v25 }
 0x1f7   :  { %v1840_v1 = vadd.f32 %v1815_v62, %v1725_v42  ;;  %v1743_v60 = vadd.f32 %v11930_v61, %v1614_v7  ;;  %1870 = vadd.xlane.f32.xlu1 %v1859_v46  ;;  %1864 = vadd.xlane.f32.xlu0 %v1856_v10  ;;  %v1849_v58 = vmax.f32 %v1841_v5, 0.0  ;;  %v1858_v50 = vmul.f32 %v10589_v48, %v1846_v40 }
 0x1f8   :  { %v1736_v36 = vpop.f32.mrf.mxu1  ;;  %12396 = vset.pattern.permute.xlu0 %v12586_v8  ;;  %12395 = vset.pattern.permute.xlu1 %v12586_v8  ;;  %17555 = vst [vmem:[#allocation22_spill] sm:$0xff] %v13567_v49  ;;  %v1964_v46 = vsub.s32 5, %v13516_v25 }
 0x1f9   :  { %v1848_v20 = vmax.f32 %v1840_v1, 0.0  ;;  %v1843_v34 = vadd.f32 %v1827_v31, %v1743_v60  ;;  %v1737_v35 = vadd.f32 %v1736_v36, %v1608_v19  ;;  %v1861_v38 = vmul.f32 %v10589_v48, %v1849_v58 }
 0x1fa   :  { %v1968_v1 = vsub.s32 6, %v13516_v25 }
 0x1fb   :  { %v1842_v44 = vadd.f32 %v1823_v32, %v1737_v35  ;;  %1868 = vadd.xlane.f32.xlu1 %v1858_v50  ;;  %v1860_v33 = vmul.f32 %v10589_v48, %v1848_v20  ;;  %v1851_v13 = vmax.f32 %v1843_v34, 0.0  ;;  %v1972_v32 = vsub.s32 7, %v13516_v25 }
 0x1fd   :  { %v1850_v41 = vmax.f32 %v1842_v44, 0.0  ;;  %1872 = vadd.xlane.f32.xlu0 %v1860_v33  ;;  %v1863_v45 = vmul.f32 %v10589_v48, %v1851_v13 }
 0x1ff   :  { %1874 = vadd.xlane.f32.xlu1 %v1861_v38  ;;  %v1862_v62 = vmul.f32 %v10589_v48, %v1850_v41 }
 0x201   :  { %1876 = vadd.xlane.f32.xlu0 %v1862_v62 }
 0x203   :  { %1878 = vadd.xlane.f32.xlu1 %v1863_v45 }
 0x27c   :  { %v1867_v12 = vpop.xlane.xlu0 %1866 }
 0x27d   :  { %v1897_v2 = vrot.slane %v1867_v12, %v13545_v28 }
 0x280   :  { %v1871_v16 = vpop.xlane.xlu1 %1870  ;;  %v1865_v59 = vpop.xlane.xlu0 %1864 }
 0x281   :  { %v1893_v43 = vrot.slane %v1865_v59, %v13545_v28  ;;  %v1905_v48 = vrot.slane %v1871_v16, %v13545_v28 }
 0x283   :  { %v1923_v14 = vsel %vm1922_vm1, %v1897_v2, %v1893_v43 }
 0x284   :  { %v1869_v52 = vpop.xlane.xlu1 %1868 }
 0x285   :  { %v1901_v55 = vrot.slane %v1869_v52, %v13545_v28 }
 0x286   :  { %v1873_v6 = vpop.xlane.xlu0 %1872 }
 0x287   :  { %v1925_v56 = vsel %vm1924_vm2, %v1901_v55, %v1923_v14  ;;  %v1909_v11 = vrot.slane %v1873_v6, %v13545_v28 }
 0x288   :  { %v1927_v39 = vsel %vm1926_vm3, %v1905_v48, %v1925_v56  ;;  %v1875_v0 = vpop.xlane.xlu1 %1874 }
 0x289   :  { %v1929_v21 = vsel %vm1928_vm4, %v1909_v11, %v1927_v39  ;;  %v1913_v27 = vrot.slane %v1875_v0, %v13545_v28 }
 0x28a   :  { %v1877_v30 = vpop.xlane.xlu0 %1876 }
 0x28b   :  { %v1917_v47 = vrot.slane %v1877_v30, %v13545_v28  ;;  %v1931_v4 = vsel %vm1930_vm5, %v1913_v27, %v1929_v21 }
 0x28c   :  { %v1879_v17 = vpop.xlane.xlu1 %1878 }
 0x28d   :  { %v1921_v29 = vrot.slane %v1879_v17, %v13545_v28  ;;  %v1933_v22 = vsel %vm1932_vm6, %v1917_v47, %v1931_v4 }
 0x28f   :  { %v1935_v57 = vsel %vm1934_vm7, %v1921_v29, %v1933_v22 }
 0x290   :  { %v1938_v3 = vsel %vm1937_vm8, %v1935_v57, -inf }
 0x291   :  { %1939 = vmax.xlane.f32.xlu0 %v1938_v3 }
 0x31a   :  { %v1940_v9 = vpop.xlane.xlu0 %1939 }
 0x31b   :  { %v1945_v63 = vrot.slane %v1940_v9, %v13522_v18  ;;  %v1949_v53 = vrot.slane %v1940_v9, %v13564_v37  ;;  %v1953_v7 = vrot.slane %v1940_v9, %v13567_v49  ;;  %v1957_v51 = vrot.slane %v1940_v9, %v1956_v54 }
 0x31c   :  { %v1961_v61 = vrot.slane %v1940_v9, %v1960_v23  ;;  %v1965_v60 = vrot.slane %v1940_v9, %v1964_v46  ;;  %v1969_v20 = vrot.slane %v1940_v9, %v1968_v1  ;;  %v1973_v50 = vrot.slane %v1940_v9, %v1972_v32 }
 0x31d   :  { %v1982_v10 = vsub.f32 %v1865_v59, %v1945_v63  ;;  %v1983_v24 = vsub.f32 %v1867_v12, %v1949_v53  ;;  %v1984_v40 = vsub.f32 %v1869_v52, %v1953_v7  ;;  %v1985_v31 = vsub.f32 %v1871_v16, %v1957_v51  ;;  %v2138_v51 = vld [vmem:[%s17015_s3] sm:$0xff] }
 0x31e   :  { %v1986_v58 = vsub.f32 %v1873_v6, %v1961_v61  ;;  %v1987_v34 = vsub.f32 %v1875_v0, %v1965_v60  ;;  %v1988_v44 = vsub.f32 %v1877_v30, %v1969_v20  ;;  %v1989_v38 = vsub.f32 %v1879_v17, %v1973_v50 }
 0x31f   :  { %v1990_v5 = vmul.f32 1.442695, %v1982_v10  ;;  %v1992_v42 = vmul.f32 1.442695, %v1983_v24  ;;  %v1994_v19 = vmul.f32 1.442695, %v1984_v40 }
 0x320   :  { %v1996_v36 = vmul.f32 1.442695, %v1985_v31  ;;  %v1998_v35 = vmul.f32 1.442695, %v1986_v58  ;;  %v2000_v33 = vmul.f32 1.442695, %v1987_v34 }
 0x321   :  { %12397 = vpow2.f32 %v1990_v5  ;;  %v2002_v62 = vmul.f32 1.442695, %v1988_v44  ;;  %v2004_v26 = vmul.f32 1.442695, %v1989_v38  ;;  %v13630_v10 = vand.u32 4294901760, %v2138_v51 }
 0x322   :  { %12399 = vpow2.f32 %v1992_v42 }
 0x323   :  { %12401 = vpow2.f32 %v1994_v19  ;;  %11932 = vmatpush3.msra.mxu0 %v13630_v10  ;;  %v13634_v24 = vsub.f32 %v2138_v51, %v13630_v10  ;;  %v2141_v51 = vld [vmem:[%s17015_s3 + $0x18] sm:$0xff] }
 0x324   :  { %12403 = vpow2.f32 %v1996_v36  ;;  %11941 = vmatprep.subr.mxu0 %v17552_v15 }
 0x325   :  { %12405 = vpow2.f32 %v1998_v35  ;;  %v2265_v40 = vand.u32 4294901760, %v13634_v24 }
 0x326   :  { %12407 = vpow2.f32 %v2000_v33 }
 0x327   :  { %12409 = vpow2.f32 %v2002_v62  ;;  %v2266_v5 = vsub.f32 %v13634_v24, %v2265_v40 }
 0x328   :  { %12411 = vpow2.f32 %v2004_v26 }
 0x329   :  { %v2267_v42 = vand.u32 4294901760, %v2266_v5  ;;  %v13725_v5 = vand.u32 4294901760, %v2141_v51 }
 0x32b   :  { %11937 = vmatpush3.msra.mxu1 %v2267_v42 }
 0x32c   :  { %11946 = vmatprep.subr.mxu1 %v17552_v15 }
 0x32e   :  { %v13587_v13 = vpop.eup %12397 }
 0x32f   :  { %v13589_v41 = vpop.eup %12399  ;;  %2015 = vperm.xlu1 %12395, %v13587_v13  }
 0x330   :  { %2018 = vperm.xlu0 %12396, %v13589_v41   ;;  %v13593_v45 = vpop.eup %12401 }
 0x331   :  { %v13596_v12 = vpop.eup %12403 }
 0x332   :  { %v13599_v16 = vpop.eup %12405 }
 0x333   :  { %2021 = vperm.xlu1 %12395, %v13593_v45   ;;  %v13602_v59 = vpop.eup %12407 }
 0x334   :  { %v13605_v43 = vpop.eup %12409 }
 0x335   :  { %v13608_v2 = vpop.eup %12411 }
 0x337   :  { %2024 = vperm.xlu1 %12395, %v13596_v12  }
 0x33b   :  { %2027 = vperm.xlu1 %12395, %v13599_v16  }
 0x33f   :  { %2030 = vperm.xlu1 %12395, %v13602_v59  }
 0x343   :  { %2033 = vperm.xlu1 %12395, %v13605_v43  }
 0x347   :  { %2036 = vperm.xlu1 %12395, %v13608_v2  }
 0x3aa   :  { %v2016_v52 = vpop.permute.xlu1 %2015 }
 0x3ab   :  { %v2019_v6 = vpop.permute.xlu0 %2018  ;;  %v2041_v39 = vrot.slane %v2016_v52, %v13545_v28 }
 0x3ac   :  { %v2045_v11 = vrot.slane %v2019_v6, %v13545_v28 }
 0x3ae   :  { %v2022_v55 = vpop.permute.xlu1 %2021  ;;  %v2070_v47 = vsel %vm1922_vm1, %v2045_v11, %v2041_v39  ;;  %v2140_v11 = vld [vmem:[%s17015_s3 + $0x10] sm:$0xff] }
 0x3af   :  { %v2049_v0 = vrot.slane %v2022_v55, %v13545_v28 }
 0x3b1   :  { %v2071_v17 = vsel %vm1924_vm2, %v2049_v0, %v2070_v47 }
 0x3b2   :  { %v2025_v48 = vpop.permute.xlu1 %2024 }
 0x3b3   :  { %v2053_v21 = vrot.slane %v2025_v48, %v13545_v28 }
 0x3b5   :  { %v2072_v22 = vsel %vm1926_vm3, %v2053_v21, %v2071_v17 }
 0x3b6   :  { %v2028_v14 = vpop.permute.xlu1 %2027 }
 0x3b7   :  { %v2057_v27 = vrot.slane %v2028_v14, %v13545_v28 }
 0x3b9   :  { %v2073_v57 = vsel %vm1928_vm4, %v2057_v27, %v2072_v22 }
 0x3ba   :  { %v2031_v56 = vpop.permute.xlu1 %2030 }
 0x3bb   :  { %v2061_v4 = vrot.slane %v2031_v56, %v13545_v28 }
 0x3bd   :  { %v2074_v8 = vsel %vm1930_vm5, %v2061_v4, %v2073_v57  ;;  %v13694_v4 = vand.u32 4294901760, %v2140_v11 }
 0x3be   :  { %v2034_v30 = vpop.permute.xlu1 %2033 }
 0x3bf   :  { %v2065_v29 = vrot.slane %v2034_v30, %v13545_v28 }
 0x3c1   :  { %v2075_v63 = vsel %vm1932_vm6, %v2065_v29, %v2074_v8  ;;  %v13704_v8 = vsub.f32 %v2140_v11, %v13694_v4 }
 0x3c2   :  { %v2037_v3 = vpop.permute.xlu1 %2036 }
 0x3c3   :  { %v2069_v9 = vrot.slane %v2037_v3, %v13545_v28 }
 0x3c5   :  { %v2076_v53 = vsel %vm1934_vm7, %v2069_v9, %v2075_v63 }
 0x3c6   :  { %v2078_v7 = vsel %vm1937_vm8, %v2076_v53, 0.0 }
 0x3c7   :  { %2079 = vadd.xlane.f32.xlu1 %v2078_v7  ;;  %v3177_v7 = vand.u32 4294901760, %v13704_v8 }
 0x450   :  { %v2080_v61 = vpop.xlane.xlu1 %2079 }
 0x451   :  { %v2085_v31 = vrot.slane %v2080_v61, %v13522_v18  ;;  %v2089_v19 = vrot.slane %v2080_v61, %v13564_v37  ;;  %v2093_v60 = vrot.slane %v2080_v61, %v13567_v49  ;;  %v2097_v58 = vrot.slane %v2080_v61, %v1956_v54  ;;  %v5823_v37 = vld [vmem:[#allocation6 + $0x30] sm:$0xff] }
 0x452   :  { %v2101_v36 = vrot.slane %v2080_v61, %v1960_v23  ;;  %v2105_v35 = vrot.slane %v2080_v61, %v1964_v46  ;;  %v2109_v33 = vrot.slane %v2080_v61, %v1968_v1  ;;  %v2113_v23 = vrot.slane %v2080_v61, %v1972_v32  ;;  %v2139_v32 = vld [vmem:[%s17015_s3 + $0x8] sm:$0xff] }
 0x453   :  { %12413 = vrcp.f32 %v2085_v31 }
 0x454   :  { %12415 = vrcp.f32 %v2089_v19  ;;  %v3178_v19 = vsub.f32 %v13704_v8, %v3177_v7 }
 0x455   :  { %12417 = vrcp.f32 %v2093_v60 }
 0x456   :  { %12419 = vrcp.f32 %v2097_v58 }
 0x457   :  { %12421 = vrcp.f32 %v2101_v36 }
 0x458   :  { %12423 = vrcp.f32 %v2105_v35 }
 0x459   :  { %12425 = vrcp.f32 %v2109_v33 }
 0x45a   :  { %12427 = vrcp.f32 %v2113_v23 }
 0x460   :  { %v12414_v20 = vpop.eup %12413 }
 0x461   :  { %v2123_v34 = vmul.f32 %v12414_v20, %v13587_v13  ;;  %v12416_v50 = vpop.eup %12415 }
 0x462   :  { %v2125_v44 = vmul.f32 %v12416_v50, %v13589_v41  ;;  %v12418_v54 = vpop.eup %12417 }
 0x463   :  { %2148 = vperm.xlu0 %12396, %v2123_v34   ;;  %v2127_v38 = vmul.f32 %v12418_v54, %v13593_v45  ;;  %v12420_v13 = vpop.eup %12419  ;;  %v3179_v34 = vand.u32 4294901760, %v3178_v19 }
 0x464   :  { %v2129_v46 = vmul.f32 %v12420_v13, %v13596_v12  ;;  %v12422_v62 = vpop.eup %12421  ;;  %v13666_v12 = vand.u32 4294901760, %v2139_v32 }
 0x465   :  { %v2131_v41 = vmul.f32 %v12422_v62, %v13599_v16  ;;  %v12424_v26 = vpop.eup %12423 }
 0x466   :  { %v2133_v1 = vmul.f32 %v12424_v26, %v13602_v59  ;;  %v12426_v52 = vpop.eup %12425  ;;  %v13669_v48 = vsub.f32 %v2139_v32, %v13666_v12 }
 0x467   :  { %2604 = vperm.xlu0 %12396, %v2125_v44   ;;  %v2135_v45 = vmul.f32 %v12426_v52, %v13605_v43  ;;  %v12428_v55 = vpop.eup %12427 }
 0x468   :  { %v2137_v25 = vmul.f32 %v12428_v55, %v13608_v2  ;;  %v2721_v2 = vand.u32 4294901760, %v13669_v48 }
 0x46a   :  { %v2722_v47 = vsub.f32 %v13669_v48, %v2721_v2 }
 0x46b   :  { %3060 = vperm.xlu0 %12396, %v2127_v38  }
 0x46c   :  { %v2723_v3 = vand.u32 4294901760, %v2722_v47 }
 0x46f   :  { %3516 = vperm.xlu0 %12396, %v2129_v46  }
 0x473   :  { %3972 = vperm.xlu0 %12396, %v2131_v41  }
 0x477   :  { %4428 = vperm.xlu0 %12396, %v2133_v1   ;;  %v2142_v1 = vld [vmem:[%s17015_s3 + $0x20] sm:$0xff] }
 0x47b   :  { %4884 = vperm.xlu0 %12396, %v2135_v45  }
 0x47f   :  { %5340 = vperm.xlu0 %12396, %v2137_v25  }
 0x4de   :  { %v2149_v16 = vpop.permute.xlu0 %2148 }
 0x4df   :  { %v13672_v59 = vrot.slane %v2149_v16, %v13545_v28 }
 0x4e1   :  { %v2154_v43 = vsel %vm1937_vm8, %v13672_v59, 0 }
 0x4e2   :  { %v2222_v14 = vand.u32 4294901760, %v2154_v43  ;;  %v2605_v6 = vpop.permute.xlu0 %2604 }
 0x4e3   :  { %v13678_v56 = vrot.slane %v2605_v6, %v13545_v28 }
 0x4e4   :  { %v2223_v39 = vsub.f32 %v2154_v43, %v2222_v14  ;;  %11939 = vmatmul.mubr.f32.vlgmr.msra.gmra.mxu1 %v2222_v14 }
 0x4e5   :  { %v2610_v0 = vsel %vm1937_vm8, %v13678_v56, 0  ;;  %11947 = vmatpush3.msra.mxu1 %v13630_v10  ;;  %11948 = vmatprep.mubr.msk.f32.mxu1 %vm12584_vm0, %v17552_v15  ;;  %v10567_v35 = vsel %vm1922_vm1, %v13678_v56, %v13672_v59  ;;  %v2143_v56 = vld [vmem:[%s17015_s3 + $0x28] sm:$0xff] }
 0x4e6   :  { %v13688_v21 = vand.u32 4294901760, %v2610_v0  ;;  %v3061_v27 = vpop.permute.xlu0 %3060  ;;  %v2224_v30 = vand.u32 4294901760, %v2223_v39  ;;  %11956 = vmatprep.subr.mxu1 %v17552_v15 }
 0x4e7   :  { %v3065_v9 = vrot.slane %v3061_v27, %v13545_v28 }
 0x4e8   :  { %v2225_v17 = vsub.f32 %v2223_v39, %v2224_v30  ;;  %11949 = vmatmul.mubr.f32.vlgmr.msra.gmra.mxu1 %v2224_v30  ;;  %v13700_v29 = vsub.f32 %v2610_v0, %v13688_v21 }
 0x4e9   :  { %11957 = vmatpush3.msra.mxu1 %v13630_v10  ;;  %11958 = vmatprep.mubr.msk.f32.mxu1 %vm12584_vm0, %v17552_v15  ;;  %v3066_v10 = vsel %vm1937_vm8, %v3065_v9, 0  ;;  %v10568_v44 = vsel %vm1924_vm2, %v3065_v9, %v10567_v35 }
 0x4ea   :  { %v2226_v22 = vand.u32 4294901760, %v2225_v17  ;;  %v3517_v57 = vpop.permute.xlu0 %3516  ;;  %11966 = vmatprep.subr.mxu1 %v17552_v15  ;;  %v2680_v53 = vand.u32 4294901760, %v13700_v29  ;;  %v13727_v42 = vand.u32 4294901760, %v3066_v10 }
 0x4ec   :  { %11934 = vmatmul.mubr.f32.vlgmr.msra.gmra.mxu0 %v2226_v22  ;;  %11959 = vmatmul.mubr.f32.vlgmr.msra.gmra.mxu1 %v2222_v14  ;;  %v2681_v31 = vsub.f32 %v13700_v29, %v2680_v53  ;;  %v13746_v60 = vsub.f32 %v3066_v10, %v13727_v42 }
 0x4ed   :  { %11942 = vmatpush3.msra.mxu0 %v13634_v24  ;;  %11943 = vmatprep.mubr.msk.f32.mxu0 %vm12584_vm0, %v17552_v15  ;;  %v3521_v24 = vrot.slane %v3517_v57, %v13545_v28  ;;  %v2144_v57 = vld [vmem:[%s17015_s3 + $0x30] sm:$0xff] }
 0x4ee   :  { %v3973_v63 = vpop.permute.xlu0 %3972  ;;  %11951 = vmatprep.subr.mxu0 %v17552_v15  ;;  %11967 = vmatpush3.msra.mxu1 %v2723_v3  ;;  %v2682_v20 = vand.u32 4294901760, %v2681_v31  ;;  %v3136_v46 = vand.u32 4294901760, %v13746_v60  ;;  %v2145_v31 = vld [vmem:[%s17015_s3 + $0x38] sm:$0xff] }
 0x4ef   :  { %11968 = vmatprep.mubr.msk.f32.mxu1 %vm12584_vm0, %v17552_v15  ;;  %11976 = vmatprep.subr.mxu1 %v17552_v15  ;;  %v13749_v58 = vrot.slane %v3973_v63, %v13545_v28  ;;  %v10569_v54 = vsel %vm1926_vm3, %v3521_v24, %v10568_v44  ;;  %v3522_v62 = vsel %vm1937_vm8, %v3521_v24, 0  ;;  %v13899_v63 = vand.u32 4294901760, %v2144_v57 }
 0x4f0   :  { %11944 = vmatmul.mubr.f32.vlgmr.msra.gmra.mxu0 %v2223_v39  ;;  %11969 = vmatmul.mubr.f32.vlgmr.msra.gmra.mxu1 %v13688_v21  ;;  %v13801_v55 = vand.u32 4294901760, %v3522_v62  ;;  %v3137_v32 = vsub.f32 %v13746_v60, %v3136_v46 }
 0x4f1   :  { %11952 = vmatpush3.msra.mxu0 %v2265_v40  ;;  %11953 = vmatprep.mubr.msk.f32.mxu0 %vm12584_vm0, %v17552_v15  ;;  %v13743_v40 = vsub.f32 %v2141_v51, %v13725_v5  ;;  %v10570_v23 = vsel %vm1928_vm4, %v13749_v58, %v10569_v54  ;;  %v13912_v10 = vsub.f32 %v2144_v57, %v13899_v63 }
 0x4f2   :  { %v4429_v61 = vpop.permute.xlu0 %4428  ;;  %11961 = vmatprep.subr.mxu0 %v17552_v15  ;;  %11977 = vmatpush3.msra.mxu1 %v13666_v12  ;;  %v3591_v16 = vsub.f32 %v3522_v62, %v13801_v55 }
 0x4f3   :  { %11978 = vmatprep.mubr.msk.f32.mxu1 %vm12584_vm0, %v17552_v15  ;;  %11986 = vmatprep.subr.mxu1 %v17552_v15  ;;  %v13757_v50 = vrot.slane %v4429_v61, %v13545_v28  ;;  %v3633_v38 = vand.u32 4294901760, %v13743_v40 }
 0x4f4   :  { %11954 = vmatmul.mubr.f32.vlgmr.msra.gmra.mxu0 %v2222_v14  ;;  %11979 = vmatmul.mubr.f32.vlgmr.msra.gmra.mxu1 %v2680_v53  ;;  %v3592_v14 = vand.u32 4294901760, %v3591_v16 }
 0x4f5   :  { %11962 = vmatpush3.msra.mxu0 %v13666_v12  ;;  %11963 = vmatprep.mubr.msk.f32.mxu0 %vm12584_vm0, %v17552_v15  ;;  %v10571_v41 = vsel %vm1930_vm5, %v13757_v50, %v10570_v23  ;;  %v3634_v45 = vsub.f32 %v13743_v40, %v3633_v38  ;;  %v4434_v22 = vsel %vm1937_vm8, %v13757_v50, 0 }
 0x4f6   :  { %v4885_v36 = vpop.permute.xlu0 %4884  ;;  %11971 = vmatprep.subr.mxu0 %v17552_v15  ;;  %11987 = vmatpush3.msra.mxu1 %v13666_v12  ;;  %v13807_v12 = vand.u32 4294901760, %v2142_v1  ;;  %v3593_v39 = vsub.f32 %v3591_v16, %v3592_v14  ;;  %v13892_v3 = vand.u32 4294901760, %v4434_v22 }
 0x4f7   :  { %11988 = vmatprep.mubr.msk.f32.mxu1 %vm12584_vm0, %v17552_v15  ;;  %11996 = vmatprep.subr.mxu1 %v17552_v15  ;;  %v13764_v33 = vrot.slane %v4885_v36, %v13545_v28  ;;  %v3635_v59 = vand.u32 4294901760, %v3634_v45 }
 0x4f8   :  { %11964 = vmatmul.mubr.f32.vlgmr.msra.gmra.mxu0 %v2682_v20  ;;  %11989 = vmatmul.mubr.f32.vlgmr.msra.gmra.mxu1 %v13688_v21  ;;  %v13823_v43 = vsub.f32 %v2142_v1, %v13807_v12  ;;  %v3594_v30 = vand.u32 4294901760, %v3593_v39  ;;  %v4503_v53 = vsub.f32 %v4434_v22, %v13892_v3  ;;  %v5863_v1 = vld [vmem:[#allocation6 + $0x170] sm:$0xff] }
 0x4f9   :  { %11972 = vmatpush3.msra.mxu0 %v13669_v48  ;;  %11973 = vmatprep.mubr.msk.f32.mxu0 %vm12584_vm0, %v17552_v15  ;;  %v10572_v52 = vsel %vm1932_vm6, %v13764_v33, %v10571_v41  ;;  %v3138_v48 = vand.u32 4294901760, %v3137_v32  ;;  %v4890_v61 = vsel %vm1937_vm8, %v13764_v33, 0 }
 0x4fa   :  { %v5341_v13 = vpop.permute.xlu0 %5340  ;;  %11981 = vmatprep.subr.mxu0 %v17552_v15  ;;  %11997 = vmatpush3.msra.mxu1 %v3179_v34  ;;  %v4089_v6 = vand.u32 4294901760, %v13823_v43  ;;  %v13936_v19 = vand.u32 4294901760, %v4890_v61 }
 0x4fb   :  { %v13780_v26 = vrot.slane %v5341_v13, %v13545_v28  ;;  %11998 = vmatprep.mubr.msk.f32.mxu1 %vm12584_vm0, %v17552_v15  ;;  %12006 = vmatprep.subr.mxu1 %v17552_v15 }
 0x4fc   :  { %11974 = vmatmul.mubr.f32.vlgmr.msra.gmra.mxu0 %v13700_v29  ;;  %11999 = vmatmul.mubr.f32.vlgmr.msra.gmra.mxu1 %v13727_v42  ;;  %v4090_v0 = vsub.f32 %v13823_v43, %v4089_v6 }
 0x4fd   :  { %v10573_v28 = vsel %vm1934_vm7, %v13780_v26, %v10572_v52  ;;  %11982 = vmatpush3.msra.mxu0 %v2721_v2  ;;  %11983 = vmatprep.mubr.msk.f32.mxu0 %vm12584_vm0, %v17552_v15  ;;  %v3978_v2 = vsel %vm1937_vm8, %v13749_v58, 0  ;;  %v4959_v58 = vsub.f32 %v4890_v61, %v13936_v19  ;;  %v5346_v44 = vsel %vm1937_vm8, %v13780_v26, 0  ;;  %v5848_v61 = vld [vmem:[#allocation6 + $0xf8] sm:$0xff] }
 0x4fe   :  { %v10575_v25 = vsel %vm1937_vm8, %v10573_v28, 0.0  ;;  %11991 = vmatprep.subr.mxu0 %v17552_v15  ;;  %12007 = vmatpush3.msra.mxu1 %v13694_v4  ;;  %v13848_v11 = vand.u32 4294901760, %v3978_v2  ;;  %v4091_v47 = vand.u32 4294901760, %v4090_v0  ;;  %v5414_v33 = vand.u32 4294901760, %v5346_v44  ;;  %v5862_v28 = vld [vmem:[#allocation6 + $0x168] sm:$0xff] }
 0x4ff   :  { %10579 = vst [vmem:[%s17022_s10 + $0x10] sm:$0xff] %v10575_v25  ;;  %12008 = vmatprep.mubr.msk.f32.mxu1 %vm12584_vm0, %v17552_v15  ;;  %12016 = vmatprep.subr.mxu1 %v17552_v15  ;;  %v4960_v35 = vand.u32 4294901760, %v4959_v58  ;;  %v14023_v52 = vand.u32 4294901760, %v5863_v1  ;;  %v14025_v45 = vand.u32 4294901760, %v5862_v28  ;;  %v5854_v0 = vld [vmem:[#allocation6 + $0x128] sm:$0xff] }
 0x500   :  { %11984 = vmatmul.mubr.f32.vlgmr.msra.gmra.mxu0 %v13688_v21  ;;  %12009 = vmatmul.mubr.f32.vlgmr.msra.gmra.mxu1 %v3136_v46  ;;  %v13855_v21 = vand.u32 4294901760, %v2143_v56  ;;  %v4047_v27 = vsub.f32 %v3978_v2, %v13848_v11  ;;  %v5415_v23 = vsub.f32 %v5346_v44, %v5414_v33  ;;  %v5856_v2 = vld [vmem:[#allocation6 + $0x138] sm:$0xff] }
 0x501   :  { %11992 = vmatpush3.msra.mxu0 %v13694_v4  ;;  %11993 = vmatprep.mubr.msk.f32.mxu0 %vm12584_vm0, %v17552_v15  ;;  %v4961_v54 = vsub.f32 %v4959_v58, %v4960_v35  ;;  %17556 = vst [vmem:[#allocation23_spill] sm:$0xff] %v14023_v52  ;;  %v14028_v25 = vsub.f32 %v5863_v1, %v14023_v52  ;;  %v14050_v39 = vand.u32 4294901760, %v5856_v2 }
 0x502   :  { %12001 = vmatprep.subr.mxu0 %v17552_v15  ;;  %12017 = vmatpush3.msra.mxu1 %v13694_v4  ;;  %v13868_v4 = vsub.f32 %v2143_v56, %v13855_v21  ;;  %v4048_v17 = vand.u32 4294901760, %v4047_v27  ;;  %v5416_v62 = vand.u32 4294901760, %v5415_v23 }
 0x503   :  { %12018 = vmatprep.mubr.msk.f32.mxu1 %vm12584_vm0, %v17552_v15  ;;  %12026 = vmatprep.subr.mxu1 %v17552_v15  ;;  %v4962_v13 = vand.u32 4294901760, %v4961_v54  ;;  %17557 = vst [vmem:[#allocation24_spill] sm:$0xff] %v14028_v25  ;;  %v14068_v22 = vsub.f32 %v5856_v2, %v14050_v39  ;;  %v14107_v54 = vand.u32 4294901760, %v5848_v61 }
 0x504   :  { %11994 = vmatmul.mubr.f32.vlgmr.msra.gmra.mxu0 %v3138_v48  ;;  %12019 = vmatmul.mubr.f32.vlgmr.msra.gmra.mxu1 %v13727_v42  ;;  %v4545_v29 = vand.u32 4294901760, %v13868_v4  ;;  %v5417_v41 = vsub.f32 %v5415_v23, %v5416_v62 }
 0x505   :  { %12002 = vmatpush3.msra.mxu0 %v13704_v8  ;;  %12003 = vmatprep.mubr.msk.f32.mxu0 %vm12584_vm0, %v17552_v15  ;;  %v4049_v8 = vsub.f32 %v4047_v27, %v4048_v17 }
 0x506   :  { %12011 = vmatprep.subr.mxu0 %v17552_v15  ;;  %12027 = vmatpush3.msra.mxu1 %v3635_v59  ;;  %v4546_v9 = vsub.f32 %v13868_v4, %v4545_v29  ;;  %v5418_v26 = vand.u32 4294901760, %v5417_v41  ;;  %v5857_v59 = vld [vmem:[#allocation6 + $0x140] sm:$0xff]  ;;  %v5842_v41 = vld [vmem:[#allocation6 + $0xc8] sm:$0xff] }
 0x507   :  { %12028 = vmatprep.mubr.msk.f32.mxu1 %vm12584_vm0, %v17552_v15  ;;  %12036 = vmatprep.subr.mxu1 %v17552_v15 }
 0x508   :  { %12004 = vmatmul.mubr.f32.vlgmr.msra.gmra.mxu0 %v13746_v60  ;;  %12029 = vmatmul.mubr.f32.vlgmr.msra.gmra.mxu1 %v13801_v55  ;;  %v4547_v51 = vand.u32 4294901760, %v4546_v9  ;;  %v13943_v60 = vand.u32 4294901760, %v2145_v31 }
 0x509   :  { %12012 = vmatpush3.msra.mxu0 %v3177_v7  ;;  %12013 = vmatprep.mubr.msk.f32.mxu0 %vm12584_vm0, %v17552_v15  ;;  %v4050_v7 = vand.u32 4294901760, %v4049_v8 }
 0x50a   :  { %12021 = vmatprep.subr.mxu0 %v17552_v15  ;;  %12037 = vmatpush3.msra.mxu1 %v13725_v5  ;;  %v13956_v34 = vsub.f32 %v2145_v31, %v13943_v60 }
 0x50b   :  { %12038 = vmatprep.mubr.msk.f32.mxu1 %vm12584_vm0, %v17552_v15  ;;  %12046 = vmatprep.subr.mxu1 %v17552_v15 }
 0x50c   :  { %12014 = vmatmul.mubr.f32.vlgmr.msra.gmra.mxu0 %v13727_v42  ;;  %12039 = vmatmul.mubr.f32.vlgmr.msra.gmra.mxu1 %v3592_v14  ;;  %v5001_v42 = vand.u32 4294901760, %v13912_v10  ;;  %v5457_v50 = vand.u32 4294901760, %v13956_v34 }
 0x50d   :  { %12022 = vmatpush3.msra.mxu0 %v13725_v5  ;;  %12023 = vmatprep.mubr.msk.f32.mxu0 %vm12584_vm0, %v17552_v15 }
 0x50e   :  { %12031 = vmatprep.subr.mxu0 %v17552_v15  ;;  %12047 = vmatpush3.msra.mxu1 %v13725_v5  ;;  %v4504_v5 = vand.u32 4294901760, %v4503_v53 }
 0x50f   :  { %12048 = vmatprep.mubr.msk.f32.mxu1 %vm12584_vm0, %v17552_v15  ;;  %12056 = vmatprep.subr.mxu1 %v17552_v15 }
 0x510   :  { %12024 = vmatmul.mubr.f32.vlgmr.msra.gmra.mxu0 %v3594_v30  ;;  %12049 = vmatmul.mubr.f32.vlgmr.msra.gmra.mxu1 %v13801_v55  ;;  %v4505_v24 = vsub.f32 %v4503_v53, %v4504_v5 }
 0x511   :  { %12032 = vmatpush3.msra.mxu0 %v13743_v40  ;;  %12033 = vmatprep.mubr.msk.f32.mxu0 %vm12584_vm0, %v17552_v15  ;;  %v5002_v40 = vsub.f32 %v13912_v10, %v5001_v42 }
 0x512   :  { %12041 = vmatprep.subr.mxu0 %v17552_v15  ;;  %12057 = vmatpush3.msra.mxu1 %v4091_v47  ;;  %v4506_v36 = vand.u32 4294901760, %v4505_v24  ;;  %v14060_v47 = vand.u32 4294901760, %v5854_v0 }
 0x513   :  { %12058 = vmatprep.mubr.msk.f32.mxu1 %vm12584_vm0, %v17552_v15  ;;  %12066 = vmatprep.subr.mxu1 %v17552_v15  ;;  %v5003_v20 = vand.u32 4294901760, %v5002_v40 }
 0x514   :  { %12034 = vmatmul.mubr.f32.vlgmr.msra.gmra.mxu0 %v3591_v16  ;;  %12059 = vmatmul.mubr.f32.vlgmr.msra.gmra.mxu1 %v13848_v11  ;;  %v14034_v16 = vsub.f32 %v5862_v28, %v14025_v45  ;;  %v14121_v28 = vsub.f32 %v5848_v61, %v14107_v54  ;;  %v5839_v61 = vld [vmem:[#allocation6 + $0xb0] sm:$0xff] }
 0x515   :  { %12042 = vmatpush3.msra.mxu0 %v3633_v38  ;;  %12043 = vmatprep.mubr.msk.f32.mxu0 %vm12584_vm0, %v17552_v15  ;;  %v5458_v38 = vsub.f32 %v13956_v34, %v5457_v50 }
 0x516   :  { %12051 = vmatprep.subr.mxu0 %v17552_v15  ;;  %12067 = vmatpush3.msra.mxu1 %v13807_v12  ;;  %v17053_v56 = vand.u32 4294901760, %v14034_v16  ;;  %17560 = vst [vmem:[#allocation27_spill] sm:$0xff] %v14121_v28 }
 0x517   :  { %12068 = vmatprep.mubr.msk.f32.mxu1 %vm12584_vm0, %v17552_v15  ;;  %12076 = vmatprep.subr.mxu1 %v17552_v15  ;;  %v5459_v46 = vand.u32 4294901760, %v5458_v38  ;;  %v5844_v38 = vld [vmem:[#allocation6 + $0xd8] sm:$0xff] }
 0x518   :  { %12044 = vmatmul.mubr.f32.vlgmr.msra.gmra.mxu0 %v13801_v55  ;;  %12069 = vmatmul.mubr.f32.vlgmr.msra.gmra.mxu1 %v4048_v17  ;;  %v5860_v55 = vld [vmem:[#allocation6 + $0x158] sm:$0xff]  ;;  %v6084_v17 = vsub.f32 %v14034_v16, %v17053_v56 }
 0x519   :  { %12052 = vmatpush3.msra.mxu0 %v13807_v12  ;;  %12053 = vmatprep.mubr.msk.f32.mxu0 %vm12584_vm0, %v17552_v15  ;;  %v14030_v32 = vand.u32 4294901760, %v5860_v55 }
 0x51a   :  { %12061 = vmatprep.subr.mxu0 %v17552_v15  ;;  %12077 = vmatpush3.msra.mxu1 %v13807_v12  ;;  %v5859_v12 = vld [vmem:[#allocation6 + $0x150] sm:$0xff] }
 0x51b   :  { %12078 = vmatprep.mubr.msk.f32.mxu1 %vm12584_vm0, %v17552_v15  ;;  %12086 = vmatprep.subr.mxu1 %v17552_v15  ;;  %v14036_v48 = vand.u32 4294901760, %v5859_v12  ;;  %v14041_v14 = vsub.f32 %v5860_v55, %v14030_v32 }
 0x51c   :  { %12054 = vmatmul.mubr.f32.vlgmr.msra.gmra.mxu0 %v4050_v7  ;;  %12079 = vmatmul.mubr.f32.vlgmr.msra.gmra.mxu1 %v13848_v11  ;;  %v5850_v7 = vld [vmem:[#allocation6 + $0x108] sm:$0xff] }
 0x51d   :  { %12062 = vmatpush3.msra.mxu0 %v13823_v43  ;;  %12063 = vmatprep.mubr.msk.f32.mxu0 %vm12584_vm0, %v17552_v15  ;;  %v17055_v43 = vand.u32 4294901760, %v14028_v25 }
 0x51e   :  { %12071 = vmatprep.subr.mxu0 %v17552_v15  ;;  %12087 = vmatpush3.msra.mxu1 %v4547_v51  ;;  %v6085_v51 = vand.u32 4294901760, %v6084_v17  ;;  %v17039_v17 = vand.u32 4294901760, %v14121_v28 }
 0x51f   :  { %12088 = vmatprep.mubr.msk.f32.mxu1 %vm12584_vm0, %v17552_v15  ;;  %12096 = vmatprep.subr.mxu1 %v17552_v15 }
 0x520   :  { %12064 = vmatmul.mubr.f32.vlgmr.msra.gmra.mxu0 %v4047_v27  ;;  %12089 = vmatmul.mubr.f32.vlgmr.msra.gmra.mxu1 %v13892_v3  ;;  %v17052_v27 = vand.u32 4294901760, %v14041_v14 }
 0x521   :  { %12072 = vmatpush3.msra.mxu0 %v4089_v6  ;;  %12073 = vmatprep.mubr.msk.f32.mxu0 %vm12584_vm0, %v17552_v15  ;;  %v14043_v6 = vand.u32 4294901760, %v5857_v59 }
 0x522   :  { %12081 = vmatprep.subr.mxu0 %v17552_v15  ;;  %12097 = vmatpush3.msra.mxu1 %v13855_v21  ;;  %v6090_v9 = vsub.f32 %v14041_v14, %v17052_v27 }
 0x523   :  { %12098 = vmatprep.mubr.msk.f32.mxu1 %vm12584_vm0, %v17552_v15  ;;  %12106 = vmatprep.subr.mxu1 %v17552_v15  ;;  %v14058_v30 = vsub.f32 %v5857_v59, %v14043_v6 }
 0x524   :  { %12074 = vmatmul.mubr.f32.vlgmr.msra.gmra.mxu0 %v13848_v11  ;;  %12099 = vmatmul.mubr.f32.vlgmr.msra.gmra.mxu1 %v4504_v5  ;;  %v14048_v11 = vsub.f32 %v5859_v12, %v14036_v48  ;;  %v17048_v5 = vand.u32 4294901760, %v14068_v22  ;;  %v6091_v31 = vand.u32 4294901760, %v6090_v9  ;;  %v5841_v12 = vld [vmem:[#allocation6 + $0xc0] sm:$0xff] }
 0x525   :  { %12082 = vmatpush3.msra.mxu0 %v13855_v21  ;;  %12083 = vmatprep.mubr.msk.f32.mxu0 %vm12584_vm0, %v17552_v15 }
 0x526   :  { %12091 = vmatprep.subr.mxu0 %v17552_v15  ;;  %12107 = vmatpush3.msra.mxu1 %v13855_v21  ;;  %v6078_v21 = vsub.f32 %v14028_v25, %v17055_v43 }
 0x527   :  { %12108 = vmatprep.mubr.msk.f32.mxu1 %vm12584_vm0, %v17552_v15  ;;  %12116 = vmatprep.subr.mxu1 %v17552_v15 }
 0x528   :  { %12084 = vmatmul.mubr.f32.vlgmr.msra.gmra.mxu0 %v4506_v36  ;;  %12109 = vmatmul.mubr.f32.vlgmr.msra.gmra.mxu1 %v13892_v3  ;;  %v6079_v8 = vand.u32 4294901760, %v6078_v21  ;;  %v6108_v36 = vsub.f32 %v14068_v22, %v17048_v5  ;;  %v14130_v21 = vand.u32 4294901760, %v5844_v38 }
 0x529   :  { %12092 = vmatpush3.msra.mxu0 %v13868_v4  ;;  %12093 = vmatprep.mubr.msk.f32.mxu0 %vm12584_vm0, %v17552_v15  ;;  %v5853_v4 = vld [vmem:[#allocation6 + $0x120] sm:$0xff] }
 0x52a   :  { %12101 = vmatprep.subr.mxu0 %v17552_v15  ;;  %12117 = vmatpush3.msra.mxu1 %v5003_v20  ;;  %v14070_v57 = vand.u32 4294901760, %v5853_v4 }
 0x52b   :  { %12118 = vmatprep.mubr.msk.f32.mxu1 %vm12584_vm0, %v17552_v15  ;;  %12126 = vmatprep.subr.mxu1 %v17552_v15 }
 0x52c   :  { %12094 = vmatmul.mubr.f32.vlgmr.msra.gmra.mxu0 %v4503_v53  ;;  %12119 = vmatmul.mubr.f32.vlgmr.msra.gmra.mxu1 %v13936_v19  ;;  %v14078_v53 = vsub.f32 %v5854_v0, %v14060_v47 }
 0x52d   :  { %12102 = vmatpush3.msra.mxu0 %v4545_v29  ;;  %12103 = vmatprep.mubr.msk.f32.mxu0 %vm12584_vm0, %v17552_v15  ;;  %v17051_v29 = vand.u32 4294901760, %v14048_v11 }
 0x52e   :  { %12111 = vmatprep.subr.mxu0 %v17552_v15  ;;  %12127 = vmatpush3.msra.mxu1 %v13899_v63  ;;  %v17046_v24 = vand.u32 4294901760, %v14078_v53 }
 0x52f   :  { %12128 = vmatprep.mubr.msk.f32.mxu1 %vm12584_vm0, %v17552_v15  ;;  %12136 = vmatprep.subr.mxu1 %v17552_v15 }
 0x530   :  { %12104 = vmatmul.mubr.f32.vlgmr.msra.gmra.mxu0 %v13892_v3  ;;  %12129 = vmatmul.mubr.f32.vlgmr.msra.gmra.mxu1 %v4960_v35  ;;  %v5851_v3 = vld [vmem:[#allocation6 + $0x110] sm:$0xff]  ;;  %v5845_v35 = vld [vmem:[#allocation6 + $0xe0] sm:$0xff]  ;;  %v6114_v44 = vsub.f32 %v14078_v53, %v17046_v24 }
 0x531   :  { %12112 = vmatpush3.msra.mxu0 %v13899_v63  ;;  %12113 = vmatprep.mubr.msk.f32.mxu0 %vm12584_vm0, %v17552_v15  ;;  %v14093_v40 = vand.u32 4294901760, %v5851_v3  ;;  %v14123_v55 = vand.u32 4294901760, %v5845_v35 }
 0x532   :  { %12121 = vmatprep.subr.mxu0 %v17552_v15  ;;  %12137 = vmatpush3.msra.mxu1 %v13899_v63  ;;  %v17049_v63 = vand.u32 4294901760, %v14058_v30 }
 0x533   :  { %12138 = vmatprep.mubr.msk.f32.mxu1 %vm12584_vm0, %v17552_v15  ;;  %12146 = vmatprep.subr.mxu1 %v17552_v15 }
 0x534   :  { %12114 = vmatmul.mubr.f32.vlgmr.msra.gmra.mxu0 %v4962_v13  ;;  %12139 = vmatmul.mubr.f32.vlgmr.msra.gmra.mxu1 %v13936_v19 }
 0x535   :  { %12122 = vmatpush3.msra.mxu0 %v13912_v10  ;;  %12123 = vmatprep.mubr.msk.f32.mxu0 %vm12584_vm0, %v17552_v15  ;;  %v6096_v10 = vsub.f32 %v14048_v11, %v17051_v29  ;;  %v5827_v29 = vld [vmem:[#allocation6 + $0x50] sm:$0xff] }
 0x536   :  { %12131 = vmatprep.subr.mxu0 %v17552_v15  ;;  %12147 = vmatpush3.msra.mxu1 %v5459_v46  ;;  %v14253_v18 = vand.u32 4294901760, %v5827_v29 }
 0x537   :  { %12148 = vmatprep.mubr.msk.f32.mxu1 %vm12584_vm0, %v17552_v15  ;;  %12156 = vmatprep.subr.mxu1 %v17552_v15 }
 0x538   :  { %12124 = vmatmul.mubr.f32.vlgmr.msra.gmra.mxu0 %v4959_v58  ;;  %12149 = vmatmul.mubr.f32.vlgmr.msra.gmra.mxu1 %v5414_v33  ;;  %v6097_v58 = vand.u32 4294901760, %v6096_v10  ;;  %v14150_v10 = vand.u32 4294901760, %v5841_v12  ;;  %17583 = vst [vmem:[#allocation50_spill] sm:$0xff] %v14253_v18 }
 0x539   :  { %12132 = vmatpush3.msra.mxu0 %v5001_v42  ;;  %12133 = vmatprep.mubr.msk.f32.mxu0 %vm12584_vm0, %v17552_v15  ;;  %v14086_v42 = vsub.f32 %v5853_v4, %v14070_v57 }
 0x53a   :  { %12141 = vmatprep.subr.mxu0 %v17552_v15  ;;  %12157 = vmatpush3.msra.mxu1 %v13943_v60  ;;  %17564 = vst [vmem:[#allocation31_spill] sm:$0xff] %v14150_v10 }
 0x53b   :  { %12158 = vmatprep.mubr.msk.f32.mxu1 %vm12584_vm0, %v17552_v15  ;;  %12166 = vmatprep.subr.mxu1 %v17552_v15  ;;  %v17045_v20 = vand.u32 4294901760, %v14086_v42 }
 0x53c   :  { %12134 = vmatmul.mubr.f32.vlgmr.msra.gmra.mxu0 %v13936_v19  ;;  %12159 = vmatmul.mubr.f32.vlgmr.msra.gmra.mxu1 %v5416_v62  ;;  %v6102_v19 = vsub.f32 %v14058_v30, %v17049_v63 }
 0x53d   :  { %12142 = vmatpush3.msra.mxu0 %v13943_v60  ;;  %12143 = vmatprep.mubr.msk.f32.mxu0 %vm12584_vm0, %v17552_v15  ;;  %v6120_v13 = vsub.f32 %v14086_v42, %v17045_v20 }
 0x53e   :  { %12151 = vmatprep.subr.mxu0 %v17552_v15  ;;  %12167 = vmatpush3.msra.mxu1 %v13943_v60  ;;  %v5847_v60 = vld [vmem:[#allocation6 + $0xf0] sm:$0xff] }
 0x53f   :  { %12168 = vmatprep.mubr.msk.f32.mxu1 %vm12584_vm0, %v17552_v15  ;;  %6080 = vmatprep.subr.mxu1 %v6079_v8  ;;  %v14116_v62 = vand.u32 4294901760, %v5847_v60  ;;  %v6121_v59 = vand.u32 4294901760, %v6120_v13  ;;  %v14140_v8 = vand.u32 4294901760, %v5842_v41 }
 0x540   :  { %12144 = vmatmul.mubr.f32.vlgmr.msra.gmra.mxu0 %v5418_v26  ;;  %12169 = vmatmul.mubr.f32.vlgmr.msra.gmra.mxu1 %v5414_v33  ;;  %v6115_v26 = vand.u32 4294901760, %v6114_v44 }
 0x541   :  { %12152 = vmatpush3.msra.mxu0 %v13956_v34  ;;  %12153 = vmatprep.mubr.msk.f32.mxu0 %vm12584_vm0, %v17552_v15  ;;  %v14099_v34 = vand.u32 4294901760, %v5850_v7  ;;  %v14128_v0 = vsub.f32 %v5847_v60, %v14116_v62 }
 0x542   :  { %12161 = vmatprep.subr.mxu0 %v17552_v15  ;;  %6086 = vmatpush1.msra.mxu1 %v6085_v51  ;;  %v14148_v51 = vsub.f32 %v5844_v38, %v14130_v21  ;;  %v14166_v38 = vsub.f32 %v5841_v12, %v14150_v10 }
 0x543   :  { %6092 = vmatprep.subr.mxu1 %v6091_v31  ;;  %v14114_v46 = vsub.f32 %v5850_v7, %v14099_v34  ;;  %17561 = vst [vmem:[#allocation28_spill] sm:$0xff] %v14128_v0  ;;  %v17038_v7 = vand.u32 4294901760, %v14128_v0 }
 0x544   :  { %12154 = vmatmul.mubr.f32.vlgmr.msra.gmra.mxu0 %v5415_v23  ;;  %6098 = vmatpush1.msra.mxu1 %v6097_v58  ;;  %v6109_v23 = vand.u32 4294901760, %v6108_v36  ;;  %17563 = vst [vmem:[#allocation30_spill] sm:$0xff] %v14148_v51  ;;  %v14158_v58 = vsub.f32 %v5842_v41, %v14140_v8  ;;  %v5838_v36 = vld [vmem:[#allocation6 + $0xa8] sm:$0xff]  ;;  %v17042_v44 = vand.u32 4294901760, %v14148_v51  ;;  %17566 = vst [vmem:[#allocation33_spill] sm:$0xff] %v14166_v38 }
 0x545   :  { %12162 = vmatpush3.msra.mxu0 %v5457_v50  ;;  %12163 = vmatprep.mubr.msk.f32.mxu0 %vm12584_vm0, %v17552_v15  ;;  %v6103_v50 = vand.u32 4294901760, %v6102_v19  ;;  %17559 = vst [vmem:[#allocation26_spill] sm:$0xff] %v14114_v46  ;;  %v17041_v2 = vand.u32 4294901760, %v14114_v46  ;;  %v6138_v19 = vsub.f32 %v14121_v28, %v17039_v17  ;;  %v14179_v17 = vand.u32 4294901760, %v5838_v36  ;;  %v5824_v15 = vld [vmem:[#allocation6 + $0x38] sm:$0xff] }
 0x546   :  { %5931 = vmatprep.subr.mxu0 %v14023_v52  ;;  %17565 = vst [vmem:[#allocation32_spill] sm:$0xff] %v14158_v58  ;;  %v6156_v12 = vsub.f32 %v14148_v51, %v17042_v44 }
 0x547   :  { %6104 = vmatprep.subr.mxu1 %v6103_v50  ;;  %v6132_v9 = vsub.f32 %v14114_v46, %v17041_v2  ;;  %v6144_v50 = vsub.f32 %v14128_v0, %v17038_v7  ;;  %v6139_v13 = vand.u32 4294901760, %v6138_v19  ;;  %v17047_v7 = vand.u32 4294901760, %v14166_v38  ;;  %17568 = vst [vmem:[#allocation35_spill] sm:$0xff] %v14179_v17 }
 0x548   :  { %12164 = vmatmul.mubr.f32.vlgmr.msra.gmra.mxu0 %v5414_v33  ;;  %v14105_v33 = vsub.f32 %v5851_v3, %v14093_v40  ;;  %6110 = vmatpush1.msra.mxu1 %v6109_v23  ;;  %v14138_v3 = vsub.f32 %v5845_v35, %v14123_v55  ;;  %v5836_v23 = vld [vmem:[#allocation6 + $0x98] sm:$0xff]  ;;  %v6157_v44 = vand.u32 4294901760, %v6156_v12  ;;  %v5829_v12 = vld [vmem:[#allocation6 + $0x60] sm:$0xff] }
 0x549   :  { %5933 = vmatpush1.msra.mxu0 %v14025_v45  ;;  %6116 = vmatprep.subr.mxu1 %v6115_v26  ;;  %v6133_v35 = vand.u32 4294901760, %v6132_v9  ;;  %v17044_v26 = vand.u32 4294901760, %v14158_v58  ;;  %v6145_v9 = vand.u32 4294901760, %v6144_v50  ;;  %v5832_v50 = vld [vmem:[#allocation6 + $0x78] sm:$0xff] }
 0x54a   :  { %5935 = vmatprep.subr.mxu0 %v14030_v32  ;;  %17558 = vst [vmem:[#allocation25_spill] sm:$0xff] %v14105_v33  ;;  %v17043_v1 = vand.u32 4294901760, %v14105_v33  ;;  %17562 = vst [vmem:[#allocation29_spill] sm:$0xff] %v14138_v3  ;;  %6122 = vmatpush1.msra.mxu1 %v6121_v59  ;;  %v17040_v60 = vand.u32 4294901760, %v14138_v3  ;;  %v14173_v59 = vand.u32 4294901760, %v5839_v61  ;;  %v14210_v63 = vand.u32 4294901760, %v5832_v50 }
 0x54b   :  { %5937 = vmatpush1.msra.mxu0 %v14036_v48 }
 0x54c   :  { %5939 = vmatprep.subr.mxu0 %v14043_v6  ;;  %v6126_v4 = vsub.f32 %v14105_v33, %v17043_v1  ;;  %v6150_v41 = vsub.f32 %v14138_v3, %v17040_v60  ;;  %17567 = vst [vmem:[#allocation34_spill] sm:$0xff] %v14173_v59  ;;  %v6162_v60 = vsub.f32 %v14158_v58, %v17044_v26  ;;  %v5830_v26 = vld [vmem:[#allocation6 + $0x68] sm:$0xff]  ;;  %17576 = vst [vmem:[#allocation43_spill] sm:$0xff] %v14210_v63 }
 0x54d   :  { %5941 = vmatpush1.msra.mxu0 %v14050_v39  ;;  %v14185_v2 = vsub.f32 %v5839_v61, %v14173_v59  ;;  %v6168_v1 = vsub.f32 %v14166_v38, %v17047_v7 }
 0x54e   :  { %5943 = vmatprep.subr.mxu0 %v14060_v47  ;;  %v6127_v31 = vand.u32 4294901760, %v6126_v4  ;;  %v5835_v4 = vld [vmem:[#allocation6 + $0x90] sm:$0xff]  ;;  %v6151_v19 = vand.u32 4294901760, %v6150_v41  ;;  %v6163_v61 = vand.u32 4294901760, %v6162_v60 }
 0x54f   :  { %5945 = vmatpush1.msra.mxu0 %v14070_v57  ;;  %17569 = vst [vmem:[#allocation36_spill] sm:$0xff] %v14185_v2  ;;  %v14196_v41 = vand.u32 4294901760, %v5835_v4  ;;  %v17050_v20 = vand.u32 4294901760, %v14185_v2 }
 0x550   :  { %5947 = vmatprep.subr.mxu0 %v14093_v40  ;;  %6128 = vmatprep.subr.mxu1 %v6127_v31  ;;  %v5833_v31 = vld [vmem:[#allocation6 + $0x80] sm:$0xff] }
 0x551   :  { %5949 = vmatpush1.msra.mxu0 %v14099_v34  ;;  %6134 = vmatpush1.msra.mxu1 %v6133_v35  ;;  %v14187_v35 = vand.u32 4294901760, %v5836_v23  ;;  %17572 = vst [vmem:[#allocation39_spill] sm:$0xff] %v14196_v41  ;;  %v14208_v5 = vsub.f32 %v5835_v4, %v14196_v41  ;;  %v6174_v60 = vsub.f32 %v14185_v2, %v17050_v20  ;;  %v14230_v20 = vand.u32 4294901760, %v5829_v12 }
 0x552   :  { %5951 = vmatprep.subr.mxu0 %v14107_v54  ;;  %6140 = vmatprep.subr.mxu1 %v6139_v13  ;;  %v14194_v13 = vsub.f32 %v5838_v36, %v14179_v17  ;;  %v6169_v36 = vand.u32 4294901760, %v6168_v1  ;;  %v14220_v1 = vand.u32 4294901760, %v5830_v26 }
 0x553   :  { %5953 = vmatpush1.msra.mxu0 %v14116_v62  ;;  %17570 = vst [vmem:[#allocation37_spill] sm:$0xff] %v14187_v35  ;;  %6146 = vmatpush1.msra.mxu1 %v6145_v9  ;;  %v14201_v24 = vsub.f32 %v5836_v23, %v14187_v35  ;;  %v14203_v9 = vand.u32 4294901760, %v5833_v31  ;;  %17575 = vst [vmem:[#allocation42_spill] sm:$0xff] %v14208_v5  ;;  %v17064_v4 = vand.u32 4294901760, %v14208_v5 }
 0x554   :  { %5955 = vmatprep.subr.mxu0 %v14123_v55  ;;  %17571 = vst [vmem:[#allocation38_spill] sm:$0xff] %v14194_v13  ;;  %6152 = vmatprep.subr.mxu1 %v6151_v19  ;;  %v17054_v7 = vand.u32 4294901760, %v14194_v13  ;;  %17578 = vst [vmem:[#allocation45_spill] sm:$0xff] %v14220_v1  ;;  %v14238_v56 = vsub.f32 %v5830_v26, %v14220_v1 }
 0x555   :  { %5957 = vmatpush1.msra.mxu0 %v14130_v21  ;;  %17573 = vst [vmem:[#allocation40_spill] sm:$0xff] %v14201_v24  ;;  %17574 = vst [vmem:[#allocation41_spill] sm:$0xff] %v14203_v9  ;;  %6158 = vmatpush1.msra.mxu1 %v6157_v44  ;;  %v17059_v23 = vand.u32 4294901760, %v14201_v24  ;;  %v14218_v19 = vsub.f32 %v5833_v31, %v14203_v9  ;;  %v6175_v31 = vand.u32 4294901760, %v6174_v60 }
 0x556   :  { %5959 = vmatprep.subr.mxu0 %v14140_v8  ;;  %6164 = vmatprep.subr.mxu1 %v6163_v61  ;;  %v6180_v44 = vsub.f32 %v14194_v13, %v17054_v7  ;;  %v14228_v61 = vsub.f32 %v5832_v50, %v14210_v63  ;;  %17580 = vst [vmem:[#allocation47_spill] sm:$0xff] %v14230_v20  ;;  %17581 = vst [vmem:[#allocation48_spill] sm:$0xff] %v14238_v56  ;;  %v5826_v7 = vld [vmem:[#allocation6 + $0x48] sm:$0xff] }
 0x557   :  { %5961 = vmatpush1.msra.mxu0 %v14150_v10  ;;  %17577 = vst [vmem:[#allocation44_spill] sm:$0xff] %v14218_v19  ;;  %6170 = vmatpush1.msra.mxu1 %v6169_v36  ;;  %v6186_v27 = vsub.f32 %v14201_v24, %v17059_v23  ;;  %v17069_v36 = vand.u32 4294901760, %v14218_v19  ;;  %v6192_v43 = vsub.f32 %v14208_v5, %v17064_v4  ;;  %v14259_v24 = vand.u32 4294901760, %v5826_v7 }
 0x558   :  { %5963 = vmatprep.subr.mxu0 %v14173_v59  ;;  %17579 = vst [vmem:[#allocation46_spill] sm:$0xff] %v14228_v61  ;;  %v6181_v50 = vand.u32 4294901760, %v6180_v44  ;;  %v17072_v49 = vand.u32 4294901760, %v14228_v61  ;;  %v14246_v60 = vsub.f32 %v5829_v12, %v14230_v20  ;;  %6176 = vmatprep.subr.mxu1 %v6175_v31  ;;  %v17075_v44 = vand.u32 4294901760, %v14238_v56 }
 0x559   :  { %5965 = vmatpush1.msra.mxu0 %v14179_v17  ;;  %v6187_v23 = vand.u32 4294901760, %v6186_v27  ;;  %v6198_v26 = vsub.f32 %v14218_v19, %v17069_v36  ;;  %v6193_v4 = vand.u32 4294901760, %v6192_v43  ;;  %17584 = vst [vmem:[#allocation51_spill] sm:$0xff] %v14259_v24  ;;  %v5821_v27 = vld [vmem:[#allocation6 + $0x20] sm:$0xff]  ;;  %v14265_v19 = vsub.f32 %v5827_v29, %v14253_v18  ;;  %v5820_v43 = vld [vmem:[#allocation6 + $0x18] sm:$0xff] }
 0x55a   :  { %5967 = vmatprep.subr.mxu0 %v14187_v35  ;;  %17582 = vst [vmem:[#allocation49_spill] sm:$0xff] %v14246_v60  ;;  %6182 = vmatpush1.msra.mxu1 %v6181_v50  ;;  %v6204_v12 = vsub.f32 %v14228_v61, %v17072_v49  ;;  %v17080_v5 = vand.u32 4294901760, %v14246_v60  ;;  %v6210_v36 = vsub.f32 %v14238_v56, %v17075_v44  ;;  %v14267_v50 = vand.u32 4294901760, %v5824_v15  ;;  %v5818_v44 = vld [vmem:[#allocation6 + $0x8] sm:$0xff] }
 0x55b   :  { %5969 = vmatpush1.msra.mxu0 %v14196_v41  ;;  %6188 = vmatprep.subr.mxu1 %v6187_v23  ;;  %v6199_v31 = vand.u32 4294901760, %v6198_v26  ;;  %17585 = vst [vmem:[#allocation52_spill] sm:$0xff] %v14265_v19  ;;  %v14274_v23 = vsub.f32 %v5826_v7, %v14259_v24  ;;  %v14276_v26 = vand.u32 4294901760, %v5823_v37  ;;  %v17085_v56 = vand.u32 4294901760, %v14265_v19 }
 0x55c   :  { %5971 = vmatprep.subr.mxu0 %v14203_v9  ;;  %17586 = vst [vmem:[#allocation53_spill] sm:$0xff] %v14267_v50  ;;  %6194 = vmatpush1.msra.mxu1 %v6193_v4  ;;  %v6205_v49 = vand.u32 4294901760, %v6204_v12  ;;  %v6216_v61 = vsub.f32 %v14246_v60, %v17080_v5  ;;  %v6211_v29 = vand.u32 4294901760, %v6210_v36  ;;  %v14281_v13 = vsub.f32 %v5824_v15, %v14267_v50  ;;  %v5817_v12 = vld [vmem:[#allocation6] sm:$0xff]  ;;  %v5911_v36 = vld [vmem:[#allocation6 + $0x2f0] sm:$0xff] }
 0x55d   :  { %5973 = vmatpush1.msra.mxu0 %v14210_v63  ;;  %17587 = vst [vmem:[#allocation54_spill] sm:$0xff] %v14274_v23  ;;  %17588 = vst [vmem:[#allocation55_spill] sm:$0xff] %v14276_v26  ;;  %6200 = vmatprep.subr.mxu1 %v6199_v31  ;;  %v14283_v4 = vand.u32 4294901760, %v5821_v27  ;;  %v17092_v5 = vand.u32 4294901760, %v14274_v23  ;;  %v14288_v60 = vsub.f32 %v5823_v37, %v14276_v26 }
 0x55e   :  { %5975 = vmatprep.subr.mxu0 %v14220_v1  ;;  %17589 = vst [vmem:[#allocation56_spill] sm:$0xff] %v14281_v13  ;;  %6206 = vmatpush1.msra.mxu1 %v6205_v49  ;;  %v6217_v7 = vand.u32 4294901760, %v6216_v61  ;;  %v6222_v15 = vsub.f32 %v14265_v19, %v17085_v56  ;;  %v14300_v49 = vand.u32 4294901760, %v5818_v44  ;;  %v14310_v56 = vand.u32 4294901760, %v5817_v12 }
 0x55f   :  { %5977 = vmatpush1.msra.mxu0 %v14230_v20  ;;  %17590 = vst [vmem:[#allocation57_spill] sm:$0xff] %v14283_v4  ;;  %17591 = vst [vmem:[#allocation58_spill] sm:$0xff] %v14288_v60  ;;  %6212 = vmatprep.subr.mxu1 %v6211_v29  ;;  %v14298_v31 = vsub.f32 %v5821_v27, %v14283_v4  ;;  %v6228_v37 = vsub.f32 %v14274_v23, %v17092_v5  ;;  %v17103_v61 = vand.u32 4294901760, %v14288_v60  ;;  %v5910_v5 = vld [vmem:[#allocation6 + $0x2e8] sm:$0xff] }
 0x560   :  { %5979 = vmatprep.subr.mxu0 %v14253_v18  ;;  %17594 = vst [vmem:[#allocation61_spill] sm:$0xff] %v14300_v49  ;;  %6218 = vmatpush1.msra.mxu1 %v6217_v7  ;;  %17596 = vst [vmem:[#allocation63_spill] sm:$0xff] %v14310_v56  ;;  %v6223_v27 = vand.u32 4294901760, %v6222_v15  ;;  %v17597_v19 = vand.u32 4294901760, %v14281_v13  ;;  %v14326_v15 = vsub.f32 %v5817_v12, %v14310_v56 }
 0x561   :  { %5981 = vmatpush1.msra.mxu0 %v14259_v24  ;;  %v14290_v24 = vand.u32 4294901760, %v5820_v43  ;;  %17593 = vst [vmem:[#allocation60_spill] sm:$0xff] %v14298_v31  ;;  %v17108_v7 = vand.u32 4294901760, %v14298_v31  ;;  %v6240_v23 = vsub.f32 %v14288_v60, %v17103_v61 }
 0x562   :  { %5983 = vmatprep.subr.mxu0 %v14267_v50  ;;  %17599 = vst [vmem:[#allocation65_spill] sm:$0xff] %v14326_v15  ;;  %v5908_v50 = vld [vmem:[#allocation6 + $0x2d8] sm:$0xff]  ;;  %6224 = vmatprep.subr.mxu1 %v6223_v27  ;;  %v17119_v60 = vand.u32 4294901760, %v14326_v15 }
 0x563   :  { %17592 = vst [vmem:[#allocation59_spill] sm:$0xff] %v14290_v24  ;;  %5985 = vmatpush1.msra.mxu0 %v14276_v26  ;;  %v14308_v29 = vsub.f32 %v5820_v43, %v14290_v24  ;;  %v14318_v26 = vsub.f32 %v5818_v44, %v14300_v49  ;;  %v6229_v43 = vand.u32 4294901760, %v6228_v37  ;;  %v6246_v44 = vsub.f32 %v14298_v31, %v17108_v7 }
 0x564   :  { %5987 = vmatprep.subr.mxu0 %v14283_v4  ;;  %v6234_v4 = vsub.f32 %v14281_v13, %v17597_v19  ;;  %v14333_v13 = vand.u32 4294901760, %v5911_v36  ;;  %v6241_v61 = vand.u32 4294901760, %v6240_v23  ;;  %v5904_v23 = vld [vmem:[#allocation6 + $0x2b8] sm:$0xff] }
 0x565   :  { %17595 = vst [vmem:[#allocation62_spill] sm:$0xff] %v14308_v29  ;;  %5989 = vmatpush1.msra.mxu0 %v14290_v24  ;;  %17598 = vst [vmem:[#allocation64_spill] sm:$0xff] %v14318_v26  ;;  %v17111_v24 = vand.u32 4294901760, %v14308_v29  ;;  %v17114_v37 = vand.u32 4294901760, %v14318_v26  ;;  %6230 = vmatpush1.msra.mxu1 %v6229_v43  ;;  %v6247_v27 = vand.u32 4294901760, %v6246_v44  ;;  %v14347_v43 = vand.u32 4294901760, %v5908_v50 }
 0x566   :  { %5991 = vmatprep.subr.mxu0 %v14300_v49  ;;  %v6235_v19 = vand.u32 4294901760, %v6234_v4  ;;  %17600 = vst [vmem:[#allocation66_spill] sm:$0xff] %v14333_v13  ;;  %v5907_v49 = vld [vmem:[#allocation6 + $0x2d0] sm:$0xff]  ;;  %v5905_v4 = vld [vmem:[#allocation6 + $0x2c0] sm:$0xff]  ;;  %v14345_v31 = vsub.f32 %v5911_v36, %v14333_v13 }
 0x567   :  { %5993 = vmatpush1.msra.mxu0 %v14310_v56  ;;  %v6252_v12 = vsub.f32 %v14308_v29, %v17111_v24  ;;  %v14339_v56 = vand.u32 4294901760, %v5910_v5  ;;  %v6258_v7 = vsub.f32 %v14318_v26, %v17114_v37  ;;  %17603 = vst [vmem:[#allocation69_spill] sm:$0xff] %v14347_v43  ;;  %v6264_v29 = vsub.f32 %v14326_v15, %v17119_v60  ;;  %v5902_v37 = vld [vmem:[#allocation6 + $0x2a8] sm:$0xff] }
 0x568   :  { %6236 = vmatprep.subr.mxu1 %v6235_v19  ;;  %17602 = vst [vmem:[#allocation68_spill] sm:$0xff] %v14345_v31  ;;  %5995 = vmatprep.subr.mxu0 %v14333_v13  ;;  %v14356_v44 = vand.u32 4294901760, %v5907_v49  ;;  %v17124_v26 = vand.u32 4294901760, %v14345_v31  ;;  %v14361_v13 = vsub.f32 %v5908_v50, %v14347_v43 }
 0x569   :  { %17601 = vst [vmem:[#allocation67_spill] sm:$0xff] %v14339_v56  ;;  %6242 = vmatpush1.msra.mxu1 %v6241_v61  ;;  %v6253_v24 = vand.u32 4294901760, %v6252_v12  ;;  %v14354_v19 = vsub.f32 %v5910_v5, %v14339_v56  ;;  %5997 = vmatpush2.msra.mxu0 %v14339_v56  ;;  %v6259_v36 = vand.u32 4294901760, %v6258_v7  ;;  %v14363_v61 = vand.u32 4294901760, %v5905_v4  ;;  %v5901_v12 = vld [vmem:[#allocation6 + $0x2a0] sm:$0xff]  ;;  %v5899_v7 = vld [vmem:[#allocation6 + $0x290] sm:$0xff] }
 0x56a   :  { %17605 = vst [vmem:[#allocation71_spill] sm:$0xff] %v14356_v44  ;;  %6248 = vmatprep.subr.mxu1 %v6247_v27  ;;  %17606 = vst [vmem:[#allocation72_spill] sm:$0xff] %v14361_v13  ;;  %5999 = vmatprep.subr.mxu0 %v14347_v43  ;;  %v6265_v5 = vand.u32 4294901760, %v6264_v29  ;;  %v14368_v15 = vsub.f32 %v5907_v49, %v14356_v44  ;;  %v14370_v56 = vand.u32 4294901760, %v5904_v23  ;;  %v5896_v43 = vld [vmem:[#allocation6 + $0x278] sm:$0xff] }
 0x56b   :  { %17604 = vst [vmem:[#allocation70_spill] sm:$0xff] %v14354_v19  ;;  %17607 = vst [vmem:[#allocation73_spill] sm:$0xff] %v14363_v61  ;;  %6254 = vmatpush1.msra.mxu1 %v6253_v24  ;;  %v17131_v60 = vand.u32 4294901760, %v14354_v19  ;;  %6001 = vmatpush2.msra.mxu0 %v14356_v44  ;;  %v6270_v50 = vsub.f32 %v14345_v31, %v17124_v26  ;;  %v14378_v27 = vsub.f32 %v5905_v4, %v14363_v61 }
 0x56c   :  { %17608 = vst [vmem:[#allocation74_spill] sm:$0xff] %v14368_v15  ;;  %17609 = vst [vmem:[#allocation75_spill] sm:$0xff] %v14370_v56  ;;  %6260 = vmatprep.subr.mxu1 %v6259_v36  ;;  %v14380_v24 = vand.u32 4294901760, %v5902_v37  ;;  %6003 = vmatprep.subr.mxu0 %v14363_v61  ;;  %v17142_v29 = vand.u32 4294901760, %v14368_v15  ;;  %v14388_v36 = vsub.f32 %v5904_v23, %v14370_v56  ;;  %v14390_v26 = vand.u32 4294901760, %v5901_v12 }
 0x56d   :  { %17610 = vst [vmem:[#allocation76_spill] sm:$0xff] %v14378_v27  ;;  %6266 = vmatpush1.msra.mxu1 %v6265_v5  ;;  %v6276_v49 = vsub.f32 %v14354_v19, %v17131_v60  ;;  %6005 = vmatpush2.msra.mxu0 %v14370_v56  ;;  %v6271_v4 = vand.u32 4294901760, %v6270_v50  ;;  %v17614_v31 = vand.u32 4294901760, %v14361_v13  ;;  %v17147_v5 = vand.u32 4294901760, %v14378_v27  ;;  %v5898_v60 = vld [vmem:[#allocation6 + $0x288] sm:$0xff] }
 0x56e   :  { %17611 = vst [vmem:[#allocation77_spill] sm:$0xff] %v14380_v24  ;;  %17612 = vst [vmem:[#allocation78_spill] sm:$0xff] %v14388_v36  ;;  %v14398_v44 = vsub.f32 %v5902_v37, %v14380_v24  ;;  %6007 = vmatprep.subr.mxu0 %v14380_v24  ;;  %v6288_v19 = vsub.f32 %v14368_v15, %v17142_v29  ;;  %v17150_v56 = vand.u32 4294901760, %v14388_v36  ;;  %v5895_v24 = vld [vmem:[#allocation6 + $0x270] sm:$0xff] }
 0x56f   :  { %17613 = vst [vmem:[#allocation79_spill] sm:$0xff] %v14390_v26  ;;  %v6282_v61 = vsub.f32 %v14361_v13, %v17614_v31  ;;  %v6277_v23 = vand.u32 4294901760, %v6276_v49  ;;  %v14406_v50 = vsub.f32 %v5901_v12, %v14390_v26  ;;  %6009 = vmatpush2.msra.mxu0 %v14390_v26  ;;  %6272 = vmatprep.subr.mxu1 %v6271_v4  ;;  %v14413_v13 = vand.u32 4294901760, %v5899_v7 }
 0x570   :  { %17615 = vst [vmem:[#allocation80_spill] sm:$0xff] %v14398_v44  ;;  %v6294_v37 = vsub.f32 %v14378_v27, %v17147_v5  ;;  %v17153_v49 = vand.u32 4294901760, %v14398_v44  ;;  %v6289_v29 = vand.u32 4294901760, %v6288_v19  ;;  %v6300_v12 = vsub.f32 %v14388_v36, %v17150_v56  ;;  %v5892_v19 = vld [vmem:[#allocation6 + $0x258] sm:$0xff] }
 0x571   :  { %17616 = vst [vmem:[#allocation81_spill] sm:$0xff] %v14406_v50  ;;  %v6283_v31 = vand.u32 4294901760, %v6282_v61  ;;  %17617 = vst [vmem:[#allocation82_spill] sm:$0xff] %v14413_v13  ;;  %6278 = vmatpush2.msra.mxu1 %v6277_v23  ;;  %v17158_v15 = vand.u32 4294901760, %v14406_v50  ;;  %v14419_v26 = vand.u32 4294901760, %v5898_v60  ;;  %v5893_v61 = vld [vmem:[#allocation6 + $0x260] sm:$0xff]  ;;  %v14425_v27 = vsub.f32 %v5899_v7, %v14413_v13  ;;  %6011 = vmatprep.subr.mxu0 %v14413_v13 }
 0x572   :  { %v6295_v4 = vand.u32 4294901760, %v6294_v37  ;;  %v6306_v5 = vsub.f32 %v14398_v44, %v17153_v49  ;;  %v14427_v23 = vand.u32 4294901760, %v5896_v43  ;;  %v6301_v56 = vand.u32 4294901760, %v6300_v12  ;;  %v5890_v49 = vld [vmem:[#allocation6 + $0x248] sm:$0xff]  ;;  %v5889_v12 = vld [vmem:[#allocation6 + $0x240] sm:$0xff] }
 0x573   :  { %17618 = vst [vmem:[#allocation83_spill] sm:$0xff] %v14419_v26  ;;  %6284 = vmatprep.subr.mxu1 %v6283_v31  ;;  %17619 = vst [vmem:[#allocation84_spill] sm:$0xff] %v14425_v27  ;;  %v6312_v36 = vsub.f32 %v14406_v50, %v17158_v15  ;;  %v14434_v31 = vsub.f32 %v5898_v60, %v14419_v26  ;;  %v14436_v37 = vand.u32 4294901760, %v5895_v24  ;;  %6013 = vmatpush2.msra.mxu0 %v14419_v26 }
 0x574   :  { %17620 = vst [vmem:[#allocation85_spill] sm:$0xff] %v14427_v23  ;;  %6290 = vmatpush2.msra.mxu1 %v6289_v29  ;;  %v6307_v7 = vand.u32 4294901760, %v6306_v5  ;;  %v17163_v44 = vand.u32 4294901760, %v14425_v27  ;;  %v14441_v13 = vsub.f32 %v5896_v43, %v14427_v23  ;;  %v14443_v29 = vand.u32 4294901760, %v5893_v61  ;;  %6015 = vmatprep.subr.mxu0 %v14427_v23  ;;  %v5887_v5 = vld [vmem:[#allocation6 + $0x230] sm:$0xff]  ;;  %v5884_v23 = vld [vmem:[#allocation6 + $0x218] sm:$0xff] }
 0x575   :  { %17621 = vst [vmem:[#allocation86_spill] sm:$0xff] %v14434_v31  ;;  %17622 = vst [vmem:[#allocation87_spill] sm:$0xff] %v14436_v37  ;;  %6296 = vmatprep.subr.mxu1 %v6295_v4  ;;  %v6313_v60 = vand.u32 4294901760, %v6312_v36  ;;  %v17170_v15 = vand.u32 4294901760, %v14434_v31  ;;  %v14448_v50 = vsub.f32 %v5895_v24, %v14436_v37  ;;  %v14450_v26 = vand.u32 4294901760, %v5892_v19  ;;  %6017 = vmatpush2.msra.mxu0 %v14436_v37 }
 0x576   :  { %17623 = vst [vmem:[#allocation88_spill] sm:$0xff] %v14441_v13  ;;  %17624 = vst [vmem:[#allocation89_spill] sm:$0xff] %v14443_v29  ;;  %6302 = vmatpush2.msra.mxu1 %v6301_v56  ;;  %v6318_v43 = vsub.f32 %v14425_v27, %v17163_v44  ;;  %v14458_v4 = vsub.f32 %v5893_v61, %v14443_v29  ;;  %v14460_v56 = vand.u32 4294901760, %v5890_v49  ;;  %6019 = vmatprep.subr.mxu0 %v14443_v29 }
 0x577   :  { %17625 = vst [vmem:[#allocation90_spill] sm:$0xff] %v14448_v50  ;;  %17626 = vst [vmem:[#allocation91_spill] sm:$0xff] %v14450_v26  ;;  %6308 = vmatprep.subr.mxu1 %v6307_v7  ;;  %v6324_v24 = vsub.f32 %v14434_v31, %v17170_v15  ;;  %v17181_v36 = vand.u32 4294901760, %v14448_v50  ;;  %v14468_v7 = vsub.f32 %v5892_v19, %v14450_v26  ;;  %v14470_v44 = vand.u32 4294901760, %v5889_v12  ;;  %v5886_v15 = vld [vmem:[#allocation6 + $0x228] sm:$0xff] }
 0x578   :  { %17627 = vst [vmem:[#allocation92_spill] sm:$0xff] %v14458_v4  ;;  %17628 = vst [vmem:[#allocation93_spill] sm:$0xff] %v14460_v56  ;;  %6314 = vmatpush2.msra.mxu1 %v6313_v60  ;;  %6021 = vmatpush2.msra.mxu0 %v14450_v26  ;;  %v6319_v61 = vand.u32 4294901760, %v6318_v43  ;;  %v17631_v27 = vand.u32 4294901760, %v14441_v13  ;;  %v17186_v60 = vand.u32 4294901760, %v14458_v4  ;;  %v14478_v37 = vsub.f32 %v5890_v49, %v14460_v56 }
 0x579   :  { %17629 = vst [vmem:[#allocation94_spill] sm:$0xff] %v14468_v7  ;;  %17630 = vst [vmem:[#allocation95_spill] sm:$0xff] %v14470_v44  ;;  %6023 = vmatprep.subr.mxu0 %v14460_v56  ;;  %v6325_v19 = vand.u32 4294901760, %v6324_v24  ;;  %v6336_v31 = vsub.f32 %v14448_v50, %v17181_v36  ;;  %v17189_v26 = vand.u32 4294901760, %v14468_v7  ;;  %v14486_v43 = vsub.f32 %v5889_v12, %v14470_v44  ;;  %v5883_v56 = vld [vmem:[#allocation6 + $0x210] sm:$0xff] }
 0x57a   :  { %v6330_v29 = vsub.f32 %v14441_v13, %v17631_v27  ;;  %17632 = vst [vmem:[#allocation96_spill] sm:$0xff] %v14478_v37  ;;  %6025 = vmatpush2.msra.mxu0 %v14470_v44  ;;  %6320 = vmatprep.subr.mxu1 %v6319_v61  ;;  %v6342_v49 = vsub.f32 %v14458_v4, %v17186_v60  ;;  %v17192_v24 = vand.u32 4294901760, %v14478_v37  ;;  %v14493_v13 = vand.u32 4294901760, %v5887_v5 }
 0x57b   :  { %17633 = vst [vmem:[#allocation97_spill] sm:$0xff] %v14486_v43  ;;  %6326 = vmatpush2.msra.mxu1 %v6325_v19  ;;  %v6337_v36 = vand.u32 4294901760, %v6336_v31  ;;  %v6348_v12 = vsub.f32 %v14468_v7, %v17189_v26  ;;  %v17197_v50 = vand.u32 4294901760, %v14486_v43  ;;  %v14499_v44 = vand.u32 4294901760, %v5886_v15  ;;  %v5880_v31 = vld [vmem:[#allocation6 + $0x1f8] sm:$0xff] }
 0x57c   :  { %v6331_v27 = vand.u32 4294901760, %v6330_v29  ;;  %17634 = vst [vmem:[#allocation98_spill] sm:$0xff] %v14493_v13  ;;  %v5881_v29 = vld [vmem:[#allocation6 + $0x200] sm:$0xff]  ;;  %v6343_v61 = vand.u32 4294901760, %v6342_v49  ;;  %v6354_v60 = vsub.f32 %v14478_v37, %v17192_v24  ;;  %v14505_v4 = vsub.f32 %v5887_v5, %v14493_v13  ;;  %6027 = vmatprep.subr.mxu0 %v14493_v13  ;;  %v5878_v24 = vld [vmem:[#allocation6 + $0x1e8] sm:$0xff] }
 0x57d   :  { %17635 = vst [vmem:[#allocation99_spill] sm:$0xff] %v14499_v44  ;;  %v14507_v19 = vand.u32 4294901760, %v5884_v23  ;;  %v6349_v26 = vand.u32 4294901760, %v6348_v12  ;;  %v6360_v7 = vsub.f32 %v14486_v43, %v17197_v50  ;;  %v14516_v49 = vand.u32 4294901760, %v5883_v56  ;;  %6029 = vmatpush2.msra.mxu0 %v14499_v44  ;;  %v5877_v12 = vld [vmem:[#allocation6 + $0x1e0] sm:$0xff] }
 0x57e   :  { %6332 = vmatprep.subr.mxu1 %v6331_v27  ;;  %17636 = vst [vmem:[#allocation100_spill] sm:$0xff] %v14505_v4  ;;  %v14514_v27 = vsub.f32 %v5886_v15, %v14499_v44  ;;  %v6355_v5 = vand.u32 4294901760, %v6354_v60  ;;  %v17202_v37 = vand.u32 4294901760, %v14505_v4  ;;  %v14530_v44 = vand.u32 4294901760, %v5880_v31  ;;  %v5875_v60 = vld [vmem:[#allocation6 + $0x1d0] sm:$0xff] }
 0x57f   :  { %17637 = vst [vmem:[#allocation101_spill] sm:$0xff] %v14507_v19  ;;  %6338 = vmatpush2.msra.mxu1 %v6337_v36  ;;  %17639 = vst [vmem:[#allocation103_spill] sm:$0xff] %v14516_v49  ;;  %v14521_v13 = vsub.f32 %v5884_v23, %v14507_v19  ;;  %v14523_v36 = vand.u32 4294901760, %v5881_v29  ;;  %6031 = vmatprep.subr.mxu0 %v14507_v19  ;;  %v6361_v15 = vand.u32 4294901760, %v6360_v7  ;;  %v5872_v19 = vld [vmem:[#allocation6 + $0x1b8] sm:$0xff] }
 0x580   :  { %17638 = vst [vmem:[#allocation102_spill] sm:$0xff] %v14514_v27  ;;  %6344 = vmatprep.subr.mxu1 %v6343_v61  ;;  %v17209_v50 = vand.u32 4294901760, %v14514_v27  ;;  %v14528_v43 = vsub.f32 %v5883_v56, %v14516_v49  ;;  %17643 = vst [vmem:[#allocation107_spill] sm:$0xff] %v14530_v44  ;;  %6033 = vmatpush2.msra.mxu0 %v14516_v49  ;;  %v6366_v23 = vsub.f32 %v14505_v4, %v17202_v37 }
 0x581   :  { %17640 = vst [vmem:[#allocation104_spill] sm:$0xff] %v14521_v13  ;;  %17641 = vst [vmem:[#allocation105_spill] sm:$0xff] %v14523_v36  ;;  %6350 = vmatpush2.msra.mxu1 %v6349_v26  ;;  %v14538_v61 = vsub.f32 %v5881_v29, %v14523_v36  ;;  %v14540_v26 = vand.u32 4294901760, %v5878_v24  ;;  %6035 = vmatprep.subr.mxu0 %v14523_v36  ;;  %v14550_v37 = vand.u32 4294901760, %v5877_v12  ;;  %v17648_v4 = vand.u32 4294901760, %v14521_v13 }
 0x582   :  { %17642 = vst [vmem:[#allocation106_spill] sm:$0xff] %v14528_v43  ;;  %6356 = vmatprep.subr.mxu1 %v6355_v5  ;;  %v6372_v56 = vsub.f32 %v14514_v27, %v17209_v50  ;;  %v17220_v7 = vand.u32 4294901760, %v14528_v43  ;;  %v14548_v5 = vsub.f32 %v5880_v31, %v14530_v44  ;;  %6037 = vmatpush2.msra.mxu0 %v14530_v44  ;;  %v6367_v29 = vand.u32 4294901760, %v6366_v23  ;;  %v5874_v50 = vld [vmem:[#allocation6 + $0x1c8] sm:$0xff] }
 0x583   :  { %17644 = vst [vmem:[#allocation108_spill] sm:$0xff] %v14538_v61  ;;  %17645 = vst [vmem:[#allocation109_spill] sm:$0xff] %v14540_v26  ;;  %6362 = vmatpush2.msra.mxu1 %v6361_v15  ;;  %v6378_v36 = vsub.f32 %v14521_v13, %v17648_v4  ;;  %v17225_v15 = vand.u32 4294901760, %v14538_v61  ;;  %v14558_v49 = vsub.f32 %v5878_v24, %v14540_v26  ;;  %6039 = vmatprep.subr.mxu0 %v14540_v26  ;;  %v5871_v26 = vld [vmem:[#allocation6 + $0x1b0] sm:$0xff] }
 0x584   :  { %17646 = vst [vmem:[#allocation110_spill] sm:$0xff] %v14548_v5  ;;  %17647 = vst [vmem:[#allocation111_spill] sm:$0xff] %v14550_v37  ;;  %v6373_v31 = vand.u32 4294901760, %v6372_v56  ;;  %v6384_v27 = vsub.f32 %v14528_v43, %v17220_v7  ;;  %v17228_v44 = vand.u32 4294901760, %v14548_v5  ;;  %v14566_v23 = vsub.f32 %v5877_v12, %v14550_v37  ;;  %6041 = vmatpush2.msra.mxu0 %v14550_v37 }
 0x585   :  { %17649 = vst [vmem:[#allocation112_spill] sm:$0xff] %v14558_v49  ;;  %6368 = vmatprep.subr.mxu1 %v6367_v29  ;;  %v6379_v4 = vand.u32 4294901760, %v6378_v36  ;;  %v6390_v24 = vsub.f32 %v14538_v61, %v17225_v15  ;;  %v17231_v56 = vand.u32 4294901760, %v14558_v49  ;;  %v14573_v13 = vand.u32 4294901760, %v5875_v60  ;;  %v5869_v36 = vld [vmem:[#allocation6 + $0x1a0] sm:$0xff] }
 0x586   :  { %17650 = vst [vmem:[#allocation113_spill] sm:$0xff] %v14566_v23  ;;  %6374 = vmatpush2.msra.mxu1 %v6373_v31  ;;  %v6385_v7 = vand.u32 4294901760, %v6384_v27  ;;  %v6396_v12 = vsub.f32 %v14548_v5, %v17228_v44  ;;  %v17236_v43 = vand.u32 4294901760, %v14566_v23  ;;  %v14579_v37 = vand.u32 4294901760, %v5874_v50  ;;  %v5868_v27 = vld [vmem:[#allocation6 + $0x198] sm:$0xff] }
 0x587   :  { %17651 = vst [vmem:[#allocation114_spill] sm:$0xff] %v14573_v13  ;;  %6380 = vmatprep.subr.mxu1 %v6379_v4  ;;  %v6391_v29 = vand.u32 4294901760, %v6390_v24  ;;  %v6402_v15 = vsub.f32 %v14558_v49, %v17231_v56  ;;  %v14585_v61 = vsub.f32 %v5875_v60, %v14573_v13  ;;  %v14587_v31 = vand.u32 4294901760, %v5872_v19  ;;  %6043 = vmatprep.subr.mxu0 %v14573_v13  ;;  %v5866_v56 = vld [vmem:[#allocation6 + $0x188] sm:$0xff] }
 0x588   :  { %17652 = vst [vmem:[#allocation115_spill] sm:$0xff] %v14579_v37  ;;  %6386 = vmatpush2.msra.mxu1 %v6385_v7  ;;  %v6397_v44 = vand.u32 4294901760, %v6396_v12  ;;  %v6408_v5 = vsub.f32 %v14566_v23, %v17236_v43  ;;  %v14594_v4 = vsub.f32 %v5874_v50, %v14579_v37  ;;  %v14596_v24 = vand.u32 4294901760, %v5871_v26  ;;  %6045 = vmatpush2.msra.mxu0 %v14579_v37  ;;  %v5865_v12 = vld [vmem:[#allocation6 + $0x180] sm:$0xff] }
 0x589   :  { %17653 = vst [vmem:[#allocation116_spill] sm:$0xff] %v14585_v61  ;;  %17654 = vst [vmem:[#allocation117_spill] sm:$0xff] %v14587_v31  ;;  %6392 = vmatprep.subr.mxu1 %v6391_v29  ;;  %v6403_v60 = vand.u32 4294901760, %v6402_v15  ;;  %v17241_v49 = vand.u32 4294901760, %v14585_v61  ;;  %v14601_v13 = vsub.f32 %v5872_v19, %v14587_v31  ;;  %v14603_v7 = vand.u32 4294901760, %v5869_v36  ;;  %6047 = vmatprep.subr.mxu0 %v14587_v31 }
 0x58a   :  { %17655 = vst [vmem:[#allocation118_spill] sm:$0xff] %v14594_v4  ;;  %17656 = vst [vmem:[#allocation119_spill] sm:$0xff] %v14596_v24  ;;  %6398 = vmatpush2.msra.mxu1 %v6397_v44  ;;  %v6409_v50 = vand.u32 4294901760, %v6408_v5  ;;  %v17246_v43 = vand.u32 4294901760, %v14594_v4  ;;  %v14608_v23 = vsub.f32 %v5871_v26, %v14596_v24  ;;  %v14610_v37 = vand.u32 4294901760, %v5868_v27  ;;  %6049 = vmatpush2.msra.mxu0 %v14596_v24 }
 0x58b   :  { %17657 = vst [vmem:[#allocation120_spill] sm:$0xff] %v14601_v13  ;;  %17658 = vst [vmem:[#allocation121_spill] sm:$0xff] %v14603_v7  ;;  %6404 = vmatprep.subr.mxu1 %v6403_v60  ;;  %v6414_v19 = vsub.f32 %v14585_v61, %v17241_v49  ;;  %v17249_v15 = vand.u32 4294901760, %v14601_v13  ;;  %v14618_v29 = vsub.f32 %v5869_v36, %v14603_v7  ;;  %v14620_v44 = vand.u32 4294901760, %v5866_v56 }
 0x58c   :  { %17659 = vst [vmem:[#allocation122_spill] sm:$0xff] %v14608_v23  ;;  %17660 = vst [vmem:[#allocation123_spill] sm:$0xff] %v14610_v37  ;;  %6051 = vmatprep.subr.mxu0 %v14603_v7  ;;  %6410 = vmatpush2.msra.mxu1 %v6409_v50  ;;  %v6420_v26 = vsub.f32 %v14594_v4, %v17246_v43  ;;  %v17252_v5 = vand.u32 4294901760, %v14608_v23  ;;  %v14628_v60 = vsub.f32 %v5868_v27, %v14610_v37 }
 0x58d   :  { %17661 = vst [vmem:[#allocation124_spill] sm:$0xff] %v14618_v29  ;;  %17662 = vst [vmem:[#allocation125_spill] sm:$0xff] %v14620_v44  ;;  %v14630_v49 = vand.u32 4294901760, %v5865_v12  ;;  %6053 = vmatpush2.msra.mxu0 %v14610_v37  ;;  %v6415_v36 = vand.u32 4294901760, %v6414_v19  ;;  %v6426_v61 = vsub.f32 %v14601_v13, %v17249_v15  ;;  %v17255_v50 = vand.u32 4294901760, %v14618_v29 }
 0x58e   :  { %17663 = vst [vmem:[#allocation126_spill] sm:$0xff] %v14628_v60  ;;  %v14638_v7 = vsub.f32 %v5866_v56, %v14620_v44  ;;  %6055 = vmatprep.subr.mxu0 %v14620_v44  ;;  %v6421_v43 = vand.u32 4294901760, %v6420_v26  ;;  %v6432_v27 = vsub.f32 %v14608_v23, %v17252_v5  ;;  %v17257_v4 = vand.u32 4294901760, %v14628_v60 }
 0x58f   :  { %17664 = vst [vmem:[#allocation127_spill] sm:$0xff] %v14630_v49  ;;  %v14646_v19 = vsub.f32 %v5865_v12, %v14630_v49  ;;  %6057 = vmatpush2.msra.mxu0 %v14630_v49  ;;  %6416 = vmatprep.subr.mxu1 %v6415_v36  ;;  %v6427_v15 = vand.u32 4294901760, %v6426_v61  ;;  %v6438_v56 = vsub.f32 %v14618_v29, %v17255_v50 }
 0x590   :  { %17665 = vst [vmem:[#allocation128_spill] sm:$0xff] %v14638_v7  ;;  %v17260_v13 = vand.u32 4294901760, %v14638_v7  ;;  %6470 = vmatprep.subr.mxu0 %v14028_v25  ;;  %6422 = vmatpush2.msra.mxu1 %v6421_v43  ;;  %v6433_v26 = vand.u32 4294901760, %v6432_v27  ;;  %v6444_v5 = vsub.f32 %v14628_v60, %v17257_v4 }
 0x591   :  { %17666 = vst [vmem:[#allocation129_spill] sm:$0xff] %v14646_v19  ;;  %v17267_v12 = vand.u32 4294901760, %v14646_v19  ;;  %6428 = vmatprep.subr.mxu1 %v6427_v15  ;;  %v6439_v23 = vand.u32 4294901760, %v6438_v56 }
 0x592   :  { %v6450_v61 = vsub.f32 %v14638_v7, %v17260_v13  ;;  %6434 = vmatpush2.msra.mxu1 %v6433_v26  ;;  %v6445_v36 = vand.u32 4294901760, %v6444_v5 }
 0x593   :  { %v6456_v50 = vsub.f32 %v14646_v19, %v17267_v12  ;;  %6440 = vmatprep.subr.mxu1 %v6439_v23 }
 0x594   :  { %v6451_v43 = vand.u32 4294901760, %v6450_v61  ;;  %6446 = vmatpush2.msra.mxu1 %v6445_v36 }
 0x595   :  { %v6457_v25 = vand.u32 4294901760, %v6456_v50 }
 0x596   :  { %6452 = vmatprep.subr.mxu1 %v6451_v43 }
 0x597   :  { %6458 = vmatpush2.msra.mxu1 %v6457_v25 }
 0x598   :  { %6672 = vmatprep.subr.mxu1 %v14023_v52 }
 0x5a4   :  { %v2304_v27 = vpop.f32.mrf.mxu1 }
 0x5a6   :  { %v11940_v4 = vpop.f32.mrf.mxu1 }
 0x5a8   :  { %v2452_v15 = vpop.f32.mrf.mxu1 }
 0x5aa   :  { %v11950_v56 = vpop.f32.mrf.mxu1 }
 0x5ac   :  { %v2228_v60 = vpop.f32.mrf.mxu0  ;;  %v2598_v13 = vpop.f32.mrf.mxu1 }
 0x5ad   :  { %v2305_v26 = vadd.f32 %v2304_v27, %v2228_v60 }
 0x5ae   :  { %v11935_v5 = vpop.f32.mrf.mxu0  ;;  %v11960_v7 = vpop.f32.mrf.mxu1 }
 0x5b0   :  { %v2378_v29 = vpop.f32.mrf.mxu0  ;;  %v2760_v49 = vpop.f32.mrf.mxu1 }
 0x5b1   :  { %v2379_v12 = vadd.f32 %v2378_v29, %v2305_v26 }
 0x5b2   :  { %v11945_v23 = vpop.f32.mrf.mxu0  ;;  %v11970_v61 = vpop.f32.mrf.mxu1 }
 0x5b3   :  { %v2453_v19 = vadd.f32 %v2452_v15, %v2379_v12 }
 0x5b4   :  { %v2526_v36 = vpop.f32.mrf.mxu0  ;;  %v2908_v50 = vpop.f32.mrf.mxu1 }
 0x5b5   :  { %v2527_v43 = vadd.f32 %v2526_v36, %v2453_v19 }
 0x5b6   :  { %v11955_v4 = vpop.f32.mrf.mxu0  ;;  %v11980_v25 = vpop.f32.mrf.mxu1 }
 0x5b7   :  { %v2599_v44 = vadd.f32 %v2598_v13, %v2527_v43 }
 0x5b8   :  { %v2684_v52 = vpop.f32.mrf.mxu0  ;;  %v3054_v37 = vpop.f32.mrf.mxu1 }
 0x5b9   :  { %v2761_v56 = vadd.f32 %v2760_v49, %v2684_v52 }
 0x5ba   :  { %v11965_v24 = vpop.f32.mrf.mxu0  ;;  %v11990_v31 = vpop.f32.mrf.mxu1 }
 0x5bc   :  { %v2834_v60 = vpop.f32.mrf.mxu0  ;;  %v3216_v27 = vpop.f32.mrf.mxu1 }
 0x5bd   :  { %v2835_v7 = vadd.f32 %v2834_v60, %v2761_v56 }
 0x5be   :  { %v11975_v5 = vpop.f32.mrf.mxu0  ;;  %v12000_v18 = vpop.f32.mrf.mxu1 }
 0x5bf   :  { %v2909_v29 = vadd.f32 %v2908_v50, %v2835_v7 }
 0x5c0   :  { %v2982_v26 = vpop.f32.mrf.mxu0  ;;  %v3364_v23 = vpop.f32.mrf.mxu1 }
 0x5c1   :  { %v2983_v12 = vadd.f32 %v2982_v26, %v2909_v29 }
 0x5c2   :  { %v11985_v15 = vpop.f32.mrf.mxu0  ;;  %v12010_v61 = vpop.f32.mrf.mxu1 }
 0x5c3   :  { %v3055_v19 = vadd.f32 %v3054_v37, %v2983_v12 }
 0x5c4   :  { %v3140_v36 = vpop.f32.mrf.mxu0  ;;  %v3510_v4 = vpop.f32.mrf.mxu1 }
 0x5c5   :  { %v5802_v13 = vrot.slane %v3055_v19, 7  ;;  %v3217_v49 = vadd.f32 %v3216_v27, %v3140_v36 }
 0x5c6   :  { %v11995_v43 = vpop.f32.mrf.mxu0  ;;  %v12020_v25 = vpop.f32.mrf.mxu1 }
 0x5c7   :  { %v5803_v52 = vsel %vm1922_vm1, %v5802_v13, %v2599_v44 }
 0x5c8   :  { %v3290_v31 = vpop.f32.mrf.mxu0  ;;  %v3672_v24 = vpop.f32.mrf.mxu1 }
 0x5c9   :  { %v3291_v56 = vadd.f32 %v3290_v31, %v3217_v49 }
 0x5ca   :  { %v12005_v60 = vpop.f32.mrf.mxu0  ;;  %v12030_v18 = vpop.f32.mrf.mxu1 }
 0x5cb   :  { %v3365_v50 = vadd.f32 %v3364_v23, %v3291_v56 }
 0x5cc   :  { %v3438_v7 = vpop.f32.mrf.mxu0  ;;  %v3820_v5 = vpop.f32.mrf.mxu1 }
 0x5cd   :  { %v3439_v29 = vadd.f32 %v3438_v7, %v3365_v50 }
 0x5ce   :  { %v12015_v26 = vpop.f32.mrf.mxu0  ;;  %v12040_v15 = vpop.f32.mrf.mxu1 }
 0x5cf   :  { %v3511_v37 = vadd.f32 %v3510_v4, %v3439_v29 }
 0x5d0   :  { %v3596_v12 = vpop.f32.mrf.mxu0  ;;  %v14666_v61 = vpop.f32.mrf.mxu1 }
 0x5d1   :  { %v5804_v19 = vrot.slane %v3511_v37, 6 }
 0x5d2   :  { %v12025_v43 = vpop.f32.mrf.mxu0  ;;  %v12050_v25 = vpop.f32.mrf.mxu1 }
 0x5d3   :  { %v14669_v44 = vsel %vm1924_vm2, %v5804_v19, %v5803_v52 }
 0x5d4   :  { %v3746_v27 = vpop.f32.mrf.mxu0  ;;  %v4128_v36 = vpop.f32.mrf.mxu1 }
 0x5d6   :  { %v12035_v13 = vpop.f32.mrf.mxu0  ;;  %v12060_v49 = vpop.f32.mrf.mxu1 }
 0x5d8   :  { %v3894_v23 = vpop.f32.mrf.mxu0  ;;  %v4276_v31 = vpop.f32.mrf.mxu1 }
 0x5da   :  { %v12045_v56 = vpop.f32.mrf.mxu0  ;;  %v12070_v60 = vpop.f32.mrf.mxu1 }
 0x5dc   :  { %v4052_v18 = vpop.f32.mrf.mxu0  ;;  %v4422_v50 = vpop.f32.mrf.mxu1 }
 0x5de   :  { %v12055_v4 = vpop.f32.mrf.mxu0  ;;  %v12080_v7 = vpop.f32.mrf.mxu1 }
 0x5e0   :  { %v4202_v29 = vpop.f32.mrf.mxu0  ;;  %v4584_v26 = vpop.f32.mrf.mxu1 }
 0x5e2   :  { %v12065_v15 = vpop.f32.mrf.mxu0  ;;  %v12090_v37 = vpop.f32.mrf.mxu1 }
 0x5e3   :  { %v3673_v15 = vadd.f32 %v3672_v24, %v3596_v12  ;;  %v4129_v37 = vadd.f32 %v4128_v36, %v4052_v18 }
 0x5e4   :  { %v4350_v43 = vpop.f32.mrf.mxu0  ;;  %v4732_v25 = vpop.f32.mrf.mxu1 }
 0x5e5   :  { %v4203_v0 = vadd.f32 %v4202_v29, %v4129_v37 }
 0x5e6   :  { %v12075_v52 = vpop.f32.mrf.mxu0  ;;  %v12100_v19 = vpop.f32.mrf.mxu1 }
 0x5e7   :  { %v3747_v52 = vadd.f32 %v3746_v27, %v3673_v15  ;;  %v4277_v59 = vadd.f32 %v4276_v31, %v4203_v0 }
 0x5e8   :  { %v4508_v2 = vpop.f32.mrf.mxu0  ;;  %v4878_v20 = vpop.f32.mrf.mxu1 }
 0x5e9   :  { %v4585_v19 = vadd.f32 %v4584_v26, %v4508_v2  ;;  %v3821_v46 = vadd.f32 %v3820_v5, %v3747_v52 }
 0x5ea   :  { %v12085_v13 = vpop.f32.mrf.mxu0  ;;  %v12110_v49 = vpop.f32.mrf.mxu1 }
 0x5ec   :  { %v4658_v38 = vpop.f32.mrf.mxu0  ;;  %v5040_v1 = vpop.f32.mrf.mxu1 }
 0x5ed   :  { %v4659_v28 = vadd.f32 %v4658_v38, %v4585_v19 }
 0x5ee   :  { %v12095_v56 = vpop.f32.mrf.mxu0  ;;  %v12120_v60 = vpop.f32.mrf.mxu1 }
 0x5ef   :  { %v4733_v33 = vadd.f32 %v4732_v25, %v4659_v28  ;;  %v113_v28 = vld [vmem:[%s17012_s0] sm:$0xff] }
 0x5f0   :  { %v4806_v58 = vpop.f32.mrf.mxu0  ;;  %v5188_v63 = vpop.f32.mrf.mxu1  ;;  %v14675_v31 = vand.u32 4294901760, %v113_v28 }
 0x5f1   :  { %v4807_v36 = vadd.f32 %v4806_v58, %v4733_v33 }
 0x5f2   :  { %v12105_v4 = vpop.f32.mrf.mxu0  ;;  %v12130_v7 = vpop.f32.mrf.mxu1  ;;  %17667 = vst [vmem:[#allocation130_spill] sm:$0xff] %v14675_v31  ;;  %v14680_v15 = vsub.f32 %v113_v28, %v14675_v31  ;;  %v17688_v28 = vld [vmem:[#allocation32_spill] sm:$0xff] }
 0x5f4   :  { %v4964_v51 = vpop.f32.mrf.mxu0  ;;  %v5334_v9 = vpop.f32.mrf.mxu1  ;;  %17668 = vst [vmem:[#allocation131_spill] sm:$0xff] %v14680_v15 }
 0x5f5   :  { %v5041_v35 = vadd.f32 %v5040_v1, %v4964_v51 }
 0x5f6   :  { %v12115_v3 = vpop.f32.mrf.mxu0  ;;  %v12140_v41 = vpop.f32.mrf.mxu1 }
 0x5f7   :  { %v3895_v3 = vadd.f32 %v3894_v23, %v3821_v46  ;;  %v4351_v41 = vadd.f32 %v4350_v43, %v4277_v59 }
 0x5f8   :  { %v5114_v13 = vpop.f32.mrf.mxu0  ;;  %v5496_v49 = vpop.f32.mrf.mxu1 }
 0x5f9   :  { %v5115_v17 = vadd.f32 %v5114_v13, %v5041_v35  ;;  %v3967_v38 = vadd.f32 %v14666_v61, %v3895_v3  ;;  %v4423_v29 = vadd.f32 %v4422_v50, %v4351_v41  ;;  %v14687_v13 = vand.u32 4294901760, %v14680_v15  ;;  %v17676_v3 = vld [vmem:[#allocation25_spill] sm:$0xff]  ;;  %v17677_v41 = vld [vmem:[#allocation34_spill] sm:$0xff] }
 0x5fa   :  { %v12125_v56 = vpop.f32.mrf.mxu0  ;;  %v12150_v60 = vpop.f32.mrf.mxu1 }
 0x5fb   :  { %v5189_v10 = vadd.f32 %v5188_v63, %v5115_v17  ;;  %v4879_v63 = vadd.f32 %v4878_v20, %v4807_v36  ;;  %v5806_v59 = vrot.slane %v3967_v38, 5  ;;  %v5808_v33 = vrot.slane %v4423_v29, 4  ;;  %17669 = vst [vmem:[#allocation132_spill] sm:$0xff] %v14687_v13  ;;  %v17680_v36 = vld [vmem:[#allocation27_spill] sm:$0xff]  ;;  %v17684_v38 = vld [vmem:[#allocation29_spill] sm:$0xff]  ;;  %v17686_v29 = vld [vmem:[#allocation30_spill] sm:$0xff] }
 0x5fc   :  { %v5262_v4 = vpop.f32.mrf.mxu0  ;;  %v5644_v7 = vpop.f32.mrf.mxu1  ;;  %v6067_v56 = vsub.f32 %v14680_v15, %v14687_v13 }
 0x5fd   :  { %v5263_v51 = vadd.f32 %v5262_v4, %v5189_v10  ;;  %v5810_v58 = vrot.slane %v4879_v63, 3  ;;  %v5807_v50 = vsel %vm1926_vm3, %v5806_v59, %v14669_v44  ;;  %v17689_v63 = vld [vmem:[#allocation45_spill] sm:$0xff]  ;;  %v17693_v59 = vld [vmem:[#allocation50_spill] sm:$0xff] }
 0x5fe   :  { %v12135_v24 = vpop.f32.mrf.mxu0  ;;  %v12160_v12 = vpop.f32.mrf.mxu1  ;;  %v5809_v20 = vsel %vm1928_vm4, %v5808_v33, %v5807_v50  ;;  %v17695_v33 = vld [vmem:[#allocation51_spill] sm:$0xff]  ;;  %v17701_v50 = vld [vmem:[#allocation57_spill] sm:$0xff] }
 0x5ff   :  { %v5335_v17 = vadd.f32 %v5334_v9, %v5263_v51  ;;  %v5811_v9 = vsel %vm1930_vm5, %v5810_v58, %v5809_v20  ;;  %v17675_v12 = vld [vmem:[#allocation31_spill] sm:$0xff]  ;;  %v17681_v51 = vld [vmem:[#allocation37_spill] sm:$0xff] }
 0x600   :  { %v5420_v27 = vpop.f32.mrf.mxu0  ;;  %v5790_v2 = vpop.f32.mrf.mxu1  ;;  %v17697_v58 = vld [vmem:[#allocation53_spill] sm:$0xff]  ;;  %v17703_v20 = vld [vmem:[#allocation59_spill] sm:$0xff] }
 0x601   :  { %v5497_v35 = vadd.f32 %v5496_v49, %v5420_v27  ;;  %v5812_v61 = vrot.slane %v5335_v17, 2  ;;  %v17678_v27 = vld [vmem:[#allocation26_spill] sm:$0xff]  ;;  %v17691_v17 = vld [vmem:[#allocation47_spill] sm:$0xff] }
 0x602   :  { %v12145_v1 = vpop.f32.mrf.mxu0  ;;  %v12170_v18 = vpop.f32.mrf.mxu1 }
 0x603   :  { %v5813_v52 = vsel %vm1932_vm6, %v5812_v61, %v5811_v9  ;;  %v17682_v1 = vld [vmem:[#allocation28_spill] sm:$0xff]  ;;  %v17683_v18 = vld [vmem:[#allocation39_spill] sm:$0xff] }
 0x604   :  { %v5570_v5 = vpop.f32.mrf.mxu0  ;;  %v17699_v61 = vld [vmem:[#allocation55_spill] sm:$0xff]  ;;  %v17704_v9 = vld [vmem:[#allocation48_spill] sm:$0xff] }
 0x605   :  { %v5571_v0 = vadd.f32 %v5570_v5, %v5497_v35  ;;  %v17685_v35 = vld [vmem:[#allocation41_spill] sm:$0xff]  ;;  %v17687_v5 = vld [vmem:[#allocation43_spill] sm:$0xff] }
 0x606   :  { %v12155_v46 = vpop.f32.mrf.mxu0 }
 0x607   :  { %v5645_v23 = vadd.f32 %v5644_v7, %v5571_v0  ;;  %v14708_v7 = vand.u32 4294901760, %v6067_v56  ;;  %v17690_v0 = vld [vmem:[#allocation33_spill] sm:$0xff]  ;;  %v17692_v46 = vld [vmem:[#allocation36_spill] sm:$0xff] }
 0x608   :  { %v5718_v10 = vpop.f32.mrf.mxu0  ;;  %v17708_v56 = vld [vmem:[#allocation52_spill] sm:$0xff] }
 0x609   :  { %v5719_v26 = vadd.f32 %v5718_v10, %v5645_v23  ;;  %17673 = vst [vmem:[#allocation136_spill] sm:$0xff] %v14708_v7  ;;  %v17694_v23 = vld [vmem:[#allocation38_spill] sm:$0xff]  ;;  %v17696_v10 = vld [vmem:[#allocation40_spill] sm:$0xff] }
 0x60a   :  { %v12165_v43 = vpop.f32.mrf.mxu0 }
 0x60b   :  { %v5791_v25 = vadd.f32 %v5790_v2, %v5719_v26  ;;  %v17679_v2 = vld [vmem:[#allocation35_spill] sm:$0xff]  ;;  %v17698_v26 = vld [vmem:[#allocation42_spill] sm:$0xff]  ;;  %v17700_v43 = vld [vmem:[#allocation44_spill] sm:$0xff] }
 0x60d   :  { %v5814_v37 = vrot.slane %v5791_v25, 1  ;;  %v17702_v25 = vld [vmem:[#allocation46_spill] sm:$0xff] }
 0x60f   :  { %v5815_v19 = vsel %vm1934_vm7, %v5814_v37, %v5813_v52  ;;  %v17705_v37 = vld [vmem:[#allocation61_spill] sm:$0xff] }
 0x610   :  { %v14689_v49 = vand.u32 4294901760, %v5815_v19  ;;  %v17706_v52 = vld [vmem:[#allocation49_spill] sm:$0xff] }
 0x612   :  { %17670 = vst [vmem:[#allocation133_spill] sm:$0xff] %v14689_v49  ;;  %v14692_v44 = vsub.f32 %v5815_v19, %v14689_v49  ;;  %6460 = vmatprep.mubr.f32.mxu1 %v14689_v49  ;;  %v17707_v19 = vld [vmem:[#allocation63_spill] sm:$0xff] }
 0x613   :  { %6462 = vmatmul.mubr.f32.vlgmr.msra.gmra.mxu1 %v14675_v31  ;;  %v17714_v31 = vld [vmem:[#allocation58_spill] sm:$0xff] }
 0x614   :  { %17671 = vst [vmem:[#allocation134_spill] sm:$0xff] %v14692_v44  ;;  %6674 = vmatpush1.msra.mxu1 %v14025_v45  ;;  %v14700_v60 = vand.u32 4294901760, %v14692_v44 }
 0x615   :  { %6676 = vmatprep.subr.mxu1 %v14030_v32 }
 0x616   :  { %17672 = vst [vmem:[#allocation135_spill] sm:$0xff] %v14700_v60  ;;  %6678 = vmatpush1.msra.mxu1 %v14036_v48  ;;  %6802 = vmatprep.mubr.f32.mxu1 %v14700_v60  ;;  %v6061_v4 = vsub.f32 %v14692_v44, %v14700_v60  ;;  %v17712_v60 = vld [vmem:[#allocation56_spill] sm:$0xff] }
 0x617   :  { %6680 = vmatprep.subr.mxu1 %v14043_v6 }
 0x618   :  { %6682 = vmatpush1.msra.mxu1 %v14050_v39  ;;  %v14711_v24 = vand.u32 4294901760, %v6061_v4  ;;  %v17709_v4 = vld [vmem:[#allocation66_spill] sm:$0xff] }
 0x619   :  { %6684 = vmatprep.subr.mxu1 %v14060_v47 }
 0x61a   :  { %17674 = vst [vmem:[#allocation137_spill] sm:$0xff] %v14711_v24  ;;  %6686 = vmatpush1.msra.mxu1 %v14070_v57  ;;  %6063 = vmatprep.mubr.f32.mxu0 %v14711_v24  ;;  %v17713_v24 = vld [vmem:[#allocation69_spill] sm:$0xff] }
 0x61b   :  { %6688 = vmatprep.subr.mxu1 %v14093_v40  ;;  %6069 = vmatmul.mubr.f32.vlgmr.msra.gmra.mxu0 %v14708_v7  ;;  %v17711_v7 = vld [vmem:[#allocation67_spill] sm:$0xff] }
 0x61c   :  { %6473 = vmatpush1.msra.mxu0 %v14034_v16  ;;  %6690 = vmatpush1.msra.mxu1 %v14099_v34 }
 0x61d   :  { %6476 = vmatprep.subr.mxu0 %v14041_v14  ;;  %6662 = vmatprep.mubr.f32.mxu0 %v14692_v44  ;;  %v17710_v44 = vld [vmem:[#allocation54_spill] sm:$0xff] }
 0x61e   :  { %6692 = vmatprep.subr.mxu1 %v14107_v54  ;;  %6479 = vmatpush1.msra.mxu0 %v14048_v11 }
 0x61f   :  { %6694 = vmatpush1.msra.mxu1 %v14116_v62  ;;  %6482 = vmatprep.subr.mxu0 %v14058_v30 }
 0x620   :  { %6696 = vmatprep.subr.mxu1 %v14123_v55  ;;  %6485 = vmatpush1.msra.mxu0 %v14068_v22 }
 0x621   :  { %6698 = vmatpush1.msra.mxu1 %v14130_v21  ;;  %6488 = vmatprep.subr.mxu0 %v14078_v53 }
 0x622   :  { %6700 = vmatprep.subr.mxu1 %v14140_v8  ;;  %6491 = vmatpush1.msra.mxu0 %v14086_v42 }
 0x623   :  { %6702 = vmatpush1.msra.mxu1 %v17675_v12  ;;  %6494 = vmatprep.subr.mxu0 %v17676_v3 }
 0x624   :  { %6704 = vmatprep.subr.mxu1 %v17677_v41  ;;  %6497 = vmatpush1.msra.mxu0 %v17678_v27 }
 0x625   :  { %6706 = vmatpush1.msra.mxu1 %v17679_v2  ;;  %6500 = vmatprep.subr.mxu0 %v17680_v36 }
 0x626   :  { %6708 = vmatprep.subr.mxu1 %v17681_v51  ;;  %6503 = vmatpush1.msra.mxu0 %v17682_v1 }
 0x627   :  { %6710 = vmatpush1.msra.mxu1 %v17683_v18  ;;  %6506 = vmatprep.subr.mxu0 %v17684_v38 }
 0x628   :  { %6712 = vmatprep.subr.mxu1 %v17685_v35  ;;  %6509 = vmatpush1.msra.mxu0 %v17686_v29 }
 0x629   :  { %6714 = vmatpush1.msra.mxu1 %v17687_v5  ;;  %6512 = vmatprep.subr.mxu0 %v17688_v28 }
 0x62a   :  { %6716 = vmatprep.subr.mxu1 %v17689_v63  ;;  %6515 = vmatpush1.msra.mxu0 %v17690_v0 }
 0x62b   :  { %6718 = vmatpush1.msra.mxu1 %v17691_v17  ;;  %6518 = vmatprep.subr.mxu0 %v17692_v46 }
 0x62c   :  { %6720 = vmatprep.subr.mxu1 %v17693_v59  ;;  %6521 = vmatpush1.msra.mxu0 %v17694_v23 }
 0x62d   :  { %6722 = vmatpush1.msra.mxu1 %v17695_v33  ;;  %6524 = vmatprep.subr.mxu0 %v17696_v10 }
 0x62e   :  { %6724 = vmatprep.subr.mxu1 %v17697_v58  ;;  %6527 = vmatpush1.msra.mxu0 %v17698_v26 }
 0x62f   :  { %6726 = vmatpush1.msra.mxu1 %v17699_v61  ;;  %6530 = vmatprep.subr.mxu0 %v17700_v43 }
 0x630   :  { %6728 = vmatprep.subr.mxu1 %v17701_v50  ;;  %6533 = vmatpush1.msra.mxu0 %v17702_v25 }
 0x631   :  { %6730 = vmatpush1.msra.mxu1 %v17703_v20  ;;  %6536 = vmatprep.subr.mxu0 %v17704_v9  ;;  %v17715_v9 = vld [vmem:[#allocation71_spill] sm:$0xff] }
 0x632   :  { %6732 = vmatprep.subr.mxu1 %v17705_v37  ;;  %6539 = vmatpush1.msra.mxu0 %v17706_v52  ;;  %v17716_v37 = vld [vmem:[#allocation60_spill] sm:$0xff]  ;;  %v17717_v52 = vld [vmem:[#allocation73_spill] sm:$0xff] }
 0x633   :  { %6734 = vmatpush1.msra.mxu1 %v17707_v19  ;;  %6542 = vmatprep.subr.mxu0 %v17708_v56  ;;  %v17718_v19 = vld [vmem:[#allocation62_spill] sm:$0xff]  ;;  %v17719_v56 = vld [vmem:[#allocation75_spill] sm:$0xff] }
 0x634   :  { %6736 = vmatprep.subr.mxu1 %v17709_v4  ;;  %6545 = vmatpush1.msra.mxu0 %v17710_v44  ;;  %v17720_v4 = vld [vmem:[#allocation64_spill] sm:$0xff]  ;;  %v17721_v44 = vld [vmem:[#allocation77_spill] sm:$0xff] }
 0x635   :  { %6738 = vmatpush2.msra.mxu1 %v17711_v7  ;;  %6548 = vmatprep.subr.mxu0 %v17712_v60  ;;  %v17722_v7 = vld [vmem:[#allocation65_spill] sm:$0xff]  ;;  %v17723_v60 = vld [vmem:[#allocation79_spill] sm:$0xff] }
 0x636   :  { %6740 = vmatprep.subr.mxu1 %v17713_v24  ;;  %6551 = vmatpush1.msra.mxu0 %v17714_v31  ;;  %v17724_v24 = vld [vmem:[#allocation68_spill] sm:$0xff]  ;;  %v17725_v31 = vld [vmem:[#allocation82_spill] sm:$0xff] }
 0x637   :  { %6742 = vmatpush2.msra.mxu1 %v17715_v9  ;;  %6554 = vmatprep.subr.mxu0 %v17716_v37  ;;  %v17726_v9 = vld [vmem:[#allocation70_spill] sm:$0xff]  ;;  %v17727_v37 = vld [vmem:[#allocation83_spill] sm:$0xff] }
 0x638   :  { %6744 = vmatprep.subr.mxu1 %v17717_v52  ;;  %6557 = vmatpush1.msra.mxu0 %v17718_v19  ;;  %v17728_v52 = vld [vmem:[#allocation72_spill] sm:$0xff]  ;;  %v17729_v19 = vld [vmem:[#allocation85_spill] sm:$0xff] }
 0x639   :  { %6746 = vmatpush2.msra.mxu1 %v17719_v56  ;;  %6560 = vmatprep.subr.mxu0 %v17720_v4  ;;  %v17730_v56 = vld [vmem:[#allocation74_spill] sm:$0xff]  ;;  %v17731_v4 = vld [vmem:[#allocation87_spill] sm:$0xff] }
 0x63a   :  { %6748 = vmatprep.subr.mxu1 %v17721_v44  ;;  %6563 = vmatpush1.msra.mxu0 %v17722_v7  ;;  %v17732_v44 = vld [vmem:[#allocation76_spill] sm:$0xff]  ;;  %v17733_v7 = vld [vmem:[#allocation89_spill] sm:$0xff] }
 0x63b   :  { %6750 = vmatpush2.msra.mxu1 %v17723_v60  ;;  %6566 = vmatprep.subr.mxu0 %v17724_v24  ;;  %v17734_v60 = vld [vmem:[#allocation78_spill] sm:$0xff]  ;;  %v17735_v24 = vld [vmem:[#allocation91_spill] sm:$0xff] }
 0x63c   :  { %6752 = vmatprep.subr.mxu1 %v17725_v31  ;;  %6569 = vmatpush2.msra.mxu0 %v17726_v9  ;;  %v17736_v31 = vld [vmem:[#allocation80_spill] sm:$0xff]  ;;  %v17737_v9 = vld [vmem:[#allocation93_spill] sm:$0xff] }
 0x63d   :  { %6754 = vmatpush2.msra.mxu1 %v17727_v37  ;;  %6572 = vmatprep.subr.mxu0 %v17728_v52  ;;  %v17738_v37 = vld [vmem:[#allocation81_spill] sm:$0xff]  ;;  %v17739_v52 = vld [vmem:[#allocation95_spill] sm:$0xff] }
 0x63e   :  { %6756 = vmatprep.subr.mxu1 %v17729_v19  ;;  %6575 = vmatpush2.msra.mxu0 %v17730_v56  ;;  %v17740_v19 = vld [vmem:[#allocation84_spill] sm:$0xff]  ;;  %v17741_v56 = vld [vmem:[#allocation98_spill] sm:$0xff] }
 0x63f   :  { %6758 = vmatpush2.msra.mxu1 %v17731_v4  ;;  %6578 = vmatprep.subr.mxu0 %v17732_v44  ;;  %v17742_v4 = vld [vmem:[#allocation86_spill] sm:$0xff]  ;;  %v17743_v44 = vld [vmem:[#allocation99_spill] sm:$0xff] }
 0x640   :  { %6760 = vmatprep.subr.mxu1 %v17733_v7  ;;  %6581 = vmatpush2.msra.mxu0 %v17734_v60  ;;  %v17744_v7 = vld [vmem:[#allocation88_spill] sm:$0xff]  ;;  %v17745_v60 = vld [vmem:[#allocation101_spill] sm:$0xff] }
 0x641   :  { %6762 = vmatpush2.msra.mxu1 %v17735_v24  ;;  %6584 = vmatprep.subr.mxu0 %v17736_v31  ;;  %v17746_v24 = vld [vmem:[#allocation90_spill] sm:$0xff]  ;;  %v17747_v31 = vld [vmem:[#allocation103_spill] sm:$0xff] }
 0x642   :  { %6764 = vmatprep.subr.mxu1 %v17737_v9  ;;  %6587 = vmatpush2.msra.mxu0 %v17738_v37  ;;  %v17748_v9 = vld [vmem:[#allocation92_spill] sm:$0xff]  ;;  %v17749_v37 = vld [vmem:[#allocation105_spill] sm:$0xff] }
 0x643   :  { %6766 = vmatpush2.msra.mxu1 %v17739_v52  ;;  %6590 = vmatprep.subr.mxu0 %v17740_v19  ;;  %v17750_v52 = vld [vmem:[#allocation94_spill] sm:$0xff]  ;;  %v17751_v19 = vld [vmem:[#allocation107_spill] sm:$0xff] }
 0x644   :  { %6768 = vmatprep.subr.mxu1 %v17741_v56  ;;  %6593 = vmatpush2.msra.mxu0 %v17742_v4  ;;  %v17752_v56 = vld [vmem:[#allocation96_spill] sm:$0xff]  ;;  %v17753_v4 = vld [vmem:[#allocation109_spill] sm:$0xff] }
 0x645   :  { %6770 = vmatpush2.msra.mxu1 %v17743_v44  ;;  %6596 = vmatprep.subr.mxu0 %v17744_v7  ;;  %v17754_v44 = vld [vmem:[#allocation97_spill] sm:$0xff]  ;;  %v17755_v7 = vld [vmem:[#allocation111_spill] sm:$0xff] }
 0x646   :  { %6772 = vmatprep.subr.mxu1 %v17745_v60  ;;  %6599 = vmatpush2.msra.mxu0 %v17746_v24  ;;  %v17756_v60 = vld [vmem:[#allocation100_spill] sm:$0xff]  ;;  %v17757_v24 = vld [vmem:[#allocation114_spill] sm:$0xff] }
 0x647   :  { %6774 = vmatpush2.msra.mxu1 %v17747_v31  ;;  %6602 = vmatprep.subr.mxu0 %v17748_v9  ;;  %v17758_v31 = vld [vmem:[#allocation102_spill] sm:$0xff]  ;;  %v17759_v9 = vld [vmem:[#allocation115_spill] sm:$0xff] }
 0x648   :  { %6776 = vmatprep.subr.mxu1 %v17749_v37  ;;  %6605 = vmatpush2.msra.mxu0 %v17750_v52  ;;  %v17760_v37 = vld [vmem:[#allocation104_spill] sm:$0xff]  ;;  %v17761_v52 = vld [vmem:[#allocation117_spill] sm:$0xff] }
 0x649   :  { %6778 = vmatpush2.msra.mxu1 %v17751_v19  ;;  %6608 = vmatprep.subr.mxu0 %v17752_v56  ;;  %v17762_v19 = vld [vmem:[#allocation106_spill] sm:$0xff]  ;;  %v17763_v56 = vld [vmem:[#allocation119_spill] sm:$0xff] }
 0x64a   :  { %6780 = vmatprep.subr.mxu1 %v17753_v4  ;;  %6611 = vmatpush2.msra.mxu0 %v17754_v44  ;;  %v17764_v4 = vld [vmem:[#allocation108_spill] sm:$0xff]  ;;  %v17765_v44 = vld [vmem:[#allocation121_spill] sm:$0xff] }
 0x64b   :  { %6782 = vmatpush2.msra.mxu1 %v17755_v7  ;;  %6614 = vmatprep.subr.mxu0 %v17756_v60  ;;  %v17766_v7 = vld [vmem:[#allocation110_spill] sm:$0xff]  ;;  %v17767_v60 = vld [vmem:[#allocation123_spill] sm:$0xff] }
 0x64c   :  { %6784 = vmatprep.subr.mxu1 %v17757_v24  ;;  %6617 = vmatpush2.msra.mxu0 %v17758_v31  ;;  %v17768_v24 = vld [vmem:[#allocation112_spill] sm:$0xff]  ;;  %v17769_v31 = vld [vmem:[#allocation125_spill] sm:$0xff] }
 0x64d   :  { %6786 = vmatpush2.msra.mxu1 %v17759_v9  ;;  %6620 = vmatprep.subr.mxu0 %v17760_v37  ;;  %v17770_v9 = vld [vmem:[#allocation113_spill] sm:$0xff]  ;;  %v17771_v37 = vld [vmem:[#allocation127_spill] sm:$0xff] }
 0x64e   :  { %6788 = vmatprep.subr.mxu1 %v17761_v52  ;;  %6623 = vmatpush2.msra.mxu0 %v17762_v19  ;;  %v17772_v52 = vld [vmem:[#allocation116_spill] sm:$0xff] }
 0x64f   :  { %6790 = vmatpush2.msra.mxu1 %v17763_v56  ;;  %6626 = vmatprep.subr.mxu0 %v17764_v4  ;;  %v17773_v56 = vld [vmem:[#allocation23_spill] sm:$0xff]  ;;  %v17774_v4 = vld [vmem:[#allocation118_spill] sm:$0xff] }
 0x650   :  { %6792 = vmatprep.subr.mxu1 %v17765_v44  ;;  %6629 = vmatpush2.msra.mxu0 %v17766_v7 }
 0x651   :  { %6794 = vmatpush2.msra.mxu1 %v17767_v60  ;;  %6632 = vmatprep.subr.mxu0 %v17768_v24  ;;  %v17775_v60 = vld [vmem:[#allocation120_spill] sm:$0xff] }
 0x652   :  { %6796 = vmatprep.subr.mxu1 %v17769_v31  ;;  %6635 = vmatpush2.msra.mxu0 %v17770_v9  ;;  %v17776_v31 = vld [vmem:[#allocation122_spill] sm:$0xff] }
 0x653   :  { %6798 = vmatpush2.msra.mxu1 %v17771_v37  ;;  %6638 = vmatprep.subr.mxu0 %v17772_v52  ;;  %v17777_v37 = vld [vmem:[#allocation124_spill] sm:$0xff] }
 0x654   :  { %6806 = vmatmul.mubr.f32.vlgmr.msra.gmra.mxu1 %v14687_v13  ;;  %7078 = vmatprep.subr.mxu1 %v17773_v56  ;;  %v17778_v13 = vld [vmem:[#allocation126_spill] sm:$0xff]  ;;  %v17779_v56 = vld [vmem:[#allocation128_spill] sm:$0xff] }
 0x655   :  { %6641 = vmatpush2.msra.mxu0 %v17774_v4  ;;  %7080 = vmatpush1.msra.mxu1 %v14025_v45  ;;  %v17780_v45 = vld [vmem:[#allocation129_spill] sm:$0xff] }
 0x656   :  { %7206 = vmatprep.mubr.f32.mxu1 %v14689_v49  ;;  %6644 = vmatprep.subr.mxu0 %v17775_v60 }
 0x657   :  { %7082 = vmatprep.subr.mxu1 %v14030_v32  ;;  %6647 = vmatpush2.msra.mxu0 %v17776_v31  ;;  %v17781_v32 = vld [vmem:[#allocation24_spill] sm:$0xff] }
 0x658   :  { %7084 = vmatpush1.msra.mxu1 %v14036_v48  ;;  %6650 = vmatprep.subr.mxu0 %v17777_v37  ;;  %v17782_v48 = vand.u32 4294901760, %v17781_v32  ;;  %v17830_v32 = vld [vmem:[#allocation77_spill] sm:$0xff] }
 0x659   :  { %7086 = vmatprep.subr.mxu1 %v14043_v6  ;;  %6653 = vmatpush2.msra.mxu0 %v17778_v13  ;;  %v17783_v6 = vand.u32 4294901760, %v14034_v16  ;;  %v17787_v16 = vand.u32 4294901760, %v14068_v22  ;;  %v17791_v22 = vand.u32 4294901760, %v17678_v27  ;;  %v17804_v27 = vld [vmem:[#allocation48_spill] sm:$0xff] }
 0x65a   :  { %7088 = vmatpush1.msra.mxu1 %v14050_v39  ;;  %6656 = vmatprep.subr.mxu0 %v17779_v56  ;;  %v17784_v39 = vand.u32 4294901760, %v14041_v14  ;;  %v17788_v14 = vand.u32 4294901760, %v14078_v53  ;;  %v17792_v53 = vand.u32 4294901760, %v17680_v36  ;;  %v17806_v36 = vld [vmem:[#allocation61_spill] sm:$0xff] }
 0x65b   :  { %7090 = vmatprep.subr.mxu1 %v14060_v47  ;;  %6659 = vmatpush2.msra.mxu0 %v17780_v45  ;;  %v17785_v47 = vand.u32 4294901760, %v14048_v11  ;;  %v17789_v11 = vand.u32 4294901760, %v14086_v42  ;;  %v17793_v42 = vand.u32 4294901760, %v17682_v1 }
 0x65c   :  { %7092 = vmatpush1.msra.mxu1 %v14070_v57  ;;  %6665 = vmatmul.mubr.f32.vlgmr.msra.gmra.mxu0 %v14680_v15  ;;  %v17786_v57 = vand.u32 4294901760, %v14058_v30  ;;  %v17790_v30 = vand.u32 4294901760, %v17676_v3  ;;  %v17802_v3 = vand.u32 4294901760, %v17700_v43  ;;  %v17914_v15 = vand.u32 4294901760, %v17772_v52 }
 0x65d   :  { %6815 = vmatprep.subr.mxu0 %v17782_v48  ;;  %7094 = vmatprep.subr.mxu1 %v14093_v40  ;;  %v17794_v40 = vand.u32 4294901760, %v17684_v38  ;;  %v17810_v38 = vld [vmem:[#allocation52_spill] sm:$0xff]  ;;  %v17831_v48 = vld [vmem:[#allocation65_spill] sm:$0xff] }
 0x65e   :  { %6819 = vmatpush1.msra.mxu0 %v17783_v6  ;;  %7069 = vmatprep.mubr.f32.mxu0 %v14689_v49  ;;  %v17832_v6 = vand.u32 4294901760, %v17831_v48 }
 0x65f   :  { %7096 = vmatpush1.msra.mxu1 %v14099_v34  ;;  %6823 = vmatprep.subr.mxu0 %v17784_v39  ;;  %v17795_v34 = vand.u32 4294901760, %v17686_v29  ;;  %v17812_v29 = vld [vmem:[#allocation66_spill] sm:$0xff] }
 0x660   :  { %7098 = vmatprep.subr.mxu1 %v14107_v54  ;;  %6827 = vmatpush1.msra.mxu0 %v17785_v47  ;;  %v17796_v54 = vand.u32 4294901760, %v17688_v28  ;;  %v5912_v39 = vld [vmem:[#allocation6 + $0x2f8] sm:$0xff] }
 0x661   :  { %7100 = vmatpush1.msra.mxu1 %v14116_v62  ;;  %6831 = vmatprep.subr.mxu0 %v17786_v57  ;;  %v17797_v62 = vand.u32 4294901760, %v17690_v0  ;;  %v17816_v0 = vld [vmem:[#allocation56_spill] sm:$0xff]  ;;  %v17833_v47 = vld [vmem:[#allocation79_spill] sm:$0xff] }
 0x662   :  { %7102 = vmatprep.subr.mxu1 %v14123_v55  ;;  %6835 = vmatpush1.msra.mxu0 %v17787_v16  ;;  %v17798_v55 = vand.u32 4294901760, %v17692_v46  ;;  %v17818_v46 = vld [vmem:[#allocation69_spill] sm:$0xff]  ;;  %v17834_v57 = vld [vmem:[#allocation68_spill] sm:$0xff] }
 0x663   :  { %7104 = vmatpush1.msra.mxu1 %v14130_v21  ;;  %6839 = vmatprep.subr.mxu0 %v17788_v14  ;;  %v17799_v21 = vand.u32 4294901760, %v17694_v23  ;;  %v17835_v16 = vand.u32 4294901760, %v17834_v57  ;;  %v5864_v14 = vld [vmem:[#allocation6 + $0x178] sm:$0xff]  ;;  %v17865_v57 = vld [vmem:[#allocation88_spill] sm:$0xff] }
 0x664   :  { %7106 = vmatprep.subr.mxu1 %v14140_v8  ;;  %6843 = vmatpush1.msra.mxu0 %v17789_v11  ;;  %v17800_v8 = vand.u32 4294901760, %v17696_v10  ;;  %v17822_v10 = vld [vmem:[#allocation60_spill] sm:$0xff]  ;;  %v17836_v11 = vld [vmem:[#allocation82_spill] sm:$0xff] }
 0x665   :  { %7108 = vmatpush1.msra.mxu1 %v17675_v12  ;;  %6847 = vmatprep.subr.mxu0 %v17790_v30  ;;  %v17801_v12 = vand.u32 4294901760, %v17698_v26  ;;  %v17824_v26 = vld [vmem:[#allocation73_spill] sm:$0xff]  ;;  %v17837_v30 = vld [vmem:[#allocation70_spill] sm:$0xff] }
 0x666   :  { %7110 = vmatprep.subr.mxu1 %v17677_v41  ;;  %6851 = vmatpush1.msra.mxu0 %v17791_v22  ;;  %v17803_v41 = vand.u32 4294901760, %v17702_v25  ;;  %v17828_v25 = vld [vmem:[#allocation64_spill] sm:$0xff]  ;;  %v17838_v22 = vand.u32 4294901760, %v17837_v30 }
 0x667   :  { %7112 = vmatpush1.msra.mxu1 %v17679_v2  ;;  %6855 = vmatprep.subr.mxu0 %v17792_v53  ;;  %v17805_v2 = vand.u32 4294901760, %v17804_v27  ;;  %v17839_v53 = vld [vmem:[#allocation83_spill] sm:$0xff] }
 0x668   :  { %7114 = vmatprep.subr.mxu1 %v17681_v51  ;;  %6859 = vmatpush1.msra.mxu0 %v17793_v42  ;;  %v17807_v51 = vld [vmem:[#allocation49_spill] sm:$0xff]  ;;  %v17840_v42 = vld [vmem:[#allocation72_spill] sm:$0xff] }
 0x669   :  { %7116 = vmatpush1.msra.mxu1 %v17683_v18  ;;  %6863 = vmatprep.subr.mxu0 %v17794_v40  ;;  %v17808_v1 = vand.u32 4294901760, %v17807_v51  ;;  %v17809_v18 = vld [vmem:[#allocation63_spill] sm:$0xff]  ;;  %v17841_v40 = vand.u32 4294901760, %v17840_v42  ;;  %v17849_v51 = vld [vmem:[#allocation78_spill] sm:$0xff] }
 0x66a   :  { %7118 = vmatprep.subr.mxu1 %v17685_v35  ;;  %6867 = vmatpush1.msra.mxu0 %v17795_v34  ;;  %v17811_v35 = vand.u32 4294901760, %v17810_v38  ;;  %v14953_v34 = vand.u32 4294901760, %v5912_v39  ;;  %v5858_v38 = vld [vmem:[#allocation6 + $0x148] sm:$0xff]  ;;  %v17869_v42 = vld [vmem:[#allocation90_spill] sm:$0xff] }
 0x66b   :  { %7120 = vmatpush1.msra.mxu1 %v17687_v5  ;;  %6871 = vmatprep.subr.mxu0 %v17796_v54  ;;  %v17813_v5 = vld [vmem:[#allocation54_spill] sm:$0xff]  ;;  %v5909_v54 = vld [vmem:[#allocation6 + $0x2e0] sm:$0xff] }
 0x66c   :  { %7122 = vmatprep.subr.mxu1 %v17689_v63  ;;  %6875 = vmatpush1.msra.mxu0 %v17797_v62  ;;  %v17814_v28 = vand.u32 4294901760, %v17813_v5  ;;  %v17815_v63 = vld [vmem:[#allocation67_spill] sm:$0xff]  ;;  %v17842_v62 = vld [vmem:[#allocation85_spill] sm:$0xff] }
 0x66d   :  { %7124 = vmatpush1.msra.mxu1 %v17691_v17  ;;  %6879 = vmatprep.subr.mxu0 %v17798_v55  ;;  %v17817_v17 = vand.u32 4294901760, %v17816_v0  ;;  %v17843_v55 = vld [vmem:[#allocation74_spill] sm:$0xff] }
 0x66e   :  { %7126 = vmatprep.subr.mxu1 %v17693_v59  ;;  %6883 = vmatpush1.msra.mxu0 %v17799_v21  ;;  %v17819_v59 = vld [vmem:[#allocation58_spill] sm:$0xff]  ;;  %v17844_v21 = vand.u32 4294901760, %v17843_v55 }
 0x66f   :  { %7128 = vmatpush1.msra.mxu1 %v17695_v33  ;;  %6887 = vmatprep.subr.mxu0 %v17800_v8  ;;  %v17820_v23 = vand.u32 4294901760, %v17819_v59  ;;  %v17821_v33 = vld [vmem:[#allocation71_spill] sm:$0xff]  ;;  %v14958_v8 = vand.u32 4294901760, %v5864_v14  ;;  %v5903_v0 = vld [vmem:[#allocation6 + $0x2b0] sm:$0xff] }
 0x670   :  { %7130 = vmatprep.subr.mxu1 %v17697_v58  ;;  %6891 = vmatpush1.msra.mxu0 %v17801_v12  ;;  %v17823_v58 = vand.u32 4294901760, %v17822_v10  ;;  %v5861_v12 = vld [vmem:[#allocation6 + $0x160] sm:$0xff]  ;;  %v5855_v10 = vld [vmem:[#allocation6 + $0x130] sm:$0xff] }
 0x671   :  { %7132 = vmatpush1.msra.mxu1 %v17699_v61  ;;  %6895 = vmatprep.subr.mxu0 %v17802_v3  ;;  %v17825_v61 = vld [vmem:[#allocation62_spill] sm:$0xff]  ;;  %v17845_v3 = vld [vmem:[#allocation87_spill] sm:$0xff]  ;;  %v15004_v30 = vand.u32 4294901760, %v5855_v10 }
 0x672   :  { %7134 = vmatprep.subr.mxu1 %v17701_v50  ;;  %6899 = vmatpush1.msra.mxu0 %v17803_v41  ;;  %v17826_v43 = vand.u32 4294901760, %v17825_v61  ;;  %v17827_v50 = vld [vmem:[#allocation75_spill] sm:$0xff]  ;;  %v17846_v41 = vld [vmem:[#allocation76_spill] sm:$0xff] }
 0x673   :  { %7136 = vmatpush1.msra.mxu1 %v17703_v20  ;;  %6903 = vmatprep.subr.mxu0 %v17805_v2  ;;  %v17829_v20 = vand.u32 4294901760, %v17828_v25  ;;  %v17847_v27 = vand.u32 4294901760, %v17846_v41  ;;  %v5906_v2 = vld [vmem:[#allocation6 + $0x2c8] sm:$0xff]  ;;  %v17860_v25 = vld [vmem:[#allocation98_spill] sm:$0xff] }
 0x674   :  { %7138 = vmatprep.subr.mxu1 %v17806_v36  ;;  %6907 = vmatpush1.msra.mxu0 %v17808_v1  ;;  %v17848_v36 = vld [vmem:[#allocation89_spill] sm:$0xff]  ;;  %v17850_v1 = vand.u32 4294901760, %v17849_v51 }
 0x675   :  { %7140 = vmatpush1.msra.mxu1 %v17809_v18  ;;  %6911 = vmatprep.subr.mxu0 %v17811_v35  ;;  %v14966_v18 = vand.u32 4294901760, %v5909_v54  ;;  %v17851_v35 = vld [vmem:[#allocation91_spill] sm:$0xff]  ;;  %v5894_v51 = vld [vmem:[#allocation6 + $0x268] sm:$0xff] }
 0x676   :  { %7142 = vmatprep.subr.mxu1 %v17812_v29  ;;  %6915 = vmatpush1.msra.mxu0 %v17814_v28  ;;  %v17852_v29 = vld [vmem:[#allocation80_spill] sm:$0xff]  ;;  %v14972_v28 = vsub.f32 %v5912_v39, %v14953_v34  ;;  %v5852_v39 = vld [vmem:[#allocation6 + $0x118] sm:$0xff] }
 0x677   :  { %7144 = vmatpush2.msra.mxu1 %v17815_v63  ;;  %6919 = vmatprep.subr.mxu0 %v17817_v17  ;;  %v17853_v5 = vand.u32 4294901760, %v17852_v29  ;;  %v14974_v63 = vand.u32 4294901760, %v5861_v12  ;;  %v17854_v17 = vld [vmem:[#allocation93_spill] sm:$0xff]  ;;  %v14993_v48 = vsub.f32 %v5909_v54, %v14966_v18 }
 0x678   :  { %7146 = vmatprep.subr.mxu1 %v17818_v46  ;;  %6923 = vmatpush1.msra.mxu0 %v17820_v23  ;;  %v17855_v46 = vld [vmem:[#allocation81_spill] sm:$0xff]  ;;  %v14980_v23 = vsub.f32 %v5864_v14, %v14958_v8  ;;  %v17332_v14 = vand.u32 4294901760, %v14972_v28 }
 0x679   :  { %7148 = vmatpush2.msra.mxu1 %v17821_v33  ;;  %6927 = vmatprep.subr.mxu0 %v17823_v58  ;;  %v17856_v59 = vand.u32 4294901760, %v17855_v46  ;;  %v14982_v33 = vand.u32 4294901760, %v5906_v2  ;;  %v17857_v58 = vld [vmem:[#allocation95_spill] sm:$0xff]  ;;  %17863 = vst [vmem:[#allocation31_spill] sm:$0xff] %v14993_v48  ;;  %v5846_v46 = vld [vmem:[#allocation6 + $0xe8] sm:$0xff] }
 0x67a   :  { %7150 = vmatprep.subr.mxu1 %v17824_v26  ;;  %6931 = vmatpush1.msra.mxu0 %v17826_v43  ;;  %v17858_v26 = vld [vmem:[#allocation84_spill] sm:$0xff]  ;;  %v14987_v43 = vand.u32 4294901760, %v5858_v38  ;;  %v17329_v54 = vand.u32 4294901760, %v14980_v23 }
 0x67b   :  { %7152 = vmatpush2.msra.mxu1 %v17827_v50  ;;  %6935 = vmatprep.subr.mxu0 %v17829_v20  ;;  %v17859_v61 = vand.u32 4294901760, %v17858_v26  ;;  %v5900_v50 = vld [vmem:[#allocation6 + $0x298] sm:$0xff]  ;;  %v15038_v26 = vsub.f32 %v14972_v28, %v17332_v14 }
 0x67c   :  { %7154 = vmatprep.subr.mxu1 %v17830_v32  ;;  %6939 = vmatpush1.msra.mxu0 %v17832_v6  ;;  %v17861_v20 = vld [vmem:[#allocation86_spill] sm:$0xff]  ;;  %v14995_v6 = vand.u32 4294901760, %v5903_v0  ;;  %v15013_v55 = vand.u32 4294901760, %v5900_v50  ;;  %v17909_v14 = vld [vmem:[#allocation123_spill] sm:$0xff] }
 0x67d   :  { %7156 = vmatpush2.msra.mxu1 %v17833_v47  ;;  %6943 = vmatprep.subr.mxu0 %v17835_v16  ;;  %v17862_v32 = vand.u32 4294901760, %v17861_v20  ;;  %v17864_v47 = vld [vmem:[#allocation99_spill] sm:$0xff]  ;;  %v17866_v16 = vand.u32 4294901760, %v17865_v57  ;;  %v5891_v20 = vld [vmem:[#allocation6 + $0x250] sm:$0xff] }
 0x67e   :  { %7158 = vmatprep.subr.mxu1 %v17836_v11  ;;  %6947 = vmatpush2.msra.mxu0 %v17838_v22  ;;  %v15002_v11 = vsub.f32 %v5861_v12, %v14974_v63  ;;  %v5897_v22 = vld [vmem:[#allocation6 + $0x280] sm:$0xff] }
 0x67f   :  { %7160 = vmatpush2.msra.mxu1 %v17839_v53  ;;  %6951 = vmatprep.subr.mxu0 %v17841_v40  ;;  %v17868_v53 = vld [vmem:[#allocation101_spill] sm:$0xff]  ;;  %v17870_v40 = vand.u32 4294901760, %v17869_v42  ;;  %v17873_v12 = vld [vmem:[#allocation92_spill] sm:$0xff]  ;;  %v15056_v42 = vsub.f32 %v5900_v50, %v15013_v55 }
 0x680   :  { %7162 = vmatprep.subr.mxu1 %v17842_v62  ;;  %6955 = vmatpush2.msra.mxu0 %v17844_v21  ;;  %17867 = vst [vmem:[#allocation25_spill] sm:$0xff] %v15002_v11  ;;  %v15011_v62 = vsub.f32 %v5906_v2, %v14982_v33  ;;  %v5849_v21 = vld [vmem:[#allocation6 + $0x100] sm:$0xff]  ;;  %v17874_v41 = vand.u32 4294901760, %v17873_v12  ;;  %v17327_v2 = vand.u32 4294901760, %v14993_v48 }
 0x681   :  { %7164 = vmatpush2.msra.mxu1 %v17845_v3  ;;  %6959 = vmatprep.subr.mxu0 %v17847_v27  ;;  %v17872_v3 = vld [vmem:[#allocation103_spill] sm:$0xff]  ;;  %v15019_v27 = vsub.f32 %v5858_v38, %v14987_v43  ;;  %v17881_v38 = vld [vmem:[#allocation96_spill] sm:$0xff]  ;;  %17887 = vst [vmem:[#allocation37_spill] sm:$0xff] %v15056_v42 }
 0x682   :  { %7166 = vmatprep.subr.mxu1 %v17848_v36  ;;  %6963 = vmatpush2.msra.mxu0 %v17850_v1  ;;  %17871 = vst [vmem:[#allocation34_spill] sm:$0xff] %v15011_v62  ;;  %v15021_v36 = vand.u32 4294901760, %v5852_v39  ;;  %v17876_v1 = vld [vmem:[#allocation105_spill] sm:$0xff]  ;;  %v15075_v50 = vsub.f32 %v14993_v48, %v17327_v2  ;;  %v17901_v2 = vand.u32 4294901760, %v17762_v19 }
 0x683   :  { %7168 = vmatpush2.msra.mxu1 %v17851_v35  ;;  %6967 = vmatprep.subr.mxu0 %v17853_v5  ;;  %17875 = vst [vmem:[#allocation26_spill] sm:$0xff] %v15019_v27  ;;  %v17877_v35 = vld [vmem:[#allocation94_spill] sm:$0xff]  ;;  %v15028_v5 = vsub.f32 %v5903_v0, %v14995_v6  ;;  %v15044_v0 = vand.u32 4294901760, %v5849_v21 }
 0x684   :  { %7170 = vmatprep.subr.mxu1 %v17854_v17  ;;  %6971 = vmatpush2.msra.mxu0 %v17856_v59  ;;  %v17878_v29 = vand.u32 4294901760, %v17877_v35  ;;  %v15030_v17 = vand.u32 4294901760, %v5897_v22  ;;  %v17880_v59 = vld [vmem:[#allocation107_spill] sm:$0xff]  ;;  %v15067_v35 = vand.u32 4294901760, %v5846_v46 }
 0x685   :  { %7172 = vmatpush2.msra.mxu1 %v17857_v58  ;;  %6975 = vmatprep.subr.mxu0 %v17859_v61  ;;  %17879 = vst [vmem:[#allocation35_spill] sm:$0xff] %v15028_v5  ;;  %v17882_v58 = vand.u32 4294901760, %v17881_v38  ;;  %v17328_v61 = vand.u32 4294901760, %v15002_v11 }
 0x686   :  { %7174 = vmatprep.subr.mxu1 %v17860_v25  ;;  %6979 = vmatpush2.msra.mxu0 %v17862_v32  ;;  %v15042_v25 = vsub.f32 %v5855_v10, %v15004_v30  ;;  %v17884_v32 = vld [vmem:[#allocation109_spill] sm:$0xff]  ;;  %v15058_v10 = vand.u32 4294901760, %v5894_v51 }
 0x687   :  { %7176 = vmatpush2.msra.mxu1 %v17864_v47  ;;  %6983 = vmatprep.subr.mxu0 %v17866_v16  ;;  %v17885_v47 = vld [vmem:[#allocation97_spill] sm:$0xff]  ;;  %v15052_v16 = vsub.f32 %v14980_v23, %v17329_v54  ;;  %v17904_v54 = vld [vmem:[#allocation108_spill] sm:$0xff] }
 0x688   :  { %7178 = vmatprep.subr.mxu1 %v17868_v53  ;;  %6987 = vmatpush2.msra.mxu0 %v17870_v40  ;;  %17883 = vst [vmem:[#allocation27_spill] sm:$0xff] %v15042_v25  ;;  %v17886_v57 = vand.u32 4294901760, %v17885_v47  ;;  %v17330_v53 = vand.u32 4294901760, %v15011_v62  ;;  %v17888_v40 = vld [vmem:[#allocation111_spill] sm:$0xff]  ;;  %v15081_v47 = vand.u32 4294901760, %v5891_v20 }
 0x689   :  { %7180 = vmatpush2.msra.mxu1 %v17872_v3  ;;  %6991 = vmatprep.subr.mxu0 %v17874_v41  ;;  %v17889_v3 = vld [vmem:[#allocation100_spill] sm:$0xff]  ;;  %v17331_v41 = vand.u32 4294901760, %v15019_v27 }
 0x68a   :  { %7182 = vmatprep.subr.mxu1 %v17876_v1  ;;  %6995 = vmatpush2.msra.mxu0 %v17878_v29  ;;  %v17890_v12 = vand.u32 4294901760, %v17889_v3  ;;  %v15065_v1 = vsub.f32 %v5852_v39, %v15021_v36  ;;  %v17892_v29 = vld [vmem:[#allocation114_spill] sm:$0xff] }
 0x68b   :  { %7184 = vmatpush2.msra.mxu1 %v17880_v59  ;;  %6999 = vmatprep.subr.mxu0 %v17882_v58  ;;  %v17893_v59 = vld [vmem:[#allocation102_spill] sm:$0xff]  ;;  %v17333_v58 = vand.u32 4294901760, %v15028_v5  ;;  %v15115_v19 = vsub.f32 %v15019_v27, %v17331_v41  ;;  %v17911_v41 = vld [vmem:[#allocation125_spill] sm:$0xff] }
 0x68c   :  { %7186 = vmatprep.subr.mxu1 %v17884_v32  ;;  %7003 = vmatpush2.msra.mxu0 %v17886_v57  ;;  %17891 = vst [vmem:[#allocation28_spill] sm:$0xff] %v15065_v1  ;;  %v17894_v38 = vand.u32 4294901760, %v17893_v59  ;;  %v15079_v32 = vsub.f32 %v5897_v22, %v15030_v17  ;;  %v5843_v39 = vld [vmem:[#allocation6 + $0xd0] sm:$0xff]  ;;  %v17896_v57 = vld [vmem:[#allocation115_spill] sm:$0xff]  ;;  %v17334_v59 = vand.u32 4294901760, %v15042_v25  ;;  %v15094_v22 = vsub.f32 %v5849_v21, %v15044_v0 }
 0x68d   :  { %7188 = vmatpush2.msra.mxu1 %v17888_v40  ;;  %7007 = vmatprep.subr.mxu0 %v17890_v12  ;;  %v17897_v40 = vld [vmem:[#allocation104_spill] sm:$0xff]  ;;  %v7443_v12 = vand.u32 4294901760, %v15038_v26  ;;  %v15103_v26 = vsub.f32 %v15011_v62, %v17330_v53  ;;  %v17903_v21 = vld [vmem:[#allocation119_spill] sm:$0xff]  ;;  %v15121_v53 = vand.u32 4294901760, %v5843_v39 }
 0x68e   :  { %7190 = vmatprep.subr.mxu1 %v17892_v29  ;;  %7011 = vmatpush2.msra.mxu0 %v17894_v38  ;;  %17895 = vst [vmem:[#allocation39_spill] sm:$0xff] %v15079_v32  ;;  %v17898_v3 = vand.u32 4294901760, %v17897_v40  ;;  %v15090_v29 = vsub.f32 %v15002_v11, %v17328_v61  ;;  %17899 = vst [vmem:[#allocation29_spill] sm:$0xff] %v15094_v22  ;;  %v17900_v38 = vld [vmem:[#allocation117_spill] sm:$0xff]  ;;  %v17336_v40 = vand.u32 4294901760, %v15056_v42  ;;  %v5888_v61 = vld [vmem:[#allocation6 + $0x238] sm:$0xff] }
 0x68f   :  { %7192 = vmatpush2.msra.mxu1 %v17896_v57  ;;  %v7331_v57 = vand.u32 4294901760, %v15052_v16  ;;  %v15119_v16 = vsub.f32 %v5846_v46, %v15067_v35  ;;  %v15134_v46 = vsub.f32 %v5891_v20, %v15081_v47  ;;  %v17912_v20 = vand.u32 4294901760, %v17770_v9 }
 0x690   :  { %7015 = vmatprep.subr.mxu0 %v17898_v3  ;;  %7194 = vmatprep.subr.mxu1 %v17900_v38  ;;  %v15107_v3 = vsub.f32 %v5894_v51, %v15058_v10  ;;  %v17905_v38 = vand.u32 4294901760, %v17904_v54  ;;  %v5840_v51 = vld [vmem:[#allocation6 + $0xb8] sm:$0xff]  ;;  %v7450_v54 = vand.u32 4294901760, %v15075_v50  ;;  %v7345_v9 = vand.u32 4294901760, %v15115_v19  ;;  %v5879_v19 = vld [vmem:[#allocation6 + $0x1f0] sm:$0xff] }
 0x691   :  { %7019 = vmatpush2.msra.mxu0 %v17901_v2  ;;  %7196 = vmatpush2.msra.mxu1 %v17903_v21  ;;  %17906 = vst [vmem:[#allocation30_spill] sm:$0xff] %v15119_v16  ;;  %v17907_v21 = vand.u32 4294901760, %v17766_v7  ;;  %17908 = vst [vmem:[#allocation43_spill] sm:$0xff] %v15134_v46  ;;  %v17910_v2 = vand.u32 4294901760, %v17768_v24  ;;  %v15143_v7 = vsub.f32 %v15042_v25, %v17334_v59  ;;  %v7457_v24 = vand.u32 4294901760, %v15103_v26  ;;  %v5837_v59 = vld [vmem:[#allocation6 + $0xa0] sm:$0xff] }
 0x692   :  { %17902 = vst [vmem:[#allocation41_spill] sm:$0xff] %v15107_v3  ;;  %7023 = vmatprep.subr.mxu0 %v17905_v38  ;;  %7198 = vmatprep.subr.mxu1 %v17765_v44  ;;  %v15130_v38 = vsub.f32 %v15028_v5, %v17333_v58  ;;  %v7338_v44 = vand.u32 4294901760, %v15090_v29  ;;  %v5885_v58 = vld [vmem:[#allocation6 + $0x220] sm:$0xff]  ;;  %v5882_v29 = vld [vmem:[#allocation6 + $0x208] sm:$0xff] }
 0x693   :  { %7027 = vmatpush2.msra.mxu0 %v17907_v21  ;;  %7200 = vmatpush2.msra.mxu1 %v17909_v14  ;;  %v15146_v21 = vand.u32 4294901760, %v5888_v61  ;;  %v15155_v14 = vsub.f32 %v15056_v42, %v17336_v40  ;;  %v17913_v50 = vld [vmem:[#allocation127_spill] sm:$0xff]  ;;  %v15171_v40 = vsub.f32 %v5843_v39, %v15121_v53  ;;  %v17917_v42 = vld [vmem:[#allocation130_spill] sm:$0xff]  ;;  %v7352_v39 = vand.u32 4294901760, %v15143_v7 }
 0x694   :  { %7031 = vmatprep.subr.mxu0 %v17910_v2  ;;  %7202 = vmatprep.subr.mxu1 %v17911_v41  ;;  %v15158_v2 = vand.u32 4294901760, %v5840_v51  ;;  %v17915_v41 = vand.u32 4294901760, %v15065_v1 }
 0x695   :  { %7035 = vmatpush2.msra.mxu0 %v17912_v20  ;;  %7204 = vmatpush2.msra.mxu1 %v17913_v50  ;;  %17916 = vst [vmem:[#allocation32_spill] sm:$0xff] %v15171_v40  ;;  %v7464_v50 = vand.u32 4294901760, %v15130_v38  ;;  %v17919_v20 = vand.u32 4294901760, %v17774_v4  ;;  %v15192_v25 = vsub.f32 %v5888_v61, %v15146_v21  ;;  %v7471_v4 = vand.u32 4294901760, %v15155_v14 }
 0x696   :  { %7039 = vmatprep.subr.mxu0 %v17914_v15  ;;  %v15167_v26 = vsub.f32 %v15065_v1, %v17915_v41  ;;  %7208 = vmatmul.mubr.f32.vlgmr.msra.gmra.mxu1 %v17917_v42  ;;  %v17918_v15 = vand.u32 4294901760, %v15079_v32  ;;  %v15181_v41 = vand.u32 4294901760, %v5885_v58  ;;  %v5834_v1 = vld [vmem:[#allocation6 + $0x88] sm:$0xff]  ;;  %v15208_v61 = vand.u32 4294901760, %v5882_v29 }
 0x697   :  { %10970 = vmatprep.subr.mxu1 %v7443_v12  ;;  %7043 = vmatpush2.msra.mxu0 %v17919_v20  ;;  %v17920_v12 = vand.u32 4294901760, %v15094_v22  ;;  %17921 = vst [vmem:[#allocation45_spill] sm:$0xff] %v15192_v25  ;;  %v15206_v20 = vsub.f32 %v5840_v51, %v15158_v2  ;;  %v5876_v51 = vld [vmem:[#allocation6 + $0x1d8] sm:$0xff] }
 0x698   :  { %v15178_v52 = vsub.f32 %v15079_v32, %v17918_v15  ;;  %10971 = vmatpush3.msra.mxu1 %v7331_v57  ;;  %v15194_v15 = vand.u32 4294901760, %v5837_v59  ;;  %7551 = vmatprep.mubr.f32.mxu1 %v14689_v49  ;;  %v17922_v32 = vand.u32 4294901760, %v17775_v60  ;;  %v17923_v57 = vand.u32 4294901760, %v15107_v3 }
 0x699   :  { %v15189_v38 = vsub.f32 %v15094_v22, %v17920_v12  ;;  %17924 = vst [vmem:[#allocation33_spill] sm:$0xff] %v15206_v20  ;;  %v5831_v12 = vld [vmem:[#allocation6 + $0x70] sm:$0xff]  ;;  %10972 = vmatprep.subr.mxu1 %v7450_v54  ;;  %v17925_v22 = vand.u32 4294901760, %v17776_v31  ;;  %v7359_v60 = vand.u32 4294901760, %v15167_v26  ;;  %v15219_v49 = vand.u32 4294901760, %v5834_v1 }
 0x69a   :  { %7047 = vmatprep.subr.mxu0 %v17922_v32  ;;  %v15203_v7 = vsub.f32 %v15107_v3, %v17923_v57  ;;  %v17926_v32 = vand.u32 4294901760, %v15119_v16  ;;  %10973 = vmatpush3.msra.mxu1 %v7338_v44  ;;  %v17927_v3 = vand.u32 4294901760, %v17777_v37  ;;  %v7478_v54 = vand.u32 4294901760, %v15178_v52  ;;  %v5828_v57 = vld [vmem:[#allocation6 + $0x58] sm:$0xff] }
 0x69b   :  { %7051 = vmatpush2.msra.mxu0 %v17925_v22  ;;  %v17928_v31 = vand.u32 4294901760, %v15134_v46  ;;  %v15230_v26 = vsub.f32 %v5885_v58, %v15181_v41  ;;  %10974 = vmatprep.subr.mxu1 %v7457_v24  ;;  %v7366_v37 = vand.u32 4294901760, %v15189_v38  ;;  %v15239_v44 = vsub.f32 %v5837_v59, %v15194_v15  ;;  %v5825_v38 = vld [vmem:[#allocation6 + $0x40] sm:$0xff]  ;;  %v5822_v24 = vld [vmem:[#allocation6 + $0x28] sm:$0xff] }
 0x69c   :  { %v15216_v14 = vsub.f32 %v15119_v16, %v17926_v32  ;;  %7055 = vmatprep.subr.mxu0 %v17927_v3  ;;  %v15232_v32 = vand.u32 4294901760, %v5879_v19  ;;  %v17930_v16 = vand.u32 4294901760, %v17778_v13  ;;  %v15241_v52 = vand.u32 4294901760, %v5831_v12  ;;  %10975 = vmatpush3.msra.mxu1 %v7345_v9 }
 0x69d   :  { %v15227_v22 = vsub.f32 %v15134_v46, %v17928_v31  ;;  %17929 = vst [vmem:[#allocation47_spill] sm:$0xff] %v15230_v26  ;;  %17931 = vst [vmem:[#allocation36_spill] sm:$0xff] %v15239_v44  ;;  %v5873_v31 = vld [vmem:[#allocation6 + $0x1c0] sm:$0xff]  ;;  %v17932_v58 = vand.u32 4294901760, %v17779_v56  ;;  %v7485_v46 = vand.u32 4294901760, %v15203_v7  ;;  %v15248_v13 = vsub.f32 %v5882_v29, %v15208_v61  ;;  %10976 = vmatprep.subr.mxu1 %v7464_v50  ;;  %v5870_v29 = vld [vmem:[#allocation6 + $0x1a8] sm:$0xff] }
 0x69e   :  { %7059 = vmatpush2.msra.mxu0 %v17930_v16  ;;  %v15250_v16 = vand.u32 4294901760, %v5876_v51  ;;  %v17933_v59 = vand.u32 4294901760, %v17780_v45  ;;  %v7373_v3 = vand.u32 4294901760, %v15216_v14  ;;  %v17934_v9 = vand.u32 4294901760, %v15171_v40  ;;  %10977 = vmatpush3.msra.mxu1 %v7352_v39  ;;  %v5867_v45 = vld [vmem:[#allocation6 + $0x190] sm:$0xff] }
 0x69f   :  { %7063 = vmatprep.subr.mxu0 %v17932_v58  ;;  %v15259_v7 = vsub.f32 %v5834_v1, %v15219_v49  ;;  %v15261_v58 = vand.u32 4294901760, %v5828_v57  ;;  %v7492_v50 = vand.u32 4294901760, %v15227_v22  ;;  %v15269_v14 = vand.u32 4294901760, %v5873_v31  ;;  %10978 = vmatprep.subr.mxu1 %v7471_v4 }
 0x6a0   :  { %7067 = vmatpush2.msra.mxu0 %v17933_v59  ;;  %v7379_v56 = vsub.f32 %v15171_v40, %v17934_v9  ;;  %v15267_v59 = vsub.f32 %v5879_v19, %v15232_v32  ;;  %v17936_v1 = vand.u32 4294901760, %v15192_v25  ;;  %v15277_v40 = vsub.f32 %v5831_v12, %v15241_v52  ;;  %v17939_v19 = vld [vmem:[#allocation137_spill] sm:$0xff]  ;;  %10979 = vmatpush3.msra.mxu1 %v7359_v60 }
 0x6a1   :  { %17935 = vst [vmem:[#allocation50_spill] sm:$0xff] %v15259_v7  ;;  %7071 = vmatmul.mubr.f32.vlgmr.msra.gmra.mxu0 %v17917_v42  ;;  %10935 = vmatprep.subr.mxu0 %v14953_v34  ;;  %v15279_v22 = vand.u32 4294901760, %v5825_v38  ;;  %v17940_v5 = vand.u32 4294901760, %v15206_v20  ;;  %v15290_v39 = vand.u32 4294901760, %v5870_v29  ;;  %v5819_v12 = vld [vmem:[#allocation6 + $0x10] sm:$0xff]  ;;  %v15297_v11 = vand.u32 4294901760, %v5822_v24 }
 0x6a2   :  { %v7498_v9 = vsub.f32 %v15192_v25, %v17936_v1  ;;  %17937 = vst [vmem:[#allocation38_spill] sm:$0xff] %v15277_v40  ;;  %10936 = vmatpush3.msra.mxu0 %v14958_v8  ;;  %7315 = vmatprep.mubr.f32.mxu0 %v17939_v19  ;;  %v15288_v1 = vsub.f32 %v5876_v51, %v15250_v16  ;;  %v7380_v25 = vand.u32 4294901760, %v7379_v56  ;;  %v15307_v56 = vand.u32 4294901760, %v5867_v45 }
 0x6a3   :  { %17938 = vst [vmem:[#allocation51_spill] sm:$0xff] %v15279_v22  ;;  %v7386_v4 = vsub.f32 %v15206_v20, %v17940_v5  ;;  %17941 = vst [vmem:[#allocation40_spill] sm:$0xff] %v15290_v39  ;;  %10937 = vmatprep.subr.mxu0 %v14966_v18  ;;  %v15295_v19 = vsub.f32 %v5828_v57, %v15261_v58  ;;  %10980 = vmatprep.subr.mxu1 %v7478_v54  ;;  %v17942_v5 = vand.u32 4294901760, %v15230_v26 }
 0x6a4   :  { %10938 = vmatpush3.msra.mxu0 %v14974_v63  ;;  %v15305_v60 = vsub.f32 %v5873_v31, %v15269_v14  ;;  %17943 = vst [vmem:[#allocation53_spill] sm:$0xff] %v15307_v56  ;;  %10981 = vmatpush3.msra.mxu1 %v7366_v37  ;;  %v17944_v57 = vand.u32 4294901760, %v15239_v44  ;;  %v15315_v20 = vsub.f32 %v5825_v38, %v15279_v22  ;;  %v7499_v31 = vand.u32 4294901760, %v7498_v9 }
 0x6a5   :  { %v7505_v51 = vsub.f32 %v15230_v26, %v17942_v5  ;;  %10939 = vmatprep.subr.mxu0 %v14982_v33  ;;  %v15317_v5 = vand.u32 4294901760, %v5819_v12  ;;  %10982 = vmatprep.subr.mxu1 %v7485_v46  ;;  %v17946_v27 = vand.u32 4294901760, %v15248_v13  ;;  %v15325_v48 = vsub.f32 %v5870_v29, %v15290_v39 }
 0x6a6   :  { %v7393_v54 = vsub.f32 %v15239_v44, %v17944_v57  ;;  %10940 = vmatpush3.msra.mxu0 %v14987_v43  ;;  %10983 = vmatpush3.msra.mxu1 %v7373_v3  ;;  %v7387_v38 = vand.u32 4294901760, %v7386_v4  ;;  %v17947_v57 = vand.u32 4294901760, %v15259_v7  ;;  %v15333_v9 = vsub.f32 %v5822_v24, %v15297_v11 }
 0x6a7   :  { %17945 = vst [vmem:[#allocation42_spill] sm:$0xff] %v15317_v5  ;;  %v7512_v37 = vsub.f32 %v15248_v13, %v17946_v27  ;;  %10941 = vmatprep.subr.mxu0 %v14995_v6  ;;  %10984 = vmatprep.subr.mxu1 %v7492_v50  ;;  %v7506_v27 = vand.u32 4294901760, %v7505_v51  ;;  %v17948_v29 = vand.u32 4294901760, %v15267_v59  ;;  %v15341_v4 = vsub.f32 %v5867_v45, %v15307_v56 }
 0x6a8   :  { %v7400_v46 = vsub.f32 %v15259_v7, %v17947_v57  ;;  %10942 = vmatpush3.msra.mxu0 %v15004_v30  ;;  %10985 = vmatpush3.msra.mxu1 %v7380_v25  ;;  %v7394_v57 = vand.u32 4294901760, %v7393_v54  ;;  %v17949_v24 = vand.u32 4294901760, %v15277_v40  ;;  %v15349_v51 = vsub.f32 %v5819_v12, %v15317_v5 }
 0x6a9   :  { %v7519_v3 = vsub.f32 %v15267_v59, %v17948_v29  ;;  %10943 = vmatprep.subr.mxu0 %v15013_v55  ;;  %10986 = vmatprep.subr.mxu1 %v7499_v31  ;;  %v7513_v29 = vand.u32 4294901760, %v7512_v37  ;;  %v17950_v45 = vand.u32 4294901760, %v15288_v1  ;;  %v17952_v37 = vand.u32 4294901760, %v15305_v60 }
 0x6aa   :  { %v7407_v50 = vsub.f32 %v15277_v40, %v17949_v24  ;;  %10944 = vmatpush3.msra.mxu0 %v15021_v36  ;;  %10987 = vmatpush3.msra.mxu1 %v7387_v38  ;;  %v7401_v54 = vand.u32 4294901760, %v7400_v46  ;;  %v17951_v24 = vand.u32 4294901760, %v15295_v19  ;;  %v17953_v46 = vand.u32 4294901760, %v15315_v20 }
 0x6ab   :  { %v7526_v25 = vsub.f32 %v15288_v1, %v17950_v45  ;;  %10945 = vmatprep.subr.mxu0 %v15030_v17  ;;  %10988 = vmatprep.subr.mxu1 %v7506_v27  ;;  %v7520_v31 = vand.u32 4294901760, %v7519_v3  ;;  %v7533_v45 = vsub.f32 %v15305_v60, %v17952_v37  ;;  %v17373_v12 = vand.u32 4294901760, %v15349_v51 }
 0x6ac   :  { %v7414_v62 = vsub.f32 %v15295_v19, %v17951_v24  ;;  %10946 = vmatpush3.msra.mxu0 %v15044_v0  ;;  %10989 = vmatpush3.msra.mxu1 %v7394_v57  ;;  %v7408_v38 = vand.u32 4294901760, %v7407_v50  ;;  %v7421_v24 = vsub.f32 %v15315_v20, %v17953_v46  ;;  %v17954_v3 = vand.u32 4294901760, %v15325_v48 }
 0x6ad   :  { %10947 = vmatprep.subr.mxu0 %v15058_v10  ;;  %10990 = vmatprep.subr.mxu1 %v7513_v29  ;;  %v7527_v27 = vand.u32 4294901760, %v7526_v25  ;;  %v17955_v50 = vand.u32 4294901760, %v15333_v9  ;;  %v7534_v46 = vand.u32 4294901760, %v7533_v45  ;;  %v17956_v29 = vand.u32 4294901760, %v15341_v4 }
 0x6ae   :  { %10948 = vmatpush3.msra.mxu0 %v15067_v35  ;;  %v7540_v37 = vsub.f32 %v15325_v48, %v17954_v3  ;;  %10991 = vmatpush3.msra.mxu1 %v7401_v54  ;;  %v7415_v57 = vand.u32 4294901760, %v7414_v62  ;;  %v7422_v3 = vand.u32 4294901760, %v7421_v24  ;;  %v7435_v62 = vsub.f32 %v15349_v51, %v17373_v12  ;;  %v17958_v24 = vld [vmem:[#allocation136_spill] sm:$0xff] }
 0x6af   :  { %10949 = vmatprep.subr.mxu0 %v15081_v47  ;;  %v7428_v26 = vsub.f32 %v15333_v9, %v17955_v50  ;;  %10992 = vmatprep.subr.mxu1 %v7520_v31  ;;  %v7547_v25 = vsub.f32 %v15341_v4, %v17956_v29  ;;  %v17962_v50 = vld [vmem:[#allocation34_spill] sm:$0xff]  ;;  %v17964_v29 = vld [vmem:[#allocation35_spill] sm:$0xff]  ;;  %v17973_v12 = vld [vmem:[#allocation32_spill] sm:$0xff] }
 0x6b0   :  { %10950 = vmatpush3.msra.mxu0 %v15121_v53  ;;  %10993 = vmatpush3.msra.mxu1 %v7408_v38  ;;  %v7541_v54 = vand.u32 4294901760, %v7540_v37  ;;  %v7436_v38 = vand.u32 4294901760, %v7435_v62  ;;  %v17960_v37 = vld [vmem:[#allocation31_spill] sm:$0xff]  ;;  %v17967_v62 = vld [vmem:[#allocation28_spill] sm:$0xff] }
 0x6b1   :  { %10951 = vmatprep.subr.mxu0 %v15146_v21  ;;  %10994 = vmatprep.subr.mxu1 %v7527_v27  ;;  %v7429_v31 = vand.u32 4294901760, %v7428_v26  ;;  %v7548_v45 = vand.u32 4294901760, %v7547_v25  ;;  %v17957_v26 = vld [vmem:[#allocation135_spill] sm:$0xff]  ;;  %v17959_v27 = vld [vmem:[#allocation134_spill] sm:$0xff] }
 0x6b2   :  { %10952 = vmatpush3.msra.mxu0 %v15158_v2  ;;  %10995 = vmatpush3.msra.mxu1 %v7415_v57  ;;  %v17961_v57 = vld [vmem:[#allocation25_spill] sm:$0xff]  ;;  %v17965_v25 = vld [vmem:[#allocation27_spill] sm:$0xff] }
 0x6b3   :  { %10953 = vmatprep.subr.mxu0 %v15181_v41  ;;  %10996 = vmatprep.subr.mxu1 %v7534_v46  ;;  %v17963_v46 = vld [vmem:[#allocation26_spill] sm:$0xff] }
 0x6b4   :  { %10954 = vmatpush3.msra.mxu0 %v15194_v15  ;;  %10997 = vmatpush3.msra.mxu1 %v7422_v3  ;;  %v17966_v3 = vld [vmem:[#allocation37_spill] sm:$0xff] }
 0x6b5   :  { %10955 = vmatprep.subr.mxu0 %v15208_v61  ;;  %10998 = vmatprep.subr.mxu1 %v7541_v54  ;;  %v17968_v54 = vld [vmem:[#allocation39_spill] sm:$0xff] }
 0x6b6   :  { %10956 = vmatpush3.msra.mxu0 %v15219_v49  ;;  %10999 = vmatpush3.msra.mxu1 %v7429_v31  ;;  %v17969_v31 = vld [vmem:[#allocation29_spill] sm:$0xff] }
 0x6b7   :  { %10957 = vmatprep.subr.mxu0 %v15232_v32  ;;  %11000 = vmatprep.subr.mxu1 %v7548_v45  ;;  %v17970_v45 = vld [vmem:[#allocation41_spill] sm:$0xff] }
 0x6b8   :  { %10958 = vmatpush3.msra.mxu0 %v15241_v52  ;;  %11001 = vmatpush3.msra.mxu1 %v7436_v38  ;;  %v17971_v38 = vld [vmem:[#allocation30_spill] sm:$0xff] }
 0x6b9   :  { %10959 = vmatprep.subr.mxu0 %v15250_v16  ;;  %7553 = vmatmul.mubr.f32.vlgmr.msra.gmra.mxu1 %v17917_v42  ;;  %v17976_v42 = vld [vmem:[#allocation47_spill] sm:$0xff] }
 0x6ba   :  { %11040 = vmatprep.subr.mxu1 %v14953_v34  ;;  %10960 = vmatpush3.msra.mxu0 %v15261_v58 }
 0x6bb   :  { %11041 = vmatpush3.msra.mxu1 %v14958_v8  ;;  %7795 = vmatprep.mubr.f32.mxu1 %v17957_v26  ;;  %v17975_v26 = vld [vmem:[#allocation33_spill] sm:$0xff] }
 0x6bc   :  { %10961 = vmatprep.subr.mxu0 %v15269_v14  ;;  %11042 = vmatprep.subr.mxu1 %v14966_v18 }
 0x6bd   :  { %10962 = vmatpush3.msra.mxu0 %v15279_v22  ;;  %11043 = vmatpush3.msra.mxu1 %v14974_v63 }
 0x6be   :  { %10963 = vmatprep.subr.mxu0 %v15290_v39  ;;  %11044 = vmatprep.subr.mxu1 %v14982_v33 }
 0x6bf   :  { %10964 = vmatpush3.msra.mxu0 %v15297_v11  ;;  %11045 = vmatpush3.msra.mxu1 %v14987_v43 }
 0x6c0   :  { %10965 = vmatprep.subr.mxu0 %v15307_v56  ;;  %11046 = vmatprep.subr.mxu1 %v14995_v6 }
 0x6c1   :  { %10966 = vmatpush3.msra.mxu0 %v15317_v5  ;;  %11047 = vmatpush3.msra.mxu1 %v15004_v30 }
 0x6c2   :  { %7321 = vmatmul.mubr.f32.vlgmr.msra.gmra.mxu0 %v17958_v24  ;;  %11005 = vmatprep.subr.mxu0 %v14972_v28  ;;  %v17972_v24 = vld [vmem:[#allocation43_spill] sm:$0xff] }
 0x6c3   :  { %11048 = vmatprep.subr.mxu1 %v15013_v55  ;;  %11006 = vmatpush3.msra.mxu0 %v14980_v23 }
 0x6c4   :  { %7688 = vmatprep.mubr.f32.mxu0 %v17959_v27  ;;  %11049 = vmatpush3.msra.mxu1 %v15021_v36  ;;  %v17974_v27 = vld [vmem:[#allocation45_spill] sm:$0xff] }
 0x6c5   :  { %11007 = vmatprep.subr.mxu0 %v17960_v37  ;;  %11050 = vmatprep.subr.mxu1 %v15030_v17 }
 0x6c6   :  { %11008 = vmatpush3.msra.mxu0 %v17961_v57  ;;  %11051 = vmatpush3.msra.mxu1 %v15044_v0 }
 0x6c7   :  { %11009 = vmatprep.subr.mxu0 %v17962_v50  ;;  %11052 = vmatprep.subr.mxu1 %v15058_v10 }
 0x6c8   :  { %11010 = vmatpush3.msra.mxu0 %v17963_v46  ;;  %11053 = vmatpush3.msra.mxu1 %v15067_v35 }
 0x6c9   :  { %11011 = vmatprep.subr.mxu0 %v17964_v29  ;;  %11054 = vmatprep.subr.mxu1 %v15081_v47 }
 0x6ca   :  { %11012 = vmatpush3.msra.mxu0 %v17965_v25  ;;  %11055 = vmatpush3.msra.mxu1 %v15121_v53 }
 0x6cb   :  { %11013 = vmatprep.subr.mxu0 %v17966_v3  ;;  %11056 = vmatprep.subr.mxu1 %v15146_v21 }
 0x6cc   :  { %11014 = vmatpush3.msra.mxu0 %v17967_v62  ;;  %11057 = vmatpush3.msra.mxu1 %v15158_v2 }
 0x6cd   :  { %11015 = vmatprep.subr.mxu0 %v17968_v54  ;;  %11058 = vmatprep.subr.mxu1 %v15181_v41 }
 0x6ce   :  { %11016 = vmatpush3.msra.mxu0 %v17969_v31  ;;  %11059 = vmatpush3.msra.mxu1 %v15194_v15 }
 0x6cf   :  { %11017 = vmatprep.subr.mxu0 %v17970_v45  ;;  %11060 = vmatprep.subr.mxu1 %v15208_v61 }
 0x6d0   :  { %11018 = vmatpush3.msra.mxu0 %v17971_v38  ;;  %11061 = vmatpush3.msra.mxu1 %v15219_v49 }
 0x6d1   :  { %11019 = vmatprep.subr.mxu0 %v17972_v24  ;;  %11062 = vmatprep.subr.mxu1 %v15232_v32 }
 0x6d2   :  { %11020 = vmatpush3.msra.mxu0 %v17973_v12  ;;  %11063 = vmatpush3.msra.mxu1 %v15241_v52 }
 0x6d3   :  { %11021 = vmatprep.subr.mxu0 %v17974_v27  ;;  %11064 = vmatprep.subr.mxu1 %v15250_v16 }
 0x6d4   :  { %11022 = vmatpush3.msra.mxu0 %v17975_v26  ;;  %11065 = vmatpush3.msra.mxu1 %v15261_v58 }
 0x6d5   :  { %11023 = vmatprep.subr.mxu0 %v17976_v42  ;;  %11066 = vmatprep.subr.mxu1 %v15269_v14 }
 0x6d6   :  { %11024 = vmatpush3.msra.mxu0 %v15239_v44  ;;  %11067 = vmatpush3.msra.mxu1 %v15279_v22  ;;  %v15463_v44 = vld [vmem:[#allocation9] ss:$2 sm:$0x7]  ;;  %v17977_v22 = vld [vmem:[#allocation132_spill] sm:$0xff] }
 0x6d7   :  { %11025 = vmatprep.subr.mxu0 %v15248_v13  ;;  %11068 = vmatprep.subr.mxu1 %v15290_v39  ;;  %v17978_v39 = vld [vmem:[#allocation21_spill] sm:$0xff] }
 0x6d8   :  { %11026 = vmatpush3.msra.mxu0 %v15259_v7  ;;  %11069 = vmatpush3.msra.mxu1 %v15297_v11  ;;  %v5922_v7 = vrot.slane %v15463_v44, %v17978_v39 }
 0x6d9   :  { %11027 = vmatprep.subr.mxu0 %v15267_v59  ;;  %11070 = vmatprep.subr.mxu1 %v15307_v56 }
 0x6da   :  { %11028 = vmatpush3.msra.mxu0 %v15277_v40  ;;  %11071 = vmatpush3.msra.mxu1 %v15317_v5  ;;  %v15473_v40 = vpop.f32.mrf.mxu1  ;;  %v17979_v5 = vld [vmem:[#allocation133_spill] sm:$0xff] }
 0x6db   :  { %11029 = vmatprep.subr.mxu0 %v15288_v1  ;;  %7799 = vmatmul.mubr.f32.vlgmr.msra.gmra.mxu1 %v17977_v22  ;;  %v15471_v56 = vpop.f32.mrf.mxu0 }
 0x6dc   :  { %11110 = vmatprep.subr.mxu1 %v14953_v34  ;;  %11030 = vmatpush3.msra.mxu0 %v15295_v19 }
 0x6dd   :  { %11111 = vmatpush3.msra.mxu1 %v14958_v8  ;;  %8069 = vmatprep.mubr.f32.mxu1 %v17979_v5  ;;  %v6072_v34 = vpop.f32.mrf.mxu0  ;;  %v6465_v8 = vpop.f32.mrf.mxu1 }
 0x6de   :  { %11031 = vmatprep.subr.mxu0 %v15305_v60  ;;  %11112 = vmatprep.subr.mxu1 %v14966_v18  ;;  %v6073_v22 = vadd.f32 %v6072_v34, %v5922_v7  ;;  %v17980_v18 = vld [vmem:[#allocation131_spill] sm:$0xff]  ;;  %v8121_v7 = vld [vmem:[#allocation7 + $0x168] sm:$0xff] }
 0x6df   :  { %11032 = vmatpush3.msra.mxu0 %v15315_v20  ;;  %11113 = vmatpush3.msra.mxu1 %v14974_v63  ;;  %v8122_v63 = vld [vmem:[#allocation7 + $0x170] sm:$0xff]  ;;  %v8119_v34 = vld [vmem:[#allocation7 + $0x158] sm:$0xff] }
 0x6e0   :  { %11033 = vmatprep.subr.mxu0 %v15325_v48  ;;  %11114 = vmatprep.subr.mxu1 %v14982_v33  ;;  %v15485_v39 = vadd.f32 %v6465_v8, %v6073_v22  ;;  %v17981_v33 = vand.u32 4294901760, %v14972_v28  ;;  %v8118_v22 = vld [vmem:[#allocation7 + $0x150] sm:$0xff]  ;;  %v17984_v28 = vand.u32 4294901760, %v17961_v57  ;;  %v17985_v8 = vand.u32 4294901760, %v17962_v50  ;;  %v8113_v57 = vld [vmem:[#allocation7 + $0x128] sm:$0xff] }
 0x6e1   :  { %11034 = vmatpush3.msra.mxu0 %v15333_v9  ;;  %11115 = vmatpush3.msra.mxu1 %v14987_v43  ;;  %v17982_v43 = vand.u32 4294901760, %v14980_v23  ;;  %v8116_v23 = vld [vmem:[#allocation7 + $0x140] sm:$0xff] }
 0x6e2   :  { %11035 = vmatprep.subr.mxu0 %v15341_v4  ;;  %11116 = vmatprep.subr.mxu1 %v14995_v6  ;;  %v17983_v6 = vand.u32 4294901760, %v17960_v37  ;;  %v8115_v37 = vld [vmem:[#allocation7 + $0x138] sm:$0xff]  ;;  %v15523_v50 = vand.u32 4294901760, %v8116_v23 }
 0x6e3   :  { %11036 = vmatpush3.msra.mxu0 %v15349_v51  ;;  %11117 = vmatpush3.msra.mxu1 %v15004_v30  ;;  %v15500_v30 = vand.u32 4294901760, %v8122_v63 }
 0x6e4   :  { %7691 = vmatmul.mubr.f32.vlgmr.msra.gmra.mxu0 %v17980_v18  ;;  %11075 = vmatprep.subr.mxu0 %v17981_v33  ;;  %v17986_v18 = vand.u32 4294901760, %v17963_v46  ;;  %v17987_v33 = vand.u32 4294901760, %v17964_v29  ;;  %17989 = vst [vmem:[#allocation44_spill] sm:$0xff] %v15523_v50  ;;  %v17992_v29 = vand.u32 4294901760, %v17966_v3  ;;  %v17996_v3 = vand.u32 4294901760, %v17968_v54 }
 0x6e5   :  { %11118 = vmatprep.subr.mxu1 %v15013_v55  ;;  %11076 = vmatpush3.msra.mxu0 %v17982_v43  ;;  %v15505_v55 = vand.u32 4294901760, %v8121_v7  ;;  %v8112_v43 = vld [vmem:[#allocation7 + $0x120] sm:$0xff] }
 0x6e6   :  { %7965 = vmatprep.mubr.f32.mxu0 %v17979_v5  ;;  %11119 = vmatpush3.msra.mxu1 %v15021_v36  ;;  %v15510_v36 = vand.u32 4294901760, %v8119_v34  ;;  %v18023_v5 = vld [vmem:[#allocation50_spill] sm:$0xff] }
 0x6e7   :  { %11077 = vmatprep.subr.mxu0 %v17983_v6  ;;  %11120 = vmatprep.subr.mxu1 %v15030_v17  ;;  %v15515_v17 = vand.u32 4294901760, %v8118_v22  ;;  %v15529_v46 = vsub.f32 %v8121_v7, %v15505_v55  ;;  %v15531_v6 = vand.u32 4294901760, %v8115_v37 }
 0x6e8   :  { %11078 = vmatpush3.msra.mxu0 %v17984_v28  ;;  %11121 = vmatpush3.msra.mxu1 %v15044_v0  ;;  %v15521_v0 = vsub.f32 %v8122_v63, %v15500_v30  ;;  %v15537_v63 = vsub.f32 %v8119_v34, %v15510_v36  ;;  %v15539_v28 = vand.u32 4294901760, %v8113_v57 }
 0x6e9   :  { %11079 = vmatprep.subr.mxu0 %v17985_v8  ;;  %11122 = vmatprep.subr.mxu1 %v15058_v10  ;;  %v17990_v10 = vand.u32 4294901760, %v17965_v25  ;;  %17991 = vst [vmem:[#allocation57_spill] sm:$0xff] %v15529_v46  ;;  %v17994_v25 = vand.u32 4294901760, %v17967_v62  ;;  %v15545_v7 = vsub.f32 %v8118_v22, %v15515_v17  ;;  %v15547_v8 = vand.u32 4294901760, %v8112_v43  ;;  %v8106_v62 = vld [vmem:[#allocation7 + $0xf0] sm:$0xff] }
 0x6ea   :  { %11080 = vmatpush3.msra.mxu0 %v17986_v18  ;;  %11123 = vmatpush3.msra.mxu1 %v15067_v35  ;;  %17988 = vst [vmem:[#allocation55_spill] sm:$0xff] %v15521_v0  ;;  %v8110_v35 = vld [vmem:[#allocation7 + $0x110] sm:$0xff]  ;;  %17993 = vst [vmem:[#allocation46_spill] sm:$0xff] %v15537_v63  ;;  %v17382_v34 = vand.u32 4294901760, %v15521_v0  ;;  %v15554_v18 = vsub.f32 %v8116_v23, %v15523_v50  ;;  %v17998_v22 = vand.u32 4294901760, %v17969_v31  ;;  %v18000_v23 = vand.u32 4294901760, %v17970_v45 }
 0x6eb   :  { %11081 = vmatprep.subr.mxu0 %v17987_v33  ;;  %11124 = vmatprep.subr.mxu1 %v15081_v47  ;;  %v8109_v47 = vld [vmem:[#allocation7 + $0x108] sm:$0xff]  ;;  %17995 = vst [vmem:[#allocation59_spill] sm:$0xff] %v15545_v7  ;;  %v17383_v33 = vand.u32 4294901760, %v15529_v46  ;;  %v15583_v45 = vand.u32 4294901760, %v8106_v62 }
 0x6ec   :  { %11082 = vmatpush3.msra.mxu0 %v17990_v10  ;;  %11125 = vmatpush3.msra.mxu1 %v15121_v53  ;;  %v8107_v53 = vld [vmem:[#allocation7 + $0xf8] sm:$0xff]  ;;  %17997 = vst [vmem:[#allocation106_spill] sm:$0xff] %v15554_v18  ;;  %v15565_v54 = vand.u32 4294901760, %v8109_v47  ;;  %v8104_v10 = vld [vmem:[#allocation7 + $0xe0] sm:$0xff] }
 0x6ed   :  { %11083 = vmatprep.subr.mxu0 %v17992_v29  ;;  %11126 = vmatprep.subr.mxu1 %v15146_v21  ;;  %v15556_v21 = vand.u32 4294901760, %v8110_v35  ;;  %v17384_v29 = vand.u32 4294901760, %v15537_v63  ;;  %v15574_v31 = vand.u32 4294901760, %v8107_v53 }
 0x6ee   :  { %11084 = vmatpush3.msra.mxu0 %v17994_v25  ;;  %11127 = vmatpush3.msra.mxu1 %v15158_v2  ;;  %v15563_v2 = vsub.f32 %v8115_v37, %v15531_v6  ;;  %v8103_v25 = vld [vmem:[#allocation7 + $0xd8] sm:$0xff]  ;;  %v18002_v37 = vand.u32 4294901760, %v17971_v38  ;;  %v18008_v38 = vand.u32 4294901760, %v17974_v27 }
 0x6ef   :  { %11085 = vmatprep.subr.mxu0 %v17996_v3  ;;  %11128 = vmatprep.subr.mxu1 %v15181_v41  ;;  %v15572_v41 = vsub.f32 %v8113_v57, %v15539_v28  ;;  %v17385_v3 = vand.u32 4294901760, %v15545_v7  ;;  %v18004_v57 = vand.u32 4294901760, %v17972_v24  ;;  %v15605_v24 = vsub.f32 %v15529_v46, %v17383_v33 }
 0x6f0   :  { %11086 = vmatpush3.msra.mxu0 %v17998_v22  ;;  %17999 = vst [vmem:[#allocation121_spill] sm:$0xff] %v15563_v2  ;;  %11129 = vmatpush3.msra.mxu1 %v15194_v15  ;;  %v15581_v15 = vsub.f32 %v8112_v43, %v15547_v8  ;;  %v8101_v22 = vld [vmem:[#allocation7 + $0xc8] sm:$0xff]  ;;  %v15597_v43 = vand.u32 4294901760, %v8104_v10 }
 0x6f1   :  { %11087 = vmatprep.subr.mxu0 %v18000_v23  ;;  %18001 = vst [vmem:[#allocation110_spill] sm:$0xff] %v15572_v41  ;;  %11130 = vmatprep.subr.mxu1 %v15208_v61  ;;  %v15591_v61 = vsub.f32 %v15521_v0, %v17382_v34  ;;  %v15595_v23 = vsub.f32 %v8110_v35, %v15556_v21  ;;  %v15611_v35 = vand.u32 4294901760, %v8103_v25  ;;  %v15625_v33 = vand.u32 4294901760, %v8101_v22 }
 0x6f2   :  { %11088 = vmatpush3.msra.mxu0 %v18002_v37  ;;  %18003 = vst [vmem:[#allocation112_spill] sm:$0xff] %v15581_v15  ;;  %11131 = vmatpush3.msra.mxu1 %v15219_v49  ;;  %v8100_v37 = vld [vmem:[#allocation7 + $0xc0] sm:$0xff]  ;;  %v18006_v49 = vand.u32 4294901760, %v17973_v12  ;;  %v15609_v34 = vsub.f32 %v8109_v47, %v15565_v54  ;;  %v18010_v47 = vand.u32 4294901760, %v17975_v26  ;;  %v18013_v26 = vand.u32 4294901760, %v15554_v18 }
 0x6f3   :  { %11089 = vmatprep.subr.mxu0 %v18004_v57  ;;  %18005 = vst [vmem:[#allocation113_spill] sm:$0xff] %v15595_v23  ;;  %11132 = vmatprep.subr.mxu1 %v15232_v32  ;;  %v17386_v57 = vand.u32 4294901760, %v15563_v2  ;;  %v15619_v32 = vsub.f32 %v15537_v63, %v17384_v29  ;;  %v15639_v29 = vand.u32 4294901760, %v8100_v37  ;;  %v15652_v27 = vsub.f32 %v8104_v10, %v15597_v43  ;;  %v18018_v10 = vld [vmem:[#allocation51_spill] sm:$0xff] }
 0x6f4   :  { %11090 = vmatpush3.msra.mxu0 %v18006_v49  ;;  %18007 = vst [vmem:[#allocation116_spill] sm:$0xff] %v15609_v34  ;;  %11133 = vmatpush3.msra.mxu1 %v15241_v52  ;;  %v15623_v49 = vsub.f32 %v8107_v53, %v15574_v31  ;;  %v15633_v52 = vsub.f32 %v15545_v7, %v17385_v3  ;;  %v18012_v53 = vand.u32 4294901760, %v17976_v42  ;;  %v8260_v42 = vand.u32 4294901760, %v15605_v24  ;;  %v18022_v3 = vld [vmem:[#allocation40_spill] sm:$0xff] }
 0x6f5   :  { %11091 = vmatprep.subr.mxu0 %v18008_v38  ;;  %11134 = vmatprep.subr.mxu1 %v15250_v16  ;;  %v15637_v38 = vsub.f32 %v8106_v62, %v15583_v45  ;;  %v8254_v16 = vand.u32 4294901760, %v15591_v61  ;;  %18014 = vst [vmem:[#allocation120_spill] sm:$0xff] %v15652_v27  ;;  %v18015_v62 = vld [vmem:[#allocation36_spill] sm:$0xff]  ;;  %v18020_v24 = vand.u32 4294901760, %v15572_v41  ;;  %v15678_v61 = vsub.f32 %v8101_v22, %v15625_v33  ;;  %v8095_v22 = vld [vmem:[#allocation7 + $0x98] sm:$0xff] }
 0x6f6   :  { %18009 = vst [vmem:[#allocation23_spill] sm:$0xff] %v15623_v49  ;;  %11092 = vmatpush3.msra.mxu0 %v18010_v47  ;;  %11135 = vmatpush3.msra.mxu1 %v15261_v58  ;;  %v15648_v47 = vsub.f32 %v15554_v18, %v18013_v26  ;;  %v18016_v12 = vand.u32 4294901760, %v18015_v62  ;;  %v15661_v58 = vsub.f32 %v15563_v2, %v17386_v57  ;;  %v8098_v26 = vld [vmem:[#allocation7 + $0xb0] sm:$0xff]  ;;  %v18034_v18 = vand.u32 4294901760, %v15288_v1 }
 0x6f7   :  { %18011 = vst [vmem:[#allocation118_spill] sm:$0xff] %v15637_v38  ;;  %11093 = vmatprep.subr.mxu0 %v18012_v53  ;;  %11136 = vmatprep.subr.mxu1 %v15269_v14  ;;  %v15665_v53 = vsub.f32 %v8103_v25, %v15611_v35  ;;  %v18019_v14 = vand.u32 4294901760, %v15248_v13  ;;  %v15674_v62 = vsub.f32 %v15572_v41, %v18020_v24  ;;  %18021 = vst [vmem:[#allocation124_spill] sm:$0xff] %v15678_v61  ;;  %v8097_v25 = vld [vmem:[#allocation7 + $0xa8] sm:$0xff]  ;;  %v8094_v24 = vld [vmem:[#allocation7 + $0x90] sm:$0xff] }
 0x6f8   :  { %11094 = vmatpush3.msra.mxu0 %v18016_v12  ;;  %11137 = vmatpush3.msra.mxu1 %v18018_v10  ;;  %v8266_v12 = vand.u32 4294901760, %v15619_v32  ;;  %v18024_v10 = vand.u32 4294901760, %v18023_v5  ;;  %v8272_v13 = vand.u32 4294901760, %v15633_v52  ;;  %v18025_v32 = vand.u32 4294901760, %v15581_v15  ;;  %v18030_v41 = vld [vmem:[#allocation38_spill] sm:$0xff] }
 0x6f9   :  { %18017 = vst [vmem:[#allocation122_spill] sm:$0xff] %v15665_v53  ;;  %11095 = vmatprep.subr.mxu0 %v18019_v14  ;;  %11138 = vmatprep.subr.mxu1 %v18022_v3  ;;  %v15691_v57 = vsub.f32 %v8100_v37, %v15639_v29  ;;  %v18027_v3 = vand.u32 4294901760, %v15267_v59  ;;  %v8278_v5 = vand.u32 4294901760, %v15648_v47  ;;  %v18028_v52 = vand.u32 4294901760, %v15595_v23  ;;  %v18029_v37 = vld [vmem:[#allocation53_spill] sm:$0xff] }
 0x6fa   :  { %11096 = vmatpush3.msra.mxu0 %v18024_v10  ;;  %v15687_v14 = vsub.f32 %v15581_v15, %v18025_v32  ;;  %11139 = vmatpush3.msra.mxu1 %v15297_v11  ;;  %v15703_v15 = vand.u32 4294901760, %v8098_v26  ;;  %v18031_v2 = vand.u32 4294901760, %v18030_v41  ;;  %v8284_v11 = vand.u32 4294901760, %v15661_v58  ;;  %v8092_v32 = vld [vmem:[#allocation7 + $0x80] sm:$0xff] }
 0x6fb   :  { %18026 = vst [vmem:[#allocation126_spill] sm:$0xff] %v15691_v57  ;;  %11097 = vmatprep.subr.mxu0 %v18027_v3  ;;  %v15700_v10 = vsub.f32 %v15595_v23, %v18028_v52  ;;  %11140 = vmatprep.subr.mxu1 %v18029_v37  ;;  %v18032_v59 = vand.u32 4294901760, %v15609_v34  ;;  %v15715_v52 = vand.u32 4294901760, %v8097_v25  ;;  %v18033_v23 = vld [vmem:[#allocation42_spill] sm:$0xff]  ;;  %v8290_v41 = vand.u32 4294901760, %v15674_v62  ;;  %v8088_v62 = vld [vmem:[#allocation7 + $0x60] sm:$0xff] }
 0x6fc   :  { %11098 = vmatpush3.msra.mxu0 %v18031_v2  ;;  %11141 = vmatpush3.msra.mxu1 %v18033_v23  ;;  %v18035_v2 = vand.u32 4294901760, %v15623_v49  ;;  %v8091_v3 = vld [vmem:[#allocation7 + $0x78] sm:$0xff]  ;;  %v8296_v23 = vand.u32 4294901760, %v15687_v14  ;;  %v18037_v1 = vand.u32 4294901760, %v15637_v38  ;;  %v18039_v7 = vand.u32 4294901760, %v15305_v60 }
 0x6fd   :  { %v15712_v47 = vsub.f32 %v15609_v34, %v18032_v59  ;;  %11099 = vmatprep.subr.mxu0 %v18034_v18  ;;  %v15727_v59 = vand.u32 4294901760, %v8095_v22  ;;  %8255 = vmatprep.subr.mxu1 %v8254_v16  ;;  %v18036_v34 = vand.u32 4294901760, %v15295_v19  ;;  %v18038_v37 = vld [vmem:[#allocation130_spill] sm:$0xff]  ;;  %v8302_v19 = vand.u32 4294901760, %v15700_v10 }
 0x6fe   :  { %v15724_v58 = vsub.f32 %v15623_v49, %v18035_v2  ;;  %v15735_v18 = vsub.f32 %v15637_v38, %v18037_v1  ;;  %v15738_v2 = vand.u32 4294901760, %v8094_v24  ;;  %v8089_v49 = vld [vmem:[#allocation7 + $0x68] sm:$0xff]  ;;  %8071 = vmatmul.mubr.f32.vlgmr.msra.gmra.mxu1 %v18038_v37  ;;  %v15750_v14 = vsub.f32 %v8098_v26, %v15703_v15  ;;  %v8086_v26 = vld [vmem:[#allocation7 + $0x50] sm:$0xff] }
 0x6ff   :  { %11100 = vmatpush3.msra.mxu0 %v18036_v34  ;;  %v18040_v34 = vand.u32 4294901760, %v15652_v27  ;;  %v15752_v1 = vand.u32 4294901760, %v8092_v32  ;;  %8261 = vmatpush1.msra.mxu1 %v8260_v42  ;;  %v18042_v38 = vand.u32 4294901760, %v15315_v20  ;;  %v8308_v60 = vand.u32 4294901760, %v15712_v47 }
 0x700   :  { %11101 = vmatprep.subr.mxu0 %v18039_v7  ;;  %18041 = vst [vmem:[#allocation128_spill] sm:$0xff] %v15750_v14  ;;  %v18043_v7 = vand.u32 4294901760, %v15665_v53  ;;  %8267 = vmatprep.subr.mxu1 %v8266_v12  ;;  %v18045_v63 = vand.u32 4294901760, %v15325_v48  ;;  %v8314_v20 = vand.u32 4294901760, %v15724_v58  ;;  %v15776_v47 = vsub.f32 %v8095_v22, %v15727_v59  ;;  %v8083_v22 = vld [vmem:[#allocation7 + $0x38] sm:$0xff] }
 0x701   :  { %v15747_v16 = vsub.f32 %v15652_v27, %v18040_v34  ;;  %11102 = vmatpush3.msra.mxu0 %v18042_v38  ;;  %v15763_v34 = vsub.f32 %v8097_v25, %v15715_v52  ;;  %v15765_v27 = vand.u32 4294901760, %v8091_v3  ;;  %v18046_v38 = vand.u32 4294901760, %v15678_v61  ;;  %v8085_v25 = vld [vmem:[#allocation7 + $0x48] sm:$0xff]  ;;  %8273 = vmatpush1.msra.mxu1 %v8272_v13 }
 0x702   :  { %v15760_v10 = vsub.f32 %v15665_v53, %v18043_v7  ;;  %11103 = vmatprep.subr.mxu0 %v18045_v63  ;;  %18047 = vst [vmem:[#allocation24_spill] sm:$0xff] %v15776_v47  ;;  %v15778_v7 = vand.u32 4294901760, %v8089_v49  ;;  %v18048_v53 = vand.u32 4294901760, %v15333_v9  ;;  %v8320_v48 = vand.u32 4294901760, %v15735_v18  ;;  %8279 = vmatprep.subr.mxu1 %v8278_v5  ;;  %v8076_v5 = vld [vmem:[#allocation7] sm:$0xff] }
 0x703   :  { %18044 = vst [vmem:[#allocation129_spill] sm:$0xff] %v15763_v34  ;;  %v15773_v42 = vsub.f32 %v15678_v61, %v18046_v38  ;;  %v18049_v63 = vand.u32 4294901760, %v15691_v57  ;;  %v15789_v58 = vsub.f32 %v8094_v24, %v15738_v2  ;;  %v15791_v38 = vand.u32 4294901760, %v8088_v62  ;;  %8285 = vmatpush1.msra.mxu1 %v8284_v11 }
 0x704   :  { %11104 = vmatpush3.msra.mxu0 %v18048_v53  ;;  %v18050_v61 = vand.u32 4294901760, %v15341_v4  ;;  %v8326_v9 = vand.u32 4294901760, %v15747_v16  ;;  %v17420_v53 = vand.u32 4294901760, %v15750_v14  ;;  %v15798_v13 = vsub.f32 %v8092_v32, %v15752_v1  ;;  %v8080_v16 = vld [vmem:[#allocation7 + $0x20] sm:$0xff]  ;;  %8291 = vmatprep.subr.mxu1 %v8290_v41 }
 0x705   :  { %v15786_v12 = vsub.f32 %v15691_v57, %v18049_v63  ;;  %v15800_v18 = vand.u32 4294901760, %v8086_v26  ;;  %v8082_v63 = vld [vmem:[#allocation7 + $0x30] sm:$0xff]  ;;  %v18051_v24 = vand.u32 4294901760, %v15349_v51  ;;  %v8332_v57 = vand.u32 4294901760, %v15760_v10  ;;  %v8079_v10 = vld [vmem:[#allocation7 + $0x18] sm:$0xff]  ;;  %8297 = vmatpush1.msra.mxu1 %v8296_v23 }
 0x706   :  { %11105 = vmatprep.subr.mxu0 %v18050_v61  ;;  %v15807_v4 = vsub.f32 %v8091_v3, %v15765_v27  ;;  %v15809_v61 = vand.u32 4294901760, %v8085_v25  ;;  %v8338_v32 = vand.u32 4294901760, %v15773_v42  ;;  %v15815_v51 = vsub.f32 %v8089_v49, %v15778_v7  ;;  %v8077_v42 = vld [vmem:[#allocation7 + $0x8] sm:$0xff]  ;;  %8303 = vmatprep.subr.mxu1 %v8302_v19 }
 0x707   :  { %11106 = vmatpush3.msra.mxu0 %v18051_v24  ;;  %v15817_v24 = vand.u32 4294901760, %v8083_v22  ;;  %v8344_v3 = vand.u32 4294901760, %v15786_v12  ;;  %v15823_v41 = vsub.f32 %v8088_v62, %v15791_v38  ;;  %v8349_v49 = vsub.f32 %v15750_v14, %v17420_v53  ;;  %8309 = vmatpush1.msra.mxu1 %v8308_v60 }
 0x708   :  { %7967 = vmatmul.mubr.f32.vlgmr.msra.gmra.mxu0 %v18038_v37  ;;  %8143 = vmatprep.subr.mxu0 %v15500_v30  ;;  %v15825_v37 = vand.u32 4294901760, %v8082_v63  ;;  %v15833_v11 = vsub.f32 %v8086_v26, %v15800_v18  ;;  %v15835_v12 = vand.u32 4294901760, %v8080_v16  ;;  %v18053_v62 = vand.u32 4294901760, %v15763_v34 }
 0x709   :  { %8145 = vmatpush1.msra.mxu0 %v15505_v55  ;;  %v15843_v0 = vsub.f32 %v8085_v25, %v15809_v61  ;;  %v15845_v53 = vand.u32 4294901760, %v8079_v10  ;;  %8315 = vmatprep.subr.mxu1 %v8314_v20  ;;  %v18055_v26 = vand.u32 4294901760, %v15776_v47  ;;  %v15853_v14 = vsub.f32 %v8083_v22, %v15817_v24 }
 0x70a   :  { %18052 = vst [vmem:[#allocation48_spill] sm:$0xff] %v15835_v12  ;;  %8147 = vmatprep.subr.mxu0 %v15510_v36  ;;  %v8355_v19 = vsub.f32 %v15763_v34, %v18053_v62  ;;  %v15855_v62 = vand.u32 4294901760, %v8077_v42  ;;  %8321 = vmatpush1.msra.mxu1 %v8320_v48  ;;  %v18057_v25 = vand.u32 4294901760, %v15789_v58  ;;  %v15863_v34 = vsub.f32 %v8082_v63, %v15825_v37 }
 0x70b   :  { %18054 = vst [vmem:[#allocation61_spill] sm:$0xff] %v15845_v53  ;;  %8149 = vmatpush1.msra.mxu0 %v15515_v17  ;;  %v8361_v60 = vsub.f32 %v15776_v47, %v18055_v26  ;;  %18056 = vst [vmem:[#allocation49_spill] sm:$0xff] %v15853_v14  ;;  %v15865_v26 = vand.u32 4294901760, %v8076_v5  ;;  %8327 = vmatprep.subr.mxu1 %v8326_v9  ;;  %v8350_v22 = vand.u32 4294901760, %v8349_v49  ;;  %v18058_v23 = vand.u32 4294901760, %v15798_v13 }
 0x70c   :  { %8151 = vmatprep.subr.mxu0 %v15523_v50  ;;  %v8367_v20 = vsub.f32 %v15789_v58, %v18057_v25  ;;  %v15873_v50 = vsub.f32 %v8080_v16, %v15835_v12  ;;  %8333 = vmatpush1.msra.mxu1 %v8332_v57  ;;  %v8356_v63 = vand.u32 4294901760, %v8355_v19  ;;  %v18059_v25 = vand.u32 4294901760, %v15807_v4 }
 0x70d   :  { %8153 = vmatpush1.msra.mxu0 %v15531_v6  ;;  %v8373_v48 = vsub.f32 %v15798_v13, %v18058_v23  ;;  %v15881_v49 = vsub.f32 %v8079_v10, %v15845_v53  ;;  %8339 = vmatprep.subr.mxu1 %v8338_v32  ;;  %v8362_v23 = vand.u32 4294901760, %v8361_v60  ;;  %v18060_v16 = vand.u32 4294901760, %v15815_v51 }
 0x70e   :  { %8155 = vmatprep.subr.mxu0 %v15539_v28  ;;  %v8379_v9 = vsub.f32 %v15807_v4, %v18059_v25  ;;  %v15889_v19 = vsub.f32 %v8077_v42, %v15855_v62  ;;  %8345 = vmatpush1.msra.mxu1 %v8344_v3  ;;  %v8368_v25 = vand.u32 4294901760, %v8367_v20  ;;  %v18061_v10 = vand.u32 4294901760, %v15823_v41 }
 0x70f   :  { %8157 = vmatpush1.msra.mxu0 %v15547_v8  ;;  %v8385_v57 = vsub.f32 %v15815_v51, %v18060_v16  ;;  %v15897_v60 = vsub.f32 %v8076_v5, %v15865_v26  ;;  %8351 = vmatprep.subr.mxu1 %v8350_v22  ;;  %v8374_v16 = vand.u32 4294901760, %v8373_v48  ;;  %v18062_v42 = vand.u32 4294901760, %v15833_v11 }
 0x710   :  { %8159 = vmatprep.subr.mxu0 %v15556_v21  ;;  %v8391_v32 = vsub.f32 %v15823_v41, %v18061_v10  ;;  %8357 = vmatpush1.msra.mxu1 %v8356_v63  ;;  %v8380_v20 = vand.u32 4294901760, %v8379_v9  ;;  %v18063_v10 = vand.u32 4294901760, %v15843_v0  ;;  %v18064_v48 = vand.u32 4294901760, %v15853_v14 }
 0x711   :  { %8161 = vmatpush1.msra.mxu0 %v15565_v54  ;;  %v8397_v3 = vsub.f32 %v15833_v11, %v18062_v42  ;;  %8363 = vmatprep.subr.mxu1 %v8362_v23  ;;  %v8386_v22 = vand.u32 4294901760, %v8385_v57  ;;  %v18065_v9 = vand.u32 4294901760, %v15863_v34  ;;  %v18066_v57 = vand.u32 4294901760, %v15873_v50 }
 0x712   :  { %8163 = vmatprep.subr.mxu0 %v15574_v31  ;;  %v8403_v46 = vsub.f32 %v15843_v0, %v18063_v10  ;;  %v8409_v42 = vsub.f32 %v15853_v14, %v18064_v48  ;;  %8369 = vmatpush1.msra.mxu1 %v8368_v25  ;;  %v8392_v63 = vand.u32 4294901760, %v8391_v32  ;;  %v18067_v32 = vand.u32 4294901760, %v15881_v49  ;;  %v18068_v14 = vld [vmem:[#allocation20_spill] sm:$0xff] }
 0x713   :  { %8165 = vmatpush1.msra.mxu0 %v15583_v45  ;;  %v8415_v10 = vsub.f32 %v15863_v34, %v18065_v9  ;;  %8375 = vmatprep.subr.mxu1 %v8374_v16  ;;  %v8398_v23 = vand.u32 4294901760, %v8397_v3  ;;  %v8421_v48 = vsub.f32 %v15873_v50, %v18066_v57  ;;  %v5918_v9 = vrot.slane %v15463_v44, %v18068_v14  ;;  %v18091_v14 = vld [vmem:[#allocation124_spill] sm:$0xff] }
 0x714   :  { %8167 = vmatprep.subr.mxu0 %v15597_v43  ;;  %8381 = vmatpush1.msra.mxu1 %v8380_v20  ;;  %v8404_v25 = vand.u32 4294901760, %v8403_v46  ;;  %v8427_v47 = vsub.f32 %v15881_v49, %v18067_v32  ;;  %v8410_v16 = vand.u32 4294901760, %v8409_v42  ;;  %v18069_v3 = vand.u32 4294901760, %v15889_v19 }
 0x715   :  { %8169 = vmatpush1.msra.mxu0 %v15611_v35  ;;  %8387 = vmatprep.subr.mxu1 %v8386_v22  ;;  %v8416_v20 = vand.u32 4294901760, %v8415_v10  ;;  %v18070_v46 = vand.u32 4294901760, %v15897_v60  ;;  %v8422_v44 = vand.u32 4294901760, %v8421_v48  ;;  %v6071_v42 = vadd.f32 %v15471_v56, %v5918_v9 }
 0x716   :  { %8171 = vmatprep.subr.mxu0 %v15625_v33  ;;  %v8433_v5 = vsub.f32 %v15889_v19, %v18069_v3  ;;  %8393 = vmatpush1.msra.mxu1 %v8392_v63  ;;  %v8428_v22 = vand.u32 4294901760, %v8427_v47  ;;  %v18071_v47 = vmov 0.0  }
 0x717   :  { %8173 = vmatpush1.msra.mxu0 %v15639_v29  ;;  %v8439_v57 = vsub.f32 %v15897_v60, %v18070_v46  ;;  %8399 = vmatprep.subr.mxu1 %v8398_v23  ;;  %v6807_v23 = vpop.f32.mrf.mxu1  ;;  %v6464_v48 = vadd.f32 %v15473_v40, %v6071_v42  ;;  %v18077_v46 = vld [vmem:[#allocation55_spill] sm:$0xff]  ;;  %v18081_v42 = vld [vmem:[#allocation106_spill] sm:$0xff] }
 0x718   :  { %8175 = vmatprep.subr.mxu0 %v15703_v15  ;;  %8405 = vmatpush1.msra.mxu1 %v8404_v25  ;;  %v8434_v63 = vand.u32 4294901760, %v8433_v5  ;;  %v18072_v25 = vld [vmem:[#allocation16_spill] sm:$0xff] }
 0x719   :  { %8177 = vmatpush1.msra.mxu0 %v15715_v52  ;;  %8411 = vmatprep.subr.mxu1 %v8410_v16  ;;  %v8440_v10 = vand.u32 4294901760, %v8439_v57  ;;  %v6809_v9 = vpop.f32.mrf.mxu1  ;;  %v18078_v57 = vld [vmem:[#allocation57_spill] sm:$0xff] }
 0x71a   :  { %8179 = vmatprep.subr.mxu0 %v15727_v59  ;;  %8417 = vmatpush1.msra.mxu1 %v8416_v20  ;;  %v18075_v20 = vld [vmem:[#allocation44_spill] sm:$0xff] }
 0x71b   :  { %8181 = vmatpush1.msra.mxu0 %v15738_v2  ;;  %8423 = vmatprep.subr.mxu1 %v8422_v44  ;;  %v18079_v44 = vld [vmem:[#allocation46_spill] sm:$0xff] }
 0x71c   :  { %8183 = vmatprep.subr.mxu0 %v15752_v1  ;;  %8429 = vmatpush1.msra.mxu1 %v8428_v22  ;;  %v6666_v56 = vpop.f32.mrf.mxu0  ;;  %v18080_v22 = vld [vmem:[#allocation59_spill] sm:$0xff] }
 0x71d   :  { %8185 = vmatpush1.msra.mxu0 %v15765_v27  ;;  %8435 = vmatprep.subr.mxu1 %v8434_v63  ;;  %v6667_v5 = vadd.f32 %v6666_v56, %v6464_v48  ;;  %v18082_v63 = vld [vmem:[#allocation121_spill] sm:$0xff]  ;;  %v18086_v56 = vld [vmem:[#allocation116_spill] sm:$0xff] }
 0x71e   :  { %8187 = vmatprep.subr.mxu0 %v15778_v7  ;;  %8441 = vmatpush1.msra.mxu1 %v8440_v10  ;;  %v6668_v32 = vpop.f32.mrf.mxu0  ;;  %v18083_v10 = vld [vmem:[#allocation110_spill] sm:$0xff]  ;;  %v18085_v48 = vld [vmem:[#allocation113_spill] sm:$0xff] }
 0x71f   :  { %8189 = vmatpush1.msra.mxu0 %v15791_v38  ;;  %8474 = vmatprep.mubr.f32.mxu1 %v18071_v47  ;;  %v15953_v40 = vadd.f32 %v6807_v23, %v6667_v5  ;;  %v6669_v16 = vadd.f32 %v6668_v32, %v15485_v39  ;;  %v18076_v39 = vld [vmem:[#allocation19_spill] sm:$0xff]  ;;  %v18084_v23 = vld [vmem:[#allocation112_spill] sm:$0xff]  ;;  %v18088_v32 = vld [vmem:[#allocation118_spill] sm:$0xff] }
 0x720   :  { %8191 = vmatprep.subr.mxu0 %v15800_v18  ;;  %8620 = vmatprep.subr.mxu1 %v15500_v30  ;;  %v18087_v5 = vld [vmem:[#allocation23_spill] sm:$0xff] }
 0x721   :  { %8193 = vmatpush1.msra.mxu0 %v15809_v61  ;;  %8476 = vmatmul.mubr.f32.vlgmr.msra.gmra.mxu1 %v18072_v25  ;;  %18073 = vst [vmem:[#allocation63_spill] sm:$0xff] %v15953_v40  ;;  %v15960_v3 = vadd.f32 %v6809_v9, %v6669_v16  ;;  %v18089_v9 = vld [vmem:[#allocation120_spill] sm:$0xff]  ;;  %v18090_v16 = vld [vmem:[#allocation122_spill] sm:$0xff] }
 0x722   :  { %8622 = vmatpush1.msra.mxu1 %v15505_v55  ;;  %8195 = vmatprep.subr.mxu0 %v15817_v24  ;;  %v18093_v25 = vld [vmem:[#allocation128_spill] sm:$0xff] }
 0x723   :  { %8624 = vmatprep.subr.mxu1 %v15510_v36  ;;  %8197 = vmatpush1.msra.mxu0 %v15825_v37  ;;  %18074 = vst [vmem:[#allocation52_spill] sm:$0xff] %v15960_v3  ;;  %v18094_v3 = vld [vmem:[#allocation129_spill] sm:$0xff]  ;;  %v18095_v40 = vld [vmem:[#allocation24_spill] sm:$0xff] }
 0x724   :  { %8626 = vmatpush1.msra.mxu1 %v15515_v17  ;;  %8199 = vmatprep.subr.mxu0 %v15835_v12 }
 0x725   :  { %8628 = vmatprep.subr.mxu1 %v18075_v20  ;;  %8201 = vmatpush1.msra.mxu0 %v15845_v53 }
 0x726   :  { %8630 = vmatpush1.msra.mxu1 %v15531_v6  ;;  %8203 = vmatprep.subr.mxu0 %v15855_v62 }
 0x727   :  { %8632 = vmatprep.subr.mxu1 %v15539_v28  ;;  %8205 = vmatpush1.msra.mxu0 %v15865_v26 }
 0x728   :  { %8238 = vmatprep.mubr.f32.mxu0 %v18071_v47  ;;  %8634 = vmatpush1.msra.mxu1 %v15547_v8 }
 0x729   :  { %8244 = vmatmul.mubr.f32.vlgmr.msra.gmra.mxu0 %v18076_v39  ;;  %8484 = vmatprep.subr.mxu0 %v18077_v46  ;;  %v18092_v39 = vld [vmem:[#allocation126_spill] sm:$0xff] }
 0x72a   :  { %8636 = vmatprep.subr.mxu1 %v15556_v21  ;;  %8487 = vmatpush1.msra.mxu0 %v18078_v57 }
 0x72b   :  { %8638 = vmatpush1.msra.mxu1 %v15565_v54  ;;  %8490 = vmatprep.subr.mxu0 %v18079_v44 }
 0x72c   :  { %8640 = vmatprep.subr.mxu1 %v15574_v31  ;;  %8493 = vmatpush1.msra.mxu0 %v18080_v22 }
 0x72d   :  { %8642 = vmatpush1.msra.mxu1 %v15583_v45  ;;  %8496 = vmatprep.subr.mxu0 %v18081_v42 }
 0x72e   :  { %8644 = vmatprep.subr.mxu1 %v15597_v43  ;;  %8499 = vmatpush1.msra.mxu0 %v18082_v63 }
 0x72f   :  { %8646 = vmatpush1.msra.mxu1 %v15611_v35  ;;  %8502 = vmatprep.subr.mxu0 %v18083_v10 }
 0x730   :  { %8648 = vmatprep.subr.mxu1 %v15625_v33  ;;  %8505 = vmatpush1.msra.mxu0 %v18084_v23 }
 0x731   :  { %8650 = vmatpush1.msra.mxu1 %v15639_v29  ;;  %8508 = vmatprep.subr.mxu0 %v18085_v48 }
 0x732   :  { %8652 = vmatprep.subr.mxu1 %v15703_v15  ;;  %8511 = vmatpush1.msra.mxu0 %v18086_v56 }
 0x733   :  { %8654 = vmatpush1.msra.mxu1 %v15715_v52  ;;  %8514 = vmatprep.subr.mxu0 %v18087_v5 }
 0x734   :  { %8656 = vmatprep.subr.mxu1 %v15727_v59  ;;  %8517 = vmatpush1.msra.mxu0 %v18088_v32 }
 0x735   :  { %8658 = vmatpush1.msra.mxu1 %v15738_v2  ;;  %8520 = vmatprep.subr.mxu0 %v18089_v9 }
 0x736   :  { %8660 = vmatprep.subr.mxu1 %v15752_v1  ;;  %8523 = vmatpush1.msra.mxu0 %v18090_v16 }
 0x737   :  { %8662 = vmatpush1.msra.mxu1 %v15765_v27  ;;  %8526 = vmatprep.subr.mxu0 %v18091_v14 }
 0x738   :  { %8664 = vmatprep.subr.mxu1 %v15778_v7  ;;  %8529 = vmatpush1.msra.mxu0 %v18092_v39 }
 0x739   :  { %8666 = vmatpush1.msra.mxu1 %v15791_v38  ;;  %8532 = vmatprep.subr.mxu0 %v18093_v25 }
 0x73a   :  { %8668 = vmatprep.subr.mxu1 %v15800_v18  ;;  %8535 = vmatpush1.msra.mxu0 %v18094_v3 }
 0x73b   :  { %8670 = vmatpush1.msra.mxu1 %v15809_v61  ;;  %8538 = vmatprep.subr.mxu0 %v18095_v40 }
 0x73c   :  { %8672 = vmatprep.subr.mxu1 %v15817_v24  ;;  %8541 = vmatpush1.msra.mxu0 %v15789_v58 }
 0x73d   :  { %8674 = vmatpush1.msra.mxu1 %v15825_v37  ;;  %8544 = vmatprep.subr.mxu0 %v15798_v13 }
 0x73e   :  { %8676 = vmatprep.subr.mxu1 %v15835_v12  ;;  %8547 = vmatpush1.msra.mxu0 %v15807_v4  ;;  %v18096_v12 = vld [vmem:[#allocation18_spill] sm:$0xff] }
 0x73f   :  { %8678 = vmatpush1.msra.mxu1 %v15845_v53  ;;  %8550 = vmatprep.subr.mxu0 %v15815_v51  ;;  %v18097_v53 = vld [vmem:[#allocation49_spill] sm:$0xff] }
 0x740   :  { %8680 = vmatprep.subr.mxu1 %v15855_v62  ;;  %8553 = vmatpush1.msra.mxu0 %v15823_v41 }
 0x741   :  { %8682 = vmatpush1.msra.mxu1 %v15865_v26  ;;  %8556 = vmatprep.subr.mxu0 %v15833_v11 }
 0x742   :  { %8715 = vmatprep.mubr.f32.mxu1 %v18071_v47  ;;  %8894 = vmatprep.subr.mxu1 %v15500_v30  ;;  %v18098_v30 = vld [vmem:[#allocation17_spill] sm:$0xff] }
 0x743   :  { %8559 = vmatpush1.msra.mxu0 %v15843_v0  ;;  %8719 = vmatmul.mubr.f32.vlgmr.msra.gmra.mxu1 %v18096_v12 }
 0x744   :  { %8896 = vmatpush1.msra.mxu1 %v15505_v55  ;;  %8562 = vmatprep.subr.mxu0 %v18097_v53  ;;  %v18099_v55 = vand.u32 4294901760, %v18077_v46  ;;  %v8117_v46 = vld [vmem:[#allocation7 + $0x148] sm:$0xff] }
 0x745   :  { %8898 = vmatprep.subr.mxu1 %v15510_v36  ;;  %8565 = vmatpush1.msra.mxu0 %v15863_v34  ;;  %v18100_v36 = vand.u32 4294901760, %v18078_v57 }
 0x746   :  { %8900 = vmatpush1.msra.mxu1 %v15515_v17  ;;  %8568 = vmatprep.subr.mxu0 %v15873_v50  ;;  %v18101_v17 = vand.u32 4294901760, %v18079_v44  ;;  %v8114_v44 = vld [vmem:[#allocation7 + $0x130] sm:$0xff] }
 0x747   :  { %8902 = vmatprep.subr.mxu1 %v18075_v20  ;;  %8571 = vmatpush1.msra.mxu0 %v15881_v49  ;;  %v18106_v20 = vand.u32 4294901760, %v18084_v23  ;;  %v18113_v23 = vand.u32 4294901760, %v18091_v14 }
 0x748   :  { %8904 = vmatpush1.msra.mxu1 %v15531_v6  ;;  %8574 = vmatprep.subr.mxu0 %v15889_v19  ;;  %v18102_v6 = vand.u32 4294901760, %v18080_v22 }
 0x749   :  { %8906 = vmatprep.subr.mxu1 %v15539_v28  ;;  %8577 = vmatpush1.msra.mxu0 %v15897_v60  ;;  %v18103_v28 = vand.u32 4294901760, %v18081_v42  ;;  %v18111_v42 = vand.u32 4294901760, %v18089_v9  ;;  %v8102_v9 = vld [vmem:[#allocation7 + $0xd0] sm:$0xff] }
 0x74a   :  { %8610 = vmatprep.mubr.f32.mxu0 %v18071_v47  ;;  %8908 = vmatpush1.msra.mxu1 %v15547_v8  ;;  %v8123_v8 = vld [vmem:[#allocation7 + $0x178] sm:$0xff] }
 0x74b   :  { %8613 = vmatmul.mubr.f32.vlgmr.msra.gmra.mxu0 %v18098_v30  ;;  %8728 = vmatprep.subr.mxu0 %v18099_v55 }
 0x74c   :  { %8910 = vmatprep.subr.mxu1 %v15556_v21  ;;  %8732 = vmatpush1.msra.mxu0 %v18100_v36  ;;  %v18104_v21 = vand.u32 4294901760, %v18082_v63  ;;  %v16086_v63 = vand.u32 4294901760, %v8114_v44 }
 0x74d   :  { %8912 = vmatpush1.msra.mxu1 %v15565_v54  ;;  %8736 = vmatprep.subr.mxu0 %v18101_v17  ;;  %v18105_v54 = vand.u32 4294901760, %v18083_v10  ;;  %v8111_v10 = vld [vmem:[#allocation7 + $0x118] sm:$0xff]  ;;  %v18121_v17 = vand.u32 4294901760, %v15807_v4  ;;  %v18124_v4 = vand.u32 4294901760, %v15823_v41 }
 0x74e   :  { %8914 = vmatprep.subr.mxu1 %v15574_v31  ;;  %8740 = vmatpush1.msra.mxu0 %v18102_v6  ;;  %v8120_v31 = vld [vmem:[#allocation7 + $0x160] sm:$0xff]  ;;  %v16110_v14 = vand.u32 4294901760, %v8111_v10 }
 0x74f   :  { %8916 = vmatpush1.msra.mxu1 %v15583_v45  ;;  %8744 = vmatprep.subr.mxu0 %v18103_v28  ;;  %v16062_v45 = vand.u32 4294901760, %v8123_v8  ;;  %v16070_v57 = vand.u32 4294901760, %v8120_v31  ;;  %v16143_v28 = vand.u32 4294901760, %v8102_v9 }
 0x750   :  { %8918 = vmatprep.subr.mxu1 %v15597_v43  ;;  %8748 = vmatpush1.msra.mxu0 %v18104_v21  ;;  %v18107_v43 = vand.u32 4294901760, %v18085_v48 }
 0x751   :  { %8920 = vmatpush1.msra.mxu1 %v15611_v35  ;;  %8752 = vmatprep.subr.mxu0 %v18105_v54  ;;  %v18108_v35 = vand.u32 4294901760, %v18086_v56  ;;  %v16079_v22 = vsub.f32 %v8123_v8, %v16062_v45  ;;  %v8108_v56 = vld [vmem:[#allocation7 + $0x100] sm:$0xff]  ;;  %v18123_v8 = vand.u32 4294901760, %v15815_v51 }
 0x752   :  { %8922 = vmatprep.subr.mxu1 %v15625_v33  ;;  %8756 = vmatpush1.msra.mxu0 %v18106_v20  ;;  %v18109_v33 = vand.u32 4294901760, %v18087_v5  ;;  %v18115_v5 = vand.u32 4294901760, %v18093_v25  ;;  %v16119_v25 = vand.u32 4294901760, %v8108_v56  ;;  %v8096_v51 = vld [vmem:[#allocation7 + $0xa0] sm:$0xff] }
 0x753   :  { %8924 = vmatpush1.msra.mxu1 %v15639_v29  ;;  %8760 = vmatprep.subr.mxu0 %v18107_v43  ;;  %v18110_v29 = vand.u32 4294901760, %v18088_v32  ;;  %v9091_v48 = vand.u32 4294901760, %v16079_v22  ;;  %v18125_v43 = vld [vmem:[#allocation63_spill] sm:$0xff] }
 0x754   :  { %8926 = vmatprep.subr.mxu1 %v15703_v15  ;;  %8764 = vmatpush1.msra.mxu0 %v18108_v35  ;;  %v16081_v15 = vand.u32 4294901760, %v8117_v46  ;;  %v16149_v54 = vsub.f32 %v8108_v56, %v16119_v25  ;;  %v18128_v56 = vand.u32 4294901760, %v15843_v0  ;;  %v18131_v0 = vand.u32 4294901760, %v15863_v34 }
 0x755   :  { %8928 = vmatpush1.msra.mxu1 %v15715_v52  ;;  %8768 = vmatprep.subr.mxu0 %v18109_v33  ;;  %v18112_v52 = vand.u32 4294901760, %v18090_v16  ;;  %v18118_v16 = vand.u32 4294901760, %v15789_v58  ;;  %v18120_v58 = vld [vmem:[#allocation48_spill] sm:$0xff]  ;;  %v18133_v34 = vand.u32 4294901760, %v15881_v49  ;;  %v18135_v49 = vand.u32 4294901760, %v15897_v60 }
 0x756   :  { %8930 = vmatprep.subr.mxu1 %v15727_v59  ;;  %8772 = vmatpush1.msra.mxu0 %v18110_v29  ;;  %v16092_v59 = vsub.f32 %v8120_v31, %v16070_v57  ;;  %v7209_v36 = vpop.f32.mrf.mxu1 }
 0x757   :  { %8932 = vmatpush1.msra.mxu1 %v15738_v2  ;;  %8776 = vmatprep.subr.mxu0 %v18111_v42  ;;  %v18114_v2 = vand.u32 4294901760, %v18092_v39  ;;  %v18116_v39 = vand.u32 4294901760, %v18094_v3 }
 0x758   :  { %8934 = vmatprep.subr.mxu1 %v15752_v1  ;;  %8780 = vmatpush1.msra.mxu0 %v18112_v52  ;;  %v16102_v1 = vsub.f32 %v8117_v46, %v16081_v15  ;;  %v9098_v32 = vand.u32 4294901760, %v16092_v59  ;;  %v7211_v29 = vpop.f32.mrf.mxu1 }
 0x759   :  { %8936 = vmatpush1.msra.mxu1 %v15765_v27  ;;  %8784 = vmatprep.subr.mxu0 %v18113_v23  ;;  %v16108_v27 = vsub.f32 %v8114_v44, %v16086_v63  ;;  %v18126_v44 = vand.u32 4294901760, %v15833_v11  ;;  %v16176_v23 = vsub.f32 %v8102_v9, %v16143_v28 }
 0x75a   :  { %8938 = vmatprep.subr.mxu1 %v15778_v7  ;;  %8788 = vmatpush1.msra.mxu0 %v18114_v2  ;;  %v8105_v7 = vld [vmem:[#allocation7 + $0xe8] sm:$0xff]  ;;  %v9105_v3 = vand.u32 4294901760, %v16102_v1  ;;  %v9099_v6 = vsub.f32 %v16092_v59, %v9098_v32 }
 0x75b   :  { %8940 = vmatpush1.msra.mxu1 %v15791_v38  ;;  %8792 = vmatprep.subr.mxu0 %v18115_v5  ;;  %v18117_v38 = vand.u32 4294901760, %v18095_v40  ;;  %v16128_v55 = vand.u32 4294901760, %v8105_v7  ;;  %v9112_v40 = vand.u32 4294901760, %v16108_v27  ;;  %v8093_v2 = vld [vmem:[#allocation7 + $0x88] sm:$0xff] }
 0x75c   :  { %8942 = vmatprep.subr.mxu1 %v15800_v18  ;;  %8796 = vmatpush1.msra.mxu0 %v18116_v39  ;;  %v9092_v18 = vsub.f32 %v16079_v22, %v9091_v48  ;;  %v9106_v20 = vsub.f32 %v16102_v1, %v9105_v3  ;;  %v9100_v52 = vand.u32 4294901760, %v9099_v6  ;;  %v18129_v5 = vld [vmem:[#allocation16_spill] sm:$0xff]  ;;  %v16182_v39 = vand.u32 4294901760, %v8096_v51 }
 0x75d   :  { %8944 = vmatpush1.msra.mxu1 %v15809_v61  ;;  %8800 = vmatprep.subr.mxu0 %v18117_v38  ;;  %v18119_v61 = vand.u32 4294901760, %v15798_v13  ;;  %v18122_v13 = vld [vmem:[#allocation61_spill] sm:$0xff]  ;;  %v16159_v35 = vsub.f32 %v8105_v7, %v16128_v55  ;;  %v9113_v41 = vsub.f32 %v16108_v27, %v9112_v40  ;;  %v9126_v7 = vand.u32 4294901760, %v16149_v54 }
 0x75e   :  { %8946 = vmatprep.subr.mxu1 %v15817_v24  ;;  %8804 = vmatpush1.msra.mxu0 %v18118_v16  ;;  %v16135_v24 = vsub.f32 %v8111_v10, %v16110_v14  ;;  %v9093_v31 = vand.u32 4294901760, %v9092_v18  ;;  %v18130_v38 = vand.u32 4294901760, %v18097_v53  ;;  %v9107_v16 = vand.u32 4294901760, %v9106_v20  ;;  %v8084_v20 = vld [vmem:[#allocation7 + $0x40] sm:$0xff] }
 0x75f   :  { %8948 = vmatpush1.msra.mxu1 %v15825_v37  ;;  %8808 = vmatprep.subr.mxu0 %v18119_v61  ;;  %v8099_v37 = vld [vmem:[#allocation7 + $0xb8] sm:$0xff]  ;;  %v9133_v9 = vand.u32 4294901760, %v16159_v35  ;;  %v8090_v61 = vld [vmem:[#allocation7 + $0x70] sm:$0xff]  ;;  %v16198_v53 = vand.u32 4294901760, %v8093_v2  ;;  %v9114_v6 = vand.u32 4294901760, %v9113_v41  ;;  %v8081_v41 = vld [vmem:[#allocation7 + $0x28] sm:$0xff] }
 0x760   :  { %8950 = vmatprep.subr.mxu1 %v18120_v58  ;;  %8812 = vmatpush1.msra.mxu0 %v18121_v17  ;;  %v16168_v42 = vand.u32 4294901760, %v8099_v37  ;;  %v18132_v17 = vand.u32 4294901760, %v15873_v50  ;;  %v18134_v50 = vand.u32 4294901760, %v15889_v19 }
 0x761   :  { %8952 = vmatpush1.msra.mxu1 %v18122_v13  ;;  %8816 = vmatprep.subr.mxu0 %v18123_v8  ;;  %v7072_v21 = vpop.f32.mrf.mxu0  ;;  %v9140_v13 = vand.u32 4294901760, %v16176_v23  ;;  %v8087_v8 = vld [vmem:[#allocation7 + $0x58] sm:$0xff] }
 0x762   :  { %8954 = vmatprep.subr.mxu1 %v15855_v62  ;;  %8820 = vmatpush1.msra.mxu0 %v18124_v4  ;;  %v7073_v46 = vadd.f32 %v7072_v21, %v18125_v43  ;;  %v9119_v62 = vand.u32 4294901760, %v16135_v24  ;;  %v16196_v58 = vsub.f32 %v8099_v37, %v16168_v42  ;;  %v9127_v37 = vsub.f32 %v16149_v54, %v9126_v7 }
 0x763   :  { %8956 = vmatpush1.msra.mxu1 %v15865_v26  ;;  %8824 = vmatprep.subr.mxu0 %v18126_v44  ;;  %v7074_v33 = vpop.f32.mrf.mxu0  ;;  %v18127_v26 = vld [vmem:[#allocation52_spill] sm:$0xff]  ;;  %v16210_v21 = vsub.f32 %v8096_v51, %v16182_v39  ;;  %v16212_v4 = vand.u32 4294901760, %v8090_v61  ;;  %v16224_v51 = vsub.f32 %v8093_v2, %v16198_v53  ;;  %v16226_v44 = vand.u32 4294901760, %v8087_v8 }
 0x764   :  { %8989 = vmatprep.mubr.f32.mxu1 %v18071_v47  ;;  %12206 = vmatprep.subr.mxu1 %v18071_v47  ;;  %v16172_v10 = vadd.f32 %v7209_v36, %v7073_v46  ;;  %v7075_v11 = vadd.f32 %v7074_v33, %v18127_v26  ;;  %v9120_v36 = vsub.f32 %v16135_v24, %v9119_v62  ;;  %v9147_v46 = vand.u32 4294901760, %v16196_v58 }
 0x765   :  { %8828 = vmatpush1.msra.mxu0 %v18128_v56  ;;  %8991 = vmatmul.mubr.f32.vlgmr.msra.gmra.mxu1 %v18129_v5  ;;  %v9141_v19 = vsub.f32 %v16176_v23, %v9140_v13  ;;  %v9128_v60 = vand.u32 4294901760, %v9127_v37  ;;  %v9154_v33 = vand.u32 4294901760, %v16210_v21  ;;  %v9161_v56 = vand.u32 4294901760, %v16224_v51 }
 0x766   :  { %12207 = vmatpush3.msra.mxu1 %v9093_v31  ;;  %8832 = vmatprep.subr.mxu0 %v18130_v38  ;;  %v16186_v18 = vadd.f32 %v7211_v29, %v7075_v11  ;;  %v9134_v31 = vsub.f32 %v16159_v35, %v9133_v9  ;;  %v9121_v43 = vand.u32 4294901760, %v9120_v36  ;;  %v16236_v29 = vsub.f32 %v8090_v61, %v16212_v4  ;;  %v8078_v11 = vld [vmem:[#allocation7 + $0x10] sm:$0xff] }
 0x767   :  { %12208 = vmatprep.subr.mxu1 %v18071_v47  ;;  %8836 = vmatpush1.msra.mxu0 %v18131_v0  ;;  %v9148_v2 = vsub.f32 %v16196_v58, %v9147_v46  ;;  %v16248_v38 = vsub.f32 %v8087_v8, %v16226_v44  ;;  %v9142_v61 = vand.u32 4294901760, %v9141_v19  ;;  %v9155_v0 = vsub.f32 %v16210_v21, %v9154_v33 }
 0x768   :  { %12209 = vmatpush3.msra.mxu1 %v9100_v52  ;;  %8840 = vmatprep.subr.mxu0 %v18132_v17  ;;  %v16238_v52 = vand.u32 4294901760, %v8084_v20  ;;  %v9135_v26 = vand.u32 4294901760, %v9134_v31  ;;  %v9168_v36 = vand.u32 4294901760, %v16236_v29 }
 0x769   :  { %12210 = vmatprep.subr.mxu1 %v18071_v47  ;;  %8844 = vmatpush1.msra.mxu0 %v18133_v34  ;;  %v9149_v8 = vand.u32 4294901760, %v9148_v2  ;;  %v9162_v34 = vsub.f32 %v16224_v51, %v9161_v56  ;;  %v9175_v37 = vand.u32 4294901760, %v16248_v38  ;;  %v9156_v31 = vand.u32 4294901760, %v9155_v0 }
 0x76a   :  { %12211 = vmatpush3.msra.mxu1 %v9107_v16  ;;  %8848 = vmatprep.subr.mxu0 %v18134_v50  ;;  %v16250_v16 = vand.u32 4294901760, %v8081_v41  ;;  %v16260_v17 = vsub.f32 %v8084_v20, %v16238_v52  ;;  %v9169_v20 = vsub.f32 %v16236_v29, %v9168_v36 }
 0x76b   :  { %12212 = vmatprep.subr.mxu1 %v18071_v47  ;;  %8852 = vmatpush1.msra.mxu0 %v18135_v49  ;;  %v9163_v19 = vand.u32 4294901760, %v9162_v34 }
 0x76c   :  { %8885 = vmatprep.mubr.f32.mxu0 %v18071_v47  ;;  %12213 = vmatpush3.msra.mxu1 %v9114_v6  ;;  %v16262_v6 = vand.u32 4294901760, %v8078_v11  ;;  %v16272_v50 = vsub.f32 %v8081_v41, %v16250_v16  ;;  %v9182_v49 = vand.u32 4294901760, %v16260_v17  ;;  %v9176_v41 = vsub.f32 %v16248_v38, %v9175_v37 }
 0x76d   :  { %8887 = vmatmul.mubr.f32.vlgmr.msra.gmra.mxu0 %v18129_v5  ;;  %12171 = vmatprep.subr.mxu0 %v18071_v47 }
 0x76e   :  { %12214 = vmatprep.subr.mxu1 %v18071_v47  ;;  %12172 = vmatpush3.msra.mxu0 %v16062_v45 }
 0x76f   :  { %12215 = vmatpush3.msra.mxu1 %v9121_v43  ;;  %12173 = vmatprep.subr.mxu0 %v18071_v47  ;;  %v16282_v43 = vsub.f32 %v8078_v11, %v16262_v6  ;;  %v9183_v11 = vsub.f32 %v16260_v17, %v9182_v49 }
 0x770   :  { %12216 = vmatprep.subr.mxu1 %v18071_v47  ;;  %12174 = vmatpush3.msra.mxu0 %v16070_v57 }
 0x771   :  { %12217 = vmatpush3.msra.mxu1 %v9128_v60  ;;  %12175 = vmatprep.subr.mxu0 %v18071_v47  ;;  %v9189_v60 = vand.u32 4294901760, %v16272_v50  ;;  %v9196_v2 = vand.u32 4294901760, %v16282_v43  ;;  %v9184_v34 = vand.u32 4294901760, %v9183_v11 }
 0x772   :  { %12218 = vmatprep.subr.mxu1 %v18071_v47  ;;  %12176 = vmatpush3.msra.mxu0 %v16081_v15 }
 0x773   :  { %12219 = vmatpush3.msra.mxu1 %v9135_v26  ;;  %12177 = vmatprep.subr.mxu0 %v18071_v47  ;;  %v9170_v26 = vand.u32 4294901760, %v9169_v20  ;;  %v9190_v0 = vsub.f32 %v16272_v50, %v9189_v60 }
 0x774   :  { %12220 = vmatprep.subr.mxu1 %v18071_v47  ;;  %12178 = vmatpush3.msra.mxu0 %v16086_v63 }
 0x775   :  { %12221 = vmatpush3.msra.mxu1 %v9142_v61  ;;  %12179 = vmatprep.subr.mxu0 %v18071_v47  ;;  %v9177_v61 = vand.u32 4294901760, %v9176_v41  ;;  %v9191_v41 = vand.u32 4294901760, %v9190_v0  ;;  %v18136_v0 = vld [vmem:[#allocation22_spill] sm:$0xff] }
 0x776   :  { %12222 = vmatprep.subr.mxu1 %v18071_v47  ;;  %12180 = vmatpush3.msra.mxu0 %v16110_v14 }
 0x777   :  { %12223 = vmatpush3.msra.mxu1 %v9149_v8  ;;  %12181 = vmatprep.subr.mxu0 %v18071_v47 }
 0x778   :  { %12224 = vmatprep.subr.mxu1 %v18071_v47  ;;  %12182 = vmatpush3.msra.mxu0 %v16119_v25 }
 0x779   :  { %12225 = vmatpush3.msra.mxu1 %v9156_v31  ;;  %12183 = vmatprep.subr.mxu0 %v18071_v47  ;;  %v11002_v8 = vpop.f32.mrf.mxu1  ;;  %v9197_v31 = vsub.f32 %v16282_v43, %v9196_v2 }
 0x77a   :  { %12226 = vmatprep.subr.mxu1 %v18071_v47  ;;  %12184 = vmatpush3.msra.mxu0 %v16128_v55 }
 0x77b   :  { %12227 = vmatpush3.msra.mxu1 %v9163_v19  ;;  %12185 = vmatprep.subr.mxu0 %v18071_v47  ;;  %v11003_v20 = vpop.f32.mrf.mxu1 }
 0x77c   :  { %12228 = vmatprep.subr.mxu1 %v18071_v47  ;;  %12186 = vmatpush3.msra.mxu0 %v16143_v28  ;;  %v11004_v19 = vadd.f32 %v11003_v20, %v11002_v8 }
 0x77d   :  { %12229 = vmatpush3.msra.mxu1 %v9170_v26  ;;  %12187 = vmatprep.subr.mxu0 %v18071_v47  ;;  %v9198_v26 = vand.u32 4294901760, %v9197_v31 }
 0x77e   :  { %12230 = vmatprep.subr.mxu1 %v18071_v47  ;;  %12188 = vmatpush3.msra.mxu0 %v16168_v42 }
 0x77f   :  { %12231 = vmatpush3.msra.mxu1 %v9177_v61  ;;  %12189 = vmatprep.subr.mxu0 %v18071_v47  ;;  %v12443_v61 = vld [vmem:[#allocation9] ss:$2 sm:$0x7] }
 0x780   :  { %12232 = vmatprep.subr.mxu1 %v18071_v47  ;;  %12190 = vmatpush3.msra.mxu0 %v16182_v39  ;;  %v5926_v8 = vrot.slane %v12443_v61, %v18136_v0 }
 0x781   :  { %12233 = vmatpush3.msra.mxu1 %v9184_v34  ;;  %12191 = vmatprep.subr.mxu0 %v18071_v47 }
 0x782   :  { %12234 = vmatprep.subr.mxu1 %v18071_v47  ;;  %12192 = vmatpush3.msra.mxu0 %v16198_v53  ;;  %v10967_v11 = vpop.f32.mrf.mxu0 }
 0x783   :  { %12235 = vmatpush3.msra.mxu1 %v9191_v41  ;;  %12193 = vmatprep.subr.mxu0 %v18071_v47 }
 0x784   :  { %12236 = vmatprep.subr.mxu1 %v18071_v47  ;;  %12194 = vmatpush3.msra.mxu0 %v16212_v4  ;;  %v10968_v34 = vpop.f32.mrf.mxu0 }
 0x785   :  { %12237 = vmatpush3.msra.mxu1 %v9198_v26  ;;  %12195 = vmatprep.subr.mxu0 %v18071_v47  ;;  %v10969_v31 = vadd.f32 %v10968_v34, %v10967_v11  ;;  %v18137_v26 = vld [vmem:[#allocation19_spill] sm:$0xff] }
 0x786   :  { %12238 = vmatprep.mubr.msk.f32.mxu1 %vm12584_vm0, %v18071_v47  ;;  %12276 = vmatprep.subr.mxu1 %v18071_v47 }
 0x787   :  { %12196 = vmatpush3.msra.mxu0 %v16226_v44  ;;  %12239 = vmatmul.mubr.f32.vlgmr.msra.gmra.mxu1 %v18129_v5  ;;  %v7323_v20 = vadd.f32 %v10969_v31, %v5926_v8 }
 0x788   :  { %12277 = vmatpush3.msra.mxu1 %v16062_v45  ;;  %12197 = vmatprep.subr.mxu0 %v18071_v47 }
 0x789   :  { %12278 = vmatprep.subr.mxu1 %v18071_v47  ;;  %12198 = vmatpush3.msra.mxu0 %v16238_v52  ;;  %v16334_v41 = vadd.f32 %v11004_v19, %v7323_v20 }
 0x78a   :  { %12279 = vmatpush3.msra.mxu1 %v16070_v57  ;;  %12199 = vmatprep.subr.mxu0 %v18071_v47 }
 0x78b   :  { %12280 = vmatprep.subr.mxu1 %v18071_v47  ;;  %12200 = vmatpush3.msra.mxu0 %v16250_v16 }
 0x78c   :  { %12281 = vmatpush3.msra.mxu1 %v16081_v15  ;;  %12201 = vmatprep.subr.mxu0 %v18071_v47 }
 0x78d   :  { %12282 = vmatprep.subr.mxu1 %v18071_v47  ;;  %12202 = vmatpush3.msra.mxu0 %v16262_v6 }
 0x78e   :  { %12203 = vmatprep.mubr.msk.f32.mxu0 %vm12584_vm0, %v18071_v47  ;;  %12283 = vmatpush3.msra.mxu1 %v16086_v63 }
 0x78f   :  { %12204 = vmatmul.mubr.f32.vlgmr.msra.gmra.mxu0 %v18137_v26  ;;  %12241 = vmatprep.subr.mxu0 %v18071_v47 }
 0x790   :  { %12284 = vmatprep.subr.mxu1 %v18071_v47  ;;  %12242 = vmatpush3.msra.mxu0 %v16079_v22 }
 0x791   :  { %12285 = vmatpush3.msra.mxu1 %v16110_v14  ;;  %12243 = vmatprep.subr.mxu0 %v18071_v47 }
 0x792   :  { %12286 = vmatprep.subr.mxu1 %v18071_v47  ;;  %12244 = vmatpush3.msra.mxu0 %v16092_v59 }
 0x793   :  { %12287 = vmatpush3.msra.mxu1 %v16119_v25  ;;  %12245 = vmatprep.subr.mxu0 %v18071_v47 }
 0x794   :  { %12288 = vmatprep.subr.mxu1 %v18071_v47  ;;  %12246 = vmatpush3.msra.mxu0 %v16102_v1  ;;  %v18139_v1 = vld [vmem:[#allocation137_spill] sm:$0xff] }
 0x795   :  { %12289 = vmatpush3.msra.mxu1 %v16128_v55  ;;  %12247 = vmatprep.subr.mxu0 %v18071_v47 }
 0x796   :  { %12290 = vmatprep.subr.mxu1 %v18071_v47  ;;  %12248 = vmatpush3.msra.mxu0 %v16108_v27  ;;  %v9690_v27 = vld [vmem:[#allocation10 + $0xf8] sm:$0xff] }
 0x797   :  { %12291 = vmatpush3.msra.mxu1 %v16143_v28  ;;  %12249 = vmatprep.subr.mxu0 %v18071_v47 }
 0x798   :  { %12292 = vmatprep.subr.mxu1 %v18071_v47  ;;  %12250 = vmatpush3.msra.mxu0 %v16135_v24 }
 0x799   :  { %12293 = vmatpush3.msra.mxu1 %v16168_v42  ;;  %12251 = vmatprep.subr.mxu0 %v18071_v47 }
 0x79a   :  { %12294 = vmatprep.subr.mxu1 %v18071_v47  ;;  %12252 = vmatpush3.msra.mxu0 %v16149_v54 }
 0x79b   :  { %12295 = vmatpush3.msra.mxu1 %v16182_v39  ;;  %12253 = vmatprep.subr.mxu0 %v18071_v47  ;;  %v11072_v19 = vpop.f32.mrf.mxu1 }
 0x79c   :  { %12296 = vmatprep.subr.mxu1 %v18071_v47  ;;  %12254 = vmatpush3.msra.mxu0 %v16159_v35 }
 0x79d   :  { %12297 = vmatpush3.msra.mxu1 %v16198_v53  ;;  %12255 = vmatprep.subr.mxu0 %v18071_v47  ;;  %v11073_v11 = vpop.f32.mrf.mxu1 }
 0x79e   :  { %12298 = vmatprep.subr.mxu1 %v18071_v47  ;;  %12256 = vmatpush3.msra.mxu0 %v16176_v23  ;;  %v11074_v61 = vadd.f32 %v11073_v11, %v11072_v19 }
 0x79f   :  { %12299 = vmatpush3.msra.mxu1 %v16212_v4  ;;  %12257 = vmatprep.subr.mxu0 %v18071_v47 }
 0x7a0   :  { %12300 = vmatprep.subr.mxu1 %v18071_v47  ;;  %12258 = vmatpush3.msra.mxu0 %v16196_v58 }
 0x7a1   :  { %12301 = vmatpush3.msra.mxu1 %v16226_v44  ;;  %12259 = vmatprep.subr.mxu0 %v18071_v47 }
 0x7a2   :  { %12302 = vmatprep.subr.mxu1 %v18071_v47  ;;  %12260 = vmatpush3.msra.mxu0 %v16210_v21 }
 0x7a3   :  { %12303 = vmatpush3.msra.mxu1 %v16238_v52  ;;  %12261 = vmatprep.subr.mxu0 %v18071_v47 }
 0x7a4   :  { %12304 = vmatprep.subr.mxu1 %v18071_v47  ;;  %12262 = vmatpush3.msra.mxu0 %v16224_v51  ;;  %v11037_v8 = vpop.f32.mrf.mxu0 }
 0x7a5   :  { %12305 = vmatpush3.msra.mxu1 %v16250_v16  ;;  %12263 = vmatprep.subr.mxu0 %v18071_v47 }
 0x7a6   :  { %12306 = vmatprep.subr.mxu1 %v18071_v47  ;;  %12264 = vmatpush3.msra.mxu0 %v16236_v29  ;;  %v11038_v34 = vpop.f32.mrf.mxu0  ;;  %v9687_v29 = vld [vmem:[#allocation10 + $0xe0] sm:$0xff] }
 0x7a7   :  { %12307 = vmatpush3.msra.mxu1 %v16262_v6  ;;  %12265 = vmatprep.subr.mxu0 %v18071_v47  ;;  %v11039_v31 = vadd.f32 %v11038_v34, %v11037_v8 }
 0x7a8   :  { %12308 = vmatprep.mubr.msk.f32.mxu1 %vm12584_vm0, %v18071_v47  ;;  %12346 = vmatprep.subr.mxu1 %v18071_v47 }
 0x7a9   :  { %12266 = vmatpush3.msra.mxu0 %v16248_v38  ;;  %12309 = vmatmul.mubr.f32.vlgmr.msra.gmra.mxu1 %v18096_v12  ;;  %v7693_v20 = vadd.f32 %v11039_v31, %v16334_v41  ;;  %v9671_v38 = vld [vmem:[#allocation10 + $0x60] sm:$0xff]  ;;  %v9685_v41 = vld [vmem:[#allocation10 + $0xd0] sm:$0xff] }
 0x7aa   :  { %12347 = vmatpush3.msra.mxu1 %v16062_v45  ;;  %12267 = vmatprep.subr.mxu0 %v18071_v47 }
 0x7ab   :  { %12348 = vmatprep.subr.mxu1 %v18071_v47  ;;  %12268 = vmatpush3.msra.mxu0 %v16260_v17  ;;  %v16407_v26 = vadd.f32 %v11074_v61, %v7693_v20  ;;  %v9686_v17 = vld [vmem:[#allocation10 + $0xd8] sm:$0xff]  ;;  %v9669_v20 = vld [vmem:[#allocation10 + $0x50] sm:$0xff] }
 0x7ac   :  { %12349 = vmatpush3.msra.mxu1 %v16070_v57  ;;  %12269 = vmatprep.subr.mxu0 %v18071_v47 }
 0x7ad   :  { %12350 = vmatprep.subr.mxu1 %v18071_v47  ;;  %12270 = vmatpush3.msra.mxu0 %v16272_v50  ;;  %v16562_v50 = vand.u32 4294901760, %v9686_v17 }
 0x7ae   :  { %12351 = vmatpush3.msra.mxu1 %v16081_v15  ;;  %12271 = vmatprep.subr.mxu0 %v18071_v47 }
 0x7af   :  { %12352 = vmatprep.subr.mxu1 %v18071_v47  ;;  %12272 = vmatpush3.msra.mxu0 %v16282_v43  ;;  %v16582_v34 = vsub.f32 %v9686_v17, %v16562_v50 }
 0x7b0   :  { %12273 = vmatprep.mubr.msk.f32.mxu0 %vm12584_vm0, %v18071_v47  ;;  %12353 = vmatpush3.msra.mxu1 %v16086_v63  ;;  %v18138_v63 = vld [vmem:[#allocation133_spill] sm:$0xff] }
 0x7b1   :  { %12274 = vmatmul.mubr.f32.vlgmr.msra.gmra.mxu0 %v18098_v30  ;;  %12311 = vmatprep.subr.mxu0 %v18071_v47 }
 0x7b2   :  { %12354 = vmatprep.subr.mxu1 %v18071_v47  ;;  %12312 = vmatpush3.msra.mxu0 %v9091_v48 }
 0x7b3   :  { %12355 = vmatpush3.msra.mxu1 %v16110_v14  ;;  %12313 = vmatprep.subr.mxu0 %v18071_v47  ;;  %v9674_v14 = vld [vmem:[#allocation10 + $0x78] sm:$0xff] }
 0x7b4   :  { %12356 = vmatprep.subr.mxu1 %v18071_v47  ;;  %12314 = vmatpush3.msra.mxu0 %v9098_v32  ;;  %v9689_v32 = vld [vmem:[#allocation10 + $0xf0] sm:$0xff] }
 0x7b5   :  { %12357 = vmatpush3.msra.mxu1 %v16119_v25  ;;  %12315 = vmatprep.subr.mxu0 %v18071_v47  ;;  %v16502_v25 = vand.u32 4294901760, %v9690_v27 }
 0x7b6   :  { %12358 = vmatprep.subr.mxu1 %v18071_v47  ;;  %12316 = vmatpush3.msra.mxu0 %v9105_v3  ;;  %v16504_v3 = vand.u32 4294901760, %v9674_v14 }
 0x7b7   :  { %12359 = vmatpush3.msra.mxu1 %v16128_v55  ;;  %12317 = vmatprep.subr.mxu0 %v18071_v47  ;;  %18140 = vst [vmem:[#allocation66_spill] sm:$0xff] %v16502_v25  ;;  %v16506_v55 = vand.u32 4294901760, %v9689_v32 }
 0x7b8   :  { %12360 = vmatprep.subr.mxu1 %v18071_v47  ;;  %12318 = vmatpush3.msra.mxu0 %v9112_v40  ;;  %v9673_v40 = vld [vmem:[#allocation10 + $0x70] sm:$0xff] }
 0x7b9   :  { %12361 = vmatpush3.msra.mxu1 %v16143_v28  ;;  %12319 = vmatprep.subr.mxu0 %v18071_v47  ;;  %v16508_v24 = vand.u32 4294901760, %v9673_v40  ;;  %v16514_v28 = vsub.f32 %v9674_v14, %v16504_v3  ;;  %v16517_v54 = vsub.f32 %v9689_v32, %v16506_v55 }
 0x7ba   :  { %12362 = vmatprep.subr.mxu1 %v18071_v47  ;;  %12320 = vmatpush3.msra.mxu0 %v9119_v62 }
 0x7bb   :  { %12363 = vmatpush3.msra.mxu1 %v16168_v42  ;;  %12321 = vmatprep.subr.mxu0 %v18071_v47  ;;  %v16521_v35 = vsub.f32 %v9673_v40, %v16508_v24  ;;  %v17447_v42 = vand.u32 4294901760, %v16514_v28  ;;  %v17446_v23 = vand.u32 4294901760, %v16517_v54  ;;  %v16601_v40 = vand.u32 4294901760, %v9669_v20 }
 0x7bc   :  { %12364 = vmatprep.subr.mxu1 %v18071_v47  ;;  %12322 = vmatpush3.msra.mxu0 %v9126_v7 }
 0x7bd   :  { %12365 = vmatpush3.msra.mxu1 %v16182_v39  ;;  %12323 = vmatprep.subr.mxu0 %v18071_v47  ;;  %v9811_v39 = vsub.f32 %v16514_v28, %v17447_v42 }
 0x7be   :  { %12366 = vmatprep.subr.mxu1 %v18071_v47  ;;  %12324 = vmatpush3.msra.mxu0 %v9133_v9  ;;  %v11142_v12 = vpop.f32.mrf.mxu1  ;;  %v9930_v9 = vsub.f32 %v16517_v54, %v17446_v23 }
 0x7bf   :  { %12367 = vmatpush3.msra.mxu1 %v16198_v53  ;;  %12325 = vmatprep.subr.mxu0 %v18071_v47 }
 0x7c0   :  { %12368 = vmatprep.subr.mxu1 %v18071_v47  ;;  %12326 = vmatpush3.msra.mxu0 %v9140_v13  ;;  %v11143_v30 = vpop.f32.mrf.mxu1  ;;  %v9812_v13 = vand.u32 4294901760, %v9811_v39  ;;  %v9931_v21 = vand.u32 4294901760, %v9930_v9  ;;  %v9667_v39 = vld [vmem:[#allocation10 + $0x40] sm:$0xff] }
 0x7c1   :  { %12369 = vmatpush3.msra.mxu1 %v16212_v4  ;;  %12327 = vmatprep.subr.mxu0 %v18071_v47  ;;  %v11144_v45 = vadd.f32 %v11143_v30, %v11142_v12 }
 0x7c2   :  { %12370 = vmatprep.subr.mxu1 %v18071_v47  ;;  %12328 = vmatpush3.msra.mxu0 %v9147_v46  ;;  %v9688_v46 = vld [vmem:[#allocation10 + $0xe8] sm:$0xff] }
 0x7c3   :  { %12371 = vmatpush3.msra.mxu1 %v16226_v44  ;;  %12329 = vmatprep.subr.mxu0 %v18071_v47  ;;  %v16542_v51 = vand.u32 4294901760, %v9688_v46  ;;  %v9672_v44 = vld [vmem:[#allocation10 + $0x68] sm:$0xff] }
 0x7c4   :  { %12372 = vmatprep.subr.mxu1 %v18071_v47  ;;  %12330 = vmatpush3.msra.mxu0 %v9154_v33  ;;  %v16544_v33 = vand.u32 4294901760, %v9672_v44 }
 0x7c5   :  { %12373 = vmatpush3.msra.mxu1 %v16238_v52  ;;  %12331 = vmatprep.subr.mxu0 %v18071_v47  ;;  %v16547_v52 = vsub.f32 %v9688_v46, %v16542_v51 }
 0x7c6   :  { %12374 = vmatprep.subr.mxu1 %v18071_v47  ;;  %12332 = vmatpush3.msra.mxu0 %v9161_v56  ;;  %v16549_v56 = vand.u32 4294901760, %v9687_v29 }
 0x7c7   :  { %12375 = vmatpush3.msra.mxu1 %v16250_v16  ;;  %12333 = vmatprep.subr.mxu0 %v18071_v47  ;;  %v16553_v16 = vsub.f32 %v9672_v44, %v16544_v33 }
 0x7c8   :  { %v11107_v57 = vpop.f32.mrf.mxu0  ;;  %12376 = vmatprep.subr.mxu1 %v18071_v47  ;;  %12334 = vmatpush3.msra.mxu0 %v9168_v36  ;;  %v16555_v36 = vand.u32 4294901760, %v9671_v38 }
 0x7c9   :  { %12377 = vmatpush3.msra.mxu1 %v16262_v6  ;;  %12378 = vmatprep.mubr.msk.f32.mxu1 %vm12584_vm0, %v18071_v47  ;;  %v17443_v6 = vand.u32 4294901760, %v16547_v52  ;;  %v17441_v43 = vand.u32 4294901760, %v16553_v16 }
 0x7ca   :  { %v11108_v22 = vpop.f32.mrf.mxu0  ;;  %12335 = vmatprep.subr.mxu0 %v18071_v47  ;;  %12379 = vmatmul.mubr.f32.vlgmr.msra.gmra.mxu1 %v18129_v5 }
 0x7cb   :  { %v11109_v15 = vadd.f32 %v11108_v22, %v11107_v57  ;;  %12336 = vmatpush3.msra.mxu0 %v9175_v37  ;;  %10032 = vmatprep.mubr.f32.mxu1 %v18138_v63  ;;  %v16560_v37 = vsub.f32 %v9687_v29, %v16549_v56  ;;  %v9937_v19 = vsub.f32 %v16547_v52, %v17443_v6  ;;  %v9668_v57 = vld [vmem:[#allocation10 + $0x48] sm:$0xff]  ;;  %v9682_v29 = vld [vmem:[#allocation10 + $0xb8] sm:$0xff] }
 0x7cc   :  { %12337 = vmatprep.subr.mxu0 %v18071_v47  ;;  %12343 = vmatprep.mubr.msk.f32.mxu0 %vm12584_vm0, %v18071_v47  ;;  %v9825_v61 = vsub.f32 %v16553_v16, %v17441_v43 }
 0x7cd   :  { %v7969_v59 = vadd.f32 %v11109_v15, %v16407_v26  ;;  %12338 = vmatpush3.msra.mxu0 %v9182_v49  ;;  %v9670_v49 = vld [vmem:[#allocation10 + $0x58] sm:$0xff]  ;;  %v17440_v11 = vand.u32 4294901760, %v16560_v37  ;;  %v9684_v26 = vld [vmem:[#allocation10 + $0xc8] sm:$0xff]  ;;  %v9938_v12 = vand.u32 4294901760, %v9937_v19  ;;  %v16627_v19 = vand.u32 4294901760, %v9667_v39 }
 0x7ce   :  { %12339 = vmatprep.subr.mxu0 %v18071_v47  ;;  %v9826_v22 = vand.u32 4294901760, %v9825_v61 }
 0x7cf   :  { %v16492_v48 = vadd.f32 %v11144_v45, %v7969_v59  ;;  %12340 = vmatpush3.msra.mxu0 %v9189_v60  ;;  %v16567_v60 = vsub.f32 %v9671_v38, %v16555_v36  ;;  %v9944_v30 = vsub.f32 %v16560_v37, %v17440_v11  ;;  %v16591_v45 = vand.u32 4294901760, %v9685_v41  ;;  %v9666_v38 = vld [vmem:[#allocation10 + $0x38] sm:$0xff] }
 0x7d0   :  { %12341 = vmatprep.subr.mxu0 %v18071_v47  ;;  %v16511_v47 = vsub.f32 %v9690_v27, %v16502_v25  ;;  %v17437_v59 = vand.u32 4294901760, %v16582_v34  ;;  %v9683_v27 = vld [vmem:[#allocation10 + $0xc0] sm:$0xff] }
 0x7d1   :  { %12342 = vmatpush3.msra.mxu0 %v9196_v2  ;;  %v16569_v2 = vand.u32 4294901760, %v9670_v49  ;;  %v17439_v8 = vand.u32 4294901760, %v16567_v60  ;;  %v9945_v14 = vand.u32 4294901760, %v9944_v30  ;;  %v16599_v32 = vsub.f32 %v9685_v41, %v16591_v45 }
 0x7d2   :  { %12344 = vmatmul.mubr.f32.vlgmr.msra.gmra.mxu0 %v18129_v5  ;;  %18141 = vst [vmem:[#allocation54_spill] sm:$0xff] %v16511_v47  ;;  %11247 = vmatprep.subr.mxu0 %v16502_v25  ;;  %v17448_v62 = vand.u32 4294901760, %v16511_v47  ;;  %v17444_v5 = vand.u32 4294901760, %v16521_v35  ;;  %v16621_v44 = vand.u32 4294901760, %v9683_v27 }
 0x7d3   :  { %9796 = vmatprep.mubr.f32.mxu0 %v18139_v1  ;;  %11248 = vmatpush3.msra.mxu0 %v16504_v3  ;;  %v16585_v31 = vsub.f32 %v9670_v49, %v16569_v2  ;;  %v9832_v15 = vsub.f32 %v16567_v60, %v17439_v8  ;;  %18142 = vst [vmem:[#allocation67_spill] sm:$0xff] %v16599_v32  ;;  %v9664_v8 = vld [vmem:[#allocation10 + $0x28] sm:$0xff] }
 0x7d4   :  { %11249 = vmatprep.subr.mxu0 %v16506_v55  ;;  %v9923_v7 = vsub.f32 %v16511_v47, %v17448_v62  ;;  %v9818_v58 = vsub.f32 %v16521_v35, %v17444_v5  ;;  %v9663_v5 = vld [vmem:[#allocation10 + $0x20] sm:$0xff]  ;;  %v9662_v62 = vld [vmem:[#allocation10 + $0x18] sm:$0xff] }
 0x7d5   :  { %11250 = vmatpush3.msra.mxu0 %v16508_v24  ;;  %v17436_v1 = vand.u32 4294901760, %v16585_v31  ;;  %v9833_v9 = vand.u32 4294901760, %v9832_v15  ;;  %v16645_v15 = vand.u32 4294901760, %v9666_v38 }
 0x7d6   :  { %v9924_v53 = vand.u32 4294901760, %v9923_v7  ;;  %v9819_v4 = vand.u32 4294901760, %v9818_v58  ;;  %11251 = vmatprep.subr.mxu0 %v16542_v51  ;;  %v16603_v7 = vand.u32 4294901760, %v9684_v26  ;;  %v9951_v58 = vsub.f32 %v16582_v34, %v17437_v59 }
 0x7d7   :  { %11252 = vmatpush3.msra.mxu0 %v16544_v33  ;;  %18148 = vst [vmem:[#allocation73_spill] sm:$0xff] %v16645_v15 }
 0x7d8   :  { %11282 = vmatprep.subr.mxu1 %v9924_v53  ;;  %11253 = vmatprep.subr.mxu0 %v16549_v56  ;;  %v9839_v53 = vsub.f32 %v16585_v31, %v17436_v1  ;;  %v16619_v46 = vsub.f32 %v9684_v26, %v16603_v7  ;;  %v9952_v17 = vand.u32 4294901760, %v9951_v58 }
 0x7d9   :  { %11283 = vmatpush3.msra.mxu1 %v9812_v13  ;;  %11254 = vmatpush3.msra.mxu0 %v16555_v36  ;;  %v16612_v13 = vand.u32 4294901760, %v9668_v57 }
 0x7da   :  { %11284 = vmatprep.subr.mxu1 %v9931_v21  ;;  %11255 = vmatprep.subr.mxu0 %v16562_v50  ;;  %v17434_v21 = vand.u32 4294901760, %v16599_v32  ;;  %18144 = vst [vmem:[#allocation69_spill] sm:$0xff] %v16619_v46  ;;  %v9840_v49 = vand.u32 4294901760, %v9839_v53  ;;  %v17435_v26 = vand.u32 4294901760, %v16619_v46 }
 0x7db   :  { %11285 = vmatpush3.msra.mxu1 %v9819_v4  ;;  %11256 = vmatpush3.msra.mxu0 %v16569_v2  ;;  %v16616_v4 = vsub.f32 %v9669_v20, %v16601_v40  ;;  %v16625_v41 = vsub.f32 %v9668_v57, %v16612_v13  ;;  %v16641_v57 = vsub.f32 %v9667_v39, %v16627_v19 }
 0x7dc   :  { %11286 = vmatprep.subr.mxu1 %v9938_v12  ;;  %11257 = vmatprep.subr.mxu0 %v16591_v45  ;;  %v9958_v61 = vsub.f32 %v16599_v32, %v17434_v21  ;;  %v16636_v12 = vsub.f32 %v9683_v27, %v16621_v44  ;;  %v9965_v58 = vsub.f32 %v16619_v46, %v17435_v26  ;;  %v9680_v21 = vld [vmem:[#allocation10 + $0xa8] sm:$0xff] }
 0x7dd   :  { %11287 = vmatpush3.msra.mxu1 %v9826_v22  ;;  %18143 = vst [vmem:[#allocation56_spill] sm:$0xff] %v16616_v4  ;;  %11258 = vmatpush3.msra.mxu0 %v16601_v40  ;;  %18145 = vst [vmem:[#allocation58_spill] sm:$0xff] %v16625_v41  ;;  %v17433_v20 = vand.u32 4294901760, %v16616_v4  ;;  %v17438_v30 = vand.u32 4294901760, %v16625_v41  ;;  %v16643_v22 = vand.u32 4294901760, %v9682_v29  ;;  %v16683_v6 = vand.u32 4294901760, %v9680_v21 }
 0x7de   :  { %11288 = vmatprep.subr.mxu1 %v9945_v14  ;;  %11259 = vmatprep.subr.mxu0 %v16603_v7  ;;  %18146 = vst [vmem:[#allocation71_spill] sm:$0xff] %v16636_v12  ;;  %18147 = vst [vmem:[#allocation60_spill] sm:$0xff] %v16641_v57  ;;  %v9681_v14 = vld [vmem:[#allocation10 + $0xb0] sm:$0xff]  ;;  %v17442_v39 = vand.u32 4294901760, %v16636_v12  ;;  %v9966_v1 = vand.u32 4294901760, %v9965_v58 }
 0x7df   :  { %11289 = vmatpush3.msra.mxu1 %v9833_v9  ;;  %11260 = vmatpush3.msra.mxu0 %v16612_v13  ;;  %v9959_v9 = vand.u32 4294901760, %v9958_v61  ;;  %v9846_v27 = vsub.f32 %v16616_v4, %v17433_v20  ;;  %v9853_v53 = vsub.f32 %v16625_v41, %v17438_v30  ;;  %v16664_v61 = vsub.f32 %v9666_v38, %v16645_v15  ;;  %v9665_v20 = vld [vmem:[#allocation10 + $0x30] sm:$0xff] }
 0x7e0   :  { %11290 = vmatprep.subr.mxu1 %v9952_v17  ;;  %11261 = vmatprep.subr.mxu0 %v16621_v44  ;;  %v17445_v17 = vand.u32 4294901760, %v16641_v57  ;;  %v9972_v59 = vsub.f32 %v16636_v12, %v17442_v39  ;;  %v16670_v30 = vand.u32 4294901760, %v9681_v14  ;;  %v16681_v39 = vand.u32 4294901760, %v9665_v20  ;;  %18154 = vst [vmem:[#allocation79_spill] sm:$0xff] %v16683_v6 }
 0x7e1   :  { %11291 = vmatpush3.msra.mxu1 %v9840_v49  ;;  %11262 = vmatpush3.msra.mxu0 %v16627_v19  ;;  %v16661_v49 = vsub.f32 %v9682_v29, %v16643_v22  ;;  %18150 = vst [vmem:[#allocation75_spill] sm:$0xff] %v16664_v61  ;;  %v9847_v26 = vand.u32 4294901760, %v9846_v27  ;;  %v9854_v29 = vand.u32 4294901760, %v9853_v53  ;;  %v9679_v27 = vld [vmem:[#allocation10 + $0xa0] sm:$0xff]  ;;  %v16699_v42 = vsub.f32 %v9680_v21, %v16683_v6 }
 0x7e2   :  { %11263 = vmatprep.subr.mxu0 %v16643_v22  ;;  %11292 = vmatprep.subr.mxu1 %v9959_v9  ;;  %18151 = vst [vmem:[#allocation64_spill] sm:$0xff] %v16670_v30  ;;  %v9860_v38 = vsub.f32 %v16641_v57, %v17445_v17  ;;  %v17450_v9 = vand.u32 4294901760, %v16664_v61  ;;  %v9973_v58 = vand.u32 4294901760, %v9972_v59  ;;  %v16679_v43 = vsub.f32 %v9681_v14, %v16670_v30  ;;  %v9660_v57 = vld [vmem:[#allocation10 + $0x8] sm:$0xff] }
 0x7e3   :  { %18149 = vst [vmem:[#allocation62_spill] sm:$0xff] %v16661_v49  ;;  %11264 = vmatpush3.msra.mxu0 %v16645_v15  ;;  %v17449_v11 = vand.u32 4294901760, %v16661_v49  ;;  %11293 = vmatpush3.msra.mxu1 %v9847_v26  ;;  %18153 = vst [vmem:[#allocation65_spill] sm:$0xff] %v16681_v39  ;;  %v16692_v26 = vand.u32 4294901760, %v9664_v8  ;;  %v16696_v23 = vsub.f32 %v9665_v20, %v16681_v39 }
 0x7e4   :  { %18152 = vst [vmem:[#allocation77_spill] sm:$0xff] %v16679_v43  ;;  %11265 = vmatprep.subr.mxu0 %v16670_v30  ;;  %11294 = vmatprep.subr.mxu1 %v9966_v1  ;;  %v9861_v53 = vand.u32 4294901760, %v9860_v38  ;;  %v9867_v59 = vsub.f32 %v16664_v61, %v17450_v9  ;;  %v17453_v14 = vand.u32 4294901760, %v16679_v43  ;;  %18157 = vst [vmem:[#allocation70_spill] sm:$0xff] %v16699_v42  ;;  %v16701_v1 = vand.u32 4294901760, %v9679_v27  ;;  %v9678_v38 = vld [vmem:[#allocation10 + $0x98] sm:$0xff] }
 0x7e5   :  { %v9979_v17 = vsub.f32 %v16661_v49, %v17449_v11  ;;  %18155 = vst [vmem:[#allocation68_spill] sm:$0xff] %v16692_v26  ;;  %11295 = vmatpush3.msra.mxu1 %v9854_v29  ;;  %18156 = vst [vmem:[#allocation82_spill] sm:$0xff] %v16696_v23  ;;  %11266 = vmatpush3.msra.mxu0 %v16681_v39  ;;  %v16705_v63 = vsub.f32 %v9664_v8, %v16692_v26  ;;  %v16707_v29 = vand.u32 4294901760, %v9663_v5 }
 0x7e6   :  { %18158 = vst [vmem:[#allocation83_spill] sm:$0xff] %v16701_v1  ;;  %11296 = vmatprep.subr.mxu1 %v9973_v58  ;;  %v9868_v9 = vand.u32 4294901760, %v9867_v59  ;;  %11267 = vmatprep.subr.mxu0 %v16683_v6  ;;  %v9986_v21 = vsub.f32 %v16679_v43, %v17453_v14  ;;  %v17460_v20 = vand.u32 4294901760, %v16696_v23  ;;  %v16716_v58 = vsub.f32 %v9679_v27, %v16701_v1  ;;  %v9677_v14 = vld [vmem:[#allocation10 + $0x90] sm:$0xff] }
 0x7e7   :  { %v9980_v11 = vand.u32 4294901760, %v9979_v17  ;;  %18159 = vst [vmem:[#allocation72_spill] sm:$0xff] %v16705_v63  ;;  %18160 = vst [vmem:[#allocation85_spill] sm:$0xff] %v16707_v29  ;;  %11297 = vmatpush3.msra.mxu1 %v9861_v53  ;;  %11268 = vmatpush3.msra.mxu0 %v16692_v26  ;;  %v16721_v17 = vsub.f32 %v9663_v5, %v16707_v29  ;;  %v16723_v53 = vand.u32 4294901760, %v9678_v38  ;;  %v16725_v59 = vand.u32 4294901760, %v9662_v62 }
 0x7e8   :  { %18161 = vst [vmem:[#allocation74_spill] sm:$0xff] %v16716_v58  ;;  %11269 = vmatprep.subr.mxu0 %v16701_v1  ;;  %v9987_v61 = vand.u32 4294901760, %v9986_v21  ;;  %v9874_v27 = vsub.f32 %v16696_v23, %v17460_v20  ;;  %v18166_v43 = vand.u32 4294901760, %v16705_v63  ;;  %v9661_v20 = vld [vmem:[#allocation10 + $0x10] sm:$0xff]  ;;  %v9676_v23 = vld [vmem:[#allocation10 + $0x88] sm:$0xff] }
 0x7e9   :  { %11298 = vmatprep.subr.mxu1 %v9980_v11  ;;  %18162 = vst [vmem:[#allocation87_spill] sm:$0xff] %v16721_v17  ;;  %18163 = vst [vmem:[#allocation76_spill] sm:$0xff] %v16723_v53  ;;  %v18165_v11 = vand.u32 4294901760, %v16699_v42  ;;  %11270 = vmatpush3.msra.mxu0 %v16707_v29  ;;  %v16744_v21 = vsub.f32 %v9662_v62, %v16725_v59  ;;  %v18171_v62 = vand.u32 4294901760, %v16721_v17 }
 0x7ea   :  { %18164 = vst [vmem:[#allocation89_spill] sm:$0xff] %v16725_v59  ;;  %11299 = vmatpush3.msra.mxu1 %v9868_v9  ;;  %v9881_v49 = vsub.f32 %v16705_v63, %v18166_v43  ;;  %v16741_v9 = vsub.f32 %v9678_v38, %v16723_v53  ;;  %11271 = vmatprep.subr.mxu0 %v16723_v53  ;;  %v16750_v43 = vand.u32 4294901760, %v9677_v14 }
 0x7eb   :  { %v9993_v8 = vsub.f32 %v16699_v42, %v18165_v11  ;;  %18168 = vst [vmem:[#allocation91_spill] sm:$0xff] %v16744_v21  ;;  %11300 = vmatprep.subr.mxu1 %v9987_v61  ;;  %v9875_v11 = vand.u32 4294901760, %v9874_v27  ;;  %v18169_v42 = vand.u32 4294901760, %v16716_v58  ;;  %11272 = vmatpush3.msra.mxu0 %v16725_v59  ;;  %v9888_v63 = vsub.f32 %v16721_v17, %v18171_v62  ;;  %v9675_v27 = vld [vmem:[#allocation10 + $0x80] sm:$0xff] }
 0x7ec   :  { %18167 = vst [vmem:[#allocation78_spill] sm:$0xff] %v16741_v9  ;;  %18170 = vst [vmem:[#allocation80_spill] sm:$0xff] %v16750_v43  ;;  %v9882_v38 = vand.u32 4294901760, %v9881_v49  ;;  %v17481_v1 = vand.u32 4294901760, %v16741_v9  ;;  %v17482_v61 = vand.u32 4294901760, %v16744_v21  ;;  %v16759_v53 = vsub.f32 %v9677_v14, %v16750_v43  ;;  %v9659_v59 = vld [vmem:[#allocation10] sm:$0xff]  ;;  %11273 = vmatprep.subr.mxu0 %v16750_v43 }
 0x7ed   :  { %v9994_v5 = vand.u32 4294901760, %v9993_v8  ;;  %v10000_v29 = vsub.f32 %v16716_v58, %v18169_v42  ;;  %11301 = vmatpush3.msra.mxu1 %v9875_v11  ;;  %v16761_v42 = vand.u32 4294901760, %v9661_v20  ;;  %v16763_v58 = vand.u32 4294901760, %v9676_v23 }
 0x7ee   :  { %18172 = vst [vmem:[#allocation93_spill] sm:$0xff] %v16759_v53  ;;  %v9889_v49 = vand.u32 4294901760, %v9888_v63  ;;  %v10007_v62 = vsub.f32 %v16741_v9, %v17481_v1  ;;  %v16772_v11 = vand.u32 4294901760, %v9660_v57  ;;  %v17485_v14 = vand.u32 4294901760, %v16759_v53 }
 0x7ef   :  { %v10001_v8 = vand.u32 4294901760, %v10000_v29  ;;  %18173 = vst [vmem:[#allocation81_spill] sm:$0xff] %v16761_v42  ;;  %18174 = vst [vmem:[#allocation95_spill] sm:$0xff] %v16763_v58  ;;  %11302 = vmatprep.subr.mxu1 %v9994_v5  ;;  %v9895_v29 = vsub.f32 %v16744_v21, %v17482_v61  ;;  %v16776_v17 = vsub.f32 %v9661_v20, %v16761_v42  ;;  %v16781_v63 = vand.u32 4294901760, %v9675_v27 }
 0x7f0   :  { %18175 = vst [vmem:[#allocation84_spill] sm:$0xff] %v16772_v11  ;;  %11303 = vmatpush3.msra.mxu1 %v9882_v38  ;;  %v16779_v43 = vsub.f32 %v9676_v23, %v16763_v58  ;;  %11274 = vmatpush3.msra.mxu0 %v16761_v42  ;;  %v10008_v5 = vand.u32 4294901760, %v10007_v62  ;;  %v16785_v61 = vsub.f32 %v9660_v57, %v16772_v11  ;;  %v16787_v21 = vand.u32 4294901760, %v9659_v59 }
 0x7f1   :  { %18176 = vst [vmem:[#allocation98_spill] sm:$0xff] %v16776_v17  ;;  %18178 = vst [vmem:[#allocation99_spill] sm:$0xff] %v16781_v63  ;;  %11304 = vmatprep.subr.mxu1 %v10001_v8  ;;  %v9896_v1 = vand.u32 4294901760, %v9895_v29  ;;  %11275 = vmatprep.subr.mxu0 %v16763_v58  ;;  %v10014_v23 = vsub.f32 %v16759_v53, %v17485_v14  ;;  %v17486_v20 = vand.u32 4294901760, %v16776_v17 }
 0x7f2   :  { %18177 = vst [vmem:[#allocation86_spill] sm:$0xff] %v16779_v43  ;;  %18179 = vst [vmem:[#allocation88_spill] sm:$0xff] %v16785_v61  ;;  %11305 = vmatpush3.msra.mxu1 %v9889_v49  ;;  %v17487_v38 = vand.u32 4294901760, %v16779_v43  ;;  %v16796_v8 = vsub.f32 %v9675_v27, %v16781_v63  ;;  %11276 = vmatpush3.msra.mxu0 %v16772_v11  ;;  %v17492_v57 = vand.u32 4294901760, %v16785_v61  ;;  %v18184_v11 = vld [vmem:[#allocation21_spill] sm:$0xff] }
 0x7f3   :  { %18180 = vst [vmem:[#allocation101_spill] sm:$0xff] %v16787_v21  ;;  %11306 = vmatprep.subr.mxu1 %v10008_v5  ;;  %v16801_v62 = vsub.f32 %v9659_v59, %v16787_v21  ;;  %11277 = vmatprep.subr.mxu0 %v16781_v63  ;;  %v10015_v49 = vand.u32 4294901760, %v10014_v23  ;;  %v9902_v29 = vsub.f32 %v16776_v17, %v17486_v20 }
 0x7f4   :  { %18181 = vst [vmem:[#allocation90_spill] sm:$0xff] %v16796_v8  ;;  %11307 = vmatpush3.msra.mxu1 %v9896_v1  ;;  %v10021_v27 = vsub.f32 %v16779_v43, %v17487_v38  ;;  %v17496_v14 = vand.u32 4294901760, %v16796_v8  ;;  %11278 = vmatpush3.msra.mxu0 %v16787_v21  ;;  %v9909_v59 = vsub.f32 %v16785_v61, %v17492_v57 }
 0x7f5   :  { %18182 = vst [vmem:[#allocation103_spill] sm:$0xff] %v16801_v62  ;;  %v17503_v5 = vand.u32 4294901760, %v16801_v62  ;;  %11317 = vmatprep.subr.mxu0 %v16511_v47  ;;  %11308 = vmatprep.subr.mxu1 %v10015_v49  ;;  %v9903_v1 = vand.u32 4294901760, %v9902_v29  ;;  %v8477_v47 = vpop.f32.mrf.mxu1 }
 0x7f6   :  { %v10022_v23 = vand.u32 4294901760, %v10021_v27  ;;  %v10028_v20 = vsub.f32 %v16796_v8, %v17496_v14  ;;  %v9910_v38 = vand.u32 4294901760, %v9909_v59  ;;  %v8245_v27 = vpop.f32.mrf.mxu0 }
 0x7f7   :  { %v9916_v43 = vsub.f32 %v16801_v62, %v17503_v5  ;;  %11309 = vmatpush3.msra.mxu1 %v9903_v1  ;;  %v8479_v49 = vpop.f32.mrf.mxu1 }
 0x7f8   :  { %v10029_v17 = vand.u32 4294901760, %v10028_v20  ;;  %11310 = vmatprep.subr.mxu1 %v10022_v23  ;;  %v8247_v14 = vpop.f32.mrf.mxu0 }
 0x7f9   :  { %v9917_v57 = vand.u32 4294901760, %v9916_v43  ;;  %11311 = vmatpush3.msra.mxu1 %v9910_v38 }
 0x7fa   :  { %11312 = vmatprep.subr.mxu1 %v10029_v17  ;;  %v8125_v17 = vld [vmem:[#allocation9 + $0x1] ss:$2 sm:$0x7] }
 0x7fb   :  { %11313 = vmatpush3.msra.mxu1 %v9917_v57  ;;  %v18183_v57 = vld [vmem:[#allocation20_spill] sm:$0xff]  ;;  %v8134_v58 = vrot.slane %v8125_v17, %v18184_v11 }
 0x7fc   :  { %11352 = vmatprep.subr.mxu1 %v16502_v25  ;;  %v8130_v62 = vrot.slane %v8125_v17, %v18183_v57 }
 0x7fd   :  { %v8248_v26 = vadd.f32 %v8247_v14, %v8134_v58 }
 0x7fe   :  { %v8246_v21 = vadd.f32 %v8245_v27, %v8130_v62  ;;  %v18185_v27 = vld [vmem:[#allocation135_spill] sm:$0xff] }
 0x7ff   :  { %v8480_v46 = vadd.f32 %v8479_v49, %v8248_v26 }
 0x800   :  { %v8478_v25 = vadd.f32 %v8477_v47, %v8246_v21 }
 0x803   :  { %v8720_v29 = vpop.f32.mrf.mxu1 }
 0x805   :  { %v8722_v61 = vpop.f32.mrf.mxu1 }
 0x80b   :  { %v8614_v8 = vpop.f32.mrf.mxu0 }
 0x80c   :  { %v8615_v63 = vadd.f32 %v8614_v8, %v8478_v25 }
 0x80d   :  { %v8616_v9 = vpop.f32.mrf.mxu0 }
 0x80e   :  { %v8721_v42 = vadd.f32 %v8720_v29, %v8615_v63  ;;  %v8617_v4 = vadd.f32 %v8616_v9, %v8480_v46 }
 0x810   :  { %v8723_v30 = vadd.f32 %v8722_v61, %v8617_v4 }
 0x825   :  { %v8992_v59 = vpop.f32.mrf.mxu1 }
 0x827   :  { %v8994_v53 = vpop.f32.mrf.mxu1 }
 0x82d   :  { %v8888_v1 = vpop.f32.mrf.mxu0 }
 0x82e   :  { %v8889_v12 = vadd.f32 %v8888_v1, %v8721_v42 }
 0x82f   :  { %v8890_v23 = vpop.f32.mrf.mxu0 }
 0x830   :  { %v8993_v41 = vadd.f32 %v8992_v59, %v8889_v12  ;;  %v8891_v15 = vadd.f32 %v8890_v23, %v8723_v30  ;;  %v8138_v12 = vrot.slane %v8125_v17, %v18136_v0  ;;  %v18187_v17 = vld [vmem:[#allocation73_spill] sm:$0xff] }
 0x832   :  { %v8995_v47 = vadd.f32 %v8994_v53, %v8891_v15 }
 0x834   :  { %v9645_v25 = vadd.f32 %v8995_v47, %v16186_v18  ;;  %v18191_v47 = vld [vmem:[#allocation65_spill] sm:$0xff] }
 0x836   :  { %v10591_v21 = vmul.f32 -1.442695, %v9645_v25  ;;  %v18192_v25 = vld [vmem:[#allocation69_spill] sm:$0xff] }
 0x847   :  { %v9235_v5 = vpop.f32.mrf.mxu1 }
 0x849   :  { %v12240_v20 = vpop.f32.mrf.mxu1 }
 0x84a   :  { %v9638_v20 = vadd.f32 %v8993_v41, %v16172_v10 }
 0x84f   :  { %v9084_v43 = vpop.f32.mrf.mxu0 }
 0x850   :  { %v9085_v26 = vadd.f32 %v9084_v43, %v8138_v12  ;;  %v18186_v43 = vld [vmem:[#allocation134_spill] sm:$0xff]  ;;  %v18195_v12 = vld [vmem:[#allocation68_spill] sm:$0xff] }
 0x851   :  { %v12205_v38 = vpop.f32.mrf.mxu0 }
 0x852   :  { %v10590_v38 = vmul.f32 -1.442695, %v9638_v20  ;;  %v18188_v20 = vld [vmem:[#allocation67_spill] sm:$0xff] }
 0x854   :  { %12429 = vpow2.f32 %v10590_v38  ;;  %v18189_v38 = vld [vmem:[#allocation64_spill] sm:$0xff] }
 0x855   :  { %12431 = vpow2.f32 %v10591_v21  ;;  %v18193_v21 = vld [vmem:[#allocation79_spill] sm:$0xff] }
 0x861   :  { %v12430_v11 = vpop.eup %12429 }
 0x862   :  { %v9642_v58 = vadd.f32 1.0, %v12430_v11  ;;  %v12432_v41 = vpop.eup %12431  ;;  %v18194_v11 = vld [vmem:[#allocation58_spill] sm:$0xff] }
 0x863   :  { %v9649_v61 = vadd.f32 1.0, %v12432_v41  ;;  %v18202_v41 = vld [vmem:[#allocation75_spill] sm:$0xff] }
 0x864   :  { %12433 = vrcp.f32 %v9642_v58  ;;  %v18196_v58 = vld [vmem:[#allocation71_spill] sm:$0xff] }
 0x865   :  { %12435 = vrcp.f32 %v9649_v61  ;;  %v18205_v61 = vld [vmem:[#allocation80_spill] sm:$0xff] }
 0x869   :  { %v9428_v6 = vpop.f32.mrf.mxu1 }
 0x86b   :  { %v12310_v39 = vpop.f32.mrf.mxu1 }
 0x86c   :  { %v9236_v39 = vadd.f32 %v9235_v5, %v9085_v26  ;;  %v18197_v26 = vld [vmem:[#allocation83_spill] sm:$0xff] }
 0x871   :  { %v9339_v32 = vpop.f32.mrf.mxu0  ;;  %v12434_v18 = vpop.eup %12433 }
 0x872   :  { %v9340_v4 = vadd.f32 %v9339_v32, %v9236_v39  ;;  %v12436_v0 = vpop.eup %12435  ;;  %v12444_v32 = vld [vmem:[%s17013_s1] sm:$0xff]  ;;  %v18199_v39 = vld [vmem:[#allocation85_spill] sm:$0xff] }
 0x873   :  { %v12275_v57 = vpop.f32.mrf.mxu0  ;;  %v9655_v8 = vsub.f32 1.0, %v12436_v0 }
 0x874   :  { %v9429_v9 = vadd.f32 %v9428_v6, %v9340_v4  ;;  %v9657_v6 = vmul.f32 %v12444_v32, %v12436_v0  ;;  %v18190_v57 = vld [vmem:[#allocation56_spill] sm:$0xff]  ;;  %v18212_v0 = vld [vmem:[#allocation74_spill] sm:$0xff] }
 0x875   :  { %v18201_v4 = vld [vmem:[#allocation76_spill] sm:$0xff]  ;;  %v18216_v32 = vld [vmem:[#allocation78_spill] sm:$0xff] }
 0x88a   :  { %v9634_v46 = vpop.f32.mrf.mxu1 }
 0x88c   :  { %v12380_v10 = vpop.f32.mrf.mxu1 }
 0x88d   :  { %v18200_v10 = vld [vmem:[#allocation62_spill] sm:$0xff] }
 0x892   :  { %v9547_v30 = vpop.f32.mrf.mxu0 }
 0x893   :  { %v9548_v42 = vadd.f32 %v9547_v30, %v9429_v9  ;;  %v18203_v9 = vld [vmem:[#allocation89_spill] sm:$0xff] }
 0x894   :  { %v12345_v15 = vpop.f32.mrf.mxu0  ;;  %v18204_v30 = vld [vmem:[#allocation77_spill] sm:$0xff] }
 0x895   :  { %v9635_v53 = vadd.f32 %v9634_v46, %v9548_v42  ;;  %v18198_v46 = vld [vmem:[#allocation60_spill] sm:$0xff]  ;;  %v18206_v42 = vld [vmem:[#allocation82_spill] sm:$0xff]  ;;  %v18207_v15 = vld [vmem:[#allocation81_spill] sm:$0xff] }
 0x897   :  { %v9652_v14 = vmul.f32 %v12434_v18, %v9635_v53  ;;  %v18208_v53 = vld [vmem:[#allocation70_spill] sm:$0xff]  ;;  %v18209_v18 = vld [vmem:[#allocation95_spill] sm:$0xff] }
 0x899   :  { %v9653_v63 = vadd.f32 %v9652_v14, %v16492_v48  ;;  %v18210_v14 = vld [vmem:[#allocation72_spill] sm:$0xff] }
 0x89b   :  { %12437 = vtanh.f32 %v9653_v63  ;;  %v18211_v63 = vld [vmem:[#allocation84_spill] sm:$0xff] }
 0x8a8   :  { %v12438_v62 = vpop.eup %12437 }
 0x8a9   :  { %v9656_v49 = vmul.f32 %v12438_v62, %v9655_v8  ;;  %v18213_v8 = vld [vmem:[#allocation99_spill] sm:$0xff] }
 0x8aa   :  { %v18214_v62 = vld [vmem:[#allocation87_spill] sm:$0xff] }
 0x8ab   :  { %v9658_v5 = vadd.f32 %v9657_v6, %v9656_v49  ;;  %v18215_v49 = vld [vmem:[#allocation101_spill] sm:$0xff]  ;;  %v18217_v6 = vld [vmem:[#allocation66_spill] sm:$0xff] }
 0x8ad   :  { %v16833_v29 = vand.u32 4294901760, %v9658_v5  ;;  %10578 = vst [vmem:[%s17022_s10 + $0x8] sm:$0xff] %v9658_v5 }
 0x8af   :  { %10034 = vmatmul.mubr.f32.vlgmr.msra.gmra.mxu1 %v16833_v29  ;;  %v16840_v48 = vsub.f32 %v9658_v5, %v16833_v29  ;;  %v18218_v5 = vld [vmem:[#allocation91_spill] sm:$0xff] }
 0x8b0   :  { %11353 = vmatpush3.msra.mxu1 %v16504_v3  ;;  %10276 = vmatprep.mubr.f32.mxu1 %v18185_v27  ;;  %v18219_v27 = vld [vmem:[#allocation133_spill] sm:$0xff] }
 0x8b1   :  { %11354 = vmatprep.subr.mxu1 %v16506_v55  ;;  %v9799_v59 = vand.u32 4294901760, %v16840_v48 }
 0x8b2   :  { %11355 = vmatpush3.msra.mxu1 %v16508_v24 }
 0x8b3   :  { %11356 = vmatprep.subr.mxu1 %v16542_v51  ;;  %v9800_v1 = vsub.f32 %v16840_v48, %v9799_v59 }
 0x8b4   :  { %11357 = vmatpush3.msra.mxu1 %v16544_v33 }
 0x8b5   :  { %11358 = vmatprep.subr.mxu1 %v16549_v56  ;;  %v9801_v23 = vand.u32 4294901760, %v9800_v1  ;;  %v18220_v1 = vld [vmem:[#allocation93_spill] sm:$0xff] }
 0x8b6   :  { %11359 = vmatpush3.msra.mxu1 %v16555_v36 }
 0x8b7   :  { %11360 = vmatprep.subr.mxu1 %v16562_v50  ;;  %9802 = vmatmul.mubr.f32.vlgmr.msra.gmra.mxu0 %v9801_v23  ;;  %v18221_v23 = vld [vmem:[#allocation98_spill] sm:$0xff] }
 0x8b8   :  { %11318 = vmatpush3.msra.mxu0 %v16514_v28  ;;  %11361 = vmatpush3.msra.mxu1 %v16569_v2 }
 0x8b9   :  { %11319 = vmatprep.subr.mxu0 %v16517_v54  ;;  %10169 = vmatprep.mubr.f32.mxu0 %v18186_v43  ;;  %v18222_v43 = vld [vmem:[#allocation86_spill] sm:$0xff] }
 0x8ba   :  { %11362 = vmatprep.subr.mxu1 %v16591_v45  ;;  %11320 = vmatpush3.msra.mxu0 %v16521_v35 }
 0x8bb   :  { %11363 = vmatpush3.msra.mxu1 %v16601_v40  ;;  %11321 = vmatprep.subr.mxu0 %v16547_v52 }
 0x8bc   :  { %11364 = vmatprep.subr.mxu1 %v16603_v7  ;;  %11322 = vmatpush3.msra.mxu0 %v16553_v16 }
 0x8bd   :  { %11365 = vmatpush3.msra.mxu1 %v16612_v13  ;;  %11323 = vmatprep.subr.mxu0 %v16560_v37 }
 0x8be   :  { %11366 = vmatprep.subr.mxu1 %v16621_v44  ;;  %11324 = vmatpush3.msra.mxu0 %v16567_v60 }
 0x8bf   :  { %11367 = vmatpush3.msra.mxu1 %v16627_v19  ;;  %11325 = vmatprep.subr.mxu0 %v16582_v34 }
 0x8c0   :  { %11368 = vmatprep.subr.mxu1 %v16643_v22  ;;  %11326 = vmatpush3.msra.mxu0 %v16585_v31 }
 0x8c1   :  { %11369 = vmatpush3.msra.mxu1 %v18187_v17  ;;  %11327 = vmatprep.subr.mxu0 %v18188_v20 }
 0x8c2   :  { %11370 = vmatprep.subr.mxu1 %v18189_v38  ;;  %11328 = vmatpush3.msra.mxu0 %v18190_v57 }
 0x8c3   :  { %11371 = vmatpush3.msra.mxu1 %v18191_v47  ;;  %11329 = vmatprep.subr.mxu0 %v18192_v25 }
 0x8c4   :  { %11372 = vmatprep.subr.mxu1 %v18193_v21  ;;  %11330 = vmatpush3.msra.mxu0 %v18194_v11 }
 0x8c5   :  { %11373 = vmatpush3.msra.mxu1 %v18195_v12  ;;  %11331 = vmatprep.subr.mxu0 %v18196_v58 }
 0x8c6   :  { %11374 = vmatprep.subr.mxu1 %v18197_v26  ;;  %11332 = vmatpush3.msra.mxu0 %v18198_v46 }
 0x8c7   :  { %11375 = vmatpush3.msra.mxu1 %v18199_v39  ;;  %11333 = vmatprep.subr.mxu0 %v18200_v10 }
 0x8c8   :  { %11376 = vmatprep.subr.mxu1 %v18201_v4  ;;  %11334 = vmatpush3.msra.mxu0 %v18202_v41 }
 0x8c9   :  { %11377 = vmatpush3.msra.mxu1 %v18203_v9  ;;  %11335 = vmatprep.subr.mxu0 %v18204_v30 }
 0x8ca   :  { %11378 = vmatprep.subr.mxu1 %v18205_v61  ;;  %11336 = vmatpush3.msra.mxu0 %v18206_v42 }
 0x8cb   :  { %11379 = vmatpush3.msra.mxu1 %v18207_v15  ;;  %11337 = vmatprep.subr.mxu0 %v18208_v53 }
 0x8cc   :  { %11380 = vmatprep.subr.mxu1 %v18209_v18  ;;  %11338 = vmatpush3.msra.mxu0 %v18210_v14 }
 0x8cd   :  { %11381 = vmatpush3.msra.mxu1 %v18211_v63  ;;  %11339 = vmatprep.subr.mxu0 %v18212_v0 }
 0x8ce   :  { %11382 = vmatprep.subr.mxu1 %v18213_v8  ;;  %11340 = vmatpush3.msra.mxu0 %v18214_v62 }
 0x8cf   :  { %11383 = vmatpush3.msra.mxu1 %v18215_v49  ;;  %11341 = vmatprep.subr.mxu0 %v18216_v32 }
 0x8d0   :  { %10280 = vmatmul.mubr.f32.vlgmr.msra.gmra.mxu1 %v9799_v59  ;;  %11422 = vmatprep.subr.mxu1 %v18217_v6  ;;  %v18223_v59 = vld [vmem:[#allocation88_spill] sm:$0xff]  ;;  %v18224_v6 = vld [vmem:[#allocation90_spill] sm:$0xff] }
 0x8d1   :  { %11342 = vmatpush3.msra.mxu0 %v18218_v5  ;;  %11423 = vmatpush3.msra.mxu1 %v16504_v3  ;;  %v18225_v3 = vld [vmem:[#allocation103_spill] sm:$0xff] }
 0x8d2   :  { %10550 = vmatprep.mubr.f32.mxu1 %v18219_v27  ;;  %11343 = vmatprep.subr.mxu0 %v18220_v1 }
 0x8d3   :  { %11424 = vmatprep.subr.mxu1 %v16506_v55  ;;  %11344 = vmatpush3.msra.mxu0 %v18221_v23  ;;  %v18226_v55 = vld [vmem:[#allocation54_spill] sm:$0xff] }
 0x8d4   :  { %11425 = vmatpush3.msra.mxu1 %v16508_v24  ;;  %11345 = vmatprep.subr.mxu0 %v18222_v43  ;;  %v18227_v24 = vand.u32 4294901760, %v18226_v55 }
 0x8d5   :  { %11426 = vmatprep.subr.mxu1 %v16542_v51  ;;  %11346 = vmatpush3.msra.mxu0 %v18223_v59  ;;  %v18228_v51 = vand.u32 4294901760, %v16514_v28  ;;  %v18232_v28 = vand.u32 4294901760, %v16553_v16  ;;  %v18236_v16 = vand.u32 4294901760, %v16585_v31  ;;  %v18242_v31 = vand.u32 4294901760, %v18198_v46 }
 0x8d6   :  { %11427 = vmatpush3.msra.mxu1 %v16544_v33  ;;  %11347 = vmatprep.subr.mxu0 %v18224_v6  ;;  %v18229_v33 = vand.u32 4294901760, %v16517_v54  ;;  %v18233_v54 = vand.u32 4294901760, %v16560_v37  ;;  %v18237_v37 = vand.u32 4294901760, %v18188_v20  ;;  %v18252_v20 = vand.u32 4294901760, %v18218_v5 }
 0x8d7   :  { %11428 = vmatprep.subr.mxu1 %v16549_v56  ;;  %11348 = vmatpush3.msra.mxu0 %v18225_v3  ;;  %v18230_v56 = vand.u32 4294901760, %v16521_v35  ;;  %v18234_v35 = vand.u32 4294901760, %v16567_v60  ;;  %v18239_v60 = vand.u32 4294901760, %v18192_v25  ;;  %v18256_v25 = vand.u32 4294901760, %v18223_v59 }
 0x8d8   :  { %11429 = vmatpush3.msra.mxu1 %v16555_v36  ;;  %10172 = vmatmul.mubr.f32.vlgmr.msra.gmra.mxu0 %v16840_v48  ;;  %v18231_v36 = vand.u32 4294901760, %v16547_v52  ;;  %v18235_v52 = vand.u32 4294901760, %v16582_v34  ;;  %v18241_v34 = vand.u32 4294901760, %v18196_v58  ;;  %v18250_v48 = vand.u32 4294901760, %v18214_v62 }
 0x8d9   :  { %11387 = vmatprep.subr.mxu0 %v18227_v24  ;;  %11430 = vmatprep.subr.mxu1 %v16562_v50  ;;  %v18238_v50 = vand.u32 4294901760, %v18190_v57  ;;  %v18254_v57 = vand.u32 4294901760, %v18221_v23 }
 0x8da   :  { %11388 = vmatpush3.msra.mxu0 %v18228_v51  ;;  %10446 = vmatprep.mubr.f32.mxu0 %v18219_v27 }
 0x8db   :  { %11431 = vmatpush3.msra.mxu1 %v16569_v2  ;;  %11389 = vmatprep.subr.mxu0 %v18229_v33  ;;  %v18240_v2 = vand.u32 4294901760, %v18194_v11  ;;  %v18258_v11 = vand.u32 4294901760, %v18225_v3 }
 0x8dc   :  { %11432 = vmatprep.subr.mxu1 %v16591_v45  ;;  %11390 = vmatpush3.msra.mxu0 %v18230_v56  ;;  %v18243_v45 = vand.u32 4294901760, %v18200_v10 }
 0x8dd   :  { %11433 = vmatpush3.msra.mxu1 %v16601_v40  ;;  %11391 = vmatprep.subr.mxu0 %v18231_v36  ;;  %v18244_v40 = vand.u32 4294901760, %v18202_v41 }
 0x8de   :  { %11434 = vmatprep.subr.mxu1 %v16603_v7  ;;  %11392 = vmatpush3.msra.mxu0 %v18232_v28  ;;  %v18245_v7 = vand.u32 4294901760, %v18204_v30 }
 0x8df   :  { %11435 = vmatpush3.msra.mxu1 %v16612_v13  ;;  %11393 = vmatprep.subr.mxu0 %v18233_v54  ;;  %v18246_v13 = vand.u32 4294901760, %v18206_v42 }
 0x8e0   :  { %11436 = vmatprep.subr.mxu1 %v16621_v44  ;;  %11394 = vmatpush3.msra.mxu0 %v18234_v35  ;;  %v18247_v44 = vand.u32 4294901760, %v18208_v53 }
 0x8e1   :  { %11437 = vmatpush3.msra.mxu1 %v16627_v19  ;;  %11395 = vmatprep.subr.mxu0 %v18235_v52  ;;  %v18248_v19 = vand.u32 4294901760, %v18210_v14 }
 0x8e2   :  { %11438 = vmatprep.subr.mxu1 %v16643_v22  ;;  %11396 = vmatpush3.msra.mxu0 %v18236_v16  ;;  %v18249_v22 = vand.u32 4294901760, %v18212_v0 }
 0x8e3   :  { %11439 = vmatpush3.msra.mxu1 %v18187_v17  ;;  %11397 = vmatprep.subr.mxu0 %v18237_v37  ;;  %v18251_v17 = vand.u32 4294901760, %v18216_v32 }
 0x8e4   :  { %11440 = vmatprep.subr.mxu1 %v18189_v38  ;;  %11398 = vmatpush3.msra.mxu0 %v18238_v50  ;;  %v18253_v38 = vand.u32 4294901760, %v18220_v1 }
 0x8e5   :  { %11441 = vmatpush3.msra.mxu1 %v18191_v47  ;;  %11399 = vmatprep.subr.mxu0 %v18239_v60  ;;  %v18255_v47 = vand.u32 4294901760, %v18222_v43 }
 0x8e6   :  { %11442 = vmatprep.subr.mxu1 %v18193_v21  ;;  %11400 = vmatpush3.msra.mxu0 %v18240_v2  ;;  %v18257_v21 = vand.u32 4294901760, %v18224_v6 }
 0x8e7   :  { %11443 = vmatpush3.msra.mxu1 %v18195_v12  ;;  %11401 = vmatprep.subr.mxu0 %v18241_v34 }
 0x8e8   :  { %11444 = vmatprep.subr.mxu1 %v18197_v26  ;;  %11402 = vmatpush3.msra.mxu0 %v18242_v31 }
 0x8e9   :  { %11445 = vmatpush3.msra.mxu1 %v18199_v39  ;;  %11403 = vmatprep.subr.mxu0 %v18243_v45 }
 0x8ea   :  { %11446 = vmatprep.subr.mxu1 %v18201_v4  ;;  %11404 = vmatpush3.msra.mxu0 %v18244_v40  ;;  %v10592_v4 = vld [vmem:[#allocation4 + $0x2] ss:$0 sm:$0xff] }
 0x8eb   :  { %11447 = vmatpush3.msra.mxu1 %v18203_v9  ;;  %11405 = vmatprep.subr.mxu0 %v18245_v7 }
 0x8ec   :  { %11448 = vmatprep.subr.mxu1 %v18205_v61  ;;  %11406 = vmatpush3.msra.mxu0 %v18246_v13 }
 0x8ed   :  { %11449 = vmatpush3.msra.mxu1 %v18207_v15  ;;  %11407 = vmatprep.subr.mxu0 %v18247_v44 }
 0x8ee   :  { %11450 = vmatprep.subr.mxu1 %v18209_v18  ;;  %11408 = vmatpush3.msra.mxu0 %v18248_v19 }
 0x8ef   :  { %11451 = vmatpush3.msra.mxu1 %v18211_v63  ;;  %11409 = vmatprep.subr.mxu0 %v18249_v22 }
 0x8f0   :  { %11452 = vmatprep.subr.mxu1 %v18213_v8  ;;  %11410 = vmatpush3.msra.mxu0 %v18250_v48 }
 0x8f1   :  { %11453 = vmatpush3.msra.mxu1 %v18215_v49  ;;  %11411 = vmatprep.subr.mxu0 %v18251_v17 }
 0x8f2   :  { %10552 = vmatmul.mubr.f32.vlgmr.msra.gmra.mxu1 %v16833_v29  ;;  %11412 = vmatpush3.msra.mxu0 %v18252_v20 }
 0x8f3   :  { %11413 = vmatprep.subr.mxu0 %v18253_v38 }
 0x8f4   :  { %11414 = vmatpush3.msra.mxu0 %v18254_v57 }
 0x8f5   :  { %11415 = vmatprep.subr.mxu0 %v18255_v47 }
 0x8f6   :  { %11416 = vmatpush3.msra.mxu0 %v18256_v25 }
 0x8f7   :  { %11417 = vmatprep.subr.mxu0 %v18257_v21 }
 0x8f8   :  { %11418 = vmatpush3.msra.mxu0 %v18258_v11 }
 0x8f9   :  { %10448 = vmatmul.mubr.f32.vlgmr.msra.gmra.mxu0 %v16833_v29 }
 0x96f   :  { %v11314_v58 = vpop.f32.mrf.mxu1 }
 0x971   :  { %v11315_v10 = vpop.f32.mrf.mxu1 }
 0x972   :  { %v11316_v61 = vadd.f32 %v11315_v10, %v11314_v58 }
 0x977   :  { %v11279_v12 = vpop.f32.mrf.mxu0 }
 0x979   :  { %v11280_v26 = vpop.f32.mrf.mxu0 }
 0x97a   :  { %v11281_v39 = vadd.f32 %v11280_v26, %v11279_v12 }
 0x97c   :  { %v9804_v30 = vadd.f32 %v11281_v39, %v10592_v4 }
 0x97e   :  { %v10036_v53 = vadd.f32 %v11316_v61, %v9804_v30 }
 0x990   :  { %v11384_v41 = vpop.f32.mrf.mxu1 }
 0x992   :  { %v11385_v15 = vpop.f32.mrf.mxu1 }
 0x993   :  { %v11386_v0 = vadd.f32 %v11385_v15, %v11384_v41 }
 0x998   :  { %v11349_v46 = vpop.f32.mrf.mxu0 }
 0x99a   :  { %v11350_v9 = vpop.f32.mrf.mxu0 }
 0x99b   :  { %v11351_v42 = vadd.f32 %v11350_v9, %v11349_v46 }
 0x99d   :  { %v10174_v14 = vadd.f32 %v11351_v42, %v10036_v53 }
 0x99f   :  { %v10282_v62 = vadd.f32 %v11386_v0, %v10174_v14 }
 0x9b2   :  { %v11454_v18 = vpop.f32.mrf.mxu1 }
 0x9b4   :  { %v11455_v8 = vpop.f32.mrf.mxu1 }
 0x9b5   :  { %v11456_v32 = vadd.f32 %v11455_v8, %v11454_v18 }
 0x9b9   :  { %v11419_v63 = vpop.f32.mrf.mxu0 }
 0x9bb   :  { %v11420_v29 = vpop.f32.mrf.mxu0 }
 0x9bc   :  { %v11421_v49 = vadd.f32 %v11420_v29, %v11419_v63 }
 0x9be   :  { %v10450_v5 = vadd.f32 %v11421_v49, %v10282_v62 }
 0x9c0   :  { %v10554_v27 = vadd.f32 %v11456_v32, %v10450_v5 }
 0x9c2   :  { %10557 = vmax.xlane.f32.xlu1 %v10554_v27 }
 0xa4b   :  { %v10558_v1 = vpop.xlane.xlu1 %10557 }
 0xa4c   :  { %v10559_v23 = vsub.f32 %v10554_v27, %v10558_v1 }
 0xa4e   :  { %v10560_v43 = vmul.f32 1.442695, %v10559_v23 }
 0xa50   :  { %12439 = vpow2.f32 %v10560_v43 }
 0xa5d   :  { %v12440_v59 = vpop.eup %12439 }
 0xa5e   :  { %10562 = vadd.xlane.f32.xlu0 %v12440_v59 }
 0xae7   :  { %v10563_v6 = vpop.xlane.xlu0 %10562 }
 0xae8   :  { %12441 = vlog2.f32 %v10563_v6 }
 0xaf5   :  { %v12442_v3 = vpop.eup %12441 }
 0xaf6   :  { %v10565_v55 = vmul.f32 0.6931472, %v12442_v3 }
 0xaf8   :  { %v10566_v24 = vadd.f32 %v10565_v55, %v10558_v1 }
 0xafa   :  { %v10576_v51 = vsub.f32 %v10554_v27, %v10566_v24 }
 0xafc   :  { %10577 = vst [vmem:[%s17022_s10] sm:$0xff] %v10576_v51 }
 0xafd   :  { %10584 = vsyncpa [#allocation3], 1 }
 0xafe   :  { %10585 = vsyncpa [#allocation5], 1 }
 0xaff   :  { %10586 = vsyncpa [#allocation8], 1 }
 0xb00   :  { %10587 = vsyncpa [#allocation11], 1 }

</bundles_post_ra>
